<compile_context>
chip_gen: v5e
topology: v5e:2x2
jax: 0.10.0
libtpu: 0.0.40
codegen_flags: <defaults>
</compile_context>

<pallas_src>
import functools

import jax
import jax.numpy as jnp
from jax import lax
from jax.experimental import pallas as pl
from jax.experimental.pallas import tpu as pltpu


def _gelu_tanh(x):
    # gelu_pytorch_tanh approximation (matches HF "gelu_pytorch_tanh")
    c = 0.7978845608028654  # sqrt(2/pi)
    return 0.5 * x * (1.0 + jnp.tanh(c * (x + 0.044715 * x * x * x)))


def _mlp_kernel(x_ref, wgu_ref, wdt_ref, o_ref, acc_ref):
    # x_ref  : [tm, H]       token tile (constant across the k axis)
    # wgu_ref: [2, tn, H]    fused gate (index 0) / up (index 1) rows, native [out, in]
    # wdt_ref: [tn, H]       pre-transposed w_down rows for this k block
    # o_ref  : [tm, H]       output tile (VMEM-resident across the k axis)
    # acc_ref: [tm, H] f32   down-projection accumulator (scratch)
    k = pl.program_id(1)
    tn = wdt_ref.shape[0]
    H = x_ref.shape[1]

    x = x_ref[...]
    # Merge the (2, tn, H) gate+up slab into (2*tn, H): leading-dim collapse only,
    # last dim untouched, tn a multiple of 128 -> layout-free reshape.
    w_gu = wgu_ref[...].reshape(2 * tn, H)
    # Single MXU matmul producing both gate and up panels, f32 accumulation.
    # TODO(synk): if bundle dumps show vxpose on this NT matmul, relayout
    # w_gate_up to [H, 2, I] at load time and contract ((1,), (0,)) instead.
    gu = lax.dot_general(x, w_gu, (((1,), (1,)), ((), ())),
                         preferred_element_type=jnp.float32)  # [tm, 2*tn]
    gate = gu[:, :tn]
    up = gu[:, tn:]
    # fused GeLU(tanh) * up (EUP tanh + VPU), cast to weight dtype for the MXU.
    h = (_gelu_tanh(gate) * up).astype(wdt_ref.dtype)
    # partial down projection, NN orientation: [tm, tn] x [tn, H] -> [tm, H]
    partial = lax.dot_general(h, wdt_ref[...], (((1,), (0,)), ((), ())),
                              preferred_element_type=jnp.float32)

    @pl.when(k == 0)
    def _():
        acc_ref[...] = partial          # assign on first step: no zero-init traffic

    @pl.when(k > 0)
    def _():
        acc_ref[...] += partial

    @pl.when(k == pl.num_programs(1) - 1)
    def _():
        o_ref[...] = acc_ref[...].astype(o_ref.dtype)


def _round_up(a, b):
    return (a + b - 1) // b * b


def _pick_i_tile(intermediate, requested):
    """Largest multiple-of-128 divisor of `intermediate` <= requested; else the
    smallest multiple-of-128 divisor (bounded VMEM); else the full dimension."""
    if intermediate <= requested:
        return intermediate
    divs = [d for d in range(128, intermediate + 1, 128) if intermediate % d == 0]
    le = [d for d in divs if d <= requested]
    if le:
        return le[-1]
    if divs:
        return divs[0]
    # TODO(synk): pad the intermediate axis for sizes with no 128-aligned divisor.
    return intermediate


def _device_defaults():
    """Generation-specific tile / VMEM defaults (conservative fallback)."""
    kind = ""
    try:
        kind = jax.devices()[0].device_kind.lower()
    except Exception:
        pass
    if "v7" in kind:
        # 64 MiB VMEM per TC, 2 TCs/chip: cap tm, keep residency ~51 MiB.
        return dict(tm=512, tn=512, vmem=56 * 1024 * 1024, two_cores=True)
    if "v6" in kind:
        # 128 MiB VMEM, knee ~560 FLOP/B: large token tile for prefill.
        return dict(tm=1024, tn=512, vmem=96 * 1024 * 1024, two_cores=False)
    if "v5" in kind:
        # knee ~240 FLOP/B: tm=256 already compute-bound; spend VMEM on tn.
        return dict(tm=256, tn=1024, vmem=48 * 1024 * 1024, two_cores=False)
    return dict(tm=256, tn=512, vmem=48 * 1024 * 1024, two_cores=False)


def prepare_gemma2_mlp_weights(w_gate_up, w_down):
    """One-time (model-load) weight prep: w_down [H, I] -> [I, H]."""
    return w_gate_up, jnp.asarray(w_down.T)


@functools.partial(jax.jit, static_argnames=("tm", "tn", "vmem_limit_bytes"))
def gemma2_mlp_pallas(x, w_gate_up, w_down_t, *, tm=None, tn=None,
                      vmem_limit_bytes=None):
    """Gemma2 MLP forward.

    x:          [S, H]    activations (tokens x hidden)
    w_gate_up:  [2*I, H]  nn.Linear weight (rows 0..I-1 = gate, I..2I-1 = up)
    w_down_t:   [I, H]    nn.Linear down_proj weight, pre-transposed ONCE at load
                          (see prepare_gemma2_mlp_weights)
    """
    S, H = x.shape
    two_I, H2 = w_gate_up.shape
    I = two_I // 2
    assert H2 == H and w_down_t.shape == (I, H)

    # --- generation-aware tile selection --------------------------------------
    d = _device_defaults()
    if tm is None:
        tm = d["tm"]
    if tn is None:
        tn = d["tn"]
    if vmem_limit_bytes is None:
        vmem_limit_bytes = d["vmem"]

    # token tile: multiple of 128 (MXU M granularity, bf16 sublane pack), <= S rounded up
    tm = min(tm, _round_up(S, 128))
    tm = max(128, _round_up(tm, 128))

    # v7x: keep >=2 token tiles so both TensorCores get work on the parallel axis.
    if d["two_cores"]:
        while pl.cdiv(S, tm) < 2 and tm > 128:
            tm = max(128, (tm // 2) // 128 * 128)
        # TODO(synk): for single-tile decode (S <= 128) split the k reduction across
        # the two cores (core axis + per-core partial accumulators) instead.

    tn = _pick_i_tile(I, tn)
    k_blocks = I // tn

    # --- pad ragged token counts to the token tile -----------------------------
    S_pad = _round_up(S, tm)
    if S_pad != S:
        x_in = jnp.zeros((S_pad, H), dtype=x.dtype).at[:S].set(x)
    else:
        x_in = x

    grid = (S_pad // tm, k_blocks)
    n_token_tiles = grid[0]

    # fused [2, I, H] view of the gate/up weight (free reshape of contiguous rows)
    w_gu3 = w_gate_up.reshape(2, I, H)

    x_bytes = jnp.dtype(x.dtype).itemsize
    w_bytes = jnp.dtype(w_gate_up.dtype).itemsize
    cost = pl.CostEstimate(
        flops=6 * S_pad * H * I,            # 4*S*H*I (gate/up) + 2*S*I*H (down)
        transcendentals=S_pad * I,          # one tanh per gate element
        bytes_accessed=(S_pad * H * x_bytes                              # x
                        + 3 * I * H * w_bytes * n_token_tiles            # weights re-streamed per token tile
                        + S_pad * H * x_bytes),                          # out
    )

    out = pl.pallas_call(
        _mlp_kernel,
        out_shape=jax.ShapeDtypeStruct((S_pad, H), x.dtype),
        grid_spec=pltpu.PrefetchScalarGridSpec(
            num_scalar_prefetch=0,
            grid=grid,
            in_specs=[
                # token tile: constant across the reduction (k) axis
                pl.BlockSpec((tm, H), lambda i, k: (i, 0)),
                # fused gate+up rows: one contiguous (2, tn, H) slab per k block
                pl.BlockSpec((2, tn, H), lambda i, k: (0, k, 0)),
                # pre-transposed w_down rows: one contiguous (tn, H) slab per k block
                pl.BlockSpec((tn, H), lambda i, k: (k, 0)),
            ],
            out_specs=pl.BlockSpec((tm, H), lambda i, k: (i, 0)),
            scratch_shapes=[pltpu.VMEM((tm, H), jnp.float32)],
        ),
        compiler_params=pltpu.CompilerParams(
            dimension_semantics=("parallel", "arbitrary"),
            vmem_limit_bytes=vmem_limit_bytes,
        ),
        cost_estimate=cost,
    )(x_in, w_gu3, w_down_t)

    return out[:S] if S_pad != S else out


def gemma2_mlp_ref(x, w_gate_up, w_down):
    xf = x.astype(jnp.float32)
    wgu = w_gate_up.astype(jnp.float32)
    wd = w_down.astype(jnp.float32)
    I = w_gate_up.shape[0] // 2
    gate_up = xf @ wgu.T
    gate, up = gate_up[:, :I], gate_up[:, I:]
    return (_gelu_tanh(gate) * up) @ wd.T


if __name__ == "__main__":
    # Small synthetic config: hidden_size=256, intermediate_size=512, tokens=256.
    S, H, I = 256, 256, 512
    key = jax.random.PRNGKey(0)
    kx, kg, kd = jax.random.split(key, 3)

    x = jax.random.normal(kx, (S, H), dtype=jnp.float32).astype(jnp.bfloat16)
    # nn.Linear weight shapes ([out, in]), bf16 like the real model.
    w_gate_up = (jax.random.normal(kg, (2 * I, H), dtype=jnp.float32) * 0.02).astype(jnp.bfloat16)
    w_down = (jax.random.normal(kd, (H, I), dtype=jnp.float32) * 0.02).astype(jnp.bfloat16)

    # One-time (model load) weight prep: transpose w_down to [I, H].
    w_gu, w_down_t = prepare_gemma2_mlp_weights(w_gate_up, w_down)
    w_down_t = jax.block_until_ready(w_down_t)

    out = gemma2_mlp_pallas(x, w_gu, w_down_t)
    out = jax.block_until_ready(out)
    assert out.shape == (S, H) and out.dtype == x.dtype

    ref = gemma2_mlp_ref(x, w_gate_up, w_down)
    err = jnp.max(jnp.abs(out.astype(jnp.float32) - ref))
    assert err < 1e-2, f"mismatch vs reference: max abs err {err}"

    # Ragged token count exercises the padded last-tile path.
    out2 = jax.block_until_ready(gemma2_mlp_pallas(x[:100], w_gu, w_down_t))
    err2 = jnp.max(jnp.abs(out2.astype(jnp.float32) - ref[:100]))
    assert out2.shape == (100, H)
    assert err2 < 1e-2, f"ragged mismatch vs reference: max abs err {err2}"

    print("KERNEL_OK")
</pallas_src>

<mosaic_0001>
module attributes {stable_mosaic.version = 11 : i64} {
  func.func @_mlp_kernel(%arg0: i32, %arg1: i32, %arg2: memref<256x256xbf16, #tpu.memory_space<vmem>>, %arg3: memref<2x512x256xbf16, #tpu.memory_space<vmem>>, %arg4: memref<512x256xbf16, #tpu.memory_space<vmem>>, %arg5: memref<256x256xbf16, #tpu.memory_space<vmem>>, %arg6: memref<256x256xf32, #tpu.memory_space<vmem>>) attributes {dimension_semantics = [#tpu.dimension_semantics<parallel>, #tpu.dimension_semantics<arbitrary>], iteration_bounds = array<i64: 1, 1>, scalar_prefetch = 0 : i64, scratch_operands = 1 : i64, tpu.core_type = #tpu.core_type<tc>, window_params = [{transform_indices = @transform_0, window_bounds = array<i64: 256, 256>}, {transform_indices = @transform_1, window_bounds = array<i64: 2, 512, 256>}, {transform_indices = @transform_2, window_bounds = array<i64: 512, 256>}, {transform_indices = @transform_3, window_bounds = array<i64: 256, 256>}]} {
    %c0 = arith.constant 0 : index
    %c0_0 = arith.constant 0 : index
    %0 = vector.load %arg2[%c0, %c0_0] : memref<256x256xbf16, #tpu.memory_space<vmem>>, vector<256x256xbf16>
    %c0_1 = arith.constant 0 : index
    %c0_2 = arith.constant 0 : index
    %c0_3 = arith.constant 0 : index
    %1 = vector.load %arg3[%c0_1, %c0_2, %c0_3] : memref<2x512x256xbf16, #tpu.memory_space<vmem>>, vector<2x512x256xbf16>
    %2 = vector.shape_cast %1 : vector<2x512x256xbf16> to vector<1024x256xbf16>
    %cst = arith.constant dense<0.000000e+00> : vector<256x1024xf32>
    %3 = tpu.matmul %0, %2, %cst {dimension_numbers = #tpu.dot_dimension_numbers<[1], [1], [0], [0], [0, 0, 1, 0], [], []>} : vector<256x256xbf16>, vector<1024x256xbf16>, vector<256x1024xf32> -> vector<256x1024xf32>
    %4 = vector.extract_strided_slice %3 {offsets = [0, 0], sizes = [256, 512], strides = [1, 1]} : vector<256x1024xf32> to vector<256x512xf32>
    %5 = vector.extract_strided_slice %3 {offsets = [0, 512], sizes = [256, 512], strides = [1, 1]} : vector<256x1024xf32> to vector<256x512xf32>
    %cst_4 = arith.constant 5.000000e-01 : f32
    %6 = vector.broadcast %cst_4 : f32 to vector<256x512xf32>
    %7 = arith.mulf %6, %4 : vector<256x512xf32>
    %cst_5 = arith.constant 4.471500e-02 : f32
    %8 = vector.broadcast %cst_5 : f32 to vector<256x512xf32>
    %9 = arith.mulf %8, %4 : vector<256x512xf32>
    %10 = arith.mulf %9, %4 : vector<256x512xf32>
    %11 = arith.mulf %10, %4 : vector<256x512xf32>
    %12 = arith.addf %4, %11 : vector<256x512xf32>
    %cst_6 = arith.constant 0.797884583 : f32
    %13 = vector.broadcast %cst_6 : f32 to vector<256x512xf32>
    %14 = arith.mulf %13, %12 : vector<256x512xf32>
    %15 = math.tanh %14 : vector<256x512xf32>
    %cst_7 = arith.constant 1.000000e+00 : f32
    %16 = vector.broadcast %cst_7 : f32 to vector<256x512xf32>
    %17 = arith.addf %16, %15 : vector<256x512xf32>
    %18 = arith.mulf %7, %17 : vector<256x512xf32>
    %19 = arith.mulf %18, %5 : vector<256x512xf32>
    %20 = arith.truncf %19 : vector<256x512xf32> to vector<256x512xbf16>
    %c0_8 = arith.constant 0 : index
    %c0_9 = arith.constant 0 : index
    %21 = vector.load %arg4[%c0_8, %c0_9] : memref<512x256xbf16, #tpu.memory_space<vmem>>, vector<512x256xbf16>
    %cst_10 = arith.constant dense<0.000000e+00> : vector<256x256xf32>
    %22 = tpu.matmul %20, %21, %cst_10 {dimension_numbers = #tpu.dot_dimension_numbers<[1], [0], [0], [1], [0, 0, 1, 1], [], []>} : vector<256x512xbf16>, vector<512x256xbf16>, vector<256x256xf32> -> vector<256x256xf32>
    %c0_i32 = arith.constant 0 : i32
    %23 = arith.cmpi eq, %arg1, %c0_i32 : i32
    %24 = arith.extui %23 : i1 to i32
    %c0_i32_11 = arith.constant 0 : i32
    %25 = arith.cmpi ne, %24, %c0_i32_11 : i32
    scf.if %25 {
      %c0_16 = arith.constant 0 : index
      %c0_17 = arith.constant 0 : index
      %32 = vector.load %arg6[%c0_16, %c0_17] : memref<256x256xf32, #tpu.memory_space<vmem>>, vector<256x256xf32>
      tpu.vector_store %arg6[%c0_16, %c0_17], %22 {strides = array<i32>} : memref<256x256xf32, #tpu.memory_space<vmem>>, vector<256x256xf32>,
    } else {
    }
    %c0_i32_12 = arith.constant 0 : i32
    %26 = arith.cmpi sgt, %arg1, %c0_i32_12 : i32
    %27 = arith.extui %26 : i1 to i32
    %c0_i32_13 = arith.constant 0 : i32
    %28 = arith.cmpi ne, %27, %c0_i32_13 : i32
    scf.if %28 {
      %c0_16 = arith.constant 0 : index
      %c0_17 = arith.constant 0 : index
      %32 = vector.load %arg6[%c0_16, %c0_17] : memref<256x256xf32, #tpu.memory_space<vmem>>, vector<256x256xf32>
      %33 = arith.addf %32, %22 : vector<256x256xf32>
      %c0_18 = arith.constant 0 : index
      %c0_19 = arith.constant 0 : index
      %34 = vector.load %arg6[%c0_18, %c0_19] : memref<256x256xf32, #tpu.memory_space<vmem>>, vector<256x256xf32>
      tpu.vector_store %arg6[%c0_18, %c0_19], %33 {strides = array<i32>} : memref<256x256xf32, #tpu.memory_space<vmem>>, vector<256x256xf32>,
    } else {
    }
    %c0_i32_14 = arith.constant 0 : i32
    %29 = arith.cmpi eq, %arg1, %c0_i32_14 : i32
    %30 = arith.extui %29 : i1 to i32
    %c0_i32_15 = arith.constant 0 : i32
    %31 = arith.cmpi ne, %30, %c0_i32_15 : i32
    scf.if %31 {
      %c0_16 = arith.constant 0 : index
      %c0_17 = arith.constant 0 : index
      %32 = vector.load %arg6[%c0_16, %c0_17] : memref<256x256xf32, #tpu.memory_space<vmem>>, vector<256x256xf32>
      %33 = arith.truncf %32 : vector<256x256xf32> to vector<256x256xbf16>
      %c0_18 = arith.constant 0 : index
      %c0_19 = arith.constant 0 : index
      %34 = vector.load %arg5[%c0_18, %c0_19] : memref<256x256xbf16, #tpu.memory_space<vmem>>, vector<256x256xbf16>
      tpu.vector_store %arg5[%c0_18, %c0_19], %33 {strides = array<i32>} : memref<256x256xbf16, #tpu.memory_space<vmem>>, vector<256x256xbf16>,
    } else {
    }
    return
  }
  func.func @transform_0(%arg0: i32, %arg1: i32) -> (i32, i32) {
    %c0_i32 = arith.constant 0 : i32
    %c0_i32_0 = arith.constant 0 : i32
    return %arg0, %c0_i32 : i32, i32
  }
  func.func @transform_1(%arg0: i32, %arg1: i32) -> (i32, i32, i32) {
    %c0_i32 = arith.constant 0 : i32
    %c0_i32_0 = arith.constant 0 : i32
    %c0_i32_1 = arith.constant 0 : i32
    return %c0_i32, %arg1, %c0_i32_0 : i32, i32, i32
  }
  func.func @transform_2(%arg0: i32, %arg1: i32) -> (i32, i32) {
    %c0_i32 = arith.constant 0 : i32
    %c0_i32_0 = arith.constant 0 : i32
    return %arg1, %c0_i32 : i32, i32
  }
  func.func @transform_3(%arg0: i32, %arg1: i32) -> (i32, i32) {
    %c0_i32 = arith.constant 0 : i32
    %c0_i32_0 = arith.constant 0 : i32
    return %arg0, %c0_i32 : i32, i32
  }
}

</mosaic_0001>

<bundles_post_ra>
// kernel: gemma2_mlp_pallas.1
= control target key start
LH: loop header
LB: loop body
LE: loop exit
PB: predicated region body
PF: predicated region fallthrough
CT: control target
= control target key end

     0   :  { %8 = vsyncpa [#allocation4], 0  ;;  %s8403_s0 = inlined_call_operand.hbm [shape: bf16[256,256], index: 0, kind: input, shape index: {}]   ;;  %s8404_s1 = inlined_call_operand.hbm [shape: bf16[2,512,256], index: 1, kind: input, shape index: {}]   ;;  %s8405_s2 = inlined_call_operand.hbm [shape: bf16[512,256], index: 2, kind: input, shape index: {}]   ;;  %s8406_s3 = inlined_call_operand.hbm [shape: bf16[256,256], index: 3, kind: output, shape index: {}]  }
   0x1   :  { %9 = vsyncpa [#allocation7], 0 }
   0x2   :  { %10 = vsyncpa [#allocation5], 0  ;;  %s28_s14 = sshll.u32 %s8404_s1, 4  ;;  %s6785_s15 = smov [#allocation6]   ;;  %s29_s14 = int_to_ptr.hbm [resolvable:$true] %s28_s14 }
   0x3   :  { %s30_s16 = sshll.u32 %s6785_s15, 4  ;;  %s15_s19 = sshll.u32 %s8403_s0, 4  ;;  %s31_s16 = int_to_ptr.vmem [resolvable:$true] %s30_s16  ;;  %s16_s19 = int_to_ptr.hbm [resolvable:$true] %s15_s19 }
   0x4   :  { %s6786_s20 = smov 128   ;;  %s6787_s21 = smov 8  }
   0x5   :  { %36 = dma.hbm_to_vmem [thread:$0]  %s29_s14, 16384, %s31_s16, [#allocation7], %s6786_s20, %s6786_s20, %s6787_s21  }
   0x6   :  { %s6788_s22 = smov [#allocation3]   ;;  %s41_s1 = sshll.u32 %s8405_s2, 4  ;;  %s42_s1 = int_to_ptr.hbm [resolvable:$true] %s41_s1 }
   0x7   :  { %s17_s23 = sshll.u32 %s6788_s22, 4  ;;  %s6789_s0 = smov [#allocation8]   ;;  %s18_s23 = int_to_ptr.vmem [resolvable:$true] %s17_s23 }
   0x8   :  { %23 = dma.hbm_to_vmem [thread:$0]  %s16_s19, 4096, %s18_s23, [#allocation4], %s6786_s20, %s6786_s20, %s6787_s21  }
   0x9   :  { %s43_s26 = sshll.u32 %s6789_s0, 4  ;;  %s44_s26 = int_to_ptr.vmem [resolvable:$true] %s43_s26 }
   0xa   :  { %49 = dma.hbm_to_vmem [thread:$0]  %s42_s1, 8192, %s44_s26, [#allocation7], %s6786_s20, %s6786_s20, %s6787_s21  }
   0xb   :  { %6779 = dma.done.wait [#allocation4], 4096  }
   0xc   :  { %6780 = vsyncadd [#allocation4], 4294963200 }
   0xd   :  { %6781 = dma.done.wait [#allocation7], 24576  }
   0xe   :  { %6782 = vsyncadd [#allocation7], 4294942720  ;;  %v5487_v0 = vld [vmem:[#allocation6 + $0x70] sm:$0xf]  ;;  %v6244_v1 = vld [vmem:[#allocation6 + $0x74] sm:$0xf0] }
   0xf   :  { %v6243_v2 = vld [vmem:[#allocation6 + $0x74] sm:$0xf]  ;;  %v5488_v3 = vor.u32 %v6244_v1, %v5487_v0  ;;  %v5489_v4 = vld [vmem:[#allocation6 + $0x78] sm:$0xf0]  ;;  %v5551_v5 = vld [vmem:[#allocation6 + $0xf0] sm:$0xf] }
  0x10   :  { %v6260_v6 = vld [vmem:[#allocation6 + $0xf4] sm:$0xf0]  ;;  %v5492_v7 = vor.u32 %v6243_v2, %v5489_v4  ;;  %v6259_v9 = vld [vmem:[#allocation6 + $0xf4] sm:$0xf]  ;;  %v5553_v10 = vld [vmem:[#allocation6 + $0xf8] sm:$0xf0] }
  0x11   :  { %v5552_v8 = vor.u32 %v6260_v6, %v5551_v5  ;;  %1022 = vmatpush.bf16.xpose.msra.mxu0 %v5488_v3  ;;  %v5556_v11 = vor.u32 %v6259_v9, %v5553_v10  ;;  %v5479_v12 = vld [vmem:[#allocation6 + $0x60] sm:$0xf]  ;;  %v6242_v13 = vld [vmem:[#allocation6 + $0x64] sm:$0xf0]  ;;  %v6241_v14 = vld [vmem:[#allocation6 + $0x64] sm:$0xf] }
  0x12   :  { %1111 = vmatpush.bf16.xpose.msra.mxu1 %v5492_v7  ;;  %v5481_v15 = vld [vmem:[#allocation6 + $0x68] sm:$0xf0]  ;;  %v5543_v16 = vld [vmem:[#allocation6 + $0xe0] sm:$0xf]  ;;  %v6258_v17 = vld [vmem:[#allocation6 + $0xe4] sm:$0xf0]  ;;  %v5480_v20 = vor.u32 %v6242_v13, %v5479_v12 }
  0x13   :  { %1200 = vmatpush.bf16.xpose.msra.mxu2 %v5552_v8  ;;  %1289 = vmatpush.bf16.xpose.msra.mxu3 %v5556_v11  ;;  %v6257_v18 = vld [vmem:[#allocation6 + $0xe4] sm:$0xf]  ;;  %v5545_v19 = vld [vmem:[#allocation6 + $0xe8] sm:$0xf0]  ;;  %v5484_v21 = vor.u32 %v6241_v14, %v5481_v15  ;;  %v5544_v22 = vor.u32 %v6258_v17, %v5543_v16  ;;  %v5471_v24 = vld [vmem:[#allocation6 + $0x50] sm:$0xf] }
  0x14   :  { %v5548_v23 = vor.u32 %v6257_v18, %v5545_v19  ;;  %v6240_v25 = vld [vmem:[#allocation6 + $0x54] sm:$0xf0]  ;;  %v6239_v26 = vld [vmem:[#allocation6 + $0x54] sm:$0xf]  ;;  %v5473_v27 = vld [vmem:[#allocation6 + $0x58] sm:$0xf0] }
  0x15   :  { %v5535_v28 = vld [vmem:[#allocation6 + $0xd0] sm:$0xf]  ;;  %v6256_v29 = vld [vmem:[#allocation6 + $0xd4] sm:$0xf0]  ;;  %v6255_v30 = vld [vmem:[#allocation6 + $0xd4] sm:$0xf]  ;;  %v5472_v32 = vor.u32 %v6240_v25, %v5471_v24  ;;  %v5476_v33 = vor.u32 %v6239_v26, %v5473_v27 }
  0x16   :  { %v5537_v31 = vld [vmem:[#allocation6 + $0xd8] sm:$0xf0]  ;;  %v5536_v34 = vor.u32 %v6256_v29, %v5535_v28  ;;  %v5463_v36 = vld [vmem:[#allocation6 + $0x40] sm:$0xf]  ;;  %v6238_v37 = vld [vmem:[#allocation6 + $0x44] sm:$0xf0] }
  0x17   :  { %v5540_v35 = vor.u32 %v6255_v30, %v5537_v31  ;;  %v6237_v38 = vld [vmem:[#allocation6 + $0x44] sm:$0xf]  ;;  %v5465_v39 = vld [vmem:[#allocation6 + $0x48] sm:$0xf0]  ;;  %v5527_v40 = vld [vmem:[#allocation6 + $0xc0] sm:$0xf]  ;;  %v5464_v44 = vor.u32 %v6238_v37, %v5463_v36 }
  0x18   :  { %v6254_v41 = vld [vmem:[#allocation6 + $0xc4] sm:$0xf0]  ;;  %v6253_v42 = vld [vmem:[#allocation6 + $0xc4] sm:$0xf]  ;;  %v5529_v43 = vld [vmem:[#allocation6 + $0xc8] sm:$0xf0]  ;;  %v5468_v45 = vor.u32 %v6237_v38, %v5465_v39 }
  0x19   :  { %1023 = vmatpush.bf16.xpose.msra.mxu0 %v5480_v20  ;;  %v5528_v46 = vor.u32 %v6254_v41, %v5527_v40  ;;  %v5532_v47 = vor.u32 %v6253_v42, %v5529_v43  ;;  %v5455_v48 = vld [vmem:[#allocation6 + $0x30] sm:$0xf]  ;;  %v6236_v49 = vld [vmem:[#allocation6 + $0x34] sm:$0xf0]  ;;  %v6235_v50 = vld [vmem:[#allocation6 + $0x34] sm:$0xf] }
  0x1a   :  { %1112 = vmatpush.bf16.xpose.msra.mxu1 %v5484_v21  ;;  %v5457_v51 = vld [vmem:[#allocation6 + $0x38] sm:$0xf0]  ;;  %v5519_v52 = vld [vmem:[#allocation6 + $0xb0] sm:$0xf]  ;;  %v6252_v53 = vld [vmem:[#allocation6 + $0xb4] sm:$0xf0]  ;;  %v5456_v56 = vor.u32 %v6236_v49, %v5455_v48 }
  0x1b   :  { %1201 = vmatpush.bf16.xpose.msra.mxu2 %v5544_v22  ;;  %1290 = vmatpush.bf16.xpose.msra.mxu3 %v5548_v23  ;;  %v6251_v54 = vld [vmem:[#allocation6 + $0xb4] sm:$0xf]  ;;  %v5521_v55 = vld [vmem:[#allocation6 + $0xb8] sm:$0xf0]  ;;  %v5460_v57 = vor.u32 %v6235_v50, %v5457_v51  ;;  %v5520_v58 = vor.u32 %v6252_v53, %v5519_v52  ;;  %v5447_v60 = vld [vmem:[#allocation6 + $0x20] sm:$0xf] }
  0x1c   :  { %v5524_v59 = vor.u32 %v6251_v54, %v5521_v55  ;;  %v6234_v61 = vld [vmem:[#allocation6 + $0x24] sm:$0xf0]  ;;  %v6233_v62 = vld [vmem:[#allocation6 + $0x24] sm:$0xf]  ;;  %v5449_v63 = vld [vmem:[#allocation6 + $0x28] sm:$0xf0] }
  0x1d   :  { %v5511_v0 = vld [vmem:[#allocation6 + $0xa0] sm:$0xf]  ;;  %v6250_v1 = vld [vmem:[#allocation6 + $0xa4] sm:$0xf0]  ;;  %v6249_v2 = vld [vmem:[#allocation6 + $0xa4] sm:$0xf]  ;;  %v5448_v4 = vor.u32 %v6234_v61, %v5447_v60  ;;  %v5452_v5 = vor.u32 %v6233_v62, %v5449_v63 }
  0x1e   :  { %v5513_v3 = vld [vmem:[#allocation6 + $0xa8] sm:$0xf0]  ;;  %v5512_v6 = vor.u32 %v6250_v1, %v5511_v0  ;;  %v5439_v8 = vld [vmem:[#allocation6 + $0x10] sm:$0xf]  ;;  %v6232_v9 = vld [vmem:[#allocation6 + $0x14] sm:$0xf0] }
  0x1f   :  { %v5516_v7 = vor.u32 %v6249_v2, %v5513_v3  ;;  %v6231_v10 = vld [vmem:[#allocation6 + $0x14] sm:$0xf]  ;;  %v5441_v11 = vld [vmem:[#allocation6 + $0x18] sm:$0xf0]  ;;  %v5503_v12 = vld [vmem:[#allocation6 + $0x90] sm:$0xf]  ;;  %v5440_v16 = vor.u32 %v6232_v9, %v5439_v8 }
  0x20   :  { %v6248_v13 = vld [vmem:[#allocation6 + $0x94] sm:$0xf0]  ;;  %v6247_v14 = vld [vmem:[#allocation6 + $0x94] sm:$0xf]  ;;  %v5505_v15 = vld [vmem:[#allocation6 + $0x98] sm:$0xf0]  ;;  %v5444_v17 = vor.u32 %v6231_v10, %v5441_v11 }
  0x21   :  { %1024 = vmatpush.bf16.xpose.msra.mxu0 %v5472_v32  ;;  %v5504_v18 = vor.u32 %v6248_v13, %v5503_v12  ;;  %v5508_v19 = vor.u32 %v6247_v14, %v5505_v15  ;;  %v5431_v20 = vld [vmem:[#allocation6] sm:$0xf]  ;;  %v6230_v21 = vld [vmem:[#allocation6 + $0x4] sm:$0xf0]  ;;  %v6229_v22 = vld [vmem:[#allocation6 + $0x4] sm:$0xf] }
  0x22   :  { %1113 = vmatpush.bf16.xpose.msra.mxu1 %v5476_v33  ;;  %v5433_v23 = vld [vmem:[#allocation6 + $0x8] sm:$0xf0]  ;;  %v5495_v24 = vld [vmem:[#allocation6 + $0x80] sm:$0xf]  ;;  %v6246_v25 = vld [vmem:[#allocation6 + $0x84] sm:$0xf0]  ;;  %v5432_v31 = vor.u32 %v6230_v21, %v5431_v20 }
  0x23   :  { %1202 = vmatpush.bf16.xpose.msra.mxu2 %v5536_v34  ;;  %1291 = vmatpush.bf16.xpose.msra.mxu3 %v5540_v35  ;;  %v6245_v26 = vld [vmem:[#allocation6 + $0x84] sm:$0xf]  ;;  %v5497_v27 = vld [vmem:[#allocation6 + $0x88] sm:$0xf0]  ;;  %v5679_v28 = vld [vmem:[#allocation6 + $0x1f0] sm:$0xf]  ;;  %v5436_v35 = vor.u32 %v6229_v22, %v5433_v23  ;;  %v5496_v36 = vor.u32 %v6246_v25, %v5495_v24 }
  0x24   :  { %v6292_v29 = vld [vmem:[#allocation6 + $0x1f4] sm:$0xf0]  ;;  %v6291_v30 = vld [vmem:[#allocation6 + $0x1f4] sm:$0xf]  ;;  %v5681_v32 = vld [vmem:[#allocation6 + $0x1f8] sm:$0xf0]  ;;  %v5500_v39 = vor.u32 %v6245_v26, %v5497_v27 }
  0x25   :  { %v5615_v33 = vld [vmem:[#allocation6 + $0x170] sm:$0xf]  ;;  %v6276_v34 = vld [vmem:[#allocation6 + $0x174] sm:$0xf0]  ;;  %v6275_v37 = vld [vmem:[#allocation6 + $0x174] sm:$0xf]  ;;  %v5680_v40 = vor.u32 %v6292_v29, %v5679_v28  ;;  %v5684_v41 = vor.u32 %v6291_v30, %v5681_v32 }
  0x26   :  { %v5617_v38 = vld [vmem:[#allocation6 + $0x178] sm:$0xf0]  ;;  %v5616_v42 = vor.u32 %v6276_v34, %v5615_v33  ;;  %v5303_v43 = vld [vmem:[#allocation3] sm:$0xf]  ;;  %v6290_v51 = vld [vmem:[#allocation6 + $0x1e4] sm:$0xf0] }
  0x27   :  { %v5671_v50 = vld [vmem:[#allocation6 + $0x1e0] sm:$0xf]  ;;  %v6289_v52 = vld [vmem:[#allocation6 + $0x1e4] sm:$0xf]  ;;  %v5673_v54 = vld [vmem:[#allocation6 + $0x1e8] sm:$0xf0] }
  0x28   :  { %v5672_v53 = vor.u32 %v6290_v51, %v5671_v50  ;;  %v5607_v55 = vld [vmem:[#allocation6 + $0x160] sm:$0xf]  ;;  %v5609_v60 = vld [vmem:[#allocation6 + $0x168] sm:$0xf0]  ;;  %v5311_v62 = vld [vmem:[#allocation3 + $0x10] sm:$0xf] }
  0x29   :  { %1025 = vmatpush.bf16.xpose.msra.mxu0 %v5464_v44  ;;  %v6198_v44 = vld [vmem:[#allocation3 + $0x4] sm:$0xf0]  ;;  %v6200_v63 = vld [vmem:[#allocation3 + $0x14] sm:$0xf0]  ;;  %v6199_v0 = vld [vmem:[#allocation3 + $0x14] sm:$0xf] }
  0x2a   :  { %1114 = vmatpush.bf16.xpose.msra.mxu1 %v5468_v45  ;;  %v5620_v45 = vor.u32 %v6275_v37, %v5617_v38  ;;  %v6829_v48 = vor.u32 %v6198_v44, %v5303_v43  ;;  %v5313_v1 = vld [vmem:[#allocation3 + $0x18] sm:$0xf0]  ;;  %v6837_v2 = vor.u32 %v6200_v63, %v5311_v62  ;;  %v5663_v10 = vld [vmem:[#allocation6 + $0x1d0] sm:$0xf]  ;;  %v6288_v11 = vld [vmem:[#allocation6 + $0x1d4] sm:$0xf0] }
  0x2b   :  { %1203 = vmatpush.bf16.xpose.msra.mxu2 %v5528_v46  ;;  %1292 = vmatpush.bf16.xpose.msra.mxu3 %v5532_v47  ;;  %v6197_v46 = vld [vmem:[#allocation3 + $0x4] sm:$0xf]  ;;  %v5305_v47 = vld [vmem:[#allocation3 + $0x8] sm:$0xf0]  ;;  %v6839_v3 = vor.u32 %v6199_v0, %v5313_v1  ;;  %v6287_v12 = vld [vmem:[#allocation6 + $0x1d4] sm:$0xf]  ;;  %v5664_v13 = vor.u32 %v6288_v11, %v5663_v10 }
  0x2c   :  { %v6831_v49 = vor.u32 %v6197_v46, %v5305_v47  ;;  %v5665_v14 = vld [vmem:[#allocation6 + $0x1d8] sm:$0xf0]  ;;  %v5599_v15 = vld [vmem:[#allocation6 + $0x150] sm:$0xf]  ;;  %v6204_v23 = vld [vmem:[#allocation3 + $0x34] sm:$0xf0] }
  0x2d   :  { %v5601_v20 = vld [vmem:[#allocation6 + $0x158] sm:$0xf0]  ;;  %v5327_v22 = vld [vmem:[#allocation3 + $0x30] sm:$0xf]  ;;  %v6203_v24 = vld [vmem:[#allocation3 + $0x34] sm:$0xf] }
  0x2e   :  { %v5329_v25 = vld [vmem:[#allocation3 + $0x38] sm:$0xf0]  ;;  %v6853_v26 = vor.u32 %v6204_v23, %v5327_v22  ;;  %v5335_v28 = vld [vmem:[#allocation3 + $0x40] sm:$0xf]  ;;  %v6206_v29 = vld [vmem:[#allocation3 + $0x44] sm:$0xf0] }
  0x2f   :  { %v6855_v27 = vor.u32 %v6203_v24, %v5329_v25  ;;  %v6205_v30 = vld [vmem:[#allocation3 + $0x44] sm:$0xf]  ;;  %v6861_v32 = vor.u32 %v6206_v29, %v5335_v28  ;;  %v5655_v34 = vld [vmem:[#allocation6 + $0x1c0] sm:$0xf]  ;;  %v5657_v38 = vld [vmem:[#allocation6 + $0x1c8] sm:$0xf0] }
  0x30   :  { %v6269_v43 = vld [vmem:[#allocation6 + $0x144] sm:$0xf]  ;;  %v5593_v44 = vld [vmem:[#allocation6 + $0x148] sm:$0xf0]  ;;  %v5343_v46 = vld [vmem:[#allocation3 + $0x50] sm:$0xf] }
  0x31   :  { %1026 = vmatpush.bf16.xpose.msra.mxu0 %v5456_v56  ;;  %v6274_v56 = vld [vmem:[#allocation6 + $0x164] sm:$0xf0]  ;;  %v6208_v47 = vld [vmem:[#allocation3 + $0x54] sm:$0xf0]  ;;  %v6207_v50 = vld [vmem:[#allocation3 + $0x54] sm:$0xf] }
  0x32   :  { %1115 = vmatpush.bf16.xpose.msra.mxu1 %v5460_v57  ;;  %v5676_v57 = vor.u32 %v6289_v52, %v5673_v54  ;;  %v5345_v51 = vld [vmem:[#allocation3 + $0x58] sm:$0xf0]  ;;  %v6869_v52 = vor.u32 %v6208_v47, %v5343_v46  ;;  %v5351_v54 = vld [vmem:[#allocation3 + $0x60] sm:$0xf]  ;;  %v6283_v62 = vld [vmem:[#allocation6 + $0x1b4] sm:$0xf] }
  0x33   :  { %1204 = vmatpush.bf16.xpose.msra.mxu2 %v5520_v58  ;;  %1293 = vmatpush.bf16.xpose.msra.mxu3 %v5524_v59  ;;  %v5608_v58 = vor.u32 %v6274_v56, %v5607_v55  ;;  %v6273_v59 = vld [vmem:[#allocation6 + $0x164] sm:$0xf]  ;;  %v6210_v55 = vld [vmem:[#allocation3 + $0x64] sm:$0xf0]  ;;  %v5649_v0 = vld [vmem:[#allocation6 + $0x1b8] sm:$0xf0] }
  0x34   :  { %v5612_v61 = vor.u32 %v6273_v59, %v5609_v60  ;;  %v6209_v56 = vld [vmem:[#allocation3 + $0x64] sm:$0xf]  ;;  %v5647_v60 = vld [vmem:[#allocation6 + $0x1b0] sm:$0xf]  ;;  %v5652_v1 = vor.u32 %v6283_v62, %v5649_v0  ;;  %v6268_v11 = vld [vmem:[#allocation6 + $0x134] sm:$0xf0] }
  0x35   :  { %v5583_v10 = vld [vmem:[#allocation6 + $0x130] sm:$0xf]  ;;  %v5639_v29 = vld [vmem:[#allocation6 + $0x1a0] sm:$0xf]  ;;  %v5377_v46 = vld [vmem:[#allocation3 + $0x98] sm:$0xf0] }
  0x36   :  { %v5575_v47 = vld [vmem:[#allocation6 + $0x120] sm:$0xf]  ;;  %s6790_s2 = smov [#allocation9]   ;;  %s5287_s30 = sshll.u32 %s8406_s3, 4  ;;  %s5288_s30 = int_to_ptr.hbm [resolvable:$true] %s5287_s30 }
  0x37   :  { %s5285_s27 = sshll.u32 %s6790_s2, 4  ;;  %s5286_s27 = int_to_ptr.vmem [resolvable:$true] %s5285_s27 }
  0x39   :  { %1027 = vmatpush.bf16.xpose.msra.mxu0 %v5448_v4  ;;  %v5319_v4 = vld [vmem:[#allocation3 + $0x20] sm:$0xf] }
  0x3a   :  { %1116 = vmatpush.bf16.xpose.msra.mxu1 %v5452_v5  ;;  %v6202_v5 = vld [vmem:[#allocation3 + $0x24] sm:$0xf0] }
  0x3b   :  { %1205 = vmatpush.bf16.xpose.msra.mxu2 %v5512_v6  ;;  %1294 = vmatpush.bf16.xpose.msra.mxu3 %v5516_v7  ;;  %v6201_v6 = vld [vmem:[#allocation3 + $0x24] sm:$0xf]  ;;  %v5321_v7 = vld [vmem:[#allocation3 + $0x28] sm:$0xf0]  ;;  %v6845_v8 = vor.u32 %v6202_v5, %v5319_v4  ;;  %v5359_v4 = vld [vmem:[#allocation3 + $0x70] sm:$0xf] }
  0x3c   :  { %v6847_v9 = vor.u32 %v6201_v6, %v5321_v7  ;;  %v6212_v5 = vld [vmem:[#allocation3 + $0x74] sm:$0xf0]  ;;  %v6211_v6 = vld [vmem:[#allocation3 + $0x74] sm:$0xf]  ;;  %v5361_v7 = vld [vmem:[#allocation3 + $0x78] sm:$0xf0] }
  0x41   :  { %1028 = vmatpush.bf16.xpose.msra.mxu0 %v5440_v16  ;;  %v6272_v16 = vld [vmem:[#allocation6 + $0x154] sm:$0xf0] }
  0x42   :  { %1117 = vmatpush.bf16.xpose.msra.mxu1 %v5444_v17  ;;  %v5668_v17 = vor.u32 %v6287_v12, %v5665_v14  ;;  %v6267_v12 = vld [vmem:[#allocation6 + $0x134] sm:$0xf]  ;;  %v5585_v14 = vld [vmem:[#allocation6 + $0x138] sm:$0xf0] }
  0x43   :  { %1206 = vmatpush.bf16.xpose.msra.mxu2 %v5504_v18  ;;  %1295 = vmatpush.bf16.xpose.msra.mxu3 %v5508_v19  ;;  %v5600_v18 = vor.u32 %v6272_v16, %v5599_v15  ;;  %v6271_v19 = vld [vmem:[#allocation6 + $0x154] sm:$0xf]  ;;  %v6885_v15 = vor.u32 %v6212_v5, %v5359_v4  ;;  %v5588_v16 = vor.u32 %v6267_v12, %v5585_v14  ;;  %v6218_v14 = vld [vmem:[#allocation3 + $0xa4] sm:$0xf0] }
  0x44   :  { %v5604_v21 = vor.u32 %v6271_v19, %v5601_v20  ;;  %v6214_v19 = vld [vmem:[#allocation3 + $0x84] sm:$0xf0]  ;;  %v6213_v20 = vld [vmem:[#allocation3 + $0x84] sm:$0xf] }
  0x45   :  { %8576 = vst [vmem:[#allocation16_spill] sm:$0xff] %v6885_v15 }
  0x49   :  { %1029 = vmatpush.bf16.xpose.msra.mxu0 %v5432_v31  ;;  %v5337_v31 = vld [vmem:[#allocation3 + $0x48] sm:$0xf0] }
  0x4a   :  { %1118 = vmatpush.bf16.xpose.msra.mxu1 %v5436_v35  ;;  %v6863_v33 = vor.u32 %v6205_v30, %v5337_v31  ;;  %v6286_v35 = vld [vmem:[#allocation6 + $0x1c4] sm:$0xf0]  ;;  %v6281_v31 = vld [vmem:[#allocation6 + $0x1a4] sm:$0xf] }
  0x4b   :  { %1207 = vmatpush.bf16.xpose.msra.mxu2 %v5496_v36  ;;  %1296 = vmatpush.bf16.xpose.msra.mxu3 %v5500_v39  ;;  %v6285_v36 = vld [vmem:[#allocation6 + $0x1c4] sm:$0xf]  ;;  %v5656_v37 = vor.u32 %v6286_v35, %v5655_v34  ;;  %v5591_v39 = vld [vmem:[#allocation6 + $0x140] sm:$0xf]  ;;  %v6282_v30 = vld [vmem:[#allocation6 + $0x1a4] sm:$0xf0] }
  0x4c   :  { %v5640_v35 = vor.u32 %v6282_v30, %v5639_v29 }
  0x50   :  { %1030 = vmatmul.bf16.vlgmr.msra.gmra.mxu0 %v6829_v48 }
  0x51   :  { %1378 = vmatpush.bf16.xpose.msrb.mxu0 %v5616_v42  ;;  %1119 = vmatmul.bf16.vlgmr.msra.gmra.mxu1 %v6831_v49 }
  0x52   :  { %1467 = vmatpush.bf16.xpose.msrb.mxu1 %v5620_v45  ;;  %1208 = vmatmul.bf16.vlgmr.msra.gmra.mxu2 %v6829_v48  ;;  %v5596_v45 = vor.u32 %v6269_v43, %v5593_v44  ;;  %v5375_v43 = vld [vmem:[#allocation3 + $0x90] sm:$0xf]  ;;  %v6216_v44 = vld [vmem:[#allocation3 + $0x94] sm:$0xf0] }
  0x53   :  { %1556 = vmatpush.bf16.xpose.msrb.mxu2 %v5680_v40  ;;  %1645 = vmatpush.bf16.xpose.msrb.mxu3 %v5684_v41  ;;  %v6270_v40 = vld [vmem:[#allocation6 + $0x144] sm:$0xf0]  ;;  %v5660_v41 = vor.u32 %v6285_v36, %v5657_v38  ;;  %v5641_v36 = vld [vmem:[#allocation6 + $0x1a8] sm:$0xf0] }
  0x54   :  { %1297 = vmatmul.bf16.vlgmr.msra.gmra.mxu3 %v6831_v49  ;;  %v5592_v42 = vor.u32 %v6270_v40, %v5591_v39  ;;  %v5644_v39 = vor.u32 %v6281_v31, %v5641_v36  ;;  %v6279_v36 = vld [vmem:[#allocation6 + $0x194] sm:$0xf] }
  0x59   :  { %1379 = vmatpush.bf16.xpose.msrb.mxu0 %v5608_v58  ;;  %v6877_v58 = vor.u32 %v6210_v55, %v5351_v54  ;;  %v5577_v55 = vld [vmem:[#allocation6 + $0x128] sm:$0xf0] }
  0x5a   :  { %1468 = vmatpush.bf16.xpose.msrb.mxu1 %v5612_v61  ;;  %v6284_v61 = vld [vmem:[#allocation6 + $0x1b4] sm:$0xf0] }
  0x5b   :  { %1557 = vmatpush.bf16.xpose.msrb.mxu2 %v5672_v53  ;;  %1646 = vmatpush.bf16.xpose.msrb.mxu3 %v5676_v57  ;;  %v6871_v53 = vor.u32 %v6207_v50, %v5345_v51  ;;  %v5353_v57 = vld [vmem:[#allocation3 + $0x68] sm:$0xf0]  ;;  %8574 = vst [vmem:[#allocation14_spill] sm:$0xff] %v6877_v58  ;;  %v5648_v63 = vor.u32 %v6284_v61, %v5647_v60  ;;  %v6266_v50 = vld [vmem:[#allocation6 + $0x124] sm:$0xf0] }
  0x5c   :  { %v6879_v59 = vor.u32 %v6209_v56, %v5353_v57  ;;  %v6265_v51 = vld [vmem:[#allocation6 + $0x124] sm:$0xf]  ;;  %v5576_v54 = vor.u32 %v6266_v50, %v5575_v47  ;;  %v6907_v57 = vor.u32 %v6216_v44, %v5375_v43  ;;  %v5391_v50 = vld [vmem:[#allocation3 + $0xb0] sm:$0xf] }
  0x5d   :  { %8573 = vst [vmem:[#allocation13_spill] sm:$0xff] %v6871_v53  ;;  %v5580_v60 = vor.u32 %v6265_v51, %v5577_v55  ;;  %v6220_v51 = vld [vmem:[#allocation3 + $0xb4] sm:$0xf0]  ;;  %v5393_v55 = vld [vmem:[#allocation3 + $0xb8] sm:$0xf0] }
  0x5e   :  { %8575 = vst [vmem:[#allocation15_spill] sm:$0xff] %v6879_v59 }
  0x60   :  { %1035 = vmatmul.bf16.gmra.mxu0 %v6837_v2 }
  0x61   :  { %1124 = vmatmul.bf16.gmra.mxu1 %v6839_v3  ;;  %1380 = vmatpush.bf16.xpose.msrb.mxu0 %v5600_v18  ;;  %v5367_v18 = vld [vmem:[#allocation3 + $0x80] sm:$0xf] }
  0x62   :  { %1213 = vmatmul.bf16.gmra.mxu2 %v6837_v2  ;;  %1469 = vmatpush.bf16.xpose.msrb.mxu1 %v5604_v21  ;;  %v5369_v21 = vld [vmem:[#allocation3 + $0x88] sm:$0xf0]  ;;  %v6893_v22 = vor.u32 %v6214_v19, %v5367_v18 }
  0x63   :  { %1558 = vmatpush.bf16.xpose.msrb.mxu2 %v5664_v13  ;;  %1647 = vmatpush.bf16.xpose.msrb.mxu3 %v5668_v17  ;;  %v5584_v13 = vor.u32 %v6268_v11, %v5583_v10  ;;  %v6887_v17 = vor.u32 %v6211_v6, %v5361_v7  ;;  %v6895_v24 = vor.u32 %v6213_v20, %v5369_v21  ;;  %v5385_v18 = vld [vmem:[#allocation3 + $0xa8] sm:$0xf0] }
  0x64   :  { %1302 = vmatmul.bf16.gmra.mxu3 %v6839_v3  ;;  %8578 = vst [vmem:[#allocation18_spill] sm:$0xff] %v6893_v22 }
  0x65   :  { %8577 = vst [vmem:[#allocation17_spill] sm:$0xff] %v6887_v17 }
  0x66   :  { %8579 = vst [vmem:[#allocation19_spill] sm:$0xff] %v6895_v24 }
  0x69   :  { %1381 = vmatpush.bf16.xpose.msrb.mxu0 %v5592_v42 }
  0x6a   :  { %1470 = vmatpush.bf16.xpose.msrb.mxu1 %v5596_v45  ;;  %v6215_v45 = vld [vmem:[#allocation3 + $0x94] sm:$0xf] }
  0x6b   :  { %1559 = vmatpush.bf16.xpose.msrb.mxu2 %v5656_v37  ;;  %1648 = vmatpush.bf16.xpose.msrb.mxu3 %v5660_v41 }
  0x70   :  { %1040 = vmatmul.bf16.gmra.mxu0 %v6845_v8 }
  0x71   :  { %1129 = vmatmul.bf16.gmra.mxu1 %v6847_v9  ;;  %1382 = vmatpush.bf16.xpose.msrb.mxu0 %v5584_v13  ;;  %v5383_v13 = vld [vmem:[#allocation3 + $0xa0] sm:$0xf] }
  0x72   :  { %1218 = vmatmul.bf16.gmra.mxu2 %v6845_v8  ;;  %1471 = vmatpush.bf16.xpose.msrb.mxu1 %v5588_v16  ;;  %v6217_v16 = vld [vmem:[#allocation3 + $0xa4] sm:$0xf]  ;;  %v6923_v20 = vor.u32 %v6218_v14, %v5383_v13 }
  0x73   :  { %1560 = vmatpush.bf16.xpose.msrb.mxu2 %v5648_v63  ;;  %1649 = vmatpush.bf16.xpose.msrb.mxu3 %v5652_v1  ;;  %v6909_v63 = vor.u32 %v6215_v45, %v5377_v46 }
  0x74   :  { %1307 = vmatmul.bf16.gmra.mxu3 %v6847_v9 }
  0x79   :  { %1383 = vmatpush.bf16.xpose.msrb.mxu0 %v5576_v54  ;;  %v6219_v54 = vld [vmem:[#allocation3 + $0xb4] sm:$0xf] }
  0x7a   :  { %1472 = vmatpush.bf16.xpose.msrb.mxu1 %v5580_v60  ;;  %v6264_v60 = vld [vmem:[#allocation6 + $0x114] sm:$0xf0]  ;;  %v6941_v14 = vor.u32 %v6219_v54, %v5393_v55 }
  0x7b   :  { %1561 = vmatpush.bf16.xpose.msrb.mxu2 %v5640_v35  ;;  %1650 = vmatpush.bf16.xpose.msrb.mxu3 %v5644_v39  ;;  %v6280_v35 = vld [vmem:[#allocation6 + $0x194] sm:$0xf0]  ;;  %v5633_v39 = vld [vmem:[#allocation6 + $0x198] sm:$0xf0] }
  0x7c   :  { %v5636_v44 = vor.u32 %v6279_v36, %v5633_v39  ;;  %v6221_v39 = vld [vmem:[#allocation3 + $0xc4] sm:$0xf] }
  0x80   :  { %1045 = vmatmul.bf16.gmra.mxu0 %v6853_v26 }
  0x81   :  { %1134 = vmatmul.bf16.gmra.mxu1 %v6855_v27 }
  0x82   :  { %1223 = vmatmul.bf16.gmra.mxu2 %v6853_v26 }
  0x83   :  { %1651 = vmatpush.bf16.xpose.msrb.mxu3 %v5636_v44 }
  0x84   :  { %1312 = vmatmul.bf16.gmra.mxu3 %v6855_v27 }
  0x90   :  { %1050 = vmatmul.bf16.gmra.mxu0 %v6861_v32 }
  0x91   :  { %1139 = vmatmul.bf16.gmra.mxu1 %v6863_v33 }
  0x92   :  { %1228 = vmatmul.bf16.gmra.mxu2 %v6861_v32 }
  0x94   :  { %1317 = vmatmul.bf16.gmra.mxu3 %v6863_v33 }
  0xa0   :  { %1055 = vmatmul.bf16.gmra.mxu0 %v6869_v52 }
  0xa1   :  { %1144 = vmatmul.bf16.gmra.mxu1 %v6871_v53 }
  0xa2   :  { %1233 = vmatmul.bf16.gmra.mxu2 %v6869_v52 }
  0xa4   :  { %1322 = vmatmul.bf16.gmra.mxu3 %v6871_v53 }
  0xb0   :  { %1060 = vmatmul.bf16.gmra.mxu0 %v6877_v58 }
  0xb1   :  { %1149 = vmatmul.bf16.gmra.mxu1 %v6879_v59 }
  0xb2   :  { %1238 = vmatmul.bf16.gmra.mxu2 %v6877_v58 }
  0xb4   :  { %1327 = vmatmul.bf16.gmra.mxu3 %v6879_v59 }
  0xc0   :  { %1065 = vmatmul.bf16.gmra.mxu0 %v6885_v15 }
  0xc1   :  { %1154 = vmatmul.bf16.gmra.mxu1 %v6887_v17 }
  0xc2   :  { %1243 = vmatmul.bf16.gmra.mxu2 %v6885_v15 }
  0xc4   :  { %1332 = vmatmul.bf16.gmra.mxu3 %v6887_v17 }
  0xcd   :  { %v1031_v23 = vpop.f32.mrf.mxu0 }
  0xce   :  { %v1120_v25 = vpop.f32.mrf.mxu1 }
  0xcf   :  { %v6897_v28 = vadd.f32 %v1120_v25, %v1031_v23  ;;  %v6925_v25 = vor.u32 %v6217_v16, %v5385_v18 }
  0xd0   :  { %1070 = vmatmul.bf16.gmra.mxu0 %v6893_v22 }
  0xd1   :  { %1159 = vmatmul.bf16.gmra.mxu1 %v6895_v24 }
  0xd2   :  { %1248 = vmatmul.bf16.gmra.mxu2 %v6893_v22 }
  0xd4   :  { %1337 = vmatmul.bf16.gmra.mxu3 %v6895_v24 }
  0xd5   :  { %v1209_v34 = vpop.f32.mrf.mxu2  ;;  %v1033_v38 = vpop.f32.mrf.mxu0 }
  0xd6   :  { %v1122_v41 = vpop.f32.mrf.mxu1 }
  0xd7   :  { %v1298_v37 = vpop.f32.mrf.mxu3  ;;  %v6905_v42 = vadd.f32 %v1122_v41, %v1033_v38 }
  0xd8   :  { %v6903_v40 = vadd.f32 %v1298_v37, %v1209_v34  ;;  %v5631_v34 = vld [vmem:[#allocation6 + $0x190] sm:$0xf] }
  0xd9   :  { %v5632_v38 = vor.u32 %v6280_v35, %v5631_v34 }
  0xdb   :  { %1562 = vmatpush.bf16.xpose.msrb.mxu2 %v5632_v38  ;;  %v6222_v38 = vld [vmem:[#allocation3 + $0xc4] sm:$0xf0] }
  0xdd   :  { %v1211_v56 = vpop.f32.mrf.mxu2  ;;  %v1036_v62 = vpop.f32.mrf.mxu0 }
  0xde   :  { %v1125_v1 = vpop.f32.mrf.mxu1 }
  0xdf   :  { %v1300_v61 = vpop.f32.mrf.mxu3  ;;  %v6913_v4 = vadd.f32 %v1125_v1, %v1036_v62  ;;  %v5569_v1 = vld [vmem:[#allocation6 + $0x118] sm:$0xf0] }
  0xe0   :  { %v6911_v0 = vadd.f32 %v1300_v61, %v1211_v56  ;;  %1075 = vmatmul.bf16.gmra.mxu0 %v6907_v57  ;;  %v5567_v56 = vld [vmem:[#allocation6 + $0x110] sm:$0xf]  ;;  %v6263_v61 = vld [vmem:[#allocation6 + $0x114] sm:$0xf] }
  0xe1   :  { %1164 = vmatmul.bf16.gmra.mxu1 %v6909_v63  ;;  %v5568_v62 = vor.u32 %v6264_v60, %v5567_v56  ;;  %v5623_v60 = vld [vmem:[#allocation6 + $0x180] sm:$0xf] }
  0xe2   :  { %1253 = vmatmul.bf16.gmra.mxu2 %v6907_v57 }
  0xe3   :  { %1384 = vmatpush.bf16.xpose.msrb.mxu0 %v5568_v62  ;;  %v6277_v62 = vld [vmem:[#allocation6 + $0x184] sm:$0xf] }
  0xe4   :  { %1342 = vmatmul.bf16.gmra.mxu3 %v6909_v63 }
  0xe5   :  { %v1214_v5 = vpop.f32.mrf.mxu2  ;;  %v1038_v7 = vpop.f32.mrf.mxu0 }
  0xe6   :  { %v1127_v11 = vpop.f32.mrf.mxu1 }
  0xe7   :  { %v1303_v6 = vpop.f32.mrf.mxu3  ;;  %v6921_v12 = vadd.f32 %v1127_v11, %v1038_v7  ;;  %v5572_v7 = vor.u32 %v6263_v61, %v5569_v1  ;;  %v6278_v61 = vld [vmem:[#allocation6 + $0x184] sm:$0xf0] }
  0xe8   :  { %v6919_v10 = vadd.f32 %v1303_v6, %v1214_v5  ;;  %v6939_v6 = vor.u32 %v6220_v51, %v5391_v50 }
  0xe9   :  { %1473 = vmatpush.bf16.xpose.msrb.mxu1 %v5572_v7  ;;  %v5625_v7 = vld [vmem:[#allocation6 + $0x188] sm:$0xf0] }
  0xed   :  { %v1216_v19 = vpop.f32.mrf.mxu2  ;;  %v1041_v23 = vpop.f32.mrf.mxu0 }
  0xee   :  { %v1130_v30 = vpop.f32.mrf.mxu1 }
  0xef   :  { %v1305_v21 = vpop.f32.mrf.mxu3  ;;  %v6929_v31 = vadd.f32 %v1130_v30, %v1041_v23 }
  0xf0   :  { %v6927_v29 = vadd.f32 %v1305_v21, %v1216_v19  ;;  %1080 = vmatmul.bf16.gmra.mxu0 %v6923_v20 }
  0xf1   :  { %1169 = vmatmul.bf16.gmra.mxu1 %v6925_v25 }
  0xf2   :  { %1258 = vmatmul.bf16.gmra.mxu2 %v6923_v20 }
  0xf4   :  { %1347 = vmatmul.bf16.gmra.mxu3 %v6925_v25 }
  0xf5   :  { %v1219_v37 = vpop.f32.mrf.mxu2  ;;  %v1043_v43 = vpop.f32.mrf.mxu0 }
  0xf6   :  { %v1132_v46 = vpop.f32.mrf.mxu1 }
  0xf7   :  { %v1308_v41 = vpop.f32.mrf.mxu3  ;;  %v6937_v47 = vadd.f32 %v1132_v46, %v1043_v43 }
  0xf8   :  { %v6935_v45 = vadd.f32 %v1308_v41, %v1219_v37  ;;  %v5399_v37 = vld [vmem:[#allocation3 + $0xc0] sm:$0xf]  ;;  %v5401_v41 = vld [vmem:[#allocation3 + $0xc8] sm:$0xf0] }
  0xf9   :  { %v6955_v44 = vor.u32 %v6222_v38, %v5399_v37  ;;  %v6957_v51 = vor.u32 %v6221_v39, %v5401_v41  ;;  %v6224_v37 = vld [vmem:[#allocation3 + $0xd4] sm:$0xf0]  ;;  %v6223_v38 = vld [vmem:[#allocation3 + $0xd4] sm:$0xf]  ;;  %v5409_v39 = vld [vmem:[#allocation3 + $0xd8] sm:$0xf0] }
  0xfa   :  { %v5559_v41 = vld [vmem:[#allocation6 + $0x100] sm:$0xf] }
  0xfd   :  { %v1221_v5 = vpop.f32.mrf.mxu2  ;;  %v1046_v13 = vpop.f32.mrf.mxu0 }
  0xfe   :  { %v1135_v18 = vpop.f32.mrf.mxu1 }
  0xff   :  { %v1310_v11 = vpop.f32.mrf.mxu3  ;;  %v6945_v19 = vadd.f32 %v1135_v18, %v1046_v13  ;;  %v5628_v18 = vor.u32 %v6277_v62, %v5625_v7 }
 0x100   :  { %v6943_v16 = vadd.f32 %v1310_v11, %v1221_v5  ;;  %1085 = vmatmul.bf16.gmra.mxu0 %v6939_v6  ;;  %v5624_v5 = vor.u32 %v6278_v61, %v5623_v60 }
 0x101   :  { %8580 = vst [vmem:[#allocation20_spill] sm:$0xff] %v6945_v19  ;;  %1174 = vmatmul.bf16.gmra.mxu1 %v6941_v14  ;;  %1652 = vmatpush.bf16.xpose.msrb.mxu3 %v5628_v18 }
 0x102   :  { %1263 = vmatmul.bf16.gmra.mxu2 %v6939_v6 }
 0x103   :  { %1563 = vmatpush.bf16.xpose.msrb.mxu2 %v5624_v5 }
 0x104   :  { %1352 = vmatmul.bf16.gmra.mxu3 %v6941_v14 }
 0x105   :  { %v1224_v21 = vpop.f32.mrf.mxu2  ;;  %v1048_v30 = vpop.f32.mrf.mxu0 }
 0x106   :  { %v1137_v35 = vpop.f32.mrf.mxu1 }
 0x107   :  { %v1313_v23 = vpop.f32.mrf.mxu3  ;;  %v6953_v36 = vadd.f32 %v1137_v35, %v1048_v30  ;;  %v5407_v35 = vld [vmem:[#allocation3 + $0xd0] sm:$0xf] }
 0x108   :  { %v6951_v34 = vadd.f32 %v1313_v23, %v1224_v21  ;;  %v6971_v61 = vor.u32 %v6224_v37, %v5407_v35 }
 0x109   :  { %8582 = vst [vmem:[#allocation22_spill] sm:$0xff] %v6953_v36 }
 0x10a   :  { %8581 = vst [vmem:[#allocation21_spill] sm:$0xff] %v6951_v34 }
 0x10d   :  { %v1226_v43 = vpop.f32.mrf.mxu2  ;;  %v1051_v50 = vpop.f32.mrf.mxu0 }
 0x10e   :  { %v1140_v55 = vpop.f32.mrf.mxu1 }
 0x10f   :  { %v1315_v46 = vpop.f32.mrf.mxu3  ;;  %v6961_v56 = vadd.f32 %v1140_v55, %v1051_v50  ;;  %v5561_v55 = vld [vmem:[#allocation6 + $0x108] sm:$0xf0] }
 0x110   :  { %v6959_v54 = vadd.f32 %v1315_v46, %v1226_v43  ;;  %1090 = vmatmul.bf16.gmra.mxu0 %v6955_v44  ;;  %v6262_v43 = vld [vmem:[#allocation6 + $0x104] sm:$0xf0]  ;;  %v6261_v46 = vld [vmem:[#allocation6 + $0x104] sm:$0xf] }
 0x111   :  { %8584 = vst [vmem:[#allocation24_spill] sm:$0xff] %v6961_v56  ;;  %1179 = vmatmul.bf16.gmra.mxu1 %v6957_v51  ;;  %v5560_v50 = vor.u32 %v6262_v43, %v5559_v41  ;;  %v5564_v62 = vor.u32 %v6261_v46, %v5561_v55  ;;  %v5415_v43 = vld [vmem:[#allocation3 + $0xe0] sm:$0xf]  ;;  %v6226_v46 = vld [vmem:[#allocation3 + $0xe4] sm:$0xf0] }
 0x112   :  { %8583 = vst [vmem:[#allocation23_spill] sm:$0xff] %v6959_v54  ;;  %1268 = vmatmul.bf16.gmra.mxu2 %v6955_v44  ;;  %v5417_v55 = vld [vmem:[#allocation3 + $0xe8] sm:$0xf0]  ;;  %v6308_v56 = vld [vmem:[#allocation6 + $0x274] sm:$0xf0] }
 0x113   :  { %1385 = vmatpush.bf16.xpose.msrb.mxu0 %v5560_v50  ;;  %1474 = vmatpush.bf16.xpose.msrb.mxu1 %v5564_v62  ;;  %v6225_v50 = vld [vmem:[#allocation3 + $0xe4] sm:$0xf]  ;;  %v6987_v62 = vor.u32 %v6226_v46, %v5415_v43  ;;  %v5809_v46 = vld [vmem:[#allocation6 + $0x2f8] sm:$0xf0]  ;;  %v6307_v54 = vld [vmem:[#allocation6 + $0x274] sm:$0xf] }
 0x114   :  { %1357 = vmatmul.bf16.gmra.mxu3 %v6957_v51 }
 0x115   :  { %v1229_v1 = vpop.f32.mrf.mxu2  ;;  %v1053_v13 = vpop.f32.mrf.mxu0 }
 0x116   :  { %v1142_v23 = vpop.f32.mrf.mxu1 }
 0x117   :  { %v1318_v11 = vpop.f32.mrf.mxu3  ;;  %v6969_v30 = vadd.f32 %v1142_v23, %v1053_v13 }
 0x118   :  { %v6967_v21 = vadd.f32 %v1318_v11, %v1229_v1  ;;  %v6973_v11 = vor.u32 %v6223_v38, %v5409_v39 }
 0x119   :  { %8586 = vst [vmem:[#allocation26_spill] sm:$0xff] %v6969_v30 }
 0x11a   :  { %8585 = vst [vmem:[#allocation25_spill] sm:$0xff] %v6967_v21  ;;  %v5743_v21 = vld [vmem:[#allocation6 + $0x270] sm:$0xf] }
 0x11b   :  { %v5744_v36 = vor.u32 %v6308_v56, %v5743_v21 }
 0x11d   :  { %v1231_v60 = vpop.f32.mrf.mxu2  ;;  %v1056_v7 = vpop.f32.mrf.mxu0  ;;  %1734 = vmatpush.bf16.xpose.msra.mxu0 %v5744_v36 }
 0x11e   :  { %v1145_v13 = vpop.f32.mrf.mxu1 }
 0x11f   :  { %v1320_v1 = vpop.f32.mrf.mxu3  ;;  %v6977_v18 = vadd.f32 %v1145_v13, %v1056_v7  ;;  %v6989_v13 = vor.u32 %v6225_v50, %v5417_v55 }
 0x120   :  { %v6975_v5 = vadd.f32 %v1320_v1, %v1231_v60  ;;  %1095 = vmatmul.bf16.gmra.mxu0 %v6971_v61 }
 0x121   :  { %8588 = vst [vmem:[#allocation28_spill] sm:$0xff] %v6977_v18  ;;  %1184 = vmatmul.bf16.gmra.mxu1 %v6973_v11 }
 0x122   :  { %8587 = vst [vmem:[#allocation27_spill] sm:$0xff] %v6975_v5  ;;  %1273 = vmatmul.bf16.gmra.mxu2 %v6971_v61 }
 0x124   :  { %1362 = vmatmul.bf16.gmra.mxu3 %v6973_v11 }
 0x125   :  { %v1234_v23 = vpop.f32.mrf.mxu2  ;;  %v1058_v37 = vpop.f32.mrf.mxu0 }
 0x126   :  { %v1147_v39 = vpop.f32.mrf.mxu1 }
 0x127   :  { %v1323_v35 = vpop.f32.mrf.mxu3  ;;  %v6985_v41 = vadd.f32 %v1147_v39, %v1058_v37  ;;  %v6323_v37 = vld [vmem:[#allocation6 + $0x2f4] sm:$0xf] }
 0x128   :  { %v6983_v38 = vadd.f32 %v1323_v35, %v1234_v23  ;;  %v5807_v23 = vld [vmem:[#allocation6 + $0x2f0] sm:$0xf]  ;;  %v6324_v35 = vld [vmem:[#allocation6 + $0x2f4] sm:$0xf0] }
 0x129   :  { %8590 = vst [vmem:[#allocation30_spill] sm:$0xff] %v6985_v41  ;;  %v5808_v43 = vor.u32 %v6324_v35, %v5807_v23  ;;  %v6227_v41 = vld [vmem:[#allocation3 + $0xf4] sm:$0xf]  ;;  %v5745_v23 = vld [vmem:[#allocation6 + $0x278] sm:$0xf0] }
 0x12a   :  { %8589 = vst [vmem:[#allocation29_spill] sm:$0xff] %v6983_v38  ;;  %v5425_v38 = vld [vmem:[#allocation3 + $0xf8] sm:$0xf0] }
 0x12b   :  { %1912 = vmatpush.bf16.xpose.msra.mxu2 %v5808_v43 }
 0x12d   :  { %v1236_v60 = vpop.f32.mrf.mxu2  ;;  %v1061_v7 = vpop.f32.mrf.mxu0 }
 0x12e   :  { %v1150_v5 = vpop.f32.mrf.mxu1 }
 0x12f   :  { %v1325_v1 = vpop.f32.mrf.mxu3  ;;  %v6993_v30 = vadd.f32 %v1150_v5, %v1061_v7 }
 0x130   :  { %v6991_v18 = vadd.f32 %v1325_v1, %v1236_v60  ;;  %1100 = vmatmul.bf16.gmra.mxu0 %v6987_v62  ;;  %v5812_v60 = vor.u32 %v6323_v37, %v5809_v46  ;;  %v5748_v37 = vor.u32 %v6307_v54, %v5745_v23 }
 0x131   :  { %8592 = vst [vmem:[#allocation32_spill] sm:$0xff] %v6993_v30  ;;  %1189 = vmatmul.bf16.gmra.mxu1 %v6989_v13  ;;  %v5423_v30 = vld [vmem:[#allocation3 + $0xf0] sm:$0xf] }
 0x132   :  { %8591 = vst [vmem:[#allocation31_spill] sm:$0xff] %v6991_v18  ;;  %1278 = vmatmul.bf16.gmra.mxu2 %v6987_v62  ;;  %2001 = vmatpush.bf16.xpose.msra.mxu3 %v5812_v60  ;;  %v6228_v18 = vld [vmem:[#allocation3 + $0xf4] sm:$0xf0] }
 0x133   :  { %v7003_v34 = vor.u32 %v6228_v18, %v5423_v30  ;;  %1823 = vmatpush.bf16.xpose.msra.mxu1 %v5748_v37 }
 0x134   :  { %1367 = vmatmul.bf16.gmra.mxu3 %v6989_v13 }
 0x135   :  { %v1239_v39 = vpop.f32.mrf.mxu2  ;;  %v1063_v55 = vpop.f32.mrf.mxu0 }
 0x136   :  { %v1152_v5 = vpop.f32.mrf.mxu1 }
 0x137   :  { %v1328_v50 = vpop.f32.mrf.mxu3  ;;  %v7001_v7 = vadd.f32 %v1152_v5, %v1063_v55 }
 0x138   :  { %v6999_v1 = vadd.f32 %v1328_v50, %v1239_v39  ;;  %v7005_v50 = vor.u32 %v6227_v41, %v5425_v38 }
 0x139   :  { %8594 = vst [vmem:[#allocation34_spill] sm:$0xff] %v7001_v7 }
 0x13a   :  { %8593 = vst [vmem:[#allocation33_spill] sm:$0xff] %v6999_v1 }
 0x13d   :  { %v1241_v35 = vpop.f32.mrf.mxu2  ;;  %v1066_v46 = vpop.f32.mrf.mxu0 }
 0x13e   :  { %v1155_v55 = vpop.f32.mrf.mxu1 }
 0x13f   :  { %v1330_v39 = vpop.f32.mrf.mxu3  ;;  %v7009_v60 = vadd.f32 %v1155_v55, %v1066_v46  ;;  %v6322_v46 = vld [vmem:[#allocation6 + $0x2e4] sm:$0xf0]  ;;  %v6321_v55 = vld [vmem:[#allocation6 + $0x2e4] sm:$0xf] }
 0x140   :  { %v7007_v43 = vadd.f32 %v1330_v39, %v1241_v35  ;;  %1105 = vmatmul.bf16.gmra.mxu0 %v7003_v34  ;;  %v5799_v39 = vld [vmem:[#allocation6 + $0x2e0] sm:$0xf] }
 0x141   :  { %8596 = vst [vmem:[#allocation36_spill] sm:$0xff] %v7009_v60  ;;  %1194 = vmatmul.bf16.gmra.mxu1 %v7005_v50 }
 0x142   :  { %8595 = vst [vmem:[#allocation35_spill] sm:$0xff] %v7007_v43  ;;  %1283 = vmatmul.bf16.gmra.mxu2 %v7003_v34  ;;  %v5737_v43 = vld [vmem:[#allocation6 + $0x268] sm:$0xf0] }
 0x144   :  { %1372 = vmatmul.bf16.gmra.mxu3 %v7005_v50 }
 0x145   :  { %v1244_v54 = vpop.f32.mrf.mxu2  ;;  %v1068_v21 = vpop.f32.mrf.mxu0 }
 0x146   :  { %v1157_v36 = vpop.f32.mrf.mxu1 }
 0x147   :  { %v1333_v56 = vpop.f32.mrf.mxu3  ;;  %v7017_v18 = vadd.f32 %v1157_v36, %v1068_v21  ;;  %v5801_v21 = vld [vmem:[#allocation6 + $0x2e8] sm:$0xf0] }
 0x148   :  { %v7015_v30 = vadd.f32 %v1333_v56, %v1244_v54  ;;  %v5800_v56 = vor.u32 %v6322_v46, %v5799_v39 }
 0x149   :  { %8598 = vst [vmem:[#allocation38_spill] sm:$0xff] %v7017_v18  ;;  %v6306_v18 = vld [vmem:[#allocation6 + $0x264] sm:$0xf0] }
 0x14a   :  { %8597 = vst [vmem:[#allocation37_spill] sm:$0xff] %v7015_v30  ;;  %1913 = vmatpush.bf16.xpose.msra.mxu2 %v5800_v56  ;;  %v6305_v30 = vld [vmem:[#allocation6 + $0x264] sm:$0xf] }
 0x14b   :  { %v5740_v1 = vor.u32 %v6305_v30, %v5737_v43 }
 0x14d   :  { %v1246_v38 = vpop.f32.mrf.mxu2  ;;  %v1071_v5 = vpop.f32.mrf.mxu0  ;;  %1824 = vmatpush.bf16.xpose.msra.mxu1 %v5740_v1 }
 0x14e   :  { %v1160_v35 = vpop.f32.mrf.mxu1 }
 0x14f   :  { %v1335_v41 = vpop.f32.mrf.mxu3  ;;  %v7021_v37 = vadd.f32 %v1160_v35, %v1071_v5 }
 0x150   :  { %v7019_v23 = vadd.f32 %v1335_v41, %v1246_v38  ;;  %1386 = vmatmul.bf16.vlgmr.msrb.gmra.mxu0 %v6829_v48  ;;  %v5804_v41 = vor.u32 %v6321_v55, %v5801_v21 }
 0x151   :  { %8600 = vst [vmem:[#allocation40_spill] sm:$0xff] %v7021_v37  ;;  %1475 = vmatmul.bf16.vlgmr.msrb.gmra.mxu1 %v6831_v49  ;;  %v5735_v37 = vld [vmem:[#allocation6 + $0x260] sm:$0xf] }
 0x152   :  { %8599 = vst [vmem:[#allocation39_spill] sm:$0xff] %v7019_v23  ;;  %1564 = vmatmul.bf16.vlgmr.msrb.gmra.mxu2 %v6829_v48  ;;  %2002 = vmatpush.bf16.xpose.msra.mxu3 %v5804_v41  ;;  %v5736_v60 = vor.u32 %v6306_v18, %v5735_v37  ;;  %v5791_v41 = vld [vmem:[#allocation6 + $0x2d0] sm:$0xf] }
 0x154   :  { %1653 = vmatmul.bf16.vlgmr.msrb.gmra.mxu3 %v6831_v49  ;;  %1735 = vmatpush.bf16.xpose.msra.mxu0 %v5736_v60 }
 0x155   :  { %v1249_v54 = vpop.f32.mrf.mxu2  ;;  %v1073_v38 = vpop.f32.mrf.mxu0 }
 0x156   :  { %v1162_v5 = vpop.f32.mrf.mxu1 }
 0x157   :  { %v1338_v36 = vpop.f32.mrf.mxu3  ;;  %v7029_v35 = vadd.f32 %v1162_v5, %v1073_v38  ;;  %v6320_v5 = vld [vmem:[#allocation6 + $0x2d4] sm:$0xf0] }
 0x158   :  { %v7027_v23 = vadd.f32 %v1338_v36, %v1249_v54 }
 0x159   :  { %8602 = vst [vmem:[#allocation42_spill] sm:$0xff] %v7029_v35 }
 0x15a   :  { %8601 = vst [vmem:[#allocation41_spill] sm:$0xff] %v7027_v23 }
 0x15d   :  { %v1251_v7 = vpop.f32.mrf.mxu2  ;;  %v1076_v39 = vpop.f32.mrf.mxu0 }
 0x15e   :  { %v1165_v55 = vpop.f32.mrf.mxu1 }
 0x15f   :  { %v1340_v19 = vpop.f32.mrf.mxu3  ;;  %v7033_v54 = vadd.f32 %v1165_v55, %v1076_v39  ;;  %v6319_v39 = vld [vmem:[#allocation6 + $0x2d4] sm:$0xf] }
 0x160   :  { %v7031_v46 = vadd.f32 %v1340_v19, %v1251_v7  ;;  %1391 = vmatmul.bf16.gmra.mxu0 %v6837_v2 }
 0x161   :  { %8604 = vst [vmem:[#allocation44_spill] sm:$0xff] %v7033_v54  ;;  %1480 = vmatmul.bf16.gmra.mxu1 %v6839_v3  ;;  %v5729_v54 = vld [vmem:[#allocation6 + $0x258] sm:$0xf0] }
 0x162   :  { %8603 = vst [vmem:[#allocation43_spill] sm:$0xff] %v7031_v46  ;;  %1569 = vmatmul.bf16.gmra.mxu2 %v6837_v2 }
 0x164   :  { %1658 = vmatmul.bf16.gmra.mxu3 %v6839_v3 }
 0x165   :  { %v1254_v18 = vpop.f32.mrf.mxu2  ;;  %v1078_v43 = vpop.f32.mrf.mxu0 }
 0x166   :  { %v1167_v60 = vpop.f32.mrf.mxu1 }
 0x167   :  { %v1343_v37 = vpop.f32.mrf.mxu3  ;;  %v7041_v19 = vadd.f32 %v1167_v60, %v1078_v43 }
 0x168   :  { %v7039_v30 = vadd.f32 %v1343_v37, %v1254_v18  ;;  %v5792_v18 = vor.u32 %v6320_v5, %v5791_v41  ;;  %v5793_v37 = vld [vmem:[#allocation6 + $0x2d8] sm:$0xf0] }
 0x169   :  { %8606 = vst [vmem:[#allocation46_spill] sm:$0xff] %v7041_v19  ;;  %v6303_v19 = vld [vmem:[#allocation6 + $0x254] sm:$0xf] }
 0x16a   :  { %8605 = vst [vmem:[#allocation45_spill] sm:$0xff] %v7039_v30  ;;  %1914 = vmatpush.bf16.xpose.msra.mxu2 %v5792_v18  ;;  %v5732_v35 = vor.u32 %v6303_v19, %v5729_v54 }
 0x16c   :  { %1825 = vmatpush.bf16.xpose.msra.mxu1 %v5732_v35 }
 0x16d   :  { %v1256_v7 = vpop.f32.mrf.mxu2  ;;  %v1081_v56 = vpop.f32.mrf.mxu0 }
 0x16e   :  { %v1170_v36 = vpop.f32.mrf.mxu1 }
 0x16f   :  { %v1345_v1 = vpop.f32.mrf.mxu3  ;;  %v7045_v38 = vadd.f32 %v1170_v36, %v1081_v56 }
 0x170   :  { %v7043_v21 = vadd.f32 %v1345_v1, %v1256_v7  ;;  %1396 = vmatmul.bf16.gmra.mxu0 %v6845_v8  ;;  %v5796_v7 = vor.u32 %v6319_v39, %v5793_v37 }
 0x171   :  { %8608 = vst [vmem:[#allocation48_spill] sm:$0xff] %v7045_v38  ;;  %1485 = vmatmul.bf16.gmra.mxu1 %v6847_v9  ;;  %v5727_v38 = vld [vmem:[#allocation6 + $0x250] sm:$0xf] }
 0x172   :  { %8607 = vst [vmem:[#allocation47_spill] sm:$0xff] %v7043_v21  ;;  %1574 = vmatmul.bf16.gmra.mxu2 %v6845_v8  ;;  %2003 = vmatpush.bf16.xpose.msra.mxu3 %v5796_v7  ;;  %v6304_v21 = vld [vmem:[#allocation6 + $0x254] sm:$0xf0]  ;;  %v5783_v7 = vld [vmem:[#allocation6 + $0x2c0] sm:$0xf] }
 0x173   :  { %v5728_v30 = vor.u32 %v6304_v21, %v5727_v38 }
 0x174   :  { %1663 = vmatmul.bf16.gmra.mxu3 %v6847_v9 }
 0x175   :  { %v1259_v55 = vpop.f32.mrf.mxu2  ;;  %v1083_v60 = vpop.f32.mrf.mxu0  ;;  %1736 = vmatpush.bf16.xpose.msra.mxu0 %v5728_v30 }
 0x176   :  { %v1172_v56 = vpop.f32.mrf.mxu1 }
 0x177   :  { %v1348_v43 = vpop.f32.mrf.mxu3  ;;  %v7053_v36 = vadd.f32 %v1172_v56, %v1083_v60  ;;  %v6318_v56 = vld [vmem:[#allocation6 + $0x2c4] sm:$0xf0] }
 0x178   :  { %v7051_v1 = vadd.f32 %v1348_v43, %v1259_v55 }
 0x179   :  { %8610 = vst [vmem:[#allocation50_spill] sm:$0xff] %v7053_v36 }
 0x17a   :  { %8609 = vst [vmem:[#allocation49_spill] sm:$0xff] %v7051_v1 }
 0x17d   :  { %v1261_v46 = vpop.f32.mrf.mxu2  ;;  %v1086_v41 = vpop.f32.mrf.mxu0 }
 0x17e   :  { %v1175_v39 = vpop.f32.mrf.mxu1 }
 0x17f   :  { %v1350_v23 = vpop.f32.mrf.mxu3  ;;  %v7057_v55 = vadd.f32 %v1175_v39, %v1086_v41  ;;  %v6317_v41 = vld [vmem:[#allocation6 + $0x2c4] sm:$0xf] }
 0x180   :  { %v7055_v5 = vadd.f32 %v1350_v23, %v1261_v46  ;;  %1401 = vmatmul.bf16.gmra.mxu0 %v6853_v26 }
 0x181   :  { %8612 = vst [vmem:[#allocation52_spill] sm:$0xff] %v7057_v55  ;;  %1490 = vmatmul.bf16.gmra.mxu1 %v6855_v27  ;;  %v5721_v55 = vld [vmem:[#allocation6 + $0x248] sm:$0xf0] }
 0x182   :  { %8611 = vst [vmem:[#allocation51_spill] sm:$0xff] %v7055_v5  ;;  %1579 = vmatmul.bf16.gmra.mxu2 %v6853_v26 }
 0x184   :  { %1668 = vmatmul.bf16.gmra.mxu3 %v6855_v27 }
 0x185   :  { %v1264_v21 = vpop.f32.mrf.mxu2  ;;  %v1088_v54 = vpop.f32.mrf.mxu0 }
 0x186   :  { %v1177_v30 = vpop.f32.mrf.mxu1 }
 0x187   :  { %v1353_v38 = vpop.f32.mrf.mxu3  ;;  %v7065_v23 = vadd.f32 %v1177_v30, %v1088_v54 }
 0x188   :  { %v7063_v19 = vadd.f32 %v1353_v38, %v1264_v21  ;;  %v5784_v21 = vor.u32 %v6318_v56, %v5783_v7  ;;  %v5785_v38 = vld [vmem:[#allocation6 + $0x2c8] sm:$0xf0] }
 0x189   :  { %8614 = vst [vmem:[#allocation54_spill] sm:$0xff] %v7065_v23  ;;  %v6301_v23 = vld [vmem:[#allocation6 + $0x244] sm:$0xf] }
 0x18a   :  { %8613 = vst [vmem:[#allocation53_spill] sm:$0xff] %v7063_v19  ;;  %1915 = vmatpush.bf16.xpose.msra.mxu2 %v5784_v21  ;;  %v5724_v36 = vor.u32 %v6301_v23, %v5721_v55 }
 0x18c   :  { %1826 = vmatpush.bf16.xpose.msra.mxu1 %v5724_v36 }
 0x18d   :  { %v1266_v46 = vpop.f32.mrf.mxu2  ;;  %v1091_v18 = vpop.f32.mrf.mxu0 }
 0x18e   :  { %v1180_v43 = vpop.f32.mrf.mxu1 }
 0x18f   :  { %v1355_v35 = vpop.f32.mrf.mxu3  ;;  %v7069_v60 = vadd.f32 %v1180_v43, %v1091_v18 }
 0x190   :  { %v7067_v37 = vadd.f32 %v1355_v35, %v1266_v46  ;;  %1406 = vmatmul.bf16.gmra.mxu0 %v6861_v32  ;;  %v5788_v46 = vor.u32 %v6317_v41, %v5785_v38 }
 0x191   :  { %8616 = vst [vmem:[#allocation56_spill] sm:$0xff] %v7069_v60  ;;  %1495 = vmatmul.bf16.gmra.mxu1 %v6863_v33  ;;  %v5719_v60 = vld [vmem:[#allocation6 + $0x240] sm:$0xf] }
 0x192   :  { %8615 = vst [vmem:[#allocation55_spill] sm:$0xff] %v7067_v37  ;;  %1584 = vmatmul.bf16.gmra.mxu2 %v6861_v32  ;;  %2004 = vmatpush.bf16.xpose.msra.mxu3 %v5788_v46  ;;  %v6302_v37 = vld [vmem:[#allocation6 + $0x244] sm:$0xf0]  ;;  %v5775_v46 = vld [vmem:[#allocation6 + $0x2b0] sm:$0xf] }
 0x193   :  { %v5720_v19 = vor.u32 %v6302_v37, %v5719_v60 }
 0x194   :  { %1673 = vmatmul.bf16.gmra.mxu3 %v6863_v33 }
 0x195   :  { %v1269_v39 = vpop.f32.mrf.mxu2  ;;  %v1093_v30 = vpop.f32.mrf.mxu0  ;;  %1737 = vmatpush.bf16.xpose.msra.mxu0 %v5720_v19 }
 0x196   :  { %v1182_v18 = vpop.f32.mrf.mxu1 }
 0x197   :  { %v1358_v54 = vpop.f32.mrf.mxu3  ;;  %v7077_v43 = vadd.f32 %v1182_v18, %v1093_v30  ;;  %v6316_v18 = vld [vmem:[#allocation6 + $0x2b4] sm:$0xf0] }
 0x198   :  { %v7075_v35 = vadd.f32 %v1358_v54, %v1269_v39 }
 0x199   :  { %8618 = vst [vmem:[#allocation58_spill] sm:$0xff] %v7077_v43 }
 0x19a   :  { %8617 = vst [vmem:[#allocation57_spill] sm:$0xff] %v7075_v35 }
 0x19d   :  { %v1271_v5 = vpop.f32.mrf.mxu2  ;;  %v1096_v7 = vpop.f32.mrf.mxu0 }
 0x19e   :  { %v1185_v41 = vpop.f32.mrf.mxu1 }
 0x19f   :  { %v1360_v1 = vpop.f32.mrf.mxu3  ;;  %v7081_v39 = vadd.f32 %v1185_v41, %v1096_v7  ;;  %v6315_v7 = vld [vmem:[#allocation6 + $0x2b4] sm:$0xf] }
 0x1a0   :  { %v7079_v56 = vadd.f32 %v1360_v1, %v1271_v5  ;;  %1411 = vmatmul.bf16.gmra.mxu0 %v6869_v52 }
 0x1a1   :  { %8620 = vst [vmem:[#allocation60_spill] sm:$0xff] %v7081_v39  ;;  %1500 = vmatmul.bf16.gmra.mxu1 %v6871_v53  ;;  %v5713_v39 = vld [vmem:[#allocation6 + $0x238] sm:$0xf0] }
 0x1a2   :  { %8619 = vst [vmem:[#allocation59_spill] sm:$0xff] %v7079_v56  ;;  %1589 = vmatmul.bf16.gmra.mxu2 %v6869_v52 }
 0x1a4   :  { %1678 = vmatmul.bf16.gmra.mxu3 %v6871_v53 }
 0x1a5   :  { %v1274_v37 = vpop.f32.mrf.mxu2  ;;  %v1098_v55 = vpop.f32.mrf.mxu0 }
 0x1a6   :  { %v1187_v19 = vpop.f32.mrf.mxu1 }
 0x1a7   :  { %v1363_v60 = vpop.f32.mrf.mxu3  ;;  %v7089_v1 = vadd.f32 %v1187_v19, %v1098_v55 }
 0x1a8   :  { %v7087_v23 = vadd.f32 %v1363_v60, %v1274_v37  ;;  %v5776_v37 = vor.u32 %v6316_v18, %v5775_v46  ;;  %v5777_v60 = vld [vmem:[#allocation6 + $0x2b8] sm:$0xf0] }
 0x1a9   :  { %8622 = vst [vmem:[#allocation62_spill] sm:$0xff] %v7089_v1  ;;  %v6299_v1 = vld [vmem:[#allocation6 + $0x234] sm:$0xf] }
 0x1aa   :  { %8621 = vst [vmem:[#allocation61_spill] sm:$0xff] %v7087_v23  ;;  %1916 = vmatpush.bf16.xpose.msra.mxu2 %v5776_v37  ;;  %v5716_v43 = vor.u32 %v6299_v1, %v5713_v39 }
 0x1ac   :  { %1827 = vmatpush.bf16.xpose.msra.mxu1 %v5716_v43 }
 0x1ad   :  { %v1276_v5 = vpop.f32.mrf.mxu2  ;;  %v1101_v21 = vpop.f32.mrf.mxu0 }
 0x1ae   :  { %v1190_v54 = vpop.f32.mrf.mxu1 }
 0x1af   :  { %v1365_v36 = vpop.f32.mrf.mxu3  ;;  %v7093_v30 = vadd.f32 %v1190_v54, %v1101_v21 }
 0x1b0   :  { %v7091_v38 = vadd.f32 %v1365_v36, %v1276_v5  ;;  %1416 = vmatmul.bf16.gmra.mxu0 %v6877_v58  ;;  %v5780_v5 = vor.u32 %v6315_v7, %v5777_v60 }
 0x1b1   :  { %8624 = vst [vmem:[#allocation64_spill] sm:$0xff] %v7093_v30  ;;  %1505 = vmatmul.bf16.gmra.mxu1 %v6879_v59  ;;  %v5711_v30 = vld [vmem:[#allocation6 + $0x230] sm:$0xf] }
 0x1b2   :  { %8623 = vst [vmem:[#allocation63_spill] sm:$0xff] %v7091_v38  ;;  %1594 = vmatmul.bf16.gmra.mxu2 %v6877_v58  ;;  %2005 = vmatpush.bf16.xpose.msra.mxu3 %v5780_v5  ;;  %v6300_v38 = vld [vmem:[#allocation6 + $0x234] sm:$0xf0]  ;;  %v5767_v5 = vld [vmem:[#allocation6 + $0x2a0] sm:$0xf] }
 0x1b3   :  { %v5712_v23 = vor.u32 %v6300_v38, %v5711_v30 }
 0x1b4   :  { %1683 = vmatmul.bf16.gmra.mxu3 %v6879_v59 }
 0x1b5   :  { %v1279_v41 = vpop.f32.mrf.mxu2  ;;  %v1103_v19 = vpop.f32.mrf.mxu0  ;;  %1738 = vmatpush.bf16.xpose.msra.mxu0 %v5712_v23 }
 0x1b6   :  { %v1192_v21 = vpop.f32.mrf.mxu1 }
 0x1b7   :  { %v1368_v55 = vpop.f32.mrf.mxu3  ;;  %v7101_v54 = vadd.f32 %v1192_v21, %v1103_v19  ;;  %v6314_v21 = vld [vmem:[#allocation6 + $0x2a4] sm:$0xf0] }
 0x1b8   :  { %v7099_v36 = vadd.f32 %v1368_v55, %v1279_v41 }
 0x1b9   :  { %8626 = vst [vmem:[#allocation66_spill] sm:$0xff] %v7101_v54 }
 0x1ba   :  { %8625 = vst [vmem:[#allocation65_spill] sm:$0xff] %v7099_v36 }
 0x1bd   :  { %v1281_v56 = vpop.f32.mrf.mxu2  ;;  %v1106_v46 = vpop.f32.mrf.mxu0 }
 0x1be   :  { %v1195_v7 = vpop.f32.mrf.mxu1 }
 0x1bf   :  { %v1370_v35 = vpop.f32.mrf.mxu3  ;;  %v7105_v41 = vadd.f32 %v1195_v7, %v1106_v46  ;;  %v6313_v46 = vld [vmem:[#allocation6 + $0x2a4] sm:$0xf] }
 0x1c0   :  { %v7103_v18 = vadd.f32 %v1370_v35, %v1281_v56  ;;  %1421 = vmatmul.bf16.gmra.mxu0 %v6885_v15 }
 0x1c1   :  { %8628 = vst [vmem:[#allocation68_spill] sm:$0xff] %v7105_v41  ;;  %1510 = vmatmul.bf16.gmra.mxu1 %v6887_v17  ;;  %v5705_v41 = vld [vmem:[#allocation6 + $0x228] sm:$0xf0] }
 0x1c2   :  { %8627 = vst [vmem:[#allocation67_spill] sm:$0xff] %v7103_v18  ;;  %1599 = vmatmul.bf16.gmra.mxu2 %v6885_v15 }
 0x1c4   :  { %1688 = vmatmul.bf16.gmra.mxu3 %v6887_v17 }
 0x1c5   :  { %v1284_v38 = vpop.f32.mrf.mxu2  ;;  %v1108_v39 = vpop.f32.mrf.mxu0 }
 0x1c6   :  { %v1197_v23 = vpop.f32.mrf.mxu1 }
 0x1c7   :  { %v1373_v30 = vpop.f32.mrf.mxu3  ;;  %v7113_v35 = vadd.f32 %v1197_v23, %v1108_v39 }
 0x1c8   :  { %v7111_v1 = vadd.f32 %v1373_v30, %v1284_v38  ;;  %v5768_v38 = vor.u32 %v6314_v21, %v5767_v5  ;;  %v5769_v30 = vld [vmem:[#allocation6 + $0x2a8] sm:$0xf0] }
 0x1c9   :  { %8630 = vst [vmem:[#allocation70_spill] sm:$0xff] %v7113_v35  ;;  %v6297_v35 = vld [vmem:[#allocation6 + $0x224] sm:$0xf] }
 0x1ca   :  { %8629 = vst [vmem:[#allocation69_spill] sm:$0xff] %v7111_v1  ;;  %1917 = vmatpush.bf16.xpose.msra.mxu2 %v5768_v38  ;;  %v5708_v54 = vor.u32 %v6297_v35, %v5705_v41 }
 0x1cc   :  { %1828 = vmatpush.bf16.xpose.msra.mxu1 %v5708_v54 }
 0x1cd   :  { %v1286_v56 = vpop.f32.mrf.mxu2  ;;  %v1387_v37 = vpop.f32.mrf.mxu0 }
 0x1ce   :  { %v1476_v55 = vpop.f32.mrf.mxu1 }
 0x1cf   :  { %v1375_v43 = vpop.f32.mrf.mxu3  ;;  %v7117_v19 = vadd.f32 %v1476_v55, %v1387_v37 }
 0x1d0   :  { %v7115_v60 = vadd.f32 %v1375_v43, %v1286_v56  ;;  %1426 = vmatmul.bf16.gmra.mxu0 %v6893_v22  ;;  %v5772_v56 = vor.u32 %v6313_v46, %v5769_v30 }
 0x1d1   :  { %8632 = vst [vmem:[#allocation72_spill] sm:$0xff] %v7117_v19  ;;  %1515 = vmatmul.bf16.gmra.mxu1 %v6895_v24  ;;  %v5703_v19 = vld [vmem:[#allocation6 + $0x220] sm:$0xf] }
 0x1d2   :  { %8631 = vst [vmem:[#allocation71_spill] sm:$0xff] %v7115_v60  ;;  %1604 = vmatmul.bf16.gmra.mxu2 %v6893_v22  ;;  %2006 = vmatpush.bf16.xpose.msra.mxu3 %v5772_v56  ;;  %v6298_v60 = vld [vmem:[#allocation6 + $0x224] sm:$0xf0]  ;;  %v5759_v56 = vld [vmem:[#allocation6 + $0x290] sm:$0xf] }
 0x1d3   :  { %v5704_v1 = vor.u32 %v6298_v60, %v5703_v19 }
 0x1d4   :  { %1693 = vmatmul.bf16.gmra.mxu3 %v6895_v24 }
 0x1d5   :  { %v1565_v7 = vpop.f32.mrf.mxu2  ;;  %v1389_v23 = vpop.f32.mrf.mxu0  ;;  %1739 = vmatpush.bf16.xpose.msra.mxu0 %v5704_v1 }
 0x1d6   :  { %v1478_v37 = vpop.f32.mrf.mxu1 }
 0x1d7   :  { %v1654_v39 = vpop.f32.mrf.mxu3  ;;  %v7125_v55 = vadd.f32 %v1478_v37, %v1389_v23  ;;  %v6312_v37 = vld [vmem:[#allocation6 + $0x294] sm:$0xf0] }
 0x1d8   :  { %v7123_v43 = vadd.f32 %v1654_v39, %v1565_v7 }
 0x1d9   :  { %8634 = vst [vmem:[#allocation74_spill] sm:$0xff] %v7125_v55 }
 0x1da   :  { %8633 = vst [vmem:[#allocation73_spill] sm:$0xff] %v7123_v43 }
 0x1dd   :  { %v1567_v18 = vpop.f32.mrf.mxu2  ;;  %v1392_v5 = vpop.f32.mrf.mxu0 }
 0x1de   :  { %v1481_v46 = vpop.f32.mrf.mxu1 }
 0x1df   :  { %v1656_v36 = vpop.f32.mrf.mxu3  ;;  %v7129_v7 = vadd.f32 %v1481_v46, %v1392_v5  ;;  %v6311_v5 = vld [vmem:[#allocation6 + $0x294] sm:$0xf] }
 0x1e0   :  { %v7127_v21 = vadd.f32 %v1656_v36, %v1567_v18  ;;  %1431 = vmatmul.bf16.gmra.mxu0 %v6907_v57 }
 0x1e1   :  { %8636 = vst [vmem:[#allocation76_spill] sm:$0xff] %v7129_v7  ;;  %1520 = vmatmul.bf16.gmra.mxu1 %v6909_v63  ;;  %v5697_v7 = vld [vmem:[#allocation6 + $0x218] sm:$0xf0] }
 0x1e2   :  { %8635 = vst [vmem:[#allocation75_spill] sm:$0xff] %v7127_v21  ;;  %1609 = vmatmul.bf16.gmra.mxu2 %v6907_v57 }
 0x1e4   :  { %1698 = vmatmul.bf16.gmra.mxu3 %v6909_v63 }
 0x1e5   :  { %v1570_v60 = vpop.f32.mrf.mxu2  ;;  %v1394_v41 = vpop.f32.mrf.mxu0 }
 0x1e6   :  { %v1483_v1 = vpop.f32.mrf.mxu1 }
 0x1e7   :  { %v1659_v19 = vpop.f32.mrf.mxu3  ;;  %v7137_v36 = vadd.f32 %v1483_v1, %v1394_v41 }
 0x1e8   :  { %v7135_v35 = vadd.f32 %v1659_v19, %v1570_v60  ;;  %v5760_v60 = vor.u32 %v6312_v37, %v5759_v56  ;;  %v5761_v19 = vld [vmem:[#allocation6 + $0x298] sm:$0xf0] }
 0x1e9   :  { %8638 = vst [vmem:[#allocation78_spill] sm:$0xff] %v7137_v36  ;;  %v6295_v36 = vld [vmem:[#allocation6 + $0x214] sm:$0xf] }
 0x1ea   :  { %8637 = vst [vmem:[#allocation77_spill] sm:$0xff] %v7135_v35  ;;  %1918 = vmatpush.bf16.xpose.msra.mxu2 %v5760_v60  ;;  %v5700_v55 = vor.u32 %v6295_v36, %v5697_v7 }
 0x1ec   :  { %1829 = vmatpush.bf16.xpose.msra.mxu1 %v5700_v55 }
 0x1ed   :  { %v1572_v18 = vpop.f32.mrf.mxu2  ;;  %v1397_v38 = vpop.f32.mrf.mxu0 }
 0x1ee   :  { %v1486_v39 = vpop.f32.mrf.mxu1 }
 0x1ef   :  { %v1661_v54 = vpop.f32.mrf.mxu3  ;;  %v7141_v23 = vadd.f32 %v1486_v39, %v1397_v38 }
 0x1f0   :  { %v7139_v30 = vadd.f32 %v1661_v54, %v1572_v18  ;;  %1436 = vmatmul.bf16.gmra.mxu0 %v6923_v20  ;;  %v5764_v18 = vor.u32 %v6311_v5, %v5761_v19 }
 0x1f1   :  { %8640 = vst [vmem:[#allocation80_spill] sm:$0xff] %v7141_v23  ;;  %1525 = vmatmul.bf16.gmra.mxu1 %v6925_v25  ;;  %v5695_v23 = vld [vmem:[#allocation6 + $0x210] sm:$0xf] }
 0x1f2   :  { %8639 = vst [vmem:[#allocation79_spill] sm:$0xff] %v7139_v30  ;;  %1614 = vmatmul.bf16.gmra.mxu2 %v6923_v20  ;;  %2007 = vmatpush.bf16.xpose.msra.mxu3 %v5764_v18  ;;  %v6296_v30 = vld [vmem:[#allocation6 + $0x214] sm:$0xf0]  ;;  %v5751_v18 = vld [vmem:[#allocation6 + $0x280] sm:$0xf] }
 0x1f3   :  { %v5696_v35 = vor.u32 %v6296_v30, %v5695_v23 }
 0x1f4   :  { %1703 = vmatmul.bf16.gmra.mxu3 %v6925_v25 }
 0x1f5   :  { %v1575_v46 = vpop.f32.mrf.mxu2  ;;  %v1399_v1 = vpop.f32.mrf.mxu0  ;;  %1740 = vmatpush.bf16.xpose.msra.mxu0 %v5696_v35 }
 0x1f6   :  { %v1488_v38 = vpop.f32.mrf.mxu1 }
 0x1f7   :  { %v1664_v41 = vpop.f32.mrf.mxu3  ;;  %v7149_v39 = vadd.f32 %v1488_v38, %v1399_v1  ;;  %v6310_v38 = vld [vmem:[#allocation6 + $0x284] sm:$0xf0] }
 0x1f8   :  { %v7147_v54 = vadd.f32 %v1664_v41, %v1575_v46 }
 0x1f9   :  { %8642 = vst [vmem:[#allocation82_spill] sm:$0xff] %v7149_v39 }
 0x1fa   :  { %8641 = vst [vmem:[#allocation81_spill] sm:$0xff] %v7147_v54 }
 0x1fd   :  { %v1577_v21 = vpop.f32.mrf.mxu2  ;;  %v1402_v56 = vpop.f32.mrf.mxu0 }
 0x1fe   :  { %v1491_v5 = vpop.f32.mrf.mxu1 }
 0x1ff   :  { %v1666_v43 = vpop.f32.mrf.mxu3  ;;  %v7153_v46 = vadd.f32 %v1491_v5, %v1402_v56  ;;  %v6309_v56 = vld [vmem:[#allocation6 + $0x284] sm:$0xf] }
 0x200   :  { %v7151_v37 = vadd.f32 %v1666_v43, %v1577_v21  ;;  %1441 = vmatmul.bf16.gmra.mxu0 %v6939_v6 }
 0x201   :  { %8644 = vst [vmem:[#allocation84_spill] sm:$0xff] %v7153_v46  ;;  %1530 = vmatmul.bf16.gmra.mxu1 %v6941_v14  ;;  %v5689_v46 = vld [vmem:[#allocation6 + $0x208] sm:$0xf0] }
 0x202   :  { %8643 = vst [vmem:[#allocation83_spill] sm:$0xff] %v7151_v37  ;;  %1619 = vmatmul.bf16.gmra.mxu2 %v6939_v6 }
 0x204   :  { %1708 = vmatmul.bf16.gmra.mxu3 %v6941_v14 }
 0x205   :  { %v1580_v30 = vpop.f32.mrf.mxu2  ;;  %v1404_v7 = vpop.f32.mrf.mxu0 }
 0x206   :  { %v1493_v35 = vpop.f32.mrf.mxu1 }
 0x207   :  { %v1669_v23 = vpop.f32.mrf.mxu3  ;;  %v7161_v43 = vadd.f32 %v1493_v35, %v1404_v7 }
 0x208   :  { %v7159_v36 = vadd.f32 %v1669_v23, %v1580_v30  ;;  %v5752_v30 = vor.u32 %v6310_v38, %v5751_v18  ;;  %v5753_v23 = vld [vmem:[#allocation6 + $0x288] sm:$0xf0] }
 0x209   :  { %8646 = vst [vmem:[#allocation86_spill] sm:$0xff] %v7161_v43  ;;  %v6293_v43 = vld [vmem:[#allocation6 + $0x204] sm:$0xf] }
 0x20a   :  { %8645 = vst [vmem:[#allocation85_spill] sm:$0xff] %v7159_v36  ;;  %1919 = vmatpush.bf16.xpose.msra.mxu2 %v5752_v30  ;;  %v5692_v39 = vor.u32 %v6293_v43, %v5689_v46 }
 0x20c   :  { %1830 = vmatpush.bf16.xpose.msra.mxu1 %v5692_v39 }
 0x20d   :  { %v1582_v21 = vpop.f32.mrf.mxu2  ;;  %v1407_v60 = vpop.f32.mrf.mxu0 }
 0x20e   :  { %v1496_v41 = vpop.f32.mrf.mxu1 }
 0x20f   :  { %v1671_v55 = vpop.f32.mrf.mxu3  ;;  %v7165_v1 = vadd.f32 %v1496_v41, %v1407_v60 }
 0x210   :  { %v7163_v19 = vadd.f32 %v1671_v55, %v1582_v21  ;;  %1446 = vmatmul.bf16.gmra.mxu0 %v6955_v44  ;;  %v5756_v21 = vor.u32 %v6309_v56, %v5753_v23 }
 0x211   :  { %8648 = vst [vmem:[#allocation88_spill] sm:$0xff] %v7165_v1  ;;  %1535 = vmatmul.bf16.gmra.mxu1 %v6957_v51  ;;  %v5687_v1 = vld [vmem:[#allocation6 + $0x200] sm:$0xf] }
 0x212   :  { %8647 = vst [vmem:[#allocation87_spill] sm:$0xff] %v7163_v19  ;;  %1624 = vmatmul.bf16.gmra.mxu2 %v6955_v44  ;;  %2008 = vmatpush.bf16.xpose.msra.mxu3 %v5756_v21  ;;  %v6294_v19 = vld [vmem:[#allocation6 + $0x204] sm:$0xf0]  ;;  %v5935_v21 = vld [vmem:[#allocation6 + $0x3f0] sm:$0xf] }
 0x213   :  { %v5688_v36 = vor.u32 %v6294_v19, %v5687_v1 }
 0x214   :  { %1713 = vmatmul.bf16.gmra.mxu3 %v6957_v51 }
 0x215   :  { %v1585_v5 = vpop.f32.mrf.mxu2  ;;  %v1409_v35 = vpop.f32.mrf.mxu0  ;;  %1741 = vmatpush.bf16.xpose.msra.mxu0 %v5688_v36 }
 0x216   :  { %v1498_v60 = vpop.f32.mrf.mxu1 }
 0x217   :  { %v1674_v7 = vpop.f32.mrf.mxu3  ;;  %v7173_v41 = vadd.f32 %v1498_v60, %v1409_v35  ;;  %v6356_v60 = vld [vmem:[#allocation6 + $0x3f4] sm:$0xf0] }
 0x218   :  { %v7171_v55 = vadd.f32 %v1674_v7, %v1585_v5 }
 0x219   :  { %8650 = vst [vmem:[#allocation90_spill] sm:$0xff] %v7173_v41 }
 0x21a   :  { %8649 = vst [vmem:[#allocation89_spill] sm:$0xff] %v7171_v55 }
 0x21d   :  { %v1587_v37 = vpop.f32.mrf.mxu2  ;;  %v1412_v18 = vpop.f32.mrf.mxu0 }
 0x21e   :  { %v1501_v56 = vpop.f32.mrf.mxu1 }
 0x21f   :  { %v1676_v54 = vpop.f32.mrf.mxu3  ;;  %v7177_v5 = vadd.f32 %v1501_v56, %v1412_v18  ;;  %v6355_v18 = vld [vmem:[#allocation6 + $0x3f4] sm:$0xf] }
 0x220   :  { %v7175_v38 = vadd.f32 %v1676_v54, %v1587_v37  ;;  %1451 = vmatmul.bf16.gmra.mxu0 %v6971_v61 }
 0x221   :  { %8652 = vst [vmem:[#allocation92_spill] sm:$0xff] %v7177_v5  ;;  %1540 = vmatmul.bf16.gmra.mxu1 %v6973_v11  ;;  %v5873_v5 = vld [vmem:[#allocation6 + $0x378] sm:$0xf0] }
 0x222   :  { %8651 = vst [vmem:[#allocation91_spill] sm:$0xff] %v7175_v38  ;;  %1629 = vmatmul.bf16.gmra.mxu2 %v6971_v61 }
 0x224   :  { %1718 = vmatmul.bf16.gmra.mxu3 %v6973_v11 }
 0x225   :  { %v1590_v19 = vpop.f32.mrf.mxu2  ;;  %v1414_v46 = vpop.f32.mrf.mxu0 }
 0x226   :  { %v1503_v36 = vpop.f32.mrf.mxu1 }
 0x227   :  { %v1679_v1 = vpop.f32.mrf.mxu3  ;;  %v7185_v54 = vadd.f32 %v1503_v36, %v1414_v46 }
 0x228   :  { %v7183_v43 = vadd.f32 %v1679_v1, %v1590_v19  ;;  %v5936_v19 = vor.u32 %v6356_v60, %v5935_v21  ;;  %v5937_v1 = vld [vmem:[#allocation6 + $0x3f8] sm:$0xf0] }
 0x229   :  { %8654 = vst [vmem:[#allocation94_spill] sm:$0xff] %v7185_v54  ;;  %v6339_v54 = vld [vmem:[#allocation6 + $0x374] sm:$0xf] }
 0x22a   :  { %8653 = vst [vmem:[#allocation93_spill] sm:$0xff] %v7183_v43  ;;  %2268 = vmatpush.bf16.xpose.msrb.mxu2 %v5936_v19  ;;  %v5876_v41 = vor.u32 %v6339_v54, %v5873_v5 }
 0x22c   :  { %2179 = vmatpush.bf16.xpose.msrb.mxu1 %v5876_v41 }
 0x22d   :  { %v1592_v37 = vpop.f32.mrf.mxu2  ;;  %v1417_v30 = vpop.f32.mrf.mxu0 }
 0x22e   :  { %v1506_v7 = vpop.f32.mrf.mxu1 }
 0x22f   :  { %v1681_v39 = vpop.f32.mrf.mxu3  ;;  %v7189_v35 = vadd.f32 %v1506_v7, %v1417_v30 }
 0x230   :  { %v7187_v23 = vadd.f32 %v1681_v39, %v1592_v37  ;;  %1456 = vmatmul.bf16.gmra.mxu0 %v6987_v62  ;;  %v5940_v37 = vor.u32 %v6355_v18, %v5937_v1 }
 0x231   :  { %8656 = vst [vmem:[#allocation96_spill] sm:$0xff] %v7189_v35  ;;  %1545 = vmatmul.bf16.gmra.mxu1 %v6989_v13  ;;  %v5871_v35 = vld [vmem:[#allocation6 + $0x370] sm:$0xf] }
 0x232   :  { %8655 = vst [vmem:[#allocation95_spill] sm:$0xff] %v7187_v23  ;;  %1634 = vmatmul.bf16.gmra.mxu2 %v6987_v62  ;;  %2357 = vmatpush.bf16.xpose.msrb.mxu3 %v5940_v37  ;;  %v6340_v23 = vld [vmem:[#allocation6 + $0x374] sm:$0xf0]  ;;  %v5927_v37 = vld [vmem:[#allocation6 + $0x3e0] sm:$0xf] }
 0x233   :  { %v5872_v43 = vor.u32 %v6340_v23, %v5871_v35 }
 0x234   :  { %1723 = vmatmul.bf16.gmra.mxu3 %v6989_v13 }
 0x235   :  { %v1595_v56 = vpop.f32.mrf.mxu2  ;;  %v1419_v36 = vpop.f32.mrf.mxu0  ;;  %2090 = vmatpush.bf16.xpose.msrb.mxu0 %v5872_v43 }
 0x236   :  { %v1508_v30 = vpop.f32.mrf.mxu1 }
 0x237   :  { %v1684_v46 = vpop.f32.mrf.mxu3  ;;  %v7197_v7 = vadd.f32 %v1508_v30, %v1419_v36  ;;  %v6354_v30 = vld [vmem:[#allocation6 + $0x3e4] sm:$0xf0] }
 0x238   :  { %v7195_v39 = vadd.f32 %v1684_v46, %v1595_v56 }
 0x239   :  { %8658 = vst [vmem:[#allocation98_spill] sm:$0xff] %v7197_v7 }
 0x23a   :  { %8657 = vst [vmem:[#allocation97_spill] sm:$0xff] %v7195_v39 }
 0x23d   :  { %v1597_v38 = vpop.f32.mrf.mxu2  ;;  %v1422_v21 = vpop.f32.mrf.mxu0 }
 0x23e   :  { %v1511_v18 = vpop.f32.mrf.mxu1 }
 0x23f   :  { %v1686_v55 = vpop.f32.mrf.mxu3  ;;  %v7201_v56 = vadd.f32 %v1511_v18, %v1422_v21  ;;  %v6353_v21 = vld [vmem:[#allocation6 + $0x3e4] sm:$0xf] }
 0x240   :  { %v7199_v60 = vadd.f32 %v1686_v55, %v1597_v38  ;;  %1461 = vmatmul.bf16.gmra.mxu0 %v7003_v34 }
 0x241   :  { %8660 = vst [vmem:[#allocation100_spill] sm:$0xff] %v7201_v56  ;;  %1550 = vmatmul.bf16.gmra.mxu1 %v7005_v50  ;;  %v5865_v56 = vld [vmem:[#allocation6 + $0x368] sm:$0xf0] }
 0x242   :  { %8659 = vst [vmem:[#allocation99_spill] sm:$0xff] %v7199_v60  ;;  %1639 = vmatmul.bf16.gmra.mxu2 %v7003_v34 }
 0x244   :  { %1728 = vmatmul.bf16.gmra.mxu3 %v7005_v50 }
 0x245   :  { %v1600_v23 = vpop.f32.mrf.mxu2  ;;  %v1424_v5 = vpop.f32.mrf.mxu0 }
 0x246   :  { %v1513_v43 = vpop.f32.mrf.mxu1 }
 0x247   :  { %v1689_v35 = vpop.f32.mrf.mxu3  ;;  %v7209_v55 = vadd.f32 %v1513_v43, %v1424_v5 }
 0x248   :  { %v7207_v54 = vadd.f32 %v1689_v35, %v1600_v23  ;;  %v5928_v23 = vor.u32 %v6354_v30, %v5927_v37  ;;  %v5929_v35 = vld [vmem:[#allocation6 + $0x3e8] sm:$0xf0] }
 0x249   :  { %8662 = vst [vmem:[#allocation102_spill] sm:$0xff] %v7209_v55  ;;  %v6337_v55 = vld [vmem:[#allocation6 + $0x364] sm:$0xf] }
 0x24a   :  { %8661 = vst [vmem:[#allocation101_spill] sm:$0xff] %v7207_v54  ;;  %2269 = vmatpush.bf16.xpose.msrb.mxu2 %v5928_v23  ;;  %v5868_v7 = vor.u32 %v6337_v55, %v5865_v56 }
 0x24c   :  { %2180 = vmatpush.bf16.xpose.msrb.mxu1 %v5868_v7 }
 0x24d   :  { %v1602_v38 = vpop.f32.mrf.mxu2  ;;  %v1427_v19 = vpop.f32.mrf.mxu0 }
 0x24e   :  { %v1516_v46 = vpop.f32.mrf.mxu1 }
 0x24f   :  { %v1691_v41 = vpop.f32.mrf.mxu3  ;;  %v7213_v36 = vadd.f32 %v1516_v46, %v1427_v19 }
 0x250   :  { %v7211_v1 = vadd.f32 %v1691_v41, %v1602_v38  ;;  %1742 = vmatmul.bf16.vlgmr.msra.gmra.mxu0 %v6829_v48  ;;  %v5932_v38 = vor.u32 %v6353_v21, %v5929_v35 }
 0x251   :  { %8664 = vst [vmem:[#allocation104_spill] sm:$0xff] %v7213_v36  ;;  %1831 = vmatmul.bf16.vlgmr.msra.gmra.mxu1 %v6831_v49  ;;  %v5863_v36 = vld [vmem:[#allocation6 + $0x360] sm:$0xf] }
 0x252   :  { %8663 = vst [vmem:[#allocation103_spill] sm:$0xff] %v7211_v1  ;;  %1920 = vmatmul.bf16.vlgmr.msra.gmra.mxu2 %v6829_v48  ;;  %2358 = vmatpush.bf16.xpose.msrb.mxu3 %v5932_v38  ;;  %v6338_v1 = vld [vmem:[#allocation6 + $0x364] sm:$0xf0]  ;;  %v5919_v38 = vld [vmem:[#allocation6 + $0x3d0] sm:$0xf] }
 0x253   :  { %v5864_v54 = vor.u32 %v6338_v1, %v5863_v36 }
 0x254   :  { %2009 = vmatmul.bf16.vlgmr.msra.gmra.mxu3 %v6831_v49 }
 0x255   :  { %v1605_v18 = vpop.f32.mrf.mxu2  ;;  %v1429_v43 = vpop.f32.mrf.mxu0  ;;  %2091 = vmatpush.bf16.xpose.msrb.mxu0 %v5864_v54 }
 0x256   :  { %v1518_v19 = vpop.f32.mrf.mxu1 }
 0x257   :  { %v1694_v5 = vpop.f32.mrf.mxu3  ;;  %v7221_v46 = vadd.f32 %v1518_v19, %v1429_v43  ;;  %v6352_v19 = vld [vmem:[#allocation6 + $0x3d4] sm:$0xf0] }
 0x258   :  { %v7219_v41 = vadd.f32 %v1694_v5, %v1605_v18 }
 0x259   :  { %8666 = vst [vmem:[#allocation106_spill] sm:$0xff] %v7221_v46 }
 0x25a   :  { %8665 = vst [vmem:[#allocation105_spill] sm:$0xff] %v7219_v41 }
 0x25d   :  { %v1607_v60 = vpop.f32.mrf.mxu2  ;;  %v1432_v37 = vpop.f32.mrf.mxu0 }
 0x25e   :  { %v1521_v21 = vpop.f32.mrf.mxu1 }
 0x25f   :  { %v1696_v39 = vpop.f32.mrf.mxu3  ;;  %v7225_v18 = vadd.f32 %v1521_v21, %v1432_v37  ;;  %v6351_v37 = vld [vmem:[#allocation6 + $0x3d4] sm:$0xf] }
 0x260   :  { %v7223_v30 = vadd.f32 %v1696_v39, %v1607_v60  ;;  %1747 = vmatmul.bf16.gmra.mxu0 %v6837_v2 }
 0x261   :  { %8668 = vst [vmem:[#allocation108_spill] sm:$0xff] %v7225_v18  ;;  %1836 = vmatmul.bf16.gmra.mxu1 %v6839_v3  ;;  %v5857_v18 = vld [vmem:[#allocation6 + $0x358] sm:$0xf0] }
 0x262   :  { %8667 = vst [vmem:[#allocation107_spill] sm:$0xff] %v7223_v30  ;;  %1925 = vmatmul.bf16.gmra.mxu2 %v6837_v2 }
 0x264   :  { %2014 = vmatmul.bf16.gmra.mxu3 %v6839_v3 }
 0x265   :  { %v1610_v1 = vpop.f32.mrf.mxu2  ;;  %v1434_v56 = vpop.f32.mrf.mxu0 }
 0x266   :  { %v1523_v54 = vpop.f32.mrf.mxu1 }
 0x267   :  { %v1699_v36 = vpop.f32.mrf.mxu3  ;;  %v7233_v39 = vadd.f32 %v1523_v54, %v1434_v56 }
 0x268   :  { %v7231_v55 = vadd.f32 %v1699_v36, %v1610_v1  ;;  %v5920_v1 = vor.u32 %v6352_v19, %v5919_v38  ;;  %v5921_v36 = vld [vmem:[#allocation6 + $0x3d8] sm:$0xf0] }
 0x269   :  { %8670 = vst [vmem:[#allocation110_spill] sm:$0xff] %v7233_v39  ;;  %v6335_v39 = vld [vmem:[#allocation6 + $0x354] sm:$0xf] }
 0x26a   :  { %8669 = vst [vmem:[#allocation109_spill] sm:$0xff] %v7231_v55  ;;  %2270 = vmatpush.bf16.xpose.msrb.mxu2 %v5920_v1  ;;  %v5860_v46 = vor.u32 %v6335_v39, %v5857_v18 }
 0x26c   :  { %2181 = vmatpush.bf16.xpose.msrb.mxu1 %v5860_v46 }
 0x26d   :  { %v1612_v60 = vpop.f32.mrf.mxu2  ;;  %v1437_v23 = vpop.f32.mrf.mxu0 }
 0x26e   :  { %v1526_v5 = vpop.f32.mrf.mxu1 }
 0x26f   :  { %v1701_v7 = vpop.f32.mrf.mxu3  ;;  %v7237_v43 = vadd.f32 %v1526_v5, %v1437_v23 }
 0x270   :  { %v7235_v35 = vadd.f32 %v1701_v7, %v1612_v60  ;;  %1752 = vmatmul.bf16.gmra.mxu0 %v6845_v8  ;;  %v5924_v60 = vor.u32 %v6351_v37, %v5921_v36 }
 0x271   :  { %8672 = vst [vmem:[#allocation112_spill] sm:$0xff] %v7237_v43  ;;  %1841 = vmatmul.bf16.gmra.mxu1 %v6847_v9  ;;  %v5855_v43 = vld [vmem:[#allocation6 + $0x350] sm:$0xf] }
 0x272   :  { %8671 = vst [vmem:[#allocation111_spill] sm:$0xff] %v7235_v35  ;;  %1930 = vmatmul.bf16.gmra.mxu2 %v6845_v8  ;;  %2359 = vmatpush.bf16.xpose.msrb.mxu3 %v5924_v60  ;;  %v6336_v35 = vld [vmem:[#allocation6 + $0x354] sm:$0xf0]  ;;  %v5911_v60 = vld [vmem:[#allocation6 + $0x3c0] sm:$0xf] }
 0x273   :  { %v5856_v55 = vor.u32 %v6336_v35, %v5855_v43 }
 0x274   :  { %2019 = vmatmul.bf16.gmra.mxu3 %v6847_v9 }
 0x275   :  { %v1615_v21 = vpop.f32.mrf.mxu2  ;;  %v1439_v54 = vpop.f32.mrf.mxu0  ;;  %2092 = vmatpush.bf16.xpose.msrb.mxu0 %v5856_v55 }
 0x276   :  { %v1528_v23 = vpop.f32.mrf.mxu1 }
 0x277   :  { %v1704_v56 = vpop.f32.mrf.mxu3  ;;  %v7245_v5 = vadd.f32 %v1528_v23, %v1439_v54  ;;  %v6350_v23 = vld [vmem:[#allocation6 + $0x3c4] sm:$0xf0] }
 0x278   :  { %v7243_v7 = vadd.f32 %v1704_v56, %v1615_v21 }
 0x279   :  { %8674 = vst [vmem:[#allocation114_spill] sm:$0xff] %v7245_v5 }
 0x27a   :  { %8673 = vst [vmem:[#allocation113_spill] sm:$0xff] %v7243_v7 }
 0x27d   :  { %v1617_v30 = vpop.f32.mrf.mxu2  ;;  %v1442_v38 = vpop.f32.mrf.mxu0 }
 0x27e   :  { %v1531_v37 = vpop.f32.mrf.mxu1 }
 0x27f   :  { %v1706_v41 = vpop.f32.mrf.mxu3  ;;  %v7249_v21 = vadd.f32 %v1531_v37, %v1442_v38  ;;  %v6349_v38 = vld [vmem:[#allocation6 + $0x3c4] sm:$0xf] }
 0x280   :  { %v7247_v19 = vadd.f32 %v1706_v41, %v1617_v30  ;;  %1757 = vmatmul.bf16.gmra.mxu0 %v6853_v26 }
 0x281   :  { %8676 = vst [vmem:[#allocation116_spill] sm:$0xff] %v7249_v21  ;;  %1846 = vmatmul.bf16.gmra.mxu1 %v6855_v27  ;;  %v5849_v21 = vld [vmem:[#allocation6 + $0x348] sm:$0xf0] }
 0x282   :  { %8675 = vst [vmem:[#allocation115_spill] sm:$0xff] %v7247_v19  ;;  %1935 = vmatmul.bf16.gmra.mxu2 %v6853_v26 }
 0x284   :  { %2024 = vmatmul.bf16.gmra.mxu3 %v6855_v27 }
 0x285   :  { %v1620_v35 = vpop.f32.mrf.mxu2  ;;  %v1444_v18 = vpop.f32.mrf.mxu0 }
 0x286   :  { %v1533_v55 = vpop.f32.mrf.mxu1 }
 0x287   :  { %v1709_v43 = vpop.f32.mrf.mxu3  ;;  %v7257_v41 = vadd.f32 %v1533_v55, %v1444_v18 }
 0x288   :  { %v7255_v39 = vadd.f32 %v1709_v43, %v1620_v35  ;;  %v5912_v35 = vor.u32 %v6350_v23, %v5911_v60  ;;  %v5913_v43 = vld [vmem:[#allocation6 + $0x3c8] sm:$0xf0] }
 0x289   :  { %8678 = vst [vmem:[#allocation118_spill] sm:$0xff] %v7257_v41  ;;  %v6333_v41 = vld [vmem:[#allocation6 + $0x344] sm:$0xf] }
 0x28a   :  { %8677 = vst [vmem:[#allocation117_spill] sm:$0xff] %v7255_v39  ;;  %2271 = vmatpush.bf16.xpose.msrb.mxu2 %v5912_v35  ;;  %v5852_v5 = vor.u32 %v6333_v41, %v5849_v21 }
 0x28c   :  { %2182 = vmatpush.bf16.xpose.msrb.mxu1 %v5852_v5 }
 0x28d   :  { %v1622_v30 = vpop.f32.mrf.mxu2  ;;  %v1447_v1 = vpop.f32.mrf.mxu0 }
 0x28e   :  { %v1536_v56 = vpop.f32.mrf.mxu1 }
 0x28f   :  { %v1711_v46 = vpop.f32.mrf.mxu3  ;;  %v7261_v54 = vadd.f32 %v1536_v56, %v1447_v1 }
 0x290   :  { %v7259_v36 = vadd.f32 %v1711_v46, %v1622_v30  ;;  %1762 = vmatmul.bf16.gmra.mxu0 %v6861_v32  ;;  %v5916_v30 = vor.u32 %v6349_v38, %v5913_v43  ;;  %v2574_v43 = vmul.f32 0.044715, %v6897_v28 }
 0x291   :  { %8680 = vst [vmem:[#allocation120_spill] sm:$0xff] %v7261_v54  ;;  %1851 = vmatmul.bf16.gmra.mxu1 %v6863_v33  ;;  %v5847_v54 = vld [vmem:[#allocation6 + $0x340] sm:$0xf] }
 0x292   :  { %8679 = vst [vmem:[#allocation119_spill] sm:$0xff] %v7259_v36  ;;  %1940 = vmatmul.bf16.gmra.mxu2 %v6861_v32  ;;  %2360 = vmatpush.bf16.xpose.msrb.mxu3 %v5916_v30  ;;  %v6334_v36 = vld [vmem:[#allocation6 + $0x344] sm:$0xf0] }
 0x293   :  { %v5848_v39 = vor.u32 %v6334_v36, %v5847_v54 }
 0x294   :  { %2029 = vmatmul.bf16.gmra.mxu3 %v6863_v33 }
 0x295   :  { %v1625_v37 = vpop.f32.mrf.mxu2  ;;  %v1449_v55 = vpop.f32.mrf.mxu0  ;;  %2093 = vmatpush.bf16.xpose.msrb.mxu0 %v5848_v39 }
 0x296   :  { %v1538_v1 = vpop.f32.mrf.mxu1 }
 0x297   :  { %v1714_v18 = vpop.f32.mrf.mxu3  ;;  %v7269_v56 = vadd.f32 %v1538_v1, %v1449_v55  ;;  %v2702_v1 = vmul.f32 %v2574_v43, %v6897_v28 }
 0x298   :  { %v7267_v46 = vadd.f32 %v1714_v18, %v1625_v37 }
 0x299   :  { %8682 = vst [vmem:[#allocation122_spill] sm:$0xff] %v7269_v56  ;;  %v2830_v43 = vmul.f32 %v2702_v1, %v6897_v28  ;;  %v6331_v56 = vld [vmem:[#allocation6 + $0x334] sm:$0xf] }
 0x29a   :  { %8681 = vst [vmem:[#allocation121_spill] sm:$0xff] %v7267_v46 }
 0x29d   :  { %v1627_v19 = vpop.f32.mrf.mxu2  ;;  %v1452_v60 = vpop.f32.mrf.mxu0 }
 0x29e   :  { %v1541_v38 = vpop.f32.mrf.mxu1 }
 0x29f   :  { %v1716_v7 = vpop.f32.mrf.mxu3  ;;  %v7273_v37 = vadd.f32 %v1541_v38, %v1452_v60  ;;  %v5903_v60 = vld [vmem:[#allocation6 + $0x3b0] sm:$0xf]  ;;  %v6348_v38 = vld [vmem:[#allocation6 + $0x3b4] sm:$0xf0] }
 0x2a0   :  { %v7271_v23 = vadd.f32 %v1716_v7, %v1627_v19  ;;  %1767 = vmatmul.bf16.gmra.mxu0 %v6869_v52 }
 0x2a1   :  { %8684 = vst [vmem:[#allocation124_spill] sm:$0xff] %v7273_v37  ;;  %1856 = vmatmul.bf16.gmra.mxu1 %v6871_v53  ;;  %v6332_v37 = vld [vmem:[#allocation6 + $0x334] sm:$0xf0] }
 0x2a2   :  { %8683 = vst [vmem:[#allocation123_spill] sm:$0xff] %v7271_v23  ;;  %1945 = vmatmul.bf16.gmra.mxu2 %v6869_v52 }
 0x2a4   :  { %2034 = vmatmul.bf16.gmra.mxu3 %v6871_v53 }
 0x2a5   :  { %v1630_v36 = vpop.f32.mrf.mxu2  ;;  %v1454_v21 = vpop.f32.mrf.mxu0 }
 0x2a6   :  { %v1543_v39 = vpop.f32.mrf.mxu1 }
 0x2a7   :  { %v1719_v54 = vpop.f32.mrf.mxu3  ;;  %v7281_v7 = vadd.f32 %v1543_v39, %v1454_v21  ;;  %v5905_v21 = vld [vmem:[#allocation6 + $0x3b8] sm:$0xf0]  ;;  %v2575_v39 = vmul.f32 0.044715, %v6903_v40 }
 0x2a8   :  { %v7279_v41 = vadd.f32 %v1719_v54, %v1630_v36  ;;  %v6347_v36 = vld [vmem:[#allocation6 + $0x3b4] sm:$0xf]  ;;  %v5904_v54 = vor.u32 %v6348_v38, %v5903_v60  ;;  %v5839_v38 = vld [vmem:[#allocation6 + $0x330] sm:$0xf] }
 0x2a9   :  { %8686 = vst [vmem:[#allocation126_spill] sm:$0xff] %v7281_v7  ;;  %v2703_v60 = vmul.f32 %v2575_v39, %v6903_v40  ;;  %v5840_v23 = vor.u32 %v6332_v37, %v5839_v38  ;;  %v2582_v39 = vmul.f32 0.044715, %v6913_v4 }
 0x2aa   :  { %8685 = vst [vmem:[#allocation125_spill] sm:$0xff] %v7279_v41  ;;  %2272 = vmatpush.bf16.xpose.msrb.mxu2 %v5904_v54  ;;  %v2958_v54 = vadd.f32 %v2830_v43, %v6897_v28 }
 0x2ab   :  { %2094 = vmatpush.bf16.xpose.msrb.mxu0 %v5840_v23  ;;  %v2831_v1 = vmul.f32 %v2703_v60, %v6903_v40  ;;  %v2583_v60 = vmul.f32 0.044715, %v6919_v10 }
 0x2ac   :  { %v3086_v38 = vmul.f32 0.7978846, %v2958_v54 }
 0x2ad   :  { %v1632_v19 = vpop.f32.mrf.mxu2  ;;  %v1457_v35 = vpop.f32.mrf.mxu0  ;;  %v2959_v23 = vadd.f32 %v2831_v1, %v6903_v40  ;;  %v2586_v1 = vmul.f32 0.044715, %v6921_v12 }
 0x2ae   :  { %v1546_v55 = vpop.f32.mrf.mxu1  ;;  %6427 = vtanh.f32 %v3086_v38 }
 0x2af   :  { %v1721_v5 = vpop.f32.mrf.mxu3  ;;  %v7286_v30 = vadd.f32 %v1546_v55, %v1457_v35 }
 0x2b0   :  { %v7284_v18 = vadd.f32 %v1721_v5, %v1632_v19  ;;  %1772 = vmatmul.bf16.gmra.mxu0 %v6877_v58  ;;  %v5908_v5 = vor.u32 %v6347_v36, %v5905_v21  ;;  %v5841_v36 = vld [vmem:[#allocation6 + $0x338] sm:$0xf0] }
 0x2b1   :  { %8688 = vst [vmem:[#allocation128_spill] sm:$0xff] %v7286_v30  ;;  %1861 = vmatmul.bf16.gmra.mxu1 %v6879_v59  ;;  %v2578_v30 = vmul.f32 0.044715, %v6905_v42  ;;  %v5844_v46 = vor.u32 %v6331_v56, %v5841_v36 }
 0x2b2   :  { %8687 = vst [vmem:[#allocation127_spill] sm:$0xff] %v7284_v18  ;;  %1950 = vmatmul.bf16.gmra.mxu2 %v6877_v58  ;;  %2361 = vmatpush.bf16.xpose.msrb.mxu3 %v5908_v5 }
 0x2b3   :  { %v2706_v21 = vmul.f32 %v2578_v30, %v6905_v42  ;;  %2183 = vmatpush.bf16.xpose.msrb.mxu1 %v5844_v46  ;;  %v2710_v46 = vmul.f32 %v2582_v39, %v6913_v4 }
 0x2b4   :  { %2039 = vmatmul.bf16.gmra.mxu3 %v6879_v59  ;;  %v6428_v38 = vpop.eup %6427 }
 0x2b5   :  { %v1635_v19 = vpop.f32.mrf.mxu2  ;;  %v1459_v55 = vpop.f32.mrf.mxu0  ;;  %v2834_v30 = vmul.f32 %v2706_v21, %v6905_v42  ;;  %v3087_v21 = vmul.f32 0.7978846, %v2959_v23  ;;  %v2838_v39 = vmul.f32 %v2710_v46, %v6913_v4 }
 0x2b6   :  { %v1548_v7 = vpop.f32.mrf.mxu1 }
 0x2b7   :  { %v1724_v35 = vpop.f32.mrf.mxu3  ;;  %v7298_v41 = vadd.f32 %v1548_v7, %v1459_v55  ;;  %v2962_v43 = vadd.f32 %v2834_v30, %v6905_v42  ;;  %v2711_v30 = vmul.f32 %v2583_v60, %v6919_v10  ;;  %6429 = vtanh.f32 %v3087_v21 }
 0x2b8   :  { %v7295_v18 = vadd.f32 %v1724_v35, %v1635_v19  ;;  %v2579_v19 = vmul.f32 0.044715, %v6911_v0  ;;  %v2590_v21 = vmul.f32 0.044715, %v6929_v31 }
 0x2b9   :  { %8690 = vst [vmem:[#allocation130_spill] sm:$0xff] %v7298_v41  ;;  %v2839_v46 = vmul.f32 %v2711_v30, %v6919_v10 }
 0x2ba   :  { %8689 = vst [vmem:[#allocation129_spill] sm:$0xff] %v7295_v18  ;;  %v2707_v56 = vmul.f32 %v2579_v19, %v6911_v0  ;;  %v3342_v18 = vadd.f32 1.0, %v6428_v38 }
 0x2bb   :  { %v2967_v30 = vadd.f32 %v2839_v46, %v6919_v10 }
 0x2bc   :  { %v2835_v54 = vmul.f32 %v2707_v56, %v6911_v0  ;;  %v2714_v56 = vmul.f32 %v2586_v1, %v6921_v12 }
 0x2bd   :  { %v1637_v35 = vpop.f32.mrf.mxu2  ;;  %v1462_v5 = vpop.f32.mrf.mxu0 }
 0x2be   :  { %v1551_v37 = vpop.f32.mrf.mxu1  ;;  %v2963_v23 = vadd.f32 %v2835_v54, %v6911_v0  ;;  %v6430_v60 = vpop.eup %6429 }
 0x2bf   :  { %v1726_v7 = vpop.f32.mrf.mxu3  ;;  %v7309_v41 = vadd.f32 %v1551_v37, %v1462_v5  ;;  %v3090_v37 = vmul.f32 0.7978846, %v2962_v43 }
 0x2c0   :  { %v7306_v55 = vadd.f32 %v1726_v7, %v1637_v35  ;;  %1777 = vmatmul.bf16.gmra.mxu0 %v6885_v15  ;;  %v3091_v43 = vmul.f32 0.7978846, %v2963_v23 }
 0x2c1   :  { %8692 = vst [vmem:[#allocation132_spill] sm:$0xff] %v7309_v41  ;;  %1866 = vmatmul.bf16.gmra.mxu1 %v6887_v17  ;;  %6431 = vtanh.f32 %v3090_v37 }
 0x2c2   :  { %8691 = vst [vmem:[#allocation131_spill] sm:$0xff] %v7306_v55  ;;  %1955 = vmatmul.bf16.gmra.mxu2 %v6885_v15  ;;  %v2966_v55 = vadd.f32 %v2838_v39, %v6913_v4  ;;  %v2842_v39 = vmul.f32 %v2714_v56, %v6921_v12  ;;  %6433 = vtanh.f32 %v3091_v43  ;;  %v6346_v56 = vld [vmem:[#allocation6 + $0x3a4] sm:$0xf0]  ;;  %v2447_v43 = vmul.f32 0.5, %v6903_v40 }
 0x2c3   :  { %v2594_v15 = vmul.f32 0.044715, %v6937_v47 }
 0x2c4   :  { %2044 = vmatmul.bf16.gmra.mxu3 %v6887_v17  ;;  %v3094_v37 = vmul.f32 0.7978846, %v2966_v55  ;;  %v2718_v55 = vmul.f32 %v2590_v21, %v6929_v31 }
 0x2c5   :  { %v1640_v36 = vpop.f32.mrf.mxu2  ;;  %v1464_v35 = vpop.f32.mrf.mxu0 }
 0x2c6   :  { %v1553_v5 = vpop.f32.mrf.mxu1  ;;  %6435 = vtanh.f32 %v3094_v37 }
 0x2c7   :  { %v1729_v19 = vpop.f32.mrf.mxu3  ;;  %v7325_v41 = vadd.f32 %v1553_v5, %v1464_v35  ;;  %v6432_v17 = vpop.eup %6431 }
 0x2c8   :  { %v7322_v7 = vadd.f32 %v1729_v19, %v1640_v36  ;;  %v2587_v36 = vmul.f32 0.044715, %v6927_v29 }
 0x2c9   :  { %8694 = vst [vmem:[#allocation134_spill] sm:$0xff] %v7325_v41  ;;  %v2446_v41 = vmul.f32 0.5, %v6897_v28 }
 0x2ca   :  { %8693 = vst [vmem:[#allocation133_spill] sm:$0xff] %v7322_v7  ;;  %v2715_v23 = vmul.f32 %v2587_v36, %v6927_v29  ;;  %v6345_v36 = vld [vmem:[#allocation6 + $0x3a4] sm:$0xf] }
 0x2cb   :  { %v3470_v7 = vmul.f32 %v3342_v18, %v2446_v41  ;;  %v2970_v41 = vadd.f32 %v2842_v39, %v6921_v12  ;;  %v5895_v18 = vld [vmem:[#allocation6 + $0x3a0] sm:$0xf]  ;;  %v2450_v39 = vmul.f32 0.5, %v6905_v42 }
 0x2cc   :  { %v5896_v46 = vor.u32 %v6346_v56, %v5895_v18  ;;  %v2846_v56 = vmul.f32 %v2718_v55, %v6929_v31  ;;  %v5831_v42 = vld [vmem:[#allocation6 + $0x320] sm:$0xf] }
 0x2cd   :  { %v1642_v19 = vpop.f32.mrf.mxu2  ;;  %v1743_v5 = vpop.f32.mrf.mxu0  ;;  %v3098_v18 = vmul.f32 0.7978846, %v2970_v41  ;;  %v2722_v41 = vmul.f32 %v2594_v15, %v6937_v47 }
 0x2ce   :  { %v1832_v1 = vpop.f32.mrf.mxu1  ;;  %2273 = vmatpush.bf16.xpose.msrb.mxu2 %v5896_v46  ;;  %v6329_v46 = vld [vmem:[#allocation6 + $0x324] sm:$0xf]  ;;  %v2974_v55 = vadd.f32 %v2846_v56, %v6929_v31 }
 0x2cf   :  { %v1731_v35 = vpop.f32.mrf.mxu3  ;;  %v1833_v38 = vadd.f32 %v1832_v1, %v1743_v5  ;;  %v2591_v5 = vmul.f32 0.044715, %v6935_v45 }
 0x2d0   :  { %v7335_v54 = vadd.f32 %v1731_v35, %v1642_v19  ;;  %1782 = vmatmul.bf16.gmra.mxu0 %v6893_v22  ;;  %v3343_v19 = vadd.f32 1.0, %v6430_v60  ;;  %v3346_v35 = vadd.f32 1.0, %v6432_v17  ;;  %v2843_v60 = vmul.f32 %v2715_v23, %v6927_v29 }
 0x2d1   :  { %v3598_v28 = vmul.f32 %v3470_v7, %v1833_v38  ;;  %1871 = vmatmul.bf16.gmra.mxu1 %v6895_v24  ;;  %v5897_v7 = vld [vmem:[#allocation6 + $0x3a8] sm:$0xf0]  ;;  %v3095_v38 = vmul.f32 0.7978846, %v2967_v30  ;;  %v2719_v23 = vmul.f32 %v2591_v5, %v6935_v45 }
 0x2d2   :  { %8695 = vst [vmem:[#allocation135_spill] sm:$0xff] %v7335_v54  ;;  %1960 = vmatmul.bf16.gmra.mxu2 %v6893_v22  ;;  %v5900_v21 = vor.u32 %v6345_v36, %v5897_v7  ;;  %v6434_v22 = vpop.eup %6433  ;;  %v3474_v30 = vmul.f32 %v3346_v35, %v2450_v39 }
 0x2d3   :  { %v6436_v58 = vpop.eup %6435  ;;  %6437 = vtanh.f32 %v3095_v38  ;;  %v3347_v53 = vadd.f32 1.0, %v6434_v22  ;;  %v2595_v38 = vmul.f32 0.044715, %v6943_v16 }
 0x2d4   :  { %2049 = vmatmul.bf16.gmra.mxu3 %v6895_v24  ;;  %v3471_v24 = vmul.f32 %v3343_v19, %v2447_v43  ;;  %v2971_v19 = vadd.f32 %v2843_v60, %v6927_v29  ;;  %v6330_v43 = vld [vmem:[#allocation6 + $0x324] sm:$0xf0]  ;;  %6439 = vtanh.f32 %v3098_v18  ;;  %v3350_v5 = vadd.f32 1.0, %v6436_v58  ;;  %v8696_v18 = vld [vmem:[#allocation20_spill] sm:$0xff] }
 0x2d5   :  { %v1921_v1 = vpop.f32.mrf.mxu2  ;;  %v1745_v37 = vpop.f32.mrf.mxu0  ;;  %2362 = vmatpush.bf16.xpose.msrb.mxu3 %v5900_v21  ;;  %v2850_v58 = vmul.f32 %v2722_v41, %v6937_v47 }
 0x2d6   :  { %v1834_v17 = vpop.f32.mrf.mxu1 }
 0x2d7   :  { %v2010_v54 = vpop.f32.mrf.mxu3  ;;  %v1835_v59 = vadd.f32 %v1834_v17, %v1745_v37  ;;  %v3099_v37 = vmul.f32 0.7978846, %v2971_v19  ;;  %v2723_v19 = vmul.f32 %v2595_v38, %v6943_v16  ;;  %v2978_v41 = vadd.f32 %v2850_v58, %v6937_v47 }
 0x2d8   :  { %v2011_v40 = vadd.f32 %v2010_v54, %v1921_v1  ;;  %v5832_v54 = vor.u32 %v6330_v43, %v5831_v42  ;;  %v5833_v1 = vld [vmem:[#allocation6 + $0x328] sm:$0xf0] }
 0x2d9   :  { %v3602_v7 = vmul.f32 %v3474_v30, %v1835_v59  ;;  %v5836_v35 = vor.u32 %v6329_v46, %v5833_v1  ;;  %v2847_v59 = vmul.f32 %v2719_v23, %v6935_v45  ;;  %v6438_v17 = vpop.eup %6437  ;;  %6441 = vtanh.f32 %v3099_v37 }
 0x2da   :  { %v3599_v36 = vmul.f32 %v3471_v24, %v2011_v40  ;;  %v2451_v24 = vmul.f32 0.5, %v6911_v0  ;;  %2095 = vmatpush.bf16.xpose.msrb.mxu0 %v5832_v54  ;;  %v2454_v40 = vmul.f32 0.5, %v6913_v4  ;;  %v3102_v0 = vmul.f32 0.7978846, %v2974_v55  ;;  %v6440_v46 = vpop.eup %6439 }
 0x2db   :  { %v7356_v21 = vpack.c.bf16 %v3602_v7, %v3598_v28  ;;  %2184 = vmatpush.bf16.xpose.msrb.mxu1 %v5836_v35  ;;  %v2598_v28 = vmul.f32 0.044715, %v8696_v18  ;;  %v3351_v7 = vadd.f32 1.0, %v6438_v17  ;;  %v2455_v55 = vmul.f32 0.5, %v6919_v10 }
 0x2dc   :  { %v3475_v39 = vmul.f32 %v3347_v53, %v2451_v24  ;;  %v3478_v43 = vmul.f32 %v3350_v5, %v2454_v40  ;;  %v2975_v53 = vadd.f32 %v2847_v59, %v6935_v45  ;;  %6443 = vtanh.f32 %v3102_v0  ;;  %v8698_v24 = vld [vmem:[#allocation21_spill] sm:$0xff]  ;;  %v8699_v40 = vld [vmem:[#allocation22_spill] sm:$0xff] }
 0x2dd   :  { %v1923_v60 = vpop.f32.mrf.mxu2  ;;  %v1748_v15 = vpop.f32.mrf.mxu0  ;;  %v2726_v54 = vmul.f32 %v2598_v28, %v8696_v18  ;;  %v3354_v35 = vadd.f32 1.0, %v6440_v46  ;;  %v2599_v5 = vmul.f32 0.044715, %v8698_v24  ;;  %v2851_v37 = vmul.f32 %v2723_v19, %v6943_v16 }
 0x2de   :  { %v1837_v30 = vpop.f32.mrf.mxu1  ;;  %v2602_v17 = vmul.f32 0.044715, %v8699_v40 }
 0x2df   :  { %v2012_v22 = vpop.f32.mrf.mxu3  ;;  %v1838_v42 = vadd.f32 %v1837_v30, %v1748_v15  ;;  %v6442_v15 = vpop.eup %6441  ;;  %v3106_v30 = vmul.f32 0.7978846, %v2978_v41  ;;  %v2854_v10 = vmul.f32 %v2726_v54, %v8696_v18  ;;  %v2979_v19 = vadd.f32 %v2851_v37, %v6943_v16 }
 0x2e0   :  { %v2013_v56 = vadd.f32 %v2012_v22, %v1923_v60  ;;  %1787 = vmatmul.bf16.gmra.mxu0 %v6907_v57  ;;  %v3103_v60 = vmul.f32 0.7978846, %v2975_v53  ;;  %v3479_v22 = vmul.f32 %v3351_v7, %v2455_v55  ;;  %v3355_v53 = vadd.f32 1.0, %v6442_v15 }
 0x2e1   :  { %v3606_v4 = vmul.f32 %v3478_v43, %v1838_v42  ;;  %1876 = vmatmul.bf16.gmra.mxu1 %v6909_v63  ;;  %v2727_v43 = vmul.f32 %v2599_v5, %v8698_v24  ;;  %v2982_v7 = vadd.f32 %v2854_v10, %v8696_v18  ;;  %v2459_v41 = vmul.f32 0.5, %v6927_v29 }
 0x2e2   :  { %v3603_v23 = vmul.f32 %v3475_v39, %v2013_v56  ;;  %1965 = vmatmul.bf16.gmra.mxu2 %v6907_v57  ;;  %v6444_v42 = vpop.eup %6443  ;;  %6445 = vtanh.f32 %v3103_v60  ;;  %v3107_v5 = vmul.f32 0.7978846, %v2979_v19 }
 0x2e3   :  { %6447 = vtanh.f32 %v3106_v30  ;;  %v3358_v55 = vadd.f32 1.0, %v6444_v42  ;;  %v2855_v60 = vmul.f32 %v2727_v43, %v8698_v24  ;;  %v3483_v37 = vmul.f32 %v3355_v53, %v2459_v41  ;;  %v6344_v41 = vld [vmem:[#allocation6 + $0x394] sm:$0xf0] }
 0x2e4   :  { %v7370_v1 = vpack.c.bf16 %v3603_v23, %v3599_v36  ;;  %2054 = vmatmul.bf16.gmra.mxu3 %v6909_v63  ;;  %v2458_v36 = vmul.f32 0.5, %v6921_v12  ;;  %v2730_v12 = vmul.f32 %v2602_v17, %v8699_v40  ;;  %v8702_v17 = vld [vmem:[#allocation24_spill] sm:$0xff]  ;;  %v3110_v29 = vmul.f32 0.7978846, %v2982_v7  ;;  %v5887_v7 = vld [vmem:[#allocation6 + $0x390] sm:$0xf] }
 0x2e5   :  { %v1926_v38 = vpop.f32.mrf.mxu2  ;;  %v1750_v39 = vpop.f32.mrf.mxu0  ;;  %6449 = vtanh.f32 %v3107_v5  ;;  %v2983_v43 = vadd.f32 %v2855_v60, %v8698_v24  ;;  %v5888_v60 = vor.u32 %v6344_v41, %v5887_v7 }
 0x2e6   :  { %8697 = vst [vmem:[#allocation20_spill] sm:$0xff] %v7370_v1  ;;  %v1839_v56 = vpop.f32.mrf.mxu1  ;;  %v3482_v58 = vmul.f32 %v3354_v35, %v2458_v36  ;;  %v8701_v35 = vld [vmem:[#allocation23_spill] sm:$0xff]  ;;  %v2462_v36 = vmul.f32 0.5, %v6929_v31  ;;  %6451 = vtanh.f32 %v3110_v29 }
 0x2e7   :  { %v2015_v59 = vpop.f32.mrf.mxu3  ;;  %v1840_v0 = vadd.f32 %v1839_v56, %v1750_v39  ;;  %2274 = vmatpush.bf16.xpose.msrb.mxu2 %v5888_v60  ;;  %v6327_v60 = vld [vmem:[#allocation6 + $0x314] sm:$0xf] }
 0x2e8   :  { %v2016_v28 = vadd.f32 %v2015_v59, %v1926_v38  ;;  %v2603_v38 = vmul.f32 0.044715, %v8701_v35  ;;  %v6446_v15 = vpop.eup %6445 }
 0x2e9   :  { %v3610_v23 = vmul.f32 %v3482_v58, %v1840_v0  ;;  %v3486_v0 = vmul.f32 %v3358_v55, %v2462_v36  ;;  %v6448_v58 = vpop.eup %6447  ;;  %v6343_v55 = vld [vmem:[#allocation6 + $0x394] sm:$0xf] }
 0x2ea   :  { %v3607_v46 = vmul.f32 %v3479_v22, %v2016_v28  ;;  %v2606_v28 = vmul.f32 0.044715, %v8702_v17  ;;  %v2731_v42 = vmul.f32 %v2603_v38, %v8701_v35  ;;  %v3362_v5 = vadd.f32 1.0, %v6448_v58 }
 0x2eb   :  { %v7385_v54 = vpack.c.bf16 %v3610_v23, %v3606_v4  ;;  %v2858_v4 = vmul.f32 %v2730_v12, %v8699_v40  ;;  %v3359_v23 = vadd.f32 1.0, %v6446_v15  ;;  %v3111_v15 = vmul.f32 0.7978846, %v2983_v43 }
 0x2ec   :  { %v2734_v53 = vmul.f32 %v2606_v28, %v8702_v17  ;;  %v2859_v28 = vmul.f32 %v2731_v42, %v8701_v35 }
 0x2ed   :  { %8700 = vst [vmem:[#allocation21_spill] sm:$0xff] %v7385_v54  ;;  %v1928_v59 = vpop.f32.mrf.mxu2  ;;  %v1753_v39 = vpop.f32.mrf.mxu0  ;;  %v2986_v12 = vadd.f32 %v2858_v4, %v8699_v40  ;;  %6453 = vtanh.f32 %v3111_v15 }
 0x2ee   :  { %v1842_v30 = vpop.f32.mrf.mxu1  ;;  %v2862_v41 = vmul.f32 %v2734_v53, %v8702_v17 }
 0x2ef   :  { %v2017_v22 = vpop.f32.mrf.mxu3  ;;  %v1843_v10 = vadd.f32 %v1842_v30, %v1753_v39  ;;  %v3114_v7 = vmul.f32 0.7978846, %v2986_v12 }
 0x2f0   :  { %v2018_v56 = vadd.f32 %v2017_v22, %v1928_v59  ;;  %1792 = vmatmul.bf16.gmra.mxu0 %v6923_v20  ;;  %v2463_v59 = vmul.f32 0.5, %v6935_v45  ;;  %v5889_v22 = vld [vmem:[#allocation6 + $0x398] sm:$0xf0]  ;;  %v2990_v53 = vadd.f32 %v2862_v41, %v8702_v17 }
 0x2f1   :  { %v3614_v31 = vmul.f32 %v3486_v0, %v1843_v10  ;;  %1881 = vmatmul.bf16.gmra.mxu1 %v6925_v25  ;;  %v2466_v10 = vmul.f32 0.5, %v6937_v47  ;;  %v8705_v0 = vld [vmem:[#allocation26_spill] sm:$0xff]  ;;  %v5823_v47 = vld [vmem:[#allocation6 + $0x310] sm:$0xf]  ;;  %6455 = vtanh.f32 %v3114_v7  ;;  %v8708_v41 = vld [vmem:[#allocation28_spill] sm:$0xff] }
 0x2f2   :  { %v3611_v19 = vmul.f32 %v3483_v37, %v2018_v56  ;;  %1970 = vmatmul.bf16.gmra.mxu2 %v6923_v20  ;;  %v8704_v37 = vld [vmem:[#allocation25_spill] sm:$0xff]  ;;  %v5892_v56 = vor.u32 %v6343_v55, %v5889_v22  ;;  %v3487_v29 = vmul.f32 %v3359_v23, %v2463_v59  ;;  %v2987_v23 = vadd.f32 %v2859_v28, %v8701_v35  ;;  %v6328_v59 = vld [vmem:[#allocation6 + $0x314] sm:$0xf0]  ;;  %v8707_v28 = vld [vmem:[#allocation27_spill] sm:$0xff] }
 0x2f3   :  { %v2607_v39 = vmul.f32 0.044715, %v8704_v37  ;;  %v3490_v43 = vmul.f32 %v3362_v5, %v2466_v10 }
 0x2f4   :  { %2059 = vmatmul.bf16.gmra.mxu3 %v6925_v25  ;;  %v7400_v38 = vpack.c.bf16 %v3611_v19, %v3607_v46  ;;  %v6450_v46 = vpop.eup %6449  ;;  %v2610_v19 = vmul.f32 0.044715, %v8705_v0  ;;  %v3115_v10 = vmul.f32 0.7978846, %v2987_v23 }
 0x2f5   :  { %v1931_v36 = vpop.f32.mrf.mxu2  ;;  %v1755_v4 = vpop.f32.mrf.mxu0  ;;  %2363 = vmatpush.bf16.xpose.msrb.mxu3 %v5892_v56  ;;  %v2735_v42 = vmul.f32 %v2607_v39, %v8704_v37  ;;  %v3363_v1 = vadd.f32 1.0, %v6450_v46  ;;  %v2467_v56 = vmul.f32 0.5, %v6943_v16 }
 0x2f6   :  { %8703 = vst [vmem:[#allocation22_spill] sm:$0xff] %v7400_v38  ;;  %v1844_v58 = vpop.f32.mrf.mxu1  ;;  %v6452_v54 = vpop.eup %6451  ;;  %v2738_v12 = vmul.f32 %v2610_v19, %v8705_v0  ;;  %6457 = vtanh.f32 %v3115_v10 }
 0x2f7   :  { %v2020_v30 = vpop.f32.mrf.mxu3  ;;  %v1845_v38 = vadd.f32 %v1844_v58, %v1755_v4  ;;  %v3366_v39 = vadd.f32 1.0, %v6452_v54  ;;  %v2470_v58 = vmul.f32 0.5, %v8696_v18  ;;  %v6454_v7 = vpop.eup %6453 }
 0x2f8   :  { %v2021_v45 = vadd.f32 %v2020_v30, %v1931_v36  ;;  %v5824_v36 = vor.u32 %v6328_v59, %v5823_v47  ;;  %v5825_v30 = vld [vmem:[#allocation6 + $0x318] sm:$0xf0]  ;;  %v3118_v47 = vmul.f32 0.7978846, %v2990_v53 }
 0x2f9   :  { %v3618_v22 = vmul.f32 %v3490_v43, %v1845_v38  ;;  %v5828_v5 = vor.u32 %v6327_v60, %v5825_v30  ;;  %v2863_v38 = vmul.f32 %v2735_v42, %v8704_v37  ;;  %v2614_v43 = vmul.f32 0.044715, %v8708_v41 }
 0x2fa   :  { %v3615_v55 = vmul.f32 %v3487_v29, %v2021_v45  ;;  %2096 = vmatpush.bf16.xpose.msrb.mxu0 %v5824_v36  ;;  %v2611_v29 = vmul.f32 0.044715, %v8707_v28  ;;  %v3491_v45 = vmul.f32 %v3363_v1, %v2467_v56  ;;  %v3494_v60 = vmul.f32 %v3366_v39, %v2470_v58  ;;  %v8710_v39 = vld [vmem:[#allocation29_spill] sm:$0xff] }
 0x2fb   :  { %v7413_v15 = vpack.c.bf16 %v3618_v22, %v3614_v31  ;;  %2185 = vmatpush.bf16.xpose.msrb.mxu1 %v5828_v5  ;;  %v2866_v31 = vmul.f32 %v2738_v12, %v8705_v0  ;;  %v6456_v22 = vpop.eup %6455  ;;  %v2991_v1 = vadd.f32 %v2863_v38, %v8704_v37  ;;  %v3367_v36 = vadd.f32 1.0, %v6454_v7 }
 0x2fc   :  { %v2739_v23 = vmul.f32 %v2611_v29, %v8707_v28  ;;  %v2742_v30 = vmul.f32 %v2614_v43, %v8708_v41  ;;  %6459 = vtanh.f32 %v3118_v47  ;;  %v2471_v5 = vmul.f32 0.5, %v8698_v24  ;;  %v6458_v7 = vpop.eup %6457  ;;  %v8711_v43 = vld [vmem:[#allocation30_spill] sm:$0xff] }
 0x2fd   :  { %8706 = vst [vmem:[#allocation23_spill] sm:$0xff] %v7413_v15  ;;  %v1933_v4 = vpop.f32.mrf.mxu2  ;;  %v1758_v19 = vpop.f32.mrf.mxu0  ;;  %v2994_v12 = vadd.f32 %v2866_v31, %v8705_v0  ;;  %v3370_v56 = vadd.f32 1.0, %v6456_v22  ;;  %v2615_v29 = vmul.f32 0.044715, %v8710_v39  ;;  %v3119_v10 = vmul.f32 0.7978846, %v2991_v1 }
 0x2fe   :  { %v1847_v54 = vpop.f32.mrf.mxu1  ;;  %v2867_v38 = vmul.f32 %v2739_v23, %v8707_v28  ;;  %v2474_v58 = vmul.f32 0.5, %v8699_v40  ;;  %v2870_v24 = vmul.f32 %v2742_v30, %v8708_v41 }
 0x2ff   :  { %v2022_v46 = vpop.f32.mrf.mxu3  ;;  %v1848_v59 = vadd.f32 %v1847_v54, %v1758_v19  ;;  %v3122_v47 = vmul.f32 0.7978846, %v2994_v12  ;;  %v2743_v22 = vmul.f32 %v2615_v29, %v8710_v39  ;;  %6461 = vtanh.f32 %v3119_v10 }
 0x300   :  { %v2023_v16 = vadd.f32 %v2022_v46, %v1933_v4  ;;  %1797 = vmatmul.bf16.gmra.mxu0 %v6939_v6  ;;  %v2995_v23 = vadd.f32 %v2867_v38, %v8707_v28  ;;  %v2475_v12 = vmul.f32 0.5, %v8701_v35 }
 0x301   :  { %v3622_v18 = vmul.f32 %v3494_v60, %v1848_v59  ;;  %1886 = vmatmul.bf16.gmra.mxu1 %v6941_v14  ;;  %v3498_v59 = vmul.f32 %v3370_v56, %v2474_v58  ;;  %6463 = vtanh.f32 %v3122_v47  ;;  %v8713_v56 = vld [vmem:[#allocation31_spill] sm:$0xff]  ;;  %v2871_v10 = vmul.f32 %v2743_v22, %v8710_v39 }
 0x302   :  { %v3619_v42 = vmul.f32 %v3491_v45, %v2023_v16  ;;  %1975 = vmatmul.bf16.gmra.mxu2 %v6939_v6  ;;  %v3495_v45 = vmul.f32 %v3367_v36, %v2471_v5  ;;  %v2618_v16 = vmul.f32 0.044715, %v8711_v43  ;;  %v6460_v60 = vpop.eup %6459  ;;  %v3371_v36 = vadd.f32 1.0, %v6458_v7 }
 0x303   :  { %v2998_v5 = vadd.f32 %v2870_v24, %v8708_v41  ;;  %v3123_v29 = vmul.f32 0.7978846, %v2995_v23  ;;  %v2478_v7 = vmul.f32 0.5, %v8702_v17  ;;  %v2999_v22 = vadd.f32 %v2871_v10, %v8710_v39 }
 0x304   :  { %2064 = vmatmul.bf16.gmra.mxu3 %v6941_v14  ;;  %v7428_v53 = vpack.c.bf16 %v3619_v42, %v3615_v55  ;;  %v2746_v40 = vmul.f32 %v2618_v16, %v8711_v43  ;;  %v3499_v38 = vmul.f32 %v3371_v36, %v2475_v12  ;;  %v5879_v12 = vld [vmem:[#allocation6 + $0x380] sm:$0xf] }
 0x305   :  { %v1936_v4 = vpop.f32.mrf.mxu2  ;;  %v1760_v19 = vpop.f32.mrf.mxu0  ;;  %v3126_v35 = vmul.f32 0.7978846, %v2998_v5  ;;  %6465 = vtanh.f32 %v3123_v29  ;;  %v2479_v29 = vmul.f32 0.5, %v8704_v37 }
 0x306   :  { %8709 = vst [vmem:[#allocation24_spill] sm:$0xff] %v7428_v53  ;;  %v1849_v55 = vpop.f32.mrf.mxu1  ;;  %v6462_v16 = vpop.eup %6461 }
 0x307   :  { %v2025_v46 = vpop.f32.mrf.mxu3  ;;  %v1850_v31 = vadd.f32 %v1849_v55, %v1760_v19  ;;  %v3375_v36 = vadd.f32 1.0, %v6462_v16  ;;  %6467 = vtanh.f32 %v3126_v35 }
 0x308   :  { %v2026_v54 = vadd.f32 %v2025_v46, %v1936_v4  ;;  %v3374_v4 = vadd.f32 1.0, %v6460_v60  ;;  %v2619_v46 = vmul.f32 0.044715, %v8713_v56  ;;  %v6464_v60 = vpop.eup %6463 }
 0x309   :  { %v3626_v1 = vmul.f32 %v3498_v59, %v1850_v31  ;;  %v3378_v10 = vadd.f32 1.0, %v6464_v60 }
 0x30a   :  { %v3623_v42 = vmul.f32 %v3495_v45, %v2026_v54  ;;  %v8714_v54 = vld [vmem:[#allocation32_spill] sm:$0xff]  ;;  %v3502_v59 = vmul.f32 %v3374_v4, %v2478_v7  ;;  %v2747_v23 = vmul.f32 %v2619_v46, %v8713_v56  ;;  %v6342_v4 = vld [vmem:[#allocation6 + $0x384] sm:$0xf0]  ;;  %v6341_v46 = vld [vmem:[#allocation6 + $0x384] sm:$0xf] }
 0x30b   :  { %v7441_v30 = vpack.c.bf16 %v3626_v1, %v3622_v18  ;;  %v2622_v55 = vmul.f32 0.044715, %v8714_v54  ;;  %v2874_v18 = vmul.f32 %v2746_v40, %v8711_v43 }
 0x30d   :  { %8712 = vst [vmem:[#allocation25_spill] sm:$0xff] %v7441_v30  ;;  %v1938_v19 = vpop.f32.mrf.mxu2  ;;  %v1763_v58 = vpop.f32.mrf.mxu0  ;;  %v2750_v5 = vmul.f32 %v2622_v55, %v8714_v54  ;;  %v3002_v40 = vadd.f32 %v2874_v18, %v8711_v43  ;;  %v2875_v55 = vmul.f32 %v2747_v23, %v8713_v56 }
 0x30e   :  { %v1852_v24 = vpop.f32.mrf.mxu1 }
 0x30f   :  { %v2027_v45 = vpop.f32.mrf.mxu3  ;;  %v1853_v31 = vadd.f32 %v1852_v24, %v1763_v58  ;;  %v8716_v58 = vld [vmem:[#allocation33_spill] sm:$0xff] }
 0x310   :  { %v2028_v47 = vadd.f32 %v2027_v45, %v1938_v19  ;;  %1802 = vmatmul.bf16.gmra.mxu0 %v6955_v44  ;;  %v5880_v45 = vor.u32 %v6342_v4, %v5879_v12  ;;  %v2623_v7 = vmul.f32 0.044715, %v8716_v58  ;;  %v3130_v12 = vmul.f32 0.7978846, %v3002_v40 }
 0x311   :  { %v3630_v17 = vmul.f32 %v3502_v59, %v1853_v31  ;;  %1891 = vmatmul.bf16.gmra.mxu1 %v6957_v51  ;;  %v3503_v31 = vmul.f32 %v3375_v36, %v2479_v29  ;;  %v2482_v59 = vmul.f32 0.5, %v8705_v0  ;;  %v2878_v4 = vmul.f32 %v2750_v5, %v8714_v54  ;;  %v5815_v0 = vld [vmem:[#allocation6 + $0x300] sm:$0xf]  ;;  %v6326_v29 = vld [vmem:[#allocation6 + $0x304] sm:$0xf0] }
 0x312   :  { %v3627_v1 = vmul.f32 %v3499_v38, %v2028_v47  ;;  %1980 = vmatmul.bf16.gmra.mxu2 %v6955_v44  ;;  %v5881_v38 = vld [vmem:[#allocation6 + $0x388] sm:$0xf0]  ;;  %v3127_v47 = vmul.f32 0.7978846, %v2999_v22  ;;  %v2751_v23 = vmul.f32 %v2623_v7, %v8716_v58  ;;  %v3003_v36 = vadd.f32 %v2875_v55, %v8713_v56  ;;  %v8719_v55 = vld [vmem:[#allocation35_spill] sm:$0xff] }
 0x313   :  { %v5884_v24 = vor.u32 %v6341_v46, %v5881_v38  ;;  %2275 = vmatpush.bf16.xpose.msrb.mxu2 %v5880_v45  ;;  %v3506_v22 = vmul.f32 %v3378_v10, %v2482_v59  ;;  %v6325_v45 = vld [vmem:[#allocation6 + $0x304] sm:$0xf]  ;;  %v3006_v5 = vadd.f32 %v2878_v4, %v8714_v54  ;;  %v8720_v4 = vld [vmem:[#allocation36_spill] sm:$0xff] }
 0x314   :  { %2069 = vmatmul.bf16.gmra.mxu3 %v6957_v51  ;;  %v7456_v19 = vpack.c.bf16 %v3627_v1, %v3623_v42  ;;  %v6466_v42 = vpop.eup %6465  ;;  %v8717_v1 = vld [vmem:[#allocation34_spill] sm:$0xff]  ;;  %6469 = vtanh.f32 %v3127_v47  ;;  %v3131_v59 = vmul.f32 0.7978846, %v3003_v36 }
 0x315   :  { %v1941_v16 = vpop.f32.mrf.mxu2  ;;  %v1765_v18 = vpop.f32.mrf.mxu0  ;;  %2364 = vmatpush.bf16.xpose.msrb.mxu3 %v5884_v24  ;;  %v3379_v15 = vadd.f32 1.0, %v6466_v42  ;;  %6471 = vtanh.f32 %v3130_v12  ;;  %v2483_v24 = vmul.f32 0.5, %v8707_v28 }
 0x316   :  { %8715 = vst [vmem:[#allocation26_spill] sm:$0xff] %v7456_v19  ;;  %v2626_v19 = vmul.f32 0.044715, %v8717_v1  ;;  %v1854_v60 = vpop.f32.mrf.mxu1  ;;  %v6468_v53 = vpop.eup %6467  ;;  %6473 = vtanh.f32 %v3131_v59 }
 0x317   :  { %v2030_v35 = vpop.f32.mrf.mxu3  ;;  %v1855_v30 = vadd.f32 %v1854_v60, %v1765_v18  ;;  %v3382_v7 = vadd.f32 1.0, %v6468_v53  ;;  %v2486_v60 = vmul.f32 0.5, %v8708_v41 }
 0x318   :  { %v2031_v37 = vadd.f32 %v2030_v35, %v1941_v16  ;;  %v5816_v16 = vor.u32 %v6326_v29, %v5815_v0  ;;  %v5817_v35 = vld [vmem:[#allocation6 + $0x308] sm:$0xf0]  ;;  %v2754_v40 = vmul.f32 %v2626_v19, %v8717_v1  ;;  %v3134_v0 = vmul.f32 0.7978846, %v3006_v5 }
 0x319   :  { %v3634_v38 = vmul.f32 %v3506_v22, %v1855_v30  ;;  %v5820_v10 = vor.u32 %v6325_v45, %v5817_v35  ;;  %v2879_v30 = vmul.f32 %v2751_v23, %v8716_v58  ;;  %v2630_v22 = vmul.f32 0.044715, %v8720_v4 }
 0x31a   :  { %v3631_v46 = vmul.f32 %v3503_v31, %v2031_v37  ;;  %2097 = vmatpush.bf16.xpose.msrb.mxu0 %v5816_v16  ;;  %v2627_v31 = vmul.f32 0.044715, %v8719_v55  ;;  %v3507_v37 = vmul.f32 %v3379_v15, %v2483_v24  ;;  %v6470_v12 = vpop.eup %6469  ;;  %v3510_v45 = vmul.f32 %v3382_v7, %v2486_v60  ;;  %v8722_v7 = vld [vmem:[#allocation37_spill] sm:$0xff] }
 0x31b   :  { %v7469_v47 = vpack.c.bf16 %v3634_v38, %v3630_v17  ;;  %2186 = vmatpush.bf16.xpose.msrb.mxu1 %v5820_v10  ;;  %v2882_v17 = vmul.f32 %v2754_v40, %v8717_v1  ;;  %v6472_v38 = vpop.eup %6471  ;;  %v3007_v15 = vadd.f32 %v2879_v30, %v8716_v58  ;;  %v3383_v16 = vadd.f32 1.0, %v6470_v12 }
 0x31c   :  { %v2755_v36 = vmul.f32 %v2627_v31, %v8719_v55  ;;  %v2758_v35 = vmul.f32 %v2630_v22, %v8720_v4  ;;  %6475 = vtanh.f32 %v3134_v0  ;;  %v2487_v10 = vmul.f32 0.5, %v8710_v39  ;;  %v6474_v12 = vpop.eup %6473  ;;  %v8723_v22 = vld [vmem:[#allocation38_spill] sm:$0xff] }
 0x31d   :  { %8718 = vst [vmem:[#allocation27_spill] sm:$0xff] %v7469_v47  ;;  %v1943_v18 = vpop.f32.mrf.mxu2  ;;  %v1768_v19 = vpop.f32.mrf.mxu0  ;;  %v3010_v40 = vadd.f32 %v2882_v17, %v8717_v1  ;;  %v3386_v24 = vadd.f32 1.0, %v6472_v38  ;;  %v2631_v31 = vmul.f32 0.044715, %v8722_v7  ;;  %v3135_v59 = vmul.f32 0.7978846, %v3007_v15 }
 0x31e   :  { %v1857_v53 = vpop.f32.mrf.mxu1  ;;  %v2883_v30 = vmul.f32 %v2755_v36, %v8719_v55  ;;  %v2490_v60 = vmul.f32 0.5, %v8711_v43  ;;  %v2886_v39 = vmul.f32 %v2758_v35, %v8720_v4 }
 0x31f   :  { %v2032_v42 = vpop.f32.mrf.mxu3  ;;  %v1858_v29 = vadd.f32 %v1857_v53, %v1768_v19  ;;  %v3138_v0 = vmul.f32 0.7978846, %v3010_v40  ;;  %v2759_v38 = vmul.f32 %v2631_v31, %v8722_v7  ;;  %6477 = vtanh.f32 %v3135_v59 }
 0x320   :  { %v2033_v28 = vadd.f32 %v2032_v42, %v1943_v18  ;;  %1807 = vmatmul.bf16.gmra.mxu0 %v6971_v61  ;;  %v3011_v36 = vadd.f32 %v2883_v30, %v8719_v55  ;;  %v2491_v40 = vmul.f32 0.5, %v8713_v56 }
 0x321   :  { %v3638_v41 = vmul.f32 %v3510_v45, %v1858_v29  ;;  %1896 = vmatmul.bf16.gmra.mxu1 %v6973_v11  ;;  %v3514_v29 = vmul.f32 %v3386_v24, %v2490_v60  ;;  %6479 = vtanh.f32 %v3138_v0  ;;  %v8725_v24 = vld [vmem:[#allocation39_spill] sm:$0xff]  ;;  %v2887_v59 = vmul.f32 %v2759_v38, %v8722_v7 }
 0x322   :  { %v3635_v23 = vmul.f32 %v3507_v37, %v2033_v28  ;;  %1985 = vmatmul.bf16.gmra.mxu2 %v6971_v61  ;;  %v3511_v37 = vmul.f32 %v3383_v16, %v2487_v10  ;;  %v2634_v28 = vmul.f32 0.044715, %v8723_v22  ;;  %v6476_v45 = vpop.eup %6475  ;;  %v3387_v16 = vadd.f32 1.0, %v6474_v12 }
 0x323   :  { %v3014_v10 = vadd.f32 %v2886_v39, %v8720_v4  ;;  %v3139_v31 = vmul.f32 0.7978846, %v3011_v36  ;;  %v2494_v12 = vmul.f32 0.5, %v8714_v54  ;;  %v3015_v38 = vadd.f32 %v2887_v59, %v8722_v7 }
 0x324   :  { %2074 = vmatmul.bf16.gmra.mxu3 %v6973_v11  ;;  %v7484_v5 = vpack.c.bf16 %v3635_v23, %v3631_v46  ;;  %v2762_v43 = vmul.f32 %v2634_v28, %v8723_v22  ;;  %v3515_v30 = vmul.f32 %v3387_v16, %v2491_v40  ;;  %v6127_v40 = vld [vmem:[#allocation8 + $0x170] sm:$0xf] }
 0x325   :  { %v1946_v18 = vpop.f32.mrf.mxu2  ;;  %v1770_v19 = vpop.f32.mrf.mxu0  ;;  %v3142_v56 = vmul.f32 0.7978846, %v3014_v10  ;;  %6481 = vtanh.f32 %v3139_v31  ;;  %v2495_v31 = vmul.f32 0.5, %v8716_v58 }
 0x326   :  { %8721 = vst [vmem:[#allocation28_spill] sm:$0xff] %v7484_v5  ;;  %v1859_v46 = vpop.f32.mrf.mxu1  ;;  %v6478_v28 = vpop.eup %6477 }
 0x327   :  { %v2035_v42 = vpop.f32.mrf.mxu3  ;;  %v1860_v17 = vadd.f32 %v1859_v46, %v1770_v19  ;;  %v3391_v16 = vadd.f32 1.0, %v6478_v28  ;;  %6483 = vtanh.f32 %v3142_v56 }
 0x328   :  { %v2036_v53 = vadd.f32 %v2035_v42, %v1946_v18  ;;  %v3390_v18 = vadd.f32 1.0, %v6476_v45  ;;  %v2635_v42 = vmul.f32 0.044715, %v8725_v24  ;;  %v6480_v45 = vpop.eup %6479 }
 0x329   :  { %v3642_v15 = vmul.f32 %v3514_v29, %v1860_v17  ;;  %v3394_v59 = vadd.f32 1.0, %v6480_v45 }
 0x32a   :  { %v3639_v23 = vmul.f32 %v3511_v37, %v2036_v53  ;;  %v8726_v53 = vld [vmem:[#allocation40_spill] sm:$0xff]  ;;  %v3518_v29 = vmul.f32 %v3390_v18, %v2494_v12  ;;  %v2763_v36 = vmul.f32 %v2635_v42, %v8725_v24  ;;  %v6191_v42 = vld [vmem:[#allocation8 + $0x1f0] sm:$0xf] }
 0x32b   :  { %v7497_v35 = vpack.c.bf16 %v3642_v15, %v3638_v41  ;;  %v2638_v46 = vmul.f32 0.044715, %v8726_v53  ;;  %v2890_v41 = vmul.f32 %v2762_v43, %v8723_v22  ;;  %v6404_v18 = vld [vmem:[#allocation8 + $0x174] sm:$0xf0] }
 0x32d   :  { %8724 = vst [vmem:[#allocation29_spill] sm:$0xff] %v7497_v35  ;;  %v1948_v19 = vpop.f32.mrf.mxu2  ;;  %v1773_v60 = vpop.f32.mrf.mxu0  ;;  %v2766_v10 = vmul.f32 %v2638_v46, %v8726_v53  ;;  %v3018_v43 = vadd.f32 %v2890_v41, %v8723_v22  ;;  %v2891_v46 = vmul.f32 %v2763_v36, %v8725_v24 }
 0x32e   :  { %v1862_v39 = vpop.f32.mrf.mxu1 }
 0x32f   :  { %v2037_v37 = vpop.f32.mrf.mxu3  ;;  %v1863_v17 = vadd.f32 %v1862_v39, %v1773_v60  ;;  %v8728_v60 = vld [vmem:[#allocation41_spill] sm:$0xff] }
 0x330   :  { %v2038_v0 = vadd.f32 %v2037_v37, %v1948_v19  ;;  %1812 = vmatmul.bf16.gmra.mxu0 %v6987_v62  ;;  %v6128_v37 = vor.u32 %v6404_v18, %v6127_v40  ;;  %v2639_v12 = vmul.f32 0.044715, %v8728_v60  ;;  %v3146_v40 = vmul.f32 0.7978846, %v3018_v43 }
 0x331   :  { %v3646_v54 = vmul.f32 %v3518_v29, %v1863_v17  ;;  %1901 = vmatmul.bf16.gmra.mxu1 %v6989_v13  ;;  %v3519_v17 = vmul.f32 %v3391_v16, %v2495_v31  ;;  %v2498_v29 = vmul.f32 0.5, %v8717_v1  ;;  %v2894_v18 = vmul.f32 %v2766_v10, %v8726_v53  ;;  %v5999_v1 = vld [vmem:[#allocation8 + $0x70] sm:$0xf]  ;;  %v6372_v31 = vld [vmem:[#allocation8 + $0x74] sm:$0xf0] }
 0x332   :  { %v3643_v15 = vmul.f32 %v3515_v30, %v2038_v0  ;;  %1990 = vmatmul.bf16.gmra.mxu2 %v6987_v62  ;;  %v6420_v30 = vld [vmem:[#allocation8 + $0x1f4] sm:$0xf0]  ;;  %v3143_v0 = vmul.f32 0.7978846, %v3015_v38  ;;  %v2767_v36 = vmul.f32 %v2639_v12, %v8728_v60  ;;  %v3019_v16 = vadd.f32 %v2891_v46, %v8725_v24  ;;  %v8730_v46 = vld [vmem:[#allocation43_spill] sm:$0xff] }
 0x333   :  { %v6192_v39 = vor.u32 %v6420_v30, %v6191_v42  ;;  %4352 = vmatpush.bf16.msra.mxu2 %v6128_v37  ;;  %v3522_v38 = vmul.f32 %v3394_v59, %v2498_v29  ;;  %v6063_v37 = vld [vmem:[#allocation8 + $0xf0] sm:$0xf]  ;;  %v3022_v10 = vadd.f32 %v2894_v18, %v8726_v53  ;;  %v8731_v18 = vld [vmem:[#allocation44_spill] sm:$0xff] }
 0x334   :  { %2079 = vmatmul.bf16.gmra.mxu3 %v6989_v13  ;;  %v7512_v19 = vpack.c.bf16 %v3643_v15, %v3639_v23  ;;  %v6482_v23 = vpop.eup %6481  ;;  %v8729_v15 = vld [vmem:[#allocation42_spill] sm:$0xff]  ;;  %6485 = vtanh.f32 %v3143_v0  ;;  %v3147_v29 = vmul.f32 0.7978846, %v3019_v16 }
 0x335   :  { %v1951_v28 = vpop.f32.mrf.mxu2  ;;  %v1775_v41 = vpop.f32.mrf.mxu0  ;;  %4441 = vmatpush.bf16.msra.mxu3 %v6192_v39  ;;  %v3395_v47 = vadd.f32 1.0, %v6482_v23  ;;  %6487 = vtanh.f32 %v3146_v40  ;;  %v2499_v39 = vmul.f32 0.5, %v8719_v55 }
 0x336   :  { %8727 = vst [vmem:[#allocation30_spill] sm:$0xff] %v7512_v19  ;;  %v2642_v19 = vmul.f32 0.044715, %v8729_v15  ;;  %v1864_v45 = vpop.f32.mrf.mxu1  ;;  %v6484_v5 = vpop.eup %6483  ;;  %6489 = vtanh.f32 %v3147_v29 }
 0x337   :  { %v2040_v56 = vpop.f32.mrf.mxu3  ;;  %v1865_v35 = vadd.f32 %v1864_v45, %v1775_v41  ;;  %v3398_v12 = vadd.f32 1.0, %v6484_v5  ;;  %v2502_v45 = vmul.f32 0.5, %v8720_v4 }
 0x338   :  { %v2041_v58 = vadd.f32 %v2040_v56, %v1951_v28  ;;  %v6000_v28 = vor.u32 %v6372_v31, %v5999_v1  ;;  %v6388_v56 = vld [vmem:[#allocation8 + $0xf4] sm:$0xf0]  ;;  %v2770_v43 = vmul.f32 %v2642_v19, %v8729_v15  ;;  %v3150_v1 = vmul.f32 0.7978846, %v3022_v10 }
 0x339   :  { %v3650_v30 = vmul.f32 %v3522_v38, %v1865_v35  ;;  %v6064_v59 = vor.u32 %v6388_v56, %v6063_v37  ;;  %v2895_v35 = vmul.f32 %v2767_v36, %v8728_v60  ;;  %v2646_v38 = vmul.f32 0.044715, %v8731_v18 }
 0x33a   :  { %v3647_v42 = vmul.f32 %v3519_v17, %v2041_v58  ;;  %4174 = vmatpush.bf16.msra.mxu0 %v6000_v28  ;;  %v2643_v17 = vmul.f32 0.044715, %v8730_v46  ;;  %v3523_v58 = vmul.f32 %v3395_v47, %v2499_v39  ;;  %v6486_v40 = vpop.eup %6485  ;;  %v3526_v37 = vmul.f32 %v3398_v12, %v2502_v45  ;;  %v8732_v12 = vld [vmem:[#allocation45_spill] sm:$0xff] }
 0x33b   :  { %v7525_v0 = vpack.c.bf16 %v3650_v30, %v3646_v54  ;;  %4263 = vmatpush.bf16.msra.mxu1 %v6064_v59  ;;  %v2898_v54 = vmul.f32 %v2770_v43, %v8729_v15  ;;  %v6488_v30 = vpop.eup %6487  ;;  %v3023_v47 = vadd.f32 %v2895_v35, %v8728_v60  ;;  %v3399_v28 = vadd.f32 1.0, %v6486_v40 }
 0x33c   :  { %v2771_v16 = vmul.f32 %v2643_v17, %v8730_v46  ;;  %v2774_v56 = vmul.f32 %v2646_v38, %v8731_v18  ;;  %6491 = vtanh.f32 %v3150_v1  ;;  %v2503_v59 = vmul.f32 0.5, %v8722_v7  ;;  %v6490_v40 = vpop.eup %6489  ;;  %v8733_v38 = vld [vmem:[#allocation46_spill] sm:$0xff] }
 0x33d   :  { %v1953_v41 = vpop.f32.mrf.mxu2  ;;  %v1778_v19 = vpop.f32.mrf.mxu0  ;;  %v3026_v43 = vadd.f32 %v2898_v54, %v8729_v15  ;;  %v3402_v39 = vadd.f32 1.0, %v6488_v30  ;;  %v2647_v17 = vmul.f32 0.044715, %v8732_v12  ;;  %v3151_v29 = vmul.f32 0.7978846, %v3023_v47 }
 0x33e   :  { %v1867_v5 = vpop.f32.mrf.mxu1  ;;  %v2899_v35 = vmul.f32 %v2771_v16, %v8730_v46  ;;  %v2506_v45 = vmul.f32 0.5, %v8723_v22  ;;  %v2902_v7 = vmul.f32 %v2774_v56, %v8731_v18 }
 0x33f   :  { %v2042_v23 = vpop.f32.mrf.mxu3  ;;  %v1868_v31 = vadd.f32 %v1867_v5, %v1778_v19  ;;  %v3154_v1 = vmul.f32 0.7978846, %v3026_v43  ;;  %v2775_v30 = vmul.f32 %v2647_v17, %v8732_v12  ;;  %6493 = vtanh.f32 %v3151_v29 }
 0x340   :  { %v2043_v55 = vadd.f32 %v2042_v23, %v1953_v41  ;;  %1817 = vmatmul.bf16.gmra.mxu0 %v7003_v34  ;;  %v3027_v16 = vadd.f32 %v2899_v35, %v8730_v46  ;;  %v2507_v43 = vmul.f32 0.5, %v8725_v24 }
 0x341   :  { %v3654_v4 = vmul.f32 %v3526_v37, %v1868_v31  ;;  %1906 = vmatmul.bf16.gmra.mxu1 %v7005_v50  ;;  %v3530_v31 = vmul.f32 %v3402_v39, %v2506_v45  ;;  %6495 = vtanh.f32 %v3154_v1  ;;  %v8735_v39 = vld [vmem:[#allocation47_spill] sm:$0xff]  ;;  %v2903_v29 = vmul.f32 %v2775_v30, %v8732_v12 }
 0x342   :  { %v3651_v36 = vmul.f32 %v3523_v58, %v2043_v55  ;;  %1995 = vmatmul.bf16.gmra.mxu2 %v7003_v34  ;;  %v3527_v58 = vmul.f32 %v3399_v28, %v2503_v59  ;;  %v2650_v55 = vmul.f32 0.044715, %v8733_v38  ;;  %v6492_v37 = vpop.eup %6491  ;;  %v3403_v28 = vadd.f32 1.0, %v6490_v40 }
 0x343   :  { %v3030_v59 = vadd.f32 %v2902_v7, %v8731_v18  ;;  %v3155_v17 = vmul.f32 0.7978846, %v3027_v16  ;;  %v2510_v40 = vmul.f32 0.5, %v8726_v53  ;;  %v3031_v30 = vadd.f32 %v2903_v29, %v8732_v12 }
 0x344   :  { %2084 = vmatmul.bf16.gmra.mxu3 %v7005_v50  ;;  %v7540_v10 = vpack.c.bf16 %v3651_v36, %v3647_v42  ;;  %v2778_v22 = vmul.f32 %v2650_v55, %v8733_v38  ;;  %v3531_v35 = vmul.f32 %v3403_v28, %v2507_v43  ;;  %v6119_v43 = vld [vmem:[#allocation8 + $0x160] sm:$0xf] }
 0x345   :  { %v1956_v41 = vpop.f32.mrf.mxu2  ;;  %v1780_v19 = vpop.f32.mrf.mxu0  ;;  %v3158_v24 = vmul.f32 0.7978846, %v3030_v59  ;;  %6497 = vtanh.f32 %v3155_v17  ;;  %v2511_v17 = vmul.f32 0.5, %v8728_v60 }
 0x346   :  { %v1869_v42 = vpop.f32.mrf.mxu1  ;;  %v6494_v55 = vpop.eup %6493 }
 0x347   :  { %v2045_v23 = vpop.f32.mrf.mxu3  ;;  %v1870_v54 = vadd.f32 %v1869_v42, %v1780_v19  ;;  %v3407_v28 = vadd.f32 1.0, %v6494_v55  ;;  %6499 = vtanh.f32 %v3158_v24  ;;  %v3159_v55 = vmul.f32 0.7978846, %v3031_v30 }
 0x348   :  { %v2046_v5 = vadd.f32 %v2045_v23, %v1956_v41  ;;  %v3406_v41 = vadd.f32 1.0, %v6492_v37  ;;  %v2651_v23 = vmul.f32 0.044715, %v8735_v39  ;;  %v6496_v37 = vpop.eup %6495 }
 0x349   :  { %v3658_v47 = vmul.f32 %v3530_v31, %v1870_v54  ;;  %v3410_v29 = vadd.f32 1.0, %v6496_v37  ;;  %6501 = vtanh.f32 %v3159_v55 }
 0x34a   :  { %v3655_v36 = vmul.f32 %v3527_v58, %v2046_v5  ;;  %v8736_v5 = vld [vmem:[#allocation48_spill] sm:$0xff]  ;;  %v3534_v31 = vmul.f32 %v3406_v41, %v2510_v40  ;;  %v2779_v16 = vmul.f32 %v2651_v23, %v8735_v39  ;;  %v6402_v41 = vld [vmem:[#allocation8 + $0x164] sm:$0xf0]  ;;  %v6183_v23 = vld [vmem:[#allocation8 + $0x1e0] sm:$0xf] }
 0x34b   :  { %v7553_v56 = vpack.c.bf16 %v3658_v47, %v3654_v4  ;;  %v2654_v42 = vmul.f32 0.044715, %v8736_v5  ;;  %v2906_v4 = vmul.f32 %v2778_v22, %v8733_v38 }
 0x34d   :  { %8734 = vst [vmem:[#allocation31_spill] sm:$0xff] %v7553_v56  ;;  %v1958_v19 = vpop.f32.mrf.mxu2  ;;  %v1783_v45 = vpop.f32.mrf.mxu0  ;;  %v2782_v59 = vmul.f32 %v2654_v42, %v8736_v5  ;;  %v3034_v22 = vadd.f32 %v2906_v4, %v8733_v38  ;;  %v2907_v42 = vmul.f32 %v2779_v16, %v8735_v39  ;;  %v2514_v4 = vmul.f32 0.5, %v8729_v15  ;;  %v5991_v15 = vld [vmem:[#allocation8 + $0x60] sm:$0xf] }
 0x34e   :  { %v1872_v7 = vpop.f32.mrf.mxu1 }
 0x34f   :  { %v2047_v58 = vpop.f32.mrf.mxu3  ;;  %v1873_v54 = vadd.f32 %v1872_v7, %v1783_v45  ;;  %v8738_v45 = vld [vmem:[#allocation49_spill] sm:$0xff]  ;;  %v3535_v7 = vmul.f32 %v3407_v28, %v2511_v17  ;;  %v3538_v30 = vmul.f32 %v3410_v29, %v2514_v4  ;;  %v3035_v28 = vadd.f32 %v2907_v42, %v8735_v39  ;;  %v6370_v17 = vld [vmem:[#allocation8 + $0x64] sm:$0xf0]  ;;  %v8740_v42 = vld [vmem:[#allocation51_spill] sm:$0xff] }
 0x350   :  { %v2048_v1 = vadd.f32 %v2047_v58, %v1958_v19  ;;  %2098 = vmatmul.bf16.vlgmr.msrb.gmra.mxu0 %v6829_v48  ;;  %v6120_v58 = vor.u32 %v6402_v41, %v6119_v43  ;;  %v2910_v43 = vmul.f32 %v2782_v59, %v8736_v5 }
 0x351   :  { %v3662_v53 = vmul.f32 %v3534_v31, %v1873_v54  ;;  %2187 = vmatmul.bf16.vlgmr.msrb.gmra.mxu1 %v6831_v49  ;;  %v8739_v54 = vld [vmem:[#allocation50_spill] sm:$0xff]  ;;  %v3163_v4 = vmul.f32 0.7978846, %v3035_v28 }
 0x352   :  { %v3659_v47 = vmul.f32 %v3531_v35, %v2048_v1  ;;  %2276 = vmatmul.bf16.vlgmr.msrb.gmra.mxu2 %v6829_v48  ;;  %v6418_v35 = vld [vmem:[#allocation8 + $0x1e4] sm:$0xf0]  ;;  %v2655_v48 = vmul.f32 0.044715, %v8738_v45  ;;  %v2658_v31 = vmul.f32 0.044715, %v8739_v54  ;;  %v3038_v59 = vadd.f32 %v2910_v43, %v8736_v5 }
 0x353   :  { %4353 = vmatpush.bf16.msra.mxu2 %v6120_v58  ;;  %v6055_v58 = vld [vmem:[#allocation8 + $0xe0] sm:$0xf] }
 0x354   :  { %2365 = vmatmul.bf16.vlgmr.msrb.gmra.mxu3 %v6831_v49  ;;  %v7568_v19 = vpack.c.bf16 %v3659_v47, %v3655_v36  ;;  %v6184_v49 = vor.u32 %v6418_v35, %v6183_v23  ;;  %v6498_v36 = vpop.eup %6497  ;;  %v3162_v47 = vmul.f32 0.7978846, %v3034_v22  ;;  %v2783_v16 = vmul.f32 %v2655_v48, %v8738_v45 }
 0x355   :  { %v1961_v40 = vpop.f32.mrf.mxu2  ;;  %v1785_v24 = vpop.f32.mrf.mxu0  ;;  %v3411_v56 = vadd.f32 1.0, %v6498_v36  ;;  %v2786_v22 = vmul.f32 %v2658_v31, %v8739_v54 }
 0x356   :  { %8737 = vst [vmem:[#allocation32_spill] sm:$0xff] %v7568_v19  ;;  %v1874_v37 = vpop.f32.mrf.mxu1  ;;  %4442 = vmatpush.bf16.msra.mxu3 %v6184_v49  ;;  %v6500_v19 = vpop.eup %6499  ;;  %6503 = vtanh.f32 %v3162_v47  ;;  %v2515_v49 = vmul.f32 0.5, %v8730_v46  ;;  %v2911_v36 = vmul.f32 %v2783_v16, %v8738_v45  ;;  %v2518_v47 = vmul.f32 0.5, %v8731_v18 }
 0x357   :  { %v2050_v1 = vpop.f32.mrf.mxu3  ;;  %v1875_v41 = vadd.f32 %v1874_v37, %v1785_v24  ;;  %v3414_v48 = vadd.f32 1.0, %v6500_v19  ;;  %v6502_v43 = vpop.eup %6501  ;;  %6505 = vtanh.f32 %v3163_v4 }
 0x358   :  { %v2051_v60 = vadd.f32 %v2050_v1, %v1961_v40  ;;  %v5992_v40 = vor.u32 %v6370_v17, %v5991_v15  ;;  %v6386_v1 = vld [vmem:[#allocation8 + $0xe4] sm:$0xf0]  ;;  %v3539_v37 = vmul.f32 %v3411_v56, %v2515_v49  ;;  %v3166_v15 = vmul.f32 0.7978846, %v3038_v59 }
 0x359   :  { %v3666_v35 = vmul.f32 %v3538_v30, %v1875_v41  ;;  %v6056_v29 = vor.u32 %v6386_v1, %v6055_v58  ;;  %v8741_v41 = vld [vmem:[#allocation52_spill] sm:$0xff]  ;;  %v3542_v58 = vmul.f32 %v3414_v48, %v2518_v47  ;;  %v3039_v56 = vadd.f32 %v2911_v36, %v8738_v45  ;;  %v8742_v48 = vld [vmem:[#allocation53_spill] sm:$0xff]  ;;  %v8743_v47 = vld [vmem:[#allocation54_spill] sm:$0xff] }
 0x35a   :  { %v3663_v23 = vmul.f32 %v3535_v7, %v2051_v60  ;;  %4175 = vmatpush.bf16.msra.mxu0 %v5992_v40  ;;  %v2659_v7 = vmul.f32 0.044715, %v8740_v42  ;;  %v2662_v30 = vmul.f32 0.044715, %v8741_v41  ;;  %v3415_v40 = vadd.f32 1.0, %v6502_v43 }
 0x35b   :  { %v7581_v55 = vpack.c.bf16 %v3666_v35, %v3662_v53  ;;  %4264 = vmatpush.bf16.msra.mxu1 %v6056_v29  ;;  %v2914_v53 = vmul.f32 %v2786_v22, %v8739_v54  ;;  %6507 = vtanh.f32 %v3166_v15  ;;  %v2519_v29 = vmul.f32 0.5, %v8732_v12 }
 0x35c   :  { %v6504_v35 = vpop.eup %6503  ;;  %v2787_v28 = vmul.f32 %v2659_v7, %v8740_v42  ;;  %v2790_v1 = vmul.f32 %v2662_v30, %v8741_v41  ;;  %v2663_v7 = vmul.f32 0.044715, %v8742_v48  ;;  %v3167_v4 = vmul.f32 0.7978846, %v3039_v56 }
 0x35d   :  { %v1963_v24 = vpop.f32.mrf.mxu2  ;;  %v1788_v31 = vpop.f32.mrf.mxu0  ;;  %v3042_v22 = vadd.f32 %v2914_v53, %v8739_v54  ;;  %v3418_v49 = vadd.f32 1.0, %v6504_v35  ;;  %v2666_v43 = vmul.f32 0.044715, %v8743_v47 }
 0x35e   :  { %v1877_v19 = vpop.f32.mrf.mxu1  ;;  %v2915_v36 = vmul.f32 %v2787_v28, %v8740_v42  ;;  %v2918_v12 = vmul.f32 %v2790_v1, %v8741_v41  ;;  %6509 = vtanh.f32 %v3167_v4 }
 0x35f   :  { %v2052_v60 = vpop.f32.mrf.mxu3  ;;  %v1878_v17 = vadd.f32 %v1877_v19, %v1788_v31  ;;  %v2522_v31 = vmul.f32 0.5, %v8733_v38  ;;  %v2794_v38 = vmul.f32 %v2666_v43, %v8743_v47 }
 0x360   :  { %v2053_v46 = vadd.f32 %v2052_v60, %v1963_v24  ;;  %2103 = vmatmul.bf16.gmra.mxu0 %v6837_v2  ;;  %v3543_v60 = vmul.f32 %v3415_v40, %v2519_v29  ;;  %v3043_v35 = vadd.f32 %v2915_v36, %v8740_v42  ;;  %v3046_v56 = vadd.f32 %v2918_v12, %v8741_v41  ;;  %v8744_v29 = vld [vmem:[#allocation55_spill] sm:$0xff] }
 0x361   :  { %v3670_v18 = vmul.f32 %v3542_v58, %v1878_v17  ;;  %2192 = vmatmul.bf16.gmra.mxu1 %v6839_v3  ;;  %v3546_v15 = vmul.f32 %v3418_v49, %v2522_v31  ;;  %v2791_v17 = vmul.f32 %v2663_v7, %v8742_v48  ;;  %v2523_v40 = vmul.f32 0.5, %v8735_v39 }
 0x362   :  { %v3667_v16 = vmul.f32 %v3539_v37, %v2053_v46  ;;  %2281 = vmatmul.bf16.gmra.mxu2 %v6837_v2  ;;  %v3170_v46 = vmul.f32 0.7978846, %v3042_v22  ;;  %v2667_v49 = vmul.f32 0.044715, %v8744_v29  ;;  %v3171_v7 = vmul.f32 0.7978846, %v3043_v35 }
 0x363   :  { %v2919_v4 = vmul.f32 %v2791_v17, %v8742_v48  ;;  %v3174_v39 = vmul.f32 0.7978846, %v3046_v56  ;;  %v6400_v56 = vld [vmem:[#allocation8 + $0x154] sm:$0xf0] }
 0x364   :  { %2370 = vmatmul.bf16.gmra.mxu3 %v6839_v3  ;;  %v7596_v59 = vpack.c.bf16 %v3667_v16, %v3663_v23  ;;  %v6506_v3 = vpop.eup %6505  ;;  %6511 = vtanh.f32 %v3170_v46 }
 0x365   :  { %v1966_v24 = vpop.f32.mrf.mxu2  ;;  %v1790_v37 = vpop.f32.mrf.mxu0  ;;  %v3419_v16 = vadd.f32 1.0, %v6506_v3  ;;  %v8745_v3 = vld [vmem:[#allocation56_spill] sm:$0xff]  ;;  %6513 = vtanh.f32 %v3171_v7  ;;  %v3047_v17 = vadd.f32 %v2919_v4, %v8742_v48 }
 0x366   :  { %v1879_v23 = vpop.f32.mrf.mxu1  ;;  %v6508_v53 = vpop.eup %6507  ;;  %v2670_v43 = vmul.f32 0.044715, %v8745_v3  ;;  %6515 = vtanh.f32 %v3174_v39  ;;  %v6416_v4 = vld [vmem:[#allocation8 + $0x1d4] sm:$0xf0]  ;;  %v8747_v39 = vld [vmem:[#allocation58_spill] sm:$0xff] }
 0x367   :  { %v2055_v2 = vpop.f32.mrf.mxu3  ;;  %v1880_v19 = vadd.f32 %v1879_v23, %v1790_v37  ;;  %v3422_v22 = vadd.f32 1.0, %v6508_v53  ;;  %v3547_v36 = vmul.f32 %v3419_v16, %v2523_v40  ;;  %v2526_v37 = vmul.f32 0.5, %v8736_v5  ;;  %v6510_v31 = vpop.eup %6509  ;;  %v6175_v40 = vld [vmem:[#allocation8 + $0x1d0] sm:$0xf] }
 0x368   :  { %v2056_v30 = vadd.f32 %v2055_v2, %v1966_v24  ;;  %v3423_v35 = vadd.f32 1.0, %v6510_v31 }
 0x369   :  { %v3674_v28 = vmul.f32 %v3546_v15, %v1880_v19  ;;  %v3550_v12 = vmul.f32 %v3422_v22, %v2526_v37  ;;  %v2795_v15 = vmul.f32 %v2667_v49, %v8744_v29  ;;  %v2527_v49 = vmul.f32 0.5, %v8738_v45 }
 0x36a   :  { %v3671_v58 = vmul.f32 %v3543_v60, %v2056_v30  ;;  %v6512_v19 = vpop.eup %6511 }
 0x36b   :  { %v7609_v1 = vpack.c.bf16 %v3674_v28, %v3670_v18  ;;  %v2922_v18 = vmul.f32 %v2794_v38, %v8743_v47  ;;  %v2798_v28 = vmul.f32 %v2670_v43, %v8745_v3  ;;  %v6111_v38 = vld [vmem:[#allocation8 + $0x150] sm:$0xf]  ;;  %v2923_v37 = vmul.f32 %v2795_v15, %v8744_v29 }
 0x36c   :  { %v6112_v7 = vor.u32 %v6400_v56, %v6111_v38  ;;  %v3551_v43 = vmul.f32 %v3423_v35, %v2527_v49  ;;  %v6047_v49 = vld [vmem:[#allocation8 + $0xd0] sm:$0xf] }
 0x36d   :  { %v1968_v24 = vpop.f32.mrf.mxu2  ;;  %v1793_v60 = vpop.f32.mrf.mxu0  ;;  %v3050_v16 = vadd.f32 %v2922_v18, %v8743_v47  ;;  %v2674_v18 = vmul.f32 0.044715, %v8747_v39  ;;  %v3051_v35 = vadd.f32 %v2923_v37, %v8744_v29  ;;  %v8748_v37 = vld [vmem:[#allocation59_spill] sm:$0xff] }
 0x36e   :  { %v1882_v23 = vpop.f32.mrf.mxu1  ;;  %4354 = vmatpush.bf16.msra.mxu2 %v6112_v7 }
 0x36f   :  { %v2057_v2 = vpop.f32.mrf.mxu3  ;;  %v1883_v46 = vadd.f32 %v1882_v23, %v1793_v60  ;;  %v3175_v60 = vmul.f32 0.7978846, %v3047_v17  ;;  %v2530_v23 = vmul.f32 0.5, %v8739_v54  ;;  %v5983_v54 = vld [vmem:[#allocation8 + $0x50] sm:$0xf] }
 0x370   :  { %v2058_v30 = vadd.f32 %v2057_v2, %v1968_v24  ;;  %2108 = vmatmul.bf16.gmra.mxu0 %v6845_v8  ;;  %v3426_v24 = vadd.f32 1.0, %v6512_v19  ;;  %v8746_v2 = vld [vmem:[#allocation57_spill] sm:$0xff]  ;;  %v2926_v19 = vmul.f32 %v2798_v28, %v8745_v3 }
 0x371   :  { %v3678_v5 = vmul.f32 %v3550_v12, %v1883_v46  ;;  %2197 = vmatmul.bf16.gmra.mxu1 %v6847_v9  ;;  %v3178_v12 = vmul.f32 0.7978846, %v3050_v16  ;;  %6517 = vtanh.f32 %v3175_v60  ;;  %v2802_v16 = vmul.f32 %v2674_v18, %v8747_v39 }
 0x372   :  { %v3675_v53 = vmul.f32 %v3547_v36, %v2058_v30  ;;  %2286 = vmatmul.bf16.gmra.mxu2 %v6845_v8  ;;  %v2671_v8 = vmul.f32 0.044715, %v8746_v2  ;;  %v3554_v17 = vmul.f32 %v3426_v24, %v2530_v23  ;;  %v3054_v28 = vadd.f32 %v2926_v19, %v8745_v3 }
 0x373   :  { %6519 = vtanh.f32 %v3178_v12  ;;  %v3179_v23 = vmul.f32 0.7978846, %v3051_v35  ;;  %v2534_v12 = vmul.f32 0.5, %v8741_v41 }
 0x374   :  { %2375 = vmatmul.bf16.gmra.mxu3 %v6847_v9  ;;  %v7624_v22 = vpack.c.bf16 %v3675_v53, %v3671_v58  ;;  %v6176_v9 = vor.u32 %v6416_v4, %v6175_v40  ;;  %v6514_v58 = vpop.eup %6513  ;;  %v2799_v15 = vmul.f32 %v2671_v8, %v8746_v2  ;;  %v6368_v40 = vld [vmem:[#allocation8 + $0x54] sm:$0xf0] }
 0x375   :  { %v1971_v36 = vpop.f32.mrf.mxu2  ;;  %v1795_v30 = vpop.f32.mrf.mxu0  ;;  %v3427_v4 = vadd.f32 1.0, %v6514_v58  ;;  %6521 = vtanh.f32 %v3179_v23 }
 0x376   :  { %v1884_v46 = vpop.f32.mrf.mxu1  ;;  %4443 = vmatpush.bf16.msra.mxu3 %v6176_v9  ;;  %v6516_v38 = vpop.eup %6515  ;;  %v2531_v9 = vmul.f32 0.5, %v8740_v42  ;;  %v2927_v58 = vmul.f32 %v2799_v15, %v8746_v2 }
 0x377   :  { %v2060_v31 = vpop.f32.mrf.mxu3  ;;  %v1885_v53 = vadd.f32 %v1884_v46, %v1795_v30  ;;  %v3430_v8 = vadd.f32 1.0, %v6516_v38  ;;  %v6518_v19 = vpop.eup %6517 }
 0x378   :  { %v2061_v45 = vadd.f32 %v2060_v31, %v1971_v36  ;;  %v5984_v36 = vor.u32 %v6368_v40, %v5983_v54  ;;  %v6384_v31 = vld [vmem:[#allocation8 + $0xd4] sm:$0xf0]  ;;  %v3555_v46 = vmul.f32 %v3427_v4, %v2531_v9  ;;  %v3182_v54 = vmul.f32 0.7978846, %v3054_v28 }
 0x379   :  { %v3682_v7 = vmul.f32 %v3554_v17, %v1885_v53  ;;  %v6048_v24 = vor.u32 %v6384_v31, %v6047_v49  ;;  %v8749_v53 = vld [vmem:[#allocation60_spill] sm:$0xff]  ;;  %v3558_v49 = vmul.f32 %v3430_v8, %v2534_v12  ;;  %v3055_v4 = vadd.f32 %v2927_v58, %v8746_v2  ;;  %v8750_v8 = vld [vmem:[#allocation61_spill] sm:$0xff]  ;;  %v8751_v12 = vld [vmem:[#allocation62_spill] sm:$0xff] }
 0x37a   :  { %v3679_v56 = vmul.f32 %v3551_v43, %v2061_v45  ;;  %4176 = vmatpush.bf16.msra.mxu0 %v5984_v36  ;;  %v2675_v43 = vmul.f32 0.044715, %v8748_v37  ;;  %v2678_v17 = vmul.f32 0.044715, %v8749_v53  ;;  %v3431_v36 = vadd.f32 1.0, %v6518_v19 }
 0x37b   :  { %v7637_v60 = vpack.c.bf16 %v3682_v7, %v3678_v5  ;;  %4265 = vmatpush.bf16.msra.mxu1 %v6048_v24  ;;  %v2930_v5 = vmul.f32 %v2802_v16, %v8747_v39  ;;  %v6520_v7 = vpop.eup %6519  ;;  %6523 = vtanh.f32 %v3182_v54  ;;  %v2535_v24 = vmul.f32 0.5, %v8742_v48 }
 0x37c   :  { %v2803_v35 = vmul.f32 %v2675_v43, %v8748_v37  ;;  %v2806_v31 = vmul.f32 %v2678_v17, %v8749_v53  ;;  %v3434_v9 = vadd.f32 1.0, %v6520_v7  ;;  %v2679_v43 = vmul.f32 0.044715, %v8750_v8 }
 0x37d   :  { %v1973_v30 = vpop.f32.mrf.mxu2  ;;  %v1798_v18 = vpop.f32.mrf.mxu0  ;;  %v3058_v16 = vadd.f32 %v2930_v5, %v8747_v39  ;;  %v3183_v23 = vmul.f32 0.7978846, %v3055_v4  ;;  %v2682_v19 = vmul.f32 0.044715, %v8751_v12 }
 0x37e   :  { %v1887_v38 = vpop.f32.mrf.mxu1  ;;  %v2931_v58 = vmul.f32 %v2803_v35, %v8748_v37  ;;  %v2934_v48 = vmul.f32 %v2806_v31, %v8749_v53 }
 0x37f   :  { %v2062_v45 = vpop.f32.mrf.mxu3  ;;  %v1888_v40 = vadd.f32 %v1887_v38, %v1798_v18  ;;  %v2538_v18 = vmul.f32 0.5, %v8743_v47  ;;  %6525 = vtanh.f32 %v3183_v23  ;;  %v2810_v47 = vmul.f32 %v2682_v19, %v8751_v12 }
 0x380   :  { %v2063_v42 = vadd.f32 %v2062_v45, %v1973_v30  ;;  %2113 = vmatmul.bf16.gmra.mxu0 %v6853_v26  ;;  %v3559_v45 = vmul.f32 %v3431_v36, %v2535_v24  ;;  %v3059_v7 = vadd.f32 %v2931_v58, %v8748_v37  ;;  %v3062_v4 = vadd.f32 %v2934_v48, %v8749_v53  ;;  %v8752_v24 = vld [vmem:[#allocation63_spill] sm:$0xff] }
 0x381   :  { %v3686_v41 = vmul.f32 %v3558_v49, %v1888_v40  ;;  %2202 = vmatmul.bf16.gmra.mxu1 %v6855_v27  ;;  %v3562_v54 = vmul.f32 %v3434_v9, %v2538_v18  ;;  %v2807_v40 = vmul.f32 %v2679_v43, %v8750_v8  ;;  %v2539_v36 = vmul.f32 0.5, %v8744_v29 }
 0x382   :  { %v3683_v15 = vmul.f32 %v3555_v46, %v2063_v42  ;;  %2291 = vmatmul.bf16.gmra.mxu2 %v6853_v26  ;;  %v3186_v42 = vmul.f32 0.7978846, %v3058_v16  ;;  %v2683_v9 = vmul.f32 0.044715, %v8752_v24  ;;  %v3187_v43 = vmul.f32 0.7978846, %v3059_v7 }
 0x383   :  { %v2935_v23 = vmul.f32 %v2807_v40, %v8750_v8  ;;  %v3190_v29 = vmul.f32 0.7978846, %v3062_v4  ;;  %v6398_v4 = vld [vmem:[#allocation8 + $0x144] sm:$0xf0] }
 0x384   :  { %2380 = vmatmul.bf16.gmra.mxu3 %v6855_v27  ;;  %v7652_v28 = vpack.c.bf16 %v3683_v15, %v3679_v56  ;;  %v6522_v27 = vpop.eup %6521  ;;  %6527 = vtanh.f32 %v3186_v42 }
 0x385   :  { %v1976_v30 = vpop.f32.mrf.mxu2  ;;  %v1800_v46 = vpop.f32.mrf.mxu0  ;;  %v3435_v15 = vadd.f32 1.0, %v6522_v27  ;;  %v8753_v27 = vld [vmem:[#allocation64_spill] sm:$0xff]  ;;  %6529 = vtanh.f32 %v3187_v43  ;;  %v3063_v40 = vadd.f32 %v2935_v23, %v8750_v8  ;;  %v6414_v23 = vld [vmem:[#allocation8 + $0x1c4] sm:$0xf0] }
 0x386   :  { %v1889_v56 = vpop.f32.mrf.mxu1  ;;  %v6524_v5 = vpop.eup %6523  ;;  %v2686_v19 = vmul.f32 0.044715, %v8753_v27  ;;  %6531 = vtanh.f32 %v3190_v29  ;;  %v8755_v29 = vld [vmem:[#allocation66_spill] sm:$0xff] }
 0x387   :  { %v2065_v26 = vpop.f32.mrf.mxu3  ;;  %v1890_v38 = vadd.f32 %v1889_v56, %v1800_v46  ;;  %v3438_v16 = vadd.f32 1.0, %v6524_v5  ;;  %v3563_v58 = vmul.f32 %v3435_v15, %v2539_v36  ;;  %v2542_v46 = vmul.f32 0.5, %v8745_v3  ;;  %v6526_v18 = vpop.eup %6525  ;;  %v6167_v36 = vld [vmem:[#allocation8 + $0x1c0] sm:$0xf] }
 0x388   :  { %v2066_v17 = vadd.f32 %v2065_v26, %v1976_v30  ;;  %v3439_v7 = vadd.f32 1.0, %v6526_v18 }
 0x389   :  { %v3690_v35 = vmul.f32 %v3562_v54, %v1890_v38  ;;  %v3566_v48 = vmul.f32 %v3438_v16, %v2542_v46  ;;  %v2811_v54 = vmul.f32 %v2683_v9, %v8752_v24  ;;  %v2543_v9 = vmul.f32 0.5, %v8746_v2 }
 0x38a   :  { %v3687_v49 = vmul.f32 %v3559_v45, %v2066_v17  ;;  %v6528_v38 = vpop.eup %6527 }
 0x38b   :  { %v7665_v31 = vpack.c.bf16 %v3690_v35, %v3686_v41  ;;  %v2938_v41 = vmul.f32 %v2810_v47, %v8751_v12  ;;  %v2814_v35 = vmul.f32 %v2686_v19, %v8753_v27  ;;  %v6103_v47 = vld [vmem:[#allocation8 + $0x140] sm:$0xf]  ;;  %v2939_v46 = vmul.f32 %v2811_v54, %v8752_v24 }
 0x38c   :  { %v6104_v43 = vor.u32 %v6398_v4, %v6103_v47  ;;  %v3567_v19 = vmul.f32 %v3439_v7, %v2543_v9  ;;  %v6039_v9 = vld [vmem:[#allocation8 + $0xc0] sm:$0xf] }
 0x38d   :  { %v1978_v30 = vpop.f32.mrf.mxu2  ;;  %v1803_v45 = vpop.f32.mrf.mxu0  ;;  %v3066_v15 = vadd.f32 %v2938_v41, %v8751_v12  ;;  %v2690_v41 = vmul.f32 0.044715, %v8755_v29  ;;  %v3067_v7 = vadd.f32 %v2939_v46, %v8752_v24  ;;  %v8756_v46 = vld [vmem:[#allocation67_spill] sm:$0xff] }
 0x38e   :  { %v1892_v56 = vpop.f32.mrf.mxu1  ;;  %4355 = vmatpush.bf16.msra.mxu2 %v6104_v43 }
 0x38f   :  { %v2067_v26 = vpop.f32.mrf.mxu3  ;;  %v1893_v42 = vadd.f32 %v1892_v56, %v1803_v45  ;;  %v3191_v45 = vmul.f32 0.7978846, %v3063_v40  ;;  %v2546_v56 = vmul.f32 0.5, %v8747_v39  ;;  %v5975_v39 = vld [vmem:[#allocation8 + $0x40] sm:$0xf] }
 0x390   :  { %v2068_v17 = vadd.f32 %v2067_v26, %v1978_v30  ;;  %2118 = vmatmul.bf16.gmra.mxu0 %v6861_v32  ;;  %v3442_v30 = vadd.f32 1.0, %v6528_v38  ;;  %v8754_v26 = vld [vmem:[#allocation65_spill] sm:$0xff]  ;;  %v2942_v38 = vmul.f32 %v2814_v35, %v8753_v27 }
 0x391   :  { %v3694_v3 = vmul.f32 %v3566_v48, %v1893_v42  ;;  %2207 = vmatmul.bf16.gmra.mxu1 %v6863_v33  ;;  %v3194_v48 = vmul.f32 0.7978846, %v3066_v15  ;;  %6533 = vtanh.f32 %v3191_v45  ;;  %v2818_v15 = vmul.f32 %v2690_v41, %v8755_v29 }
 0x392   :  { %v3691_v5 = vmul.f32 %v3563_v58, %v2068_v17  ;;  %2296 = vmatmul.bf16.gmra.mxu2 %v6861_v32  ;;  %v2687_v32 = vmul.f32 0.044715, %v8754_v26  ;;  %v3570_v40 = vmul.f32 %v3442_v30, %v2546_v56  ;;  %v3070_v35 = vadd.f32 %v2942_v38, %v8753_v27 }
 0x393   :  { %6535 = vtanh.f32 %v3194_v48  ;;  %v3195_v56 = vmul.f32 0.7978846, %v3067_v7  ;;  %v2550_v48 = vmul.f32 0.5, %v8749_v53 }
 0x394   :  { %2385 = vmatmul.bf16.gmra.mxu3 %v6863_v33  ;;  %v7680_v16 = vpack.c.bf16 %v3691_v5, %v3687_v49  ;;  %v6168_v33 = vor.u32 %v6414_v23, %v6167_v36  ;;  %v6530_v49 = vpop.eup %6529  ;;  %v2815_v54 = vmul.f32 %v2687_v32, %v8754_v26  ;;  %v6366_v36 = vld [vmem:[#allocation8 + $0x44] sm:$0xf0] }
 0x395   :  { %v1981_v58 = vpop.f32.mrf.mxu2  ;;  %v1805_v17 = vpop.f32.mrf.mxu0  ;;  %v3443_v23 = vadd.f32 1.0, %v6530_v49  ;;  %6537 = vtanh.f32 %v3195_v56 }
 0x396   :  { %v1894_v42 = vpop.f32.mrf.mxu1  ;;  %4444 = vmatpush.bf16.msra.mxu3 %v6168_v33  ;;  %v6532_v47 = vpop.eup %6531  ;;  %v2547_v33 = vmul.f32 0.5, %v8748_v37  ;;  %v2943_v49 = vmul.f32 %v2815_v54, %v8754_v26 }
 0x397   :  { %v2070_v18 = vpop.f32.mrf.mxu3  ;;  %v1895_v5 = vadd.f32 %v1894_v42, %v1805_v17  ;;  %v3446_v32 = vadd.f32 1.0, %v6532_v47  ;;  %v6534_v38 = vpop.eup %6533 }
 0x398   :  { %v2071_v2 = vadd.f32 %v2070_v18, %v1981_v58  ;;  %v5976_v58 = vor.u32 %v6366_v36, %v5975_v39  ;;  %v6382_v18 = vld [vmem:[#allocation8 + $0xc4] sm:$0xf0]  ;;  %v3571_v42 = vmul.f32 %v3443_v23, %v2547_v33  ;;  %v3198_v39 = vmul.f32 0.7978846, %v3070_v35 }
 0x399   :  { %v3698_v43 = vmul.f32 %v3570_v40, %v1895_v5  ;;  %v6040_v30 = vor.u32 %v6382_v18, %v6039_v9  ;;  %v8757_v5 = vld [vmem:[#allocation68_spill] sm:$0xff]  ;;  %v3574_v9 = vmul.f32 %v3446_v32, %v2550_v48  ;;  %v3071_v23 = vadd.f32 %v2943_v49, %v8754_v26 }
 0x39a   :  { %v3695_v4 = vmul.f32 %v3567_v19, %v2071_v2  ;;  %4177 = vmatpush.bf16.msra.mxu0 %v5976_v58  ;;  %v2691_v19 = vmul.f32 0.044715, %v8756_v46  ;;  %v2694_v40 = vmul.f32 0.044715, %v8757_v5  ;;  %v8758_v58 = vld [vmem:[#allocation13_spill] sm:$0xff]  ;;  %v3447_v18 = vadd.f32 1.0, %v6534_v38 }
 0x39b   :  { %v7693_v45 = vpack.c.bf16 %v3698_v43, %v3694_v3  ;;  %4266 = vmatpush.bf16.msra.mxu1 %v6040_v30  ;;  %v2946_v3 = vmul.f32 %v2818_v15, %v8755_v29  ;;  %v6536_v43 = vpop.eup %6535  ;;  %6539 = vtanh.f32 %v3198_v39  ;;  %v2551_v33 = vmul.f32 0.5, %v8750_v8 }
 0x39c   :  { %v2819_v7 = vmul.f32 %v2691_v19, %v8756_v46  ;;  %v2822_v35 = vmul.f32 %v2694_v40, %v8757_v5  ;;  %v3450_v32 = vadd.f32 1.0, %v6536_v43  ;;  %v8760_v19 = vld [vmem:[#allocation69_spill] sm:$0xff]  ;;  %v3199_v49 = vmul.f32 0.7978846, %v3071_v23  ;;  %v6538_v38 = vpop.eup %6537  ;;  %v8761_v40 = vld [vmem:[#allocation70_spill] sm:$0xff] }
 0x39d   :  { %v1983_v17 = vpop.f32.mrf.mxu2  ;;  %v1808_v41 = vpop.f32.mrf.mxu0  ;;  %v3074_v15 = vadd.f32 %v2946_v3, %v8755_v29  ;;  %v2554_v48 = vmul.f32 0.5, %v8751_v12 }
 0x39e   :  { %v1897_v47 = vpop.f32.mrf.mxu1  ;;  %v2950_v8 = vmul.f32 %v2822_v35, %v8757_v5  ;;  %6541 = vtanh.f32 %v3199_v49 }
 0x39f   :  { %v2072_v2 = vpop.f32.mrf.mxu3  ;;  %v1898_v36 = vadd.f32 %v1897_v47, %v1808_v41  ;;  %v3202_v39 = vmul.f32 0.7978846, %v3074_v15  ;;  %v2555_v15 = vmul.f32 0.5, %v8752_v24 }
 0x3a0   :  { %v2073_v37 = vadd.f32 %v2072_v2, %v1983_v17  ;;  %2123 = vmatmul.bf16.gmra.mxu0 %v6869_v52  ;;  %v2695_v17 = vmul.f32 0.044715, %v8760_v19  ;;  %v2947_v2 = vmul.f32 %v2819_v7, %v8756_v46 }
 0x3a1   :  { %v3702_v53 = vmul.f32 %v3574_v9, %v1898_v36  ;;  %2212 = vmatmul.bf16.gmra.mxu1 %v8758_v58  ;;  %v3578_v36 = vmul.f32 %v3450_v32, %v2554_v48  ;;  %v6540_v9 = vpop.eup %6539  ;;  %6543 = vtanh.f32 %v3202_v39  ;;  %v8763_v32 = vld [vmem:[#allocation71_spill] sm:$0xff]  ;;  %v2558_v48 = vmul.f32 0.5, %v8753_v27 }
 0x3a2   :  { %v3699_v54 = vmul.f32 %v3571_v42, %v2073_v37  ;;  %2301 = vmatmul.bf16.gmra.mxu2 %v6869_v52  ;;  %v3575_v42 = vmul.f32 %v3447_v18, %v2551_v33  ;;  %v2698_v37 = vmul.f32 0.044715, %v8761_v40  ;;  %v2823_v43 = vmul.f32 %v2695_v17, %v8760_v19 }
 0x3a3   :  { %v3075_v7 = vadd.f32 %v2947_v2, %v8756_v46  ;;  %v3078_v18 = vadd.f32 %v2950_v8, %v8757_v5  ;;  %v3454_v33 = vadd.f32 1.0, %v6540_v9 }
 0x3a4   :  { %2390 = vmatmul.bf16.gmra.mxu3 %v8758_v58  ;;  %v7708_v30 = vpack.c.bf16 %v3699_v54, %v3695_v4  ;;  %v3451_v58 = vadd.f32 1.0, %v6538_v38  ;;  %v2826_v12 = vmul.f32 %v2698_v37, %v8761_v40  ;;  %v2951_v49 = vmul.f32 %v2823_v43, %v8760_v19  ;;  %v6542_v38 = vpop.eup %6541  ;;  %v8764_v37 = vld [vmem:[#allocation72_spill] sm:$0xff]  ;;  %v8765_v43 = vld [vmem:[#allocation14_spill] sm:$0xff] }
 0x3a5   :  { %v1986_v56 = vpop.f32.mrf.mxu2  ;;  %v1810_v41 = vpop.f32.mrf.mxu0  ;;  %v3203_v17 = vmul.f32 0.7978846, %v3075_v7  ;;  %v3206_v24 = vmul.f32 0.7978846, %v3078_v18 }
 0x3a6   :  { %8759 = vst [vmem:[#allocation33_spill] sm:$0xff] %v7708_v30  ;;  %v1899_v4 = vpop.f32.mrf.mxu1  ;;  %v3579_v2 = vmul.f32 %v3451_v58, %v2555_v15  ;;  %v8766_v58 = vld [vmem:[#allocation15_spill] sm:$0xff]  ;;  %v3455_v15 = vadd.f32 1.0, %v6542_v38 }
 0x3a7   :  { %v2075_v52 = vpop.f32.mrf.mxu3  ;;  %v1900_v3 = vadd.f32 %v1899_v4, %v1810_v41  ;;  %6545 = vtanh.f32 %v3203_v17  ;;  %v2559_v17 = vmul.f32 0.5, %v8754_v26 }
 0x3a8   :  { %v2076_v47 = vadd.f32 %v2075_v52, %v1986_v56  ;;  %v2699_v56 = vmul.f32 0.044715, %v8763_v32  ;;  %6547 = vtanh.f32 %v3206_v24 }
 0x3a9   :  { %v3706_v23 = vmul.f32 %v3578_v36, %v1900_v3  ;;  %v3582_v3 = vmul.f32 %v3454_v33, %v2558_v48  ;;  %v6544_v36 = vpop.eup %6543  ;;  %v6095_v33 = vld [vmem:[#allocation8 + $0x130] sm:$0xf]  ;;  %v8768_v48 = vld [vmem:[#allocation73_spill] sm:$0xff] }
 0x3aa   :  { %v3703_v54 = vmul.f32 %v3575_v42, %v2076_v47  ;;  %v2576_v47 = vmul.f32 0.044715, %v8764_v37  ;;  %v2827_v9 = vmul.f32 %v2699_v56, %v8763_v32  ;;  %v6396_v56 = vld [vmem:[#allocation8 + $0x134] sm:$0xf0] }
 0x3ab   :  { %v7721_v35 = vpack.c.bf16 %v3706_v23, %v3702_v53  ;;  %v2954_v53 = vmul.f32 %v2826_v12, %v8761_v40  ;;  %v3079_v23 = vadd.f32 %v2951_v49, %v8760_v19  ;;  %v3458_v49 = vadd.f32 1.0, %v6544_v36 }
 0x3ac   :  { %v2704_v18 = vmul.f32 %v2576_v47, %v8764_v37  ;;  %v2955_v47 = vmul.f32 %v2827_v9, %v8763_v32 }
 0x3ad   :  { %8762 = vst [vmem:[#allocation34_spill] sm:$0xff] %v7721_v35  ;;  %v1988_v52 = vpop.f32.mrf.mxu2  ;;  %v1813_v41 = vpop.f32.mrf.mxu0  ;;  %v3082_v12 = vadd.f32 %v2954_v53, %v8761_v40 }
 0x3ae   :  { %v1902_v39 = vpop.f32.mrf.mxu1 }
 0x3af   :  { %v2077_v42 = vpop.f32.mrf.mxu3  ;;  %v1903_v8 = vadd.f32 %v1902_v39, %v1813_v41  ;;  %v6412_v41 = vld [vmem:[#allocation8 + $0x1b4] sm:$0xf0]  ;;  %v3207_v39 = vmul.f32 0.7978846, %v3079_v23 }
 0x3b0   :  { %v2078_v4 = vadd.f32 %v2077_v42, %v1988_v52  ;;  %2128 = vmatmul.bf16.gmra.mxu0 %v8765_v43  ;;  %v6159_v52 = vld [vmem:[#allocation8 + $0x1b0] sm:$0xf] }
 0x3b1   :  { %v3710_v27 = vmul.f32 %v3582_v3, %v1903_v8  ;;  %2217 = vmatmul.bf16.gmra.mxu1 %v8766_v58  ;;  %v6160_v8 = vor.u32 %v6412_v41, %v6159_v52  ;;  %v3583_v3 = vmul.f32 %v3455_v15, %v2559_v17  ;;  %6549 = vtanh.f32 %v3207_v39  ;;  %v6364_v17 = vld [vmem:[#allocation8 + $0x34] sm:$0xf0] }
 0x3b2   :  { %v3707_v7 = vmul.f32 %v3579_v2, %v2078_v4  ;;  %2306 = vmatmul.bf16.gmra.mxu2 %v8765_v43  ;;  %v6096_v2 = vor.u32 %v6396_v56, %v6095_v33  ;;  %v2577_v4 = vmul.f32 0.044715, %v8768_v48  ;;  %v2562_v43 = vmul.f32 0.5, %v8755_v29  ;;  %v5967_v29 = vld [vmem:[#allocation8 + $0x30] sm:$0xf] }
 0x3b3   :  { %v3210_v33 = vmul.f32 0.7978846, %v3082_v12  ;;  %v2832_v56 = vmul.f32 %v2704_v18, %v8764_v37  ;;  %4445 = vmatpush.bf16.msra.mxu3 %v6160_v8  ;;  %v3083_v15 = vadd.f32 %v2955_v47, %v8763_v32  ;;  %v2563_v8 = vmul.f32 0.5, %v8756_v46  ;;  %v8771_v47 = vld [vmem:[#allocation75_spill] sm:$0xff] }
 0x3b4   :  { %2395 = vmatmul.bf16.gmra.mxu3 %v8766_v58  ;;  %v7736_v42 = vpack.c.bf16 %v3707_v7, %v3703_v54  ;;  %4356 = vmatpush.bf16.msra.mxu2 %v6096_v2  ;;  %v6546_v54 = vpop.eup %6545  ;;  %v8769_v7 = vld [vmem:[#allocation74_spill] sm:$0xff]  ;;  %v3586_v23 = vmul.f32 %v3458_v49, %v2562_v43  ;;  %v2705_v9 = vmul.f32 %v2577_v4, %v8768_v48  ;;  %v6031_v2 = vld [vmem:[#allocation8 + $0xb0] sm:$0xf] }
 0x3b5   :  { %v1991_v38 = vpop.f32.mrf.mxu2  ;;  %v1815_v53 = vpop.f32.mrf.mxu0  ;;  %v2580_v58 = vmul.f32 0.044715, %v8769_v7  ;;  %v3459_v30 = vadd.f32 1.0, %v6546_v54  ;;  %6551 = vtanh.f32 %v3210_v33  ;;  %v2960_v18 = vadd.f32 %v2832_v56, %v8764_v37  ;;  %v8772_v56 = vld [vmem:[#allocation76_spill] sm:$0xff] }
 0x3b6   :  { %8767 = vst [vmem:[#allocation35_spill] sm:$0xff] %v7736_v42  ;;  %v1904_v36 = vpop.f32.mrf.mxu1  ;;  %v6548_v35 = vpop.eup %6547  ;;  %v3211_v43 = vmul.f32 0.7978846, %v3083_v15 }
 0x3b7   :  { %v2080_v24 = vpop.f32.mrf.mxu3  ;;  %v1905_v42 = vadd.f32 %v1904_v36, %v1815_v53  ;;  %v2708_v12 = vmul.f32 %v2580_v58, %v8769_v7  ;;  %v3462_v4 = vadd.f32 1.0, %v6548_v35  ;;  %v2566_v36 = vmul.f32 0.5, %v8757_v5  ;;  %v6550_v33 = vpop.eup %6549 }
 0x3b8   :  { %v2081_v26 = vadd.f32 %v2080_v24, %v1991_v38  ;;  %v5968_v38 = vor.u32 %v6364_v17, %v5967_v29  ;;  %v6380_v24 = vld [vmem:[#allocation8 + $0xb4] sm:$0xf0]  ;;  %v3088_v29 = vmul.f32 0.7978846, %v2960_v18  ;;  %6553 = vtanh.f32 %v3211_v43 }
 0x3b9   :  { %v3714_v41 = vmul.f32 %v3586_v23, %v1905_v42  ;;  %v6032_v49 = vor.u32 %v6380_v24, %v6031_v2  ;;  %v2833_v42 = vmul.f32 %v2705_v9, %v8768_v48  ;;  %v2584_v23 = vmul.f32 0.044715, %v8772_v56  ;;  %v8774_v24 = vld [vmem:[#allocation17_spill] sm:$0xff] }
 0x3ba   :  { %v3711_v52 = vmul.f32 %v3583_v3, %v2081_v26  ;;  %4178 = vmatpush.bf16.msra.mxu0 %v5968_v38  ;;  %v2581_v3 = vmul.f32 0.044715, %v8771_v47  ;;  %v3587_v26 = vmul.f32 %v3459_v30, %v2563_v8  ;;  %v3590_v2 = vmul.f32 %v3462_v4, %v2566_v36  ;;  %v8773_v38 = vld [vmem:[#allocation16_spill] sm:$0xff] }
 0x3bb   :  { %v7749_v39 = vpack.c.bf16 %v3714_v41, %v3710_v27  ;;  %4267 = vmatpush.bf16.msra.mxu1 %v6032_v49  ;;  %v2836_v27 = vmul.f32 %v2708_v12, %v8769_v7  ;;  %v6552_v41 = vpop.eup %6551  ;;  %v2961_v30 = vadd.f32 %v2833_v42, %v8768_v48  ;;  %v3463_v49 = vadd.f32 1.0, %v6550_v33 }
 0x3bc   :  { %v2709_v15 = vmul.f32 %v2581_v3, %v8771_v47  ;;  %v2712_v18 = vmul.f32 %v2584_v23, %v8772_v56  ;;  %6555 = vtanh.f32 %v3088_v29  ;;  %v2567_v4 = vmul.f32 0.5, %v8760_v19 }
 0x3bd   :  { %8770 = vst [vmem:[#allocation36_spill] sm:$0xff] %v7749_v39  ;;  %v1993_v53 = vpop.f32.mrf.mxu2  ;;  %v1818_v58 = vpop.f32.mrf.mxu0  ;;  %v2964_v12 = vadd.f32 %v2836_v27, %v8769_v7  ;;  %v3466_v3 = vadd.f32 1.0, %v6552_v41  ;;  %v2570_v23 = vmul.f32 0.5, %v8761_v40 }
 0x3be   :  { %v1907_v35 = vpop.f32.mrf.mxu1  ;;  %v3591_v36 = vmul.f32 %v3463_v49, %v2567_v4  ;;  %v2840_v19 = vmul.f32 %v2712_v18, %v8772_v56 }
 0x3bf   :  { %v2082_v54 = vpop.f32.mrf.mxu3  ;;  %v1908_v17 = vadd.f32 %v1907_v35, %v1818_v58  ;;  %v8777_v35 = vld [vmem:[#allocation78_spill] sm:$0xff]  ;;  %v3594_v41 = vmul.f32 %v3466_v3, %v2570_v23  ;;  %v8779_v3 = vld [vmem:[#allocation79_spill] sm:$0xff] }
 0x3c0   :  { %v2083_v46 = vadd.f32 %v2082_v54, %v1993_v53  ;;  %2133 = vmatmul.bf16.gmra.mxu0 %v8773_v38  ;;  %v8776_v53 = vld [vmem:[#allocation77_spill] sm:$0xff]  ;;  %v3089_v54 = vmul.f32 0.7978846, %v2961_v30  ;;  %v2588_v29 = vmul.f32 0.044715, %v8777_v35  ;;  %v2968_v4 = vadd.f32 %v2840_v19, %v8772_v56 }
 0x3c1   :  { %v3718_v5 = vmul.f32 %v3590_v2, %v1908_v17  ;;  %2222 = vmatmul.bf16.gmra.mxu1 %v8774_v24  ;;  %v2585_v43 = vmul.f32 0.044715, %v8776_v53  ;;  %v3092_v17 = vmul.f32 0.7978846, %v2964_v12  ;;  %v2571_v12 = vmul.f32 0.5, %v8763_v32 }
 0x3c2   :  { %v3715_v9 = vmul.f32 %v3587_v26, %v2083_v46  ;;  %2311 = vmatmul.bf16.gmra.mxu2 %v8773_v38  ;;  %v2837_v26 = vmul.f32 %v2709_v15, %v8771_v47  ;;  %v6554_v46 = vpop.eup %6553  ;;  %6557 = vtanh.f32 %v3089_v54  ;;  %v2716_v40 = vmul.f32 %v2588_v29, %v8777_v35 }
 0x3c3   :  { %v2713_v38 = vmul.f32 %v2585_v43, %v8776_v53  ;;  %v3467_v49 = vadd.f32 1.0, %v6554_v46  ;;  %6559 = vtanh.f32 %v3092_v17  ;;  %v2448_v46 = vmul.f32 0.5, %v8764_v37 }
 0x3c4   :  { %2400 = vmatmul.bf16.gmra.mxu3 %v8774_v24  ;;  %v7764_v8 = vpack.c.bf16 %v3715_v9, %v3711_v52  ;;  %v6556_v9 = vpop.eup %6555  ;;  %v2965_v15 = vadd.f32 %v2837_v26, %v8771_v47  ;;  %v3096_v32 = vmul.f32 0.7978846, %v2968_v4 }
 0x3c5   :  { %v1996_v42 = vpop.f32.mrf.mxu2  ;;  %v1820_v33 = vpop.f32.mrf.mxu0  ;;  %v2841_v54 = vmul.f32 %v2713_v38, %v8776_v53  ;;  %v3595_v26 = vmul.f32 %v3467_v49, %v2571_v12  ;;  %v8781_v38 = vld [vmem:[#allocation18_spill] sm:$0xff]  ;;  %v8782_v12 = vld [vmem:[#allocation19_spill] sm:$0xff] }
 0x3c6   :  { %8775 = vst [vmem:[#allocation37_spill] sm:$0xff] %v7764_v8  ;;  %v1909_v52 = vpop.f32.mrf.mxu1  ;;  %v3093_v43 = vmul.f32 0.7978846, %v2965_v15 }
 0x3c7   :  { %v2085_v58 = vpop.f32.mrf.mxu3  ;;  %v1910_v2 = vadd.f32 %v1909_v52, %v1820_v33  ;;  %v2969_v49 = vadd.f32 %v2841_v54, %v8776_v53 }
 0x3c8   :  { %v2086_v27 = vadd.f32 %v2085_v58, %v1996_v42  ;;  %v3344_v42 = vadd.f32 1.0, %v6556_v9  ;;  %v2589_v58 = vmul.f32 0.044715, %v8779_v3  ;;  %v6558_v29 = vpop.eup %6557  ;;  %6561 = vtanh.f32 %v3093_v43 }
 0x3c9   :  { %v3722_v24 = vmul.f32 %v3594_v41, %v1910_v2  ;;  %v6560_v9 = vpop.eup %6559  ;;  %6563 = vtanh.f32 %v3096_v32  ;;  %v2449_v43 = vmul.f32 0.5, %v8768_v48 }
 0x3ca   :  { %v3719_v30 = vmul.f32 %v3591_v36, %v2086_v27  ;;  %v8780_v27 = vld [vmem:[#allocation80_spill] sm:$0xff]  ;;  %v3472_v41 = vmul.f32 %v3344_v42, %v2448_v46  ;;  %v2717_v15 = vmul.f32 %v2589_v58, %v8779_v3  ;;  %v6087_v42 = vld [vmem:[#allocation8 + $0x120] sm:$0xf]  ;;  %v6394_v58 = vld [vmem:[#allocation8 + $0x124] sm:$0xf0]  ;;  %v3348_v54 = vadd.f32 1.0, %v6560_v9 }
 0x3cb   :  { %v7777_v18 = vpack.c.bf16 %v3722_v24, %v3718_v5  ;;  %v2592_v52 = vmul.f32 0.044715, %v8780_v27  ;;  %v2844_v5 = vmul.f32 %v2716_v40, %v8777_v35  ;;  %v6410_v46 = vld [vmem:[#allocation8 + $0x1a4] sm:$0xf0] }
 0x3cd   :  { %8778 = vst [vmem:[#allocation38_spill] sm:$0xff] %v7777_v18  ;;  %v1998_v33 = vpop.f32.mrf.mxu2  ;;  %v2099_v23 = vpop.f32.mrf.mxu0  ;;  %v2720_v4 = vmul.f32 %v2592_v52, %v8780_v27  ;;  %v2972_v40 = vadd.f32 %v2844_v5, %v8777_v35  ;;  %v2845_v52 = vmul.f32 %v2717_v15, %v8779_v3 }
 0x3ce   :  { %v2188_v19 = vpop.f32.mrf.mxu1 }
 0x3cf   :  { %v2087_v36 = vpop.f32.mrf.mxu3  ;;  %v2189_v2 = vadd.f32 %v2188_v19, %v2099_v23  ;;  %v6088_v23 = vor.u32 %v6394_v58, %v6087_v42  ;;  %v3100_v42 = vmul.f32 0.7978846, %v2972_v40  ;;  %v2848_v58 = vmul.f32 %v2720_v4, %v8780_v27 }
 0x3d0   :  { %v2088_v17 = vadd.f32 %v2087_v36, %v1998_v33  ;;  %2138 = vmatmul.bf16.gmra.mxu0 %v8781_v38  ;;  %v3345_v33 = vadd.f32 1.0, %v6558_v29  ;;  %v6151_v36 = vld [vmem:[#allocation8 + $0x1a0] sm:$0xf] }
 0x3d1   :  { %v3600_v37 = vmul.f32 %v3472_v41, %v2189_v2  ;;  %2227 = vmatmul.bf16.gmra.mxu1 %v8782_v12  ;;  %v3097_v2 = vmul.f32 0.7978846, %v2969_v49  ;;  %v6152_v41 = vor.u32 %v6410_v46, %v6151_v36  ;;  %4357 = vmatpush.bf16.msra.mxu2 %v6088_v23  ;;  %v6023_v23 = vld [vmem:[#allocation8 + $0xa0] sm:$0xf]  ;;  %v2976_v4 = vadd.f32 %v2848_v58, %v8780_v27  ;;  %v8788_v58 = vld [vmem:[#allocation84_spill] sm:$0xff] }
 0x3d2   :  { %v3723_v24 = vmul.f32 %v3595_v26, %v2088_v17  ;;  %2316 = vmatmul.bf16.gmra.mxu2 %v8781_v38  ;;  %v8784_v17 = vld [vmem:[#allocation81_spill] sm:$0xff]  ;;  %v3473_v38 = vmul.f32 %v3345_v33, %v2449_v43  ;;  %v2973_v33 = vadd.f32 %v2845_v52, %v8779_v3  ;;  %v6362_v43 = vld [vmem:[#allocation8 + $0x24] sm:$0xf0]  ;;  %v8787_v52 = vld [vmem:[#allocation83_spill] sm:$0xff] }
 0x3d3   :  { %v2593_v19 = vmul.f32 0.044715, %v8784_v17  ;;  %4446 = vmatpush.bf16.msra.mxu3 %v6152_v41  ;;  %6565 = vtanh.f32 %v3097_v2 }
 0x3d4   :  { %2405 = vmatmul.bf16.gmra.mxu3 %v8782_v12  ;;  %v7792_v26 = vpack.c.bf16 %v3723_v24, %v3719_v30  ;;  %v2452_v12 = vmul.f32 0.5, %v8769_v7  ;;  %v6562_v30 = vpop.eup %6561  ;;  %v8785_v24 = vld [vmem:[#allocation82_spill] sm:$0xff]  ;;  %v5959_v7 = vld [vmem:[#allocation8 + $0x20] sm:$0xf]  ;;  %6567 = vtanh.f32 %v3100_v42 }
 0x3d5   :  { %v2277_v29 = vpop.f32.mrf.mxu2  ;;  %v2101_v5 = vpop.f32.mrf.mxu0  ;;  %v2721_v15 = vmul.f32 %v2593_v19, %v8784_v17  ;;  %v3349_v39 = vadd.f32 1.0, %v6562_v30  ;;  %v2453_v19 = vmul.f32 0.5, %v8771_v47  ;;  %v3104_v47 = vmul.f32 0.7978846, %v2976_v4 }
 0x3d6   :  { %8783 = vst [vmem:[#allocation39_spill] sm:$0xff] %v7792_v26  ;;  %v2596_v26 = vmul.f32 0.044715, %v8785_v24  ;;  %v2190_v9 = vpop.f32.mrf.mxu1  ;;  %v3476_v49 = vmul.f32 %v3348_v54, %v2452_v12  ;;  %v6564_v8 = vpop.eup %6563  ;;  %v3101_v12 = vmul.f32 0.7978846, %v2973_v33 }
 0x3d7   :  { %v2366_v32 = vpop.f32.mrf.mxu3  ;;  %v2191_v18 = vadd.f32 %v2190_v9, %v2101_v5  ;;  %v3352_v2 = vadd.f32 1.0, %v6564_v8  ;;  %v2456_v9 = vmul.f32 0.5, %v8772_v56 }
 0x3d8   :  { %v2367_v48 = vadd.f32 %v2366_v32, %v2277_v29  ;;  %v5960_v29 = vor.u32 %v6362_v43, %v5959_v7  ;;  %v6378_v32 = vld [vmem:[#allocation8 + $0xa4] sm:$0xf0]  ;;  %v2724_v40 = vmul.f32 %v2596_v26, %v8785_v24  ;;  %6569 = vtanh.f32 %v3101_v12 }
 0x3d9   :  { %v3604_v46 = vmul.f32 %v3476_v49, %v2191_v18  ;;  %v6024_v54 = vor.u32 %v6378_v32, %v6023_v23  ;;  %v2849_v18 = vmul.f32 %v2721_v15, %v8784_v17  ;;  %v6566_v42 = vpop.eup %6565  ;;  %v3480_v23 = vmul.f32 %v3352_v2, %v2456_v9  ;;  %v8790_v2 = vld [vmem:[#allocation85_spill] sm:$0xff]  ;;  %v8791_v9 = vld [vmem:[#allocation86_spill] sm:$0xff] }
 0x3da   :  { %v3601_v36 = vmul.f32 %v3473_v38, %v2367_v48  ;;  %4179 = vmatpush.bf16.msra.mxu0 %v5960_v29  ;;  %v2597_v38 = vmul.f32 0.044715, %v8787_v52  ;;  %v3477_v48 = vmul.f32 %v3349_v39, %v2453_v19  ;;  %v2852_v8 = vmul.f32 %v2724_v40, %v8785_v24 }
 0x3db   :  { %v7804_v41 = vpack.c.bf16 %v3604_v46, %v3600_v37  ;;  %4268 = vmatpush.bf16.msra.mxu1 %v6024_v54  ;;  %v2600_v37 = vmul.f32 0.044715, %v8788_v58  ;;  %v6568_v46 = vpop.eup %6567  ;;  %v2977_v39 = vadd.f32 %v2849_v18, %v8784_v17  ;;  %v3353_v29 = vadd.f32 1.0, %v6566_v42 }
 0x3dc   :  { %v2725_v33 = vmul.f32 %v2597_v38, %v8787_v52  ;;  %6571 = vtanh.f32 %v3104_v47  ;;  %v2980_v4 = vadd.f32 %v2852_v8, %v8785_v24  ;;  %v2457_v54 = vmul.f32 0.5, %v8776_v53 }
 0x3dd   :  { %8786 = vst [vmem:[#allocation40_spill] sm:$0xff] %v7804_v41  ;;  %v2279_v5 = vpop.f32.mrf.mxu2  ;;  %v2104_v26 = vpop.f32.mrf.mxu0  ;;  %v2728_v32 = vmul.f32 %v2600_v37, %v8788_v58  ;;  %v3356_v19 = vadd.f32 1.0, %v6568_v46  ;;  %v2601_v38 = vmul.f32 0.044715, %v8790_v2  ;;  %v3105_v12 = vmul.f32 0.7978846, %v2977_v39 }
 0x3de   :  { %v2193_v7 = vpop.f32.mrf.mxu1  ;;  %v2853_v18 = vmul.f32 %v2725_v33, %v8787_v52 }
 0x3df   :  { %v2368_v30 = vpop.f32.mrf.mxu3  ;;  %v2194_v43 = vadd.f32 %v2193_v7, %v2104_v26  ;;  %v6570_v26 = vpop.eup %6569  ;;  %v2856_v53 = vmul.f32 %v2728_v32, %v8788_v58  ;;  %6573 = vtanh.f32 %v3105_v12 }
 0x3e0   :  { %v2369_v49 = vadd.f32 %v2368_v30, %v2279_v5  ;;  %2143 = vmatmul.bf16.gmra.mxu0 %v6907_v57  ;;  %v3481_v30 = vmul.f32 %v3353_v29, %v2457_v54  ;;  %v2981_v46 = vadd.f32 %v2853_v18, %v8787_v52  ;;  %v2461_v29 = vmul.f32 0.5, %v8779_v3  ;;  %v8793_v54 = vld [vmem:[#allocation87_spill] sm:$0xff] }
 0x3e1   :  { %v3608_v56 = vmul.f32 %v3480_v23, %v2194_v43  ;;  %2232 = vmatmul.bf16.gmra.mxu1 %v6909_v63  ;;  %v2729_v43 = vmul.f32 %v2601_v38, %v8790_v2  ;;  %v2984_v39 = vadd.f32 %v2856_v53, %v8788_v58 }
 0x3e2   :  { %v3605_v15 = vmul.f32 %v3477_v48, %v2369_v49  ;;  %2321 = vmatmul.bf16.gmra.mxu2 %v6907_v57  ;;  %v3108_v49 = vmul.f32 0.7978846, %v2980_v4  ;;  %v6572_v8 = vpop.eup %6571  ;;  %v3109_v38 = vmul.f32 0.7978846, %v2981_v46 }
 0x3e3   :  { %v3360_v4 = vadd.f32 1.0, %v6572_v8  ;;  %v2857_v12 = vmul.f32 %v2729_v43, %v8790_v2  ;;  %v3112_v3 = vmul.f32 0.7978846, %v2984_v39  ;;  %v6392_v39 = vld [vmem:[#allocation8 + $0x114] sm:$0xf0] }
 0x3e4   :  { %v7818_v40 = vpack.c.bf16 %v3605_v15, %v3601_v36  ;;  %2410 = vmatmul.bf16.gmra.mxu3 %v6909_v63  ;;  %v2460_v36 = vmul.f32 0.5, %v8777_v35  ;;  %v2604_v63 = vmul.f32 0.044715, %v8791_v9  ;;  %v3357_v15 = vadd.f32 1.0, %v6570_v26  ;;  %v8794_v26 = vld [vmem:[#allocation88_spill] sm:$0xff] }
 0x3e5   :  { %v2282_v5 = vpop.f32.mrf.mxu2  ;;  %v2106_v48 = vpop.f32.mrf.mxu0  ;;  %6575 = vtanh.f32 %v3108_v49  ;;  %v2985_v43 = vadd.f32 %v2857_v12, %v8790_v2  ;;  %v6408_v12 = vld [vmem:[#allocation8 + $0x194] sm:$0xf0] }
 0x3e6   :  { %8789 = vst [vmem:[#allocation41_spill] sm:$0xff] %v7818_v40  ;;  %v2195_v37 = vpop.f32.mrf.mxu1  ;;  %v3484_v47 = vmul.f32 %v3356_v19, %v2460_v36  ;;  %v2732_v35 = vmul.f32 %v2604_v63, %v8791_v9  ;;  %v2605_v19 = vmul.f32 0.044715, %v8793_v54  ;;  %v3485_v18 = vmul.f32 %v3357_v15, %v2461_v29  ;;  %v6574_v36 = vpop.eup %6573  ;;  %v6143_v29 = vld [vmem:[#allocation8 + $0x190] sm:$0xf] }
 0x3e7   :  { %v2371_v57 = vpop.f32.mrf.mxu3  ;;  %v2196_v7 = vadd.f32 %v2195_v37, %v2106_v48  ;;  %v2464_v48 = vmul.f32 0.5, %v8780_v27  ;;  %v2608_v63 = vmul.f32 0.044715, %v8794_v26  ;;  %6577 = vtanh.f32 %v3109_v38 }
 0x3e8   :  { %v2372_v42 = vadd.f32 %v2371_v57, %v2282_v5  ;;  %v3361_v46 = vadd.f32 1.0, %v6574_v36  ;;  %6579 = vtanh.f32 %v3112_v3  ;;  %v8797_v3 = vld [vmem:[#allocation90_spill] sm:$0xff] }
 0x3e9   :  { %v3612_v33 = vmul.f32 %v3484_v47, %v2196_v7  ;;  %v3488_v53 = vmul.f32 %v3360_v4, %v2464_v48  ;;  %v2733_v47 = vmul.f32 %v2605_v19, %v8793_v54  ;;  %v2465_v19 = vmul.f32 0.5, %v8784_v17 }
 0x3ea   :  { %v3609_v23 = vmul.f32 %v3481_v30, %v2372_v42 }
 0x3eb   :  { %v7833_v32 = vpack.c.bf16 %v3612_v33, %v3608_v56  ;;  %v2860_v56 = vmul.f32 %v2732_v35, %v8791_v9  ;;  %v6576_v7 = vpop.eup %6575  ;;  %v2736_v33 = vmul.f32 %v2608_v63, %v8794_v26  ;;  %v6079_v35 = vld [vmem:[#allocation8 + $0x110] sm:$0xf]  ;;  %v2861_v48 = vmul.f32 %v2733_v47, %v8793_v54 }
 0x3ec   :  { %v6080_v38 = vor.u32 %v6392_v39, %v6079_v35  ;;  %v3489_v63 = vmul.f32 %v3361_v46, %v2465_v19  ;;  %v6015_v19 = vld [vmem:[#allocation8 + $0x90] sm:$0xf] }
 0x3ed   :  { %8792 = vst [vmem:[#allocation42_spill] sm:$0xff] %v7833_v32  ;;  %v2284_v5 = vpop.f32.mrf.mxu2  ;;  %v2109_v30 = vpop.f32.mrf.mxu0  ;;  %v2988_v15 = vadd.f32 %v2860_v56, %v8791_v9  ;;  %v2612_v56 = vmul.f32 0.044715, %v8797_v3  ;;  %v2989_v46 = vadd.f32 %v2861_v48, %v8793_v54  ;;  %v8799_v48 = vld [vmem:[#allocation91_spill] sm:$0xff] }
 0x3ee   :  { %v2198_v37 = vpop.f32.mrf.mxu1  ;;  %4358 = vmatpush.bf16.msra.mxu2 %v6080_v38 }
 0x3ef   :  { %v2373_v57 = vpop.f32.mrf.mxu3  ;;  %v2199_v49 = vadd.f32 %v2198_v37, %v2109_v30  ;;  %v3113_v30 = vmul.f32 0.7978846, %v2985_v43  ;;  %v2468_v37 = vmul.f32 0.5, %v8785_v24  ;;  %v5951_v24 = vld [vmem:[#allocation8 + $0x10] sm:$0xf] }
 0x3f0   :  { %v2374_v42 = vadd.f32 %v2373_v57, %v2284_v5  ;;  %2148 = vmatmul.bf16.gmra.mxu0 %v6923_v20  ;;  %v3364_v5 = vadd.f32 1.0, %v6576_v7  ;;  %v8796_v57 = vld [vmem:[#allocation89_spill] sm:$0xff]  ;;  %v2864_v7 = vmul.f32 %v2736_v33, %v8794_v26 }
 0x3f1   :  { %v3616_v27 = vmul.f32 %v3488_v53, %v2199_v49  ;;  %2237 = vmatmul.bf16.gmra.mxu1 %v6925_v25  ;;  %v3116_v53 = vmul.f32 0.7978846, %v2988_v15  ;;  %6581 = vtanh.f32 %v3113_v30  ;;  %v2740_v15 = vmul.f32 %v2612_v56, %v8797_v3 }
 0x3f2   :  { %v3613_v8 = vmul.f32 %v3485_v18, %v2374_v42  ;;  %2326 = vmatmul.bf16.gmra.mxu2 %v6923_v20  ;;  %v2609_v20 = vmul.f32 0.044715, %v8796_v57  ;;  %v3492_v43 = vmul.f32 %v3364_v5, %v2468_v37  ;;  %v2992_v33 = vadd.f32 %v2864_v7, %v8794_v26 }
 0x3f3   :  { %6583 = vtanh.f32 %v3116_v53  ;;  %v3117_v37 = vmul.f32 0.7978846, %v2989_v46  ;;  %v2472_v53 = vmul.f32 0.5, %v8788_v58 }
 0x3f4   :  { %2415 = vmatmul.bf16.gmra.mxu3 %v6925_v25  ;;  %v7848_v4 = vpack.c.bf16 %v3613_v8, %v3609_v23  ;;  %v6144_v25 = vor.u32 %v6408_v12, %v6143_v29  ;;  %v6578_v23 = vpop.eup %6577  ;;  %v2737_v47 = vmul.f32 %v2609_v20, %v8796_v57  ;;  %v6360_v29 = vld [vmem:[#allocation8 + $0x14] sm:$0xf0] }
 0x3f5   :  { %v2287_v18 = vpop.f32.mrf.mxu2  ;;  %v2111_v42 = vpop.f32.mrf.mxu0  ;;  %v3365_v12 = vadd.f32 1.0, %v6578_v23  ;;  %6585 = vtanh.f32 %v3117_v37 }
 0x3f6   :  { %8795 = vst [vmem:[#allocation43_spill] sm:$0xff] %v7848_v4  ;;  %v2200_v49 = vpop.f32.mrf.mxu1  ;;  %4447 = vmatpush.bf16.msra.mxu3 %v6144_v25  ;;  %v6580_v35 = vpop.eup %6579  ;;  %v2469_v25 = vmul.f32 0.5, %v8787_v52  ;;  %v2865_v23 = vmul.f32 %v2737_v47, %v8796_v57 }
 0x3f7   :  { %v2376_v36 = vpop.f32.mrf.mxu3  ;;  %v2201_v8 = vadd.f32 %v2200_v49, %v2111_v42  ;;  %v3368_v20 = vadd.f32 1.0, %v6580_v35  ;;  %v6582_v7 = vpop.eup %6581 }
 0x3f8   :  { %v2377_v17 = vadd.f32 %v2376_v36, %v2287_v18  ;;  %v5952_v18 = vor.u32 %v6360_v29, %v5951_v24  ;;  %v6376_v36 = vld [vmem:[#allocation8 + $0x94] sm:$0xf0]  ;;  %v3493_v49 = vmul.f32 %v3365_v12, %v2469_v25  ;;  %v3120_v24 = vmul.f32 0.7978846, %v2992_v33 }
 0x3f9   :  { %v3620_v38 = vmul.f32 %v3492_v43, %v2201_v8  ;;  %v6016_v5 = vor.u32 %v6376_v36, %v6015_v19  ;;  %v8800_v8 = vld [vmem:[#allocation92_spill] sm:$0xff]  ;;  %v3496_v19 = vmul.f32 %v3368_v20, %v2472_v53  ;;  %v2993_v12 = vadd.f32 %v2865_v23, %v8796_v57  ;;  %v8802_v20 = vld [vmem:[#allocation93_spill] sm:$0xff]  ;;  %v8803_v53 = vld [vmem:[#allocation94_spill] sm:$0xff] }
 0x3fa   :  { %v3617_v39 = vmul.f32 %v3489_v63, %v2377_v17  ;;  %4180 = vmatpush.bf16.msra.mxu0 %v5952_v18  ;;  %v2613_v63 = vmul.f32 0.044715, %v8799_v48  ;;  %v2616_v43 = vmul.f32 0.044715, %v8800_v8  ;;  %v3369_v18 = vadd.f32 1.0, %v6582_v7 }
 0x3fb   :  { %v7861_v30 = vpack.c.bf16 %v3620_v38, %v3616_v27  ;;  %4269 = vmatpush.bf16.msra.mxu1 %v6016_v5  ;;  %v2868_v27 = vmul.f32 %v2740_v15, %v8797_v3  ;;  %v6584_v38 = vpop.eup %6583  ;;  %6587 = vtanh.f32 %v3120_v24  ;;  %v2473_v5 = vmul.f32 0.5, %v8790_v2 }
 0x3fc   :  { %v2741_v46 = vmul.f32 %v2613_v63, %v8799_v48  ;;  %v2744_v36 = vmul.f32 %v2616_v43, %v8800_v8  ;;  %v3372_v25 = vadd.f32 1.0, %v6584_v38  ;;  %v2617_v63 = vmul.f32 0.044715, %v8802_v20 }
 0x3fd   :  { %8798 = vst [vmem:[#allocation44_spill] sm:$0xff] %v7861_v30  ;;  %v2289_v42 = vpop.f32.mrf.mxu2  ;;  %v2114_v56 = vpop.f32.mrf.mxu0  ;;  %v2996_v15 = vadd.f32 %v2868_v27, %v8797_v3  ;;  %v3121_v37 = vmul.f32 0.7978846, %v2993_v12  ;;  %v2620_v7 = vmul.f32 0.044715, %v8803_v53 }
 0x3fe   :  { %v2203_v35 = vpop.f32.mrf.mxu1  ;;  %v2869_v23 = vmul.f32 %v2741_v46, %v8799_v48  ;;  %v2872_v2 = vmul.f32 %v2744_v36, %v8800_v8 }
 0x3ff   :  { %v2378_v17 = vpop.f32.mrf.mxu3  ;;  %v2204_v29 = vadd.f32 %v2203_v35, %v2114_v56  ;;  %v2476_v56 = vmul.f32 0.5, %v8791_v9  ;;  %6589 = vtanh.f32 %v3121_v37  ;;  %v2748_v9 = vmul.f32 %v2620_v7, %v8803_v53 }
 0x400   :  { %v2379_v52 = vadd.f32 %v2378_v17, %v2289_v42  ;;  %2153 = vmatmul.bf16.gmra.mxu0 %v6939_v6  ;;  %v3497_v17 = vmul.f32 %v3369_v18, %v2473_v5  ;;  %v2997_v38 = vadd.f32 %v2869_v23, %v8799_v48  ;;  %v3000_v12 = vadd.f32 %v2872_v2, %v8800_v8  ;;  %v8805_v5 = vld [vmem:[#allocation95_spill] sm:$0xff] }
 0x401   :  { %v3624_v58 = vmul.f32 %v3496_v19, %v2204_v29  ;;  %2242 = vmatmul.bf16.gmra.mxu1 %v6941_v14  ;;  %v3500_v24 = vmul.f32 %v3372_v25, %v2476_v56  ;;  %v2745_v29 = vmul.f32 %v2617_v63, %v8802_v20  ;;  %v2477_v18 = vmul.f32 0.5, %v8793_v54 }
 0x402   :  { %v3621_v47 = vmul.f32 %v3493_v49, %v2379_v52  ;;  %2331 = vmatmul.bf16.gmra.mxu2 %v6939_v6  ;;  %v3124_v52 = vmul.f32 0.7978846, %v2996_v15  ;;  %v2621_v25 = vmul.f32 0.044715, %v8805_v5  ;;  %v3125_v63 = vmul.f32 0.7978846, %v2997_v38 }
 0x403   :  { %v2873_v37 = vmul.f32 %v2745_v29, %v8802_v20  ;;  %v3128_v54 = vmul.f32 0.7978846, %v3000_v12  ;;  %v6390_v12 = vld [vmem:[#allocation8 + $0x104] sm:$0xf0] }
 0x404   :  { %2420 = vmatmul.bf16.gmra.mxu3 %v6941_v14  ;;  %v7876_v33 = vpack.c.bf16 %v3621_v47, %v3617_v39  ;;  %v6586_v14 = vpop.eup %6585  ;;  %6591 = vtanh.f32 %v3124_v52 }
 0x405   :  { %v2292_v42 = vpop.f32.mrf.mxu2  ;;  %v2116_v49 = vpop.f32.mrf.mxu0  ;;  %v3373_v47 = vadd.f32 1.0, %v6586_v14  ;;  %v8806_v14 = vld [vmem:[#allocation96_spill] sm:$0xff]  ;;  %6593 = vtanh.f32 %v3125_v63  ;;  %v3001_v29 = vadd.f32 %v2873_v37, %v8802_v20  ;;  %v6406_v37 = vld [vmem:[#allocation8 + $0x184] sm:$0xf0] }
 0x406   :  { %8801 = vst [vmem:[#allocation45_spill] sm:$0xff] %v7876_v33  ;;  %v2205_v39 = vpop.f32.mrf.mxu1  ;;  %v6588_v27 = vpop.eup %6587  ;;  %v2624_v7 = vmul.f32 0.044715, %v8806_v14  ;;  %6595 = vtanh.f32 %v3128_v54  ;;  %v8809_v54 = vld [vmem:[#allocation98_spill] sm:$0xff] }
 0x407   :  { %v2381_v6 = vpop.f32.mrf.mxu3  ;;  %v2206_v35 = vadd.f32 %v2205_v39, %v2116_v49  ;;  %v3376_v15 = vadd.f32 1.0, %v6588_v27  ;;  %v3501_v23 = vmul.f32 %v3373_v47, %v2477_v18  ;;  %v2480_v49 = vmul.f32 0.5, %v8794_v26  ;;  %v6590_v56 = vpop.eup %6589  ;;  %v6135_v18 = vld [vmem:[#allocation8 + $0x180] sm:$0xf] }
 0x408   :  { %v2382_v43 = vadd.f32 %v2381_v6, %v2292_v42  ;;  %v3377_v38 = vadd.f32 1.0, %v6590_v56 }
 0x409   :  { %v3628_v46 = vmul.f32 %v3500_v24, %v2206_v35  ;;  %v3504_v2 = vmul.f32 %v3376_v15, %v2480_v49  ;;  %v2749_v24 = vmul.f32 %v2621_v25, %v8805_v5  ;;  %v2481_v25 = vmul.f32 0.5, %v8796_v57 }
 0x40a   :  { %v3625_v19 = vmul.f32 %v3497_v17, %v2382_v43  ;;  %v6592_v35 = vpop.eup %6591 }
 0x40b   :  { %v7889_v36 = vpack.c.bf16 %v3628_v46, %v3624_v58  ;;  %v2876_v58 = vmul.f32 %v2748_v9, %v8803_v53  ;;  %v2752_v46 = vmul.f32 %v2624_v7, %v8806_v14  ;;  %v6071_v9 = vld [vmem:[#allocation8 + $0x100] sm:$0xf]  ;;  %v2877_v49 = vmul.f32 %v2749_v24, %v8805_v5 }
 0x40c   :  { %v6072_v63 = vor.u32 %v6390_v12, %v6071_v9  ;;  %v3505_v7 = vmul.f32 %v3377_v38, %v2481_v25  ;;  %v6007_v25 = vld [vmem:[#allocation8 + $0x80] sm:$0xf] }
 0x40d   :  { %8804 = vst [vmem:[#allocation46_spill] sm:$0xff] %v7889_v36  ;;  %v2294_v42 = vpop.f32.mrf.mxu2  ;;  %v2119_v17 = vpop.f32.mrf.mxu0  ;;  %v3004_v47 = vadd.f32 %v2876_v58, %v8803_v53  ;;  %v2628_v58 = vmul.f32 0.044715, %v8809_v54  ;;  %v3005_v38 = vadd.f32 %v2877_v49, %v8805_v5  ;;  %v8811_v49 = vld [vmem:[#allocation99_spill] sm:$0xff] }
 0x40e   :  { %v2208_v39 = vpop.f32.mrf.mxu1  ;;  %4359 = vmatpush.bf16.msra.mxu2 %v6072_v63 }
 0x40f   :  { %v2383_v6 = vpop.f32.mrf.mxu3  ;;  %v2209_v52 = vadd.f32 %v2208_v39, %v2119_v17  ;;  %v3129_v17 = vmul.f32 0.7978846, %v3001_v29  ;;  %v2484_v39 = vmul.f32 0.5, %v8797_v3  ;;  %v5943_v3 = vld [vmem:[#allocation8] sm:$0xf] }
 0x410   :  { %v2384_v43 = vadd.f32 %v2383_v6, %v2294_v42  ;;  %2158 = vmatmul.bf16.gmra.mxu0 %v6955_v44  ;;  %v3380_v42 = vadd.f32 1.0, %v6592_v35  ;;  %v8808_v6 = vld [vmem:[#allocation97_spill] sm:$0xff]  ;;  %v2880_v35 = vmul.f32 %v2752_v46, %v8806_v14 }
 0x411   :  { %v3632_v26 = vmul.f32 %v3504_v2, %v2209_v52  ;;  %2247 = vmatmul.bf16.gmra.mxu1 %v6957_v51  ;;  %v3132_v2 = vmul.f32 0.7978846, %v3004_v47  ;;  %6597 = vtanh.f32 %v3129_v17  ;;  %v2756_v47 = vmul.f32 %v2628_v58, %v8809_v54 }
 0x412   :  { %v3629_v27 = vmul.f32 %v3501_v23, %v2384_v43  ;;  %2336 = vmatmul.bf16.gmra.mxu2 %v6955_v44  ;;  %v2625_v44 = vmul.f32 0.044715, %v8808_v6  ;;  %v3508_v29 = vmul.f32 %v3380_v42, %v2484_v39  ;;  %v3008_v46 = vadd.f32 %v2880_v35, %v8806_v14 }
 0x413   :  { %6599 = vtanh.f32 %v3132_v2  ;;  %v3133_v39 = vmul.f32 0.7978846, %v3005_v38  ;;  %v2488_v2 = vmul.f32 0.5, %v8800_v8 }
 0x414   :  { %2425 = vmatmul.bf16.gmra.mxu3 %v6957_v51  ;;  %v7904_v15 = vpack.c.bf16 %v3629_v27, %v3625_v19  ;;  %v6136_v51 = vor.u32 %v6406_v37, %v6135_v18  ;;  %v6594_v19 = vpop.eup %6593  ;;  %v2753_v24 = vmul.f32 %v2625_v44, %v8808_v6  ;;  %v6358_v18 = vld [vmem:[#allocation8 + $0x4] sm:$0xf0] }
 0x415   :  { %v2297_v23 = vpop.f32.mrf.mxu2  ;;  %v2121_v43 = vpop.f32.mrf.mxu0  ;;  %v3381_v37 = vadd.f32 1.0, %v6594_v19  ;;  %6601 = vtanh.f32 %v3133_v39 }
 0x416   :  { %8807 = vst [vmem:[#allocation47_spill] sm:$0xff] %v7904_v15  ;;  %v2210_v52 = vpop.f32.mrf.mxu1  ;;  %4448 = vmatpush.bf16.msra.mxu3 %v6136_v51  ;;  %v6596_v9 = vpop.eup %6595  ;;  %v2485_v51 = vmul.f32 0.5, %v8799_v48  ;;  %v2881_v19 = vmul.f32 %v2753_v24, %v8808_v6 }
 0x417   :  { %v2386_v56 = vpop.f32.mrf.mxu3  ;;  %v2211_v27 = vadd.f32 %v2210_v52, %v2121_v43  ;;  %v3384_v44 = vadd.f32 1.0, %v6596_v9  ;;  %v6598_v35 = vpop.eup %6597 }
 0x418   :  { %v2387_v57 = vadd.f32 %v2386_v56, %v2297_v23  ;;  %v5944_v23 = vor.u32 %v6358_v18, %v5943_v3  ;;  %v6374_v56 = vld [vmem:[#allocation8 + $0x84] sm:$0xf0]  ;;  %v3509_v52 = vmul.f32 %v3381_v37, %v2485_v51  ;;  %v3136_v3 = vmul.f32 0.7978846, %v3008_v46 }
 0x419   :  { %v3636_v63 = vmul.f32 %v3508_v29, %v2211_v27  ;;  %v6008_v42 = vor.u32 %v6374_v56, %v6007_v25  ;;  %v8812_v27 = vld [vmem:[#allocation100_spill] sm:$0xff]  ;;  %v3512_v25 = vmul.f32 %v3384_v44, %v2488_v2  ;;  %v3009_v37 = vadd.f32 %v2881_v19, %v8808_v6  ;;  %v8814_v44 = vld [vmem:[#allocation101_spill] sm:$0xff]  ;;  %v8815_v2 = vld [vmem:[#allocation102_spill] sm:$0xff] }
 0x41a   :  { %v3633_v12 = vmul.f32 %v3505_v7, %v2387_v57  ;;  %4181 = vmatpush.bf16.msra.mxu0 %v5944_v23  ;;  %v2629_v7 = vmul.f32 0.044715, %v8811_v49  ;;  %v2632_v29 = vmul.f32 0.044715, %v8812_v27  ;;  %v3385_v23 = vadd.f32 1.0, %v6598_v35 }
 0x41b   :  { %v7917_v17 = vpack.c.bf16 %v3636_v63, %v3632_v26  ;;  %4270 = vmatpush.bf16.msra.mxu1 %v6008_v42  ;;  %v2884_v26 = vmul.f32 %v2756_v47, %v8809_v54  ;;  %v6600_v63 = vpop.eup %6599  ;;  %6603 = vtanh.f32 %v3136_v3  ;;  %v2489_v42 = vmul.f32 0.5, %v8802_v20 }
 0x41c   :  { %v2757_v38 = vmul.f32 %v2629_v7, %v8811_v49  ;;  %v2760_v56 = vmul.f32 %v2632_v29, %v8812_v27  ;;  %v3388_v51 = vadd.f32 1.0, %v6600_v63  ;;  %v2633_v7 = vmul.f32 0.044715, %v8814_v44 }
 0x41d   :  { %8810 = vst [vmem:[#allocation48_spill] sm:$0xff] %v7917_v17  ;;  %v2299_v43 = vpop.f32.mrf.mxu2  ;;  %v2124_v58 = vpop.f32.mrf.mxu0  ;;  %v3012_v47 = vadd.f32 %v2884_v26, %v8809_v54  ;;  %v3137_v39 = vmul.f32 0.7978846, %v3009_v37  ;;  %v2636_v35 = vmul.f32 0.044715, %v8815_v2 }
 0x41e   :  { %v2213_v9 = vpop.f32.mrf.mxu1  ;;  %v2885_v19 = vmul.f32 %v2757_v38, %v8811_v49  ;;  %v2888_v20 = vmul.f32 %v2760_v56, %v8812_v27 }
 0x41f   :  { %v2388_v57 = vpop.f32.mrf.mxu3  ;;  %v2214_v18 = vadd.f32 %v2213_v9, %v2124_v58  ;;  %v2492_v58 = vmul.f32 0.5, %v8803_v53  ;;  %6605 = vtanh.f32 %v3137_v39  ;;  %v2764_v53 = vmul.f32 %v2636_v35, %v8815_v2 }
 0x420   :  { %v2389_v48 = vadd.f32 %v2388_v57, %v2299_v43  ;;  %2163 = vmatmul.bf16.gmra.mxu0 %v6971_v61  ;;  %v3513_v57 = vmul.f32 %v3385_v23, %v2489_v42  ;;  %v3013_v63 = vadd.f32 %v2885_v19, %v8811_v49  ;;  %v3016_v37 = vadd.f32 %v2888_v20, %v8812_v27  ;;  %v8817_v42 = vld [vmem:[#allocation103_spill] sm:$0xff] }
 0x421   :  { %v3640_v8 = vmul.f32 %v3512_v25, %v2214_v18  ;;  %2252 = vmatmul.bf16.gmra.mxu1 %v6973_v11  ;;  %v3516_v3 = vmul.f32 %v3388_v51, %v2492_v58  ;;  %v2761_v18 = vmul.f32 %v2633_v7, %v8814_v44  ;;  %v2493_v23 = vmul.f32 0.5, %v8805_v5 }
 0x422   :  { %v3637_v24 = vmul.f32 %v3509_v52, %v2389_v48  ;;  %2341 = vmatmul.bf16.gmra.mxu2 %v6971_v61  ;;  %v3140_v48 = vmul.f32 0.7978846, %v3012_v47  ;;  %v2637_v51 = vmul.f32 0.044715, %v8817_v42  ;;  %v3141_v7 = vmul.f32 0.7978846, %v3013_v63 }
 0x423   :  { %v2889_v39 = vmul.f32 %v2761_v18, %v8814_v44  ;;  %v3144_v5 = vmul.f32 0.7978846, %v3016_v37  ;;  %v6129_v37 = vld [vmem:[#allocation8 + $0x178] sm:$0xf0] }
 0x424   :  { %2430 = vmatmul.bf16.gmra.mxu3 %v6973_v11  ;;  %v7932_v46 = vpack.c.bf16 %v3637_v24, %v3633_v12  ;;  %v6602_v11 = vpop.eup %6601  ;;  %6607 = vtanh.f32 %v3140_v48 }
 0x425   :  { %v2302_v43 = vpop.f32.mrf.mxu2  ;;  %v2126_v52 = vpop.f32.mrf.mxu0  ;;  %v3389_v24 = vadd.f32 1.0, %v6602_v11  ;;  %v8818_v11 = vld [vmem:[#allocation104_spill] sm:$0xff]  ;;  %6609 = vtanh.f32 %v3141_v7  ;;  %v3017_v18 = vadd.f32 %v2889_v39, %v8814_v44 }
 0x426   :  { %8813 = vst [vmem:[#allocation49_spill] sm:$0xff] %v7932_v46  ;;  %v2215_v12 = vpop.f32.mrf.mxu1  ;;  %v6604_v26 = vpop.eup %6603  ;;  %v2640_v35 = vmul.f32 0.044715, %v8818_v11  ;;  %6611 = vtanh.f32 %v3144_v5  ;;  %v6193_v39 = vld [vmem:[#allocation8 + $0x1f8] sm:$0xf0]  ;;  %v8821_v5 = vld [vmem:[#allocation106_spill] sm:$0xff] }
 0x427   :  { %v2391_v61 = vpop.f32.mrf.mxu3  ;;  %v2216_v9 = vadd.f32 %v2215_v12, %v2126_v52  ;;  %v3392_v47 = vadd.f32 1.0, %v6604_v26  ;;  %v3517_v19 = vmul.f32 %v3389_v24, %v2493_v23  ;;  %v2496_v52 = vmul.f32 0.5, %v8806_v14  ;;  %v6606_v58 = vpop.eup %6605  ;;  %v6419_v23 = vld [vmem:[#allocation8 + $0x1f4] sm:$0xf] }
 0x428   :  { %v2392_v29 = vadd.f32 %v2391_v61, %v2302_v43  ;;  %v3393_v63 = vadd.f32 1.0, %v6606_v58 }
 0x429   :  { %v3644_v38 = vmul.f32 %v3516_v3, %v2216_v9  ;;  %v3520_v20 = vmul.f32 %v3392_v47, %v2496_v52  ;;  %v2765_v3 = vmul.f32 %v2637_v51, %v8817_v42  ;;  %v2497_v51 = vmul.f32 0.5, %v8808_v6 }
 0x42a   :  { %v3641_v25 = vmul.f32 %v3513_v57, %v2392_v29  ;;  %v6608_v9 = vpop.eup %6607 }
 0x42b   :  { %v7945_v56 = vpack.c.bf16 %v3644_v38, %v3640_v8  ;;  %v2892_v8 = vmul.f32 %v2764_v53, %v8815_v2  ;;  %v2768_v38 = vmul.f32 %v2640_v35, %v8818_v11  ;;  %v6403_v53 = vld [vmem:[#allocation8 + $0x174] sm:$0xf]  ;;  %v2893_v52 = vmul.f32 %v2765_v3, %v8817_v42 }
 0x42c   :  { %v6132_v7 = vor.u32 %v6403_v53, %v6129_v37  ;;  %v3521_v35 = vmul.f32 %v3393_v63, %v2497_v51  ;;  %v6387_v51 = vld [vmem:[#allocation8 + $0xf4] sm:$0xf] }
 0x42d   :  { %8816 = vst [vmem:[#allocation50_spill] sm:$0xff] %v7945_v56  ;;  %v2304_v43 = vpop.f32.mrf.mxu2  ;;  %v2129_v57 = vpop.f32.mrf.mxu0  ;;  %v3020_v24 = vadd.f32 %v2892_v8, %v8815_v2  ;;  %v2644_v8 = vmul.f32 0.044715, %v8821_v5  ;;  %v3021_v63 = vadd.f32 %v2893_v52, %v8817_v42  ;;  %v8822_v52 = vld [vmem:[#allocation107_spill] sm:$0xff] }
 0x42e   :  { %v2218_v12 = vpop.f32.mrf.mxu1  ;;  %4708 = vmatpush.bf16.msrb.mxu2 %v6132_v7 }
 0x42f   :  { %v2393_v61 = vpop.f32.mrf.mxu3  ;;  %v2219_v48 = vadd.f32 %v2218_v12, %v2129_v57  ;;  %v3145_v57 = vmul.f32 0.7978846, %v3017_v18  ;;  %v2500_v12 = vmul.f32 0.5, %v8809_v54  ;;  %v6371_v54 = vld [vmem:[#allocation8 + $0x74] sm:$0xf] }
 0x430   :  { %v2394_v29 = vadd.f32 %v2393_v61, %v2304_v43  ;;  %2168 = vmatmul.bf16.gmra.mxu0 %v6987_v62  ;;  %v3396_v43 = vadd.f32 1.0, %v6608_v9  ;;  %v8820_v61 = vld [vmem:[#allocation105_spill] sm:$0xff]  ;;  %v2896_v9 = vmul.f32 %v2768_v38, %v8818_v11 }
 0x431   :  { %v3648_v14 = vmul.f32 %v3520_v20, %v2219_v48  ;;  %2257 = vmatmul.bf16.gmra.mxu1 %v6989_v13  ;;  %v3148_v20 = vmul.f32 0.7978846, %v3020_v24  ;;  %6613 = vtanh.f32 %v3145_v57  ;;  %v2772_v24 = vmul.f32 %v2644_v8, %v8821_v5 }
 0x432   :  { %v3645_v26 = vmul.f32 %v3517_v19, %v2394_v29  ;;  %2346 = vmatmul.bf16.gmra.mxu2 %v6987_v62  ;;  %v2641_v62 = vmul.f32 0.044715, %v8820_v61  ;;  %v3524_v18 = vmul.f32 %v3396_v43, %v2500_v12  ;;  %v3024_v38 = vadd.f32 %v2896_v9, %v8818_v11 }
 0x433   :  { %6615 = vtanh.f32 %v3148_v20  ;;  %v3149_v12 = vmul.f32 0.7978846, %v3021_v63  ;;  %v2504_v20 = vmul.f32 0.5, %v8812_v27 }
 0x434   :  { %2435 = vmatmul.bf16.gmra.mxu3 %v6989_v13  ;;  %v7960_v47 = vpack.c.bf16 %v3645_v26, %v3641_v25  ;;  %v6196_v13 = vor.u32 %v6419_v23, %v6193_v39  ;;  %v6610_v25 = vpop.eup %6609  ;;  %v2769_v3 = vmul.f32 %v2641_v62, %v8820_v61  ;;  %v6001_v23 = vld [vmem:[#allocation8 + $0x78] sm:$0xf0] }
 0x435   :  { %v2307_v19 = vpop.f32.mrf.mxu2  ;;  %v2131_v29 = vpop.f32.mrf.mxu0  ;;  %v3397_v39 = vadd.f32 1.0, %v6610_v25  ;;  %6617 = vtanh.f32 %v3149_v12 }
 0x436   :  { %8819 = vst [vmem:[#allocation51_spill] sm:$0xff] %v7960_v47  ;;  %v2220_v48 = vpop.f32.mrf.mxu1  ;;  %4797 = vmatpush.bf16.msrb.mxu3 %v6196_v13  ;;  %v6612_v53 = vpop.eup %6611  ;;  %v2501_v13 = vmul.f32 0.5, %v8811_v49  ;;  %v2897_v25 = vmul.f32 %v2769_v3, %v8820_v61 }
 0x437   :  { %v2396_v58 = vpop.f32.mrf.mxu3  ;;  %v2221_v26 = vadd.f32 %v2220_v48, %v2131_v29  ;;  %v3400_v62 = vadd.f32 1.0, %v6612_v53  ;;  %v6614_v9 = vpop.eup %6613 }
 0x438   :  { %v2397_v6 = vadd.f32 %v2396_v58, %v2307_v19  ;;  %v6004_v19 = vor.u32 %v6371_v54, %v6001_v23  ;;  %v6065_v58 = vld [vmem:[#allocation8 + $0xf8] sm:$0xf0]  ;;  %v3525_v48 = vmul.f32 %v3397_v39, %v2501_v13  ;;  %v3152_v54 = vmul.f32 0.7978846, %v3024_v38 }
 0x439   :  { %v3652_v7 = vmul.f32 %v3524_v18, %v2221_v26  ;;  %v6068_v43 = vor.u32 %v6387_v51, %v6065_v58  ;;  %v8823_v26 = vld [vmem:[#allocation108_spill] sm:$0xff]  ;;  %v3528_v51 = vmul.f32 %v3400_v62, %v2504_v20  ;;  %v3025_v39 = vadd.f32 %v2897_v25, %v8820_v61  ;;  %v8824_v62 = vld [vmem:[#allocation109_spill] sm:$0xff]  ;;  %v8825_v20 = vld [vmem:[#allocation110_spill] sm:$0xff] }
 0x43a   :  { %v3649_v37 = vmul.f32 %v3521_v35, %v2397_v6  ;;  %4530 = vmatpush.bf16.msrb.mxu0 %v6004_v19  ;;  %v2645_v35 = vmul.f32 0.044715, %v8822_v52  ;;  %v2648_v18 = vmul.f32 0.044715, %v8823_v26  ;;  %v3401_v19 = vadd.f32 1.0, %v6614_v9 }
 0x43b   :  { %v7973_v57 = vpack.c.bf16 %v3652_v7, %v3648_v14  ;;  %4619 = vmatpush.bf16.msrb.mxu1 %v6068_v43  ;;  %v2900_v14 = vmul.f32 %v2772_v24, %v8821_v5  ;;  %v6616_v7 = vpop.eup %6615  ;;  %6619 = vtanh.f32 %v3152_v54  ;;  %v2505_v43 = vmul.f32 0.5, %v8814_v44 }
 0x43c   :  { %v2773_v63 = vmul.f32 %v2645_v35, %v8822_v52  ;;  %v2776_v58 = vmul.f32 %v2648_v18, %v8823_v26  ;;  %v3404_v13 = vadd.f32 1.0, %v6616_v7  ;;  %v2649_v35 = vmul.f32 0.044715, %v8824_v62 }
 0x43d   :  { %v2309_v29 = vpop.f32.mrf.mxu2  ;;  %v2134_v8 = vpop.f32.mrf.mxu0  ;;  %v3028_v24 = vadd.f32 %v2900_v14, %v8821_v5  ;;  %v3153_v12 = vmul.f32 0.7978846, %v3025_v39  ;;  %v2652_v9 = vmul.f32 0.044715, %v8825_v20 }
 0x43e   :  { %v2223_v53 = vpop.f32.mrf.mxu1  ;;  %v2901_v25 = vmul.f32 %v2773_v63, %v8822_v52  ;;  %v2904_v44 = vmul.f32 %v2776_v58, %v8823_v26 }
 0x43f   :  { %v2398_v6 = vpop.f32.mrf.mxu3  ;;  %v2224_v23 = vadd.f32 %v2223_v53, %v2134_v8  ;;  %v2508_v8 = vmul.f32 0.5, %v8815_v2  ;;  %6621 = vtanh.f32 %v3153_v12  ;;  %v2780_v2 = vmul.f32 %v2652_v9, %v8825_v20 }
 0x440   :  { %v2399_v49 = vadd.f32 %v2398_v6, %v2309_v29  ;;  %2173 = vmatmul.bf16.gmra.mxu0 %v7003_v34  ;;  %v3529_v6 = vmul.f32 %v3401_v19, %v2505_v43  ;;  %v3029_v7 = vadd.f32 %v2901_v25, %v8822_v52  ;;  %v3032_v39 = vadd.f32 %v2904_v44, %v8823_v26  ;;  %v8826_v43 = vld [vmem:[#allocation111_spill] sm:$0xff] }
 0x441   :  { %v3656_v27 = vmul.f32 %v3528_v51, %v2224_v23  ;;  %2262 = vmatmul.bf16.gmra.mxu1 %v7005_v50  ;;  %v3532_v54 = vmul.f32 %v3404_v13, %v2508_v8  ;;  %v2777_v23 = vmul.f32 %v2649_v35, %v8824_v62  ;;  %v2509_v19 = vmul.f32 0.5, %v8817_v42 }
 0x442   :  { %v3653_v3 = vmul.f32 %v3525_v48, %v2399_v49  ;;  %2351 = vmatmul.bf16.gmra.mxu2 %v7003_v34  ;;  %v3156_v49 = vmul.f32 0.7978846, %v3028_v24  ;;  %v2653_v13 = vmul.f32 0.044715, %v8826_v43  ;;  %v3157_v35 = vmul.f32 0.7978846, %v3029_v7 }
 0x443   :  { %v2905_v12 = vmul.f32 %v2777_v23, %v8824_v62  ;;  %v3160_v42 = vmul.f32 0.7978846, %v3032_v39  ;;  %v8828_v7 = vld [vmem:[#allocation20_spill] sm:$0xff]  ;;  %v6401_v39 = vld [vmem:[#allocation8 + $0x164] sm:$0xf] }
 0x444   :  { %2440 = vmatmul.bf16.gmra.mxu3 %v7005_v50  ;;  %v7988_v38 = vpack.c.bf16 %v3653_v3, %v3649_v37  ;;  %v6618_v50 = vpop.eup %6617  ;;  %6623 = vtanh.f32 %v3156_v49 }
 0x445   :  { %v2312_v29 = vpop.f32.mrf.mxu2  ;;  %v2136_v48 = vpop.f32.mrf.mxu0  ;;  %v3405_v3 = vadd.f32 1.0, %v6618_v50  ;;  %v8827_v50 = vld [vmem:[#allocation112_spill] sm:$0xff]  ;;  %6625 = vtanh.f32 %v3157_v35  ;;  %v3033_v23 = vadd.f32 %v2905_v12, %v8824_v62 }
 0x446   :  { %v2225_v37 = vpop.f32.mrf.mxu1  ;;  %v6620_v14 = vpop.eup %6619  ;;  %v2656_v9 = vmul.f32 0.044715, %v8827_v50  ;;  %6627 = vtanh.f32 %v3160_v42 }
 0x447   :  { %v2401_v34 = vpop.f32.mrf.mxu3  ;;  %v2226_v53 = vadd.f32 %v2225_v37, %v2136_v48  ;;  %v3408_v24 = vadd.f32 1.0, %v6620_v14  ;;  %v3533_v25 = vmul.f32 %v3405_v3, %v2509_v19  ;;  %v2512_v48 = vmul.f32 0.5, %v8818_v11  ;;  %v6622_v8 = vpop.eup %6621  ;;  %v6121_v19 = vld [vmem:[#allocation8 + $0x168] sm:$0xf0] }
 0x448   :  { %v2402_v18 = vadd.f32 %v2401_v34, %v2312_v29  ;;  %v2784_v3 = vmul.f32 %v2656_v9, %v8827_v50  ;;  %v6124_v12 = vor.u32 %v6401_v39, %v6121_v19 }
 0x449   :  { %v3660_v63 = vmul.f32 %v3532_v54, %v2226_v53  ;;  %v3536_v44 = vmul.f32 %v3408_v24, %v2512_v48  ;;  %v2781_v54 = vmul.f32 %v2653_v13, %v8826_v43  ;;  %v6417_v24 = vld [vmem:[#allocation8 + $0x1e4] sm:$0xf] }
 0x44a   :  { %v3657_v51 = vmul.f32 %v3529_v6, %v2402_v18  ;;  %v6624_v53 = vpop.eup %6623  ;;  %4709 = vmatpush.bf16.msrb.mxu2 %v6124_v12  ;;  %v2912_v19 = vmul.f32 %v2784_v3, %v8827_v50  ;;  %v6385_v12 = vld [vmem:[#allocation8 + $0xe4] sm:$0xf] }
 0x44b   :  { %v8001_v58 = vpack.c.bf16 %v3660_v63, %v3656_v27  ;;  %v2908_v27 = vmul.f32 %v2780_v2, %v8825_v20  ;;  %v3409_v63 = vadd.f32 1.0, %v6622_v8  ;;  %v3412_v35 = vadd.f32 1.0, %v6624_v53 }
 0x44c   :  { %v3161_v8 = vmul.f32 0.7978846, %v3033_v23  ;;  %v2909_v9 = vmul.f32 %v2781_v54, %v8826_v43  ;;  %v3040_v3 = vadd.f32 %v2912_v19, %v8827_v50  ;;  %v8832_v19 = vld [vmem:[#allocation116_spill] sm:$0xff] }
 0x44d   :  { %v2314_v29 = vpop.f32.mrf.mxu2  ;;  %v2139_v6 = vpop.f32.mrf.mxu0  ;;  %v3036_v2 = vadd.f32 %v2908_v27, %v8825_v20 }
 0x44e   :  { %v2228_v37 = vpop.f32.mrf.mxu1  ;;  %6629 = vtanh.f32 %v3161_v8 }
 0x44f   :  { %v2403_v34 = vpop.f32.mrf.mxu3  ;;  %v2229_v49 = vadd.f32 %v2228_v37, %v2139_v6  ;;  %v3164_v39 = vmul.f32 0.7978846, %v3036_v2 }
 0x450   :  { %v2404_v18 = vadd.f32 %v2403_v34, %v2314_v29  ;;  %4182 = vmatmul.bf16.vlgmr.msra.gmra.mxu0 %v7356_v21  ;;  %v2513_v29 = vmul.f32 0.5, %v8820_v61  ;;  %v6185_v34 = vld [vmem:[#allocation8 + $0x1e8] sm:$0xf0] }
 0x451   :  { %v3664_v11 = vmul.f32 %v3536_v44, %v2229_v49  ;;  %4271 = vmatmul.bf16.vlgmr.msra.gmra.mxu1 %v8828_v7  ;;  %v2516_v49 = vmul.f32 0.5, %v8821_v5  ;;  %v8830_v44 = vld [vmem:[#allocation114_spill] sm:$0xff]  ;;  %v6369_v5 = vld [vmem:[#allocation8 + $0x64] sm:$0xf]  ;;  %6631 = vtanh.f32 %v3164_v39 }
 0x452   :  { %v3661_v14 = vmul.f32 %v3533_v25, %v2404_v18  ;;  %4360 = vmatmul.bf16.vlgmr.msra.gmra.mxu2 %v7804_v41  ;;  %v8829_v25 = vld [vmem:[#allocation113_spill] sm:$0xff]  ;;  %v6188_v18 = vor.u32 %v6417_v24, %v6185_v34  ;;  %v3537_v42 = vmul.f32 %v3409_v63, %v2513_v29  ;;  %v3037_v63 = vadd.f32 %v2909_v9, %v8826_v43  ;;  %v5993_v29 = vld [vmem:[#allocation8 + $0x68] sm:$0xf0]  ;;  %v8831_v9 = vld [vmem:[#allocation115_spill] sm:$0xff] }
 0x453   :  { %v2657_v6 = vmul.f32 0.044715, %v8829_v25  ;;  %v3540_v23 = vmul.f32 %v3412_v35, %v2516_v49 }
 0x454   :  { %4449 = vmatmul.bf16.vlgmr.msra.gmra.mxu3 %v7818_v40  ;;  %v8016_v13 = vpack.c.bf16 %v3661_v14, %v3657_v51  ;;  %v6626_v51 = vpop.eup %6625  ;;  %v2660_v14 = vmul.f32 0.044715, %v8830_v44  ;;  %v3165_v49 = vmul.f32 0.7978846, %v3037_v63 }
 0x455   :  { %v2317_v48 = vpop.f32.mrf.mxu2  ;;  %v2141_v27 = vpop.f32.mrf.mxu0  ;;  %4798 = vmatpush.bf16.msrb.mxu3 %v6188_v18  ;;  %v2785_v54 = vmul.f32 %v2657_v6, %v8829_v25  ;;  %v3413_v7 = vadd.f32 1.0, %v6626_v51  ;;  %v2517_v18 = vmul.f32 0.5, %v8822_v52 }
 0x456   :  { %v2230_v53 = vpop.f32.mrf.mxu1  ;;  %v6628_v41 = vpop.eup %6627  ;;  %v2788_v2 = vmul.f32 %v2660_v14, %v8830_v44  ;;  %6633 = vtanh.f32 %v3165_v49 }
 0x457   :  { %v2406_v37 = vpop.f32.mrf.mxu3  ;;  %v2231_v40 = vadd.f32 %v2230_v53, %v2141_v27  ;;  %v3416_v6 = vadd.f32 1.0, %v6628_v41  ;;  %v2520_v53 = vmul.f32 0.5, %v8823_v26  ;;  %v6630_v39 = vpop.eup %6629 }
 0x458   :  { %v2407_v61 = vadd.f32 %v2406_v37, %v2317_v48  ;;  %v5996_v48 = vor.u32 %v6369_v5, %v5993_v29  ;;  %v6057_v37 = vld [vmem:[#allocation8 + $0xe8] sm:$0xf0]  ;;  %v3168_v5 = vmul.f32 0.7978846, %v3040_v3 }
 0x459   :  { %v3668_v34 = vmul.f32 %v3540_v23, %v2231_v40  ;;  %v6060_v35 = vor.u32 %v6385_v12, %v6057_v37  ;;  %v2913_v40 = vmul.f32 %v2785_v54, %v8829_v25  ;;  %v2664_v23 = vmul.f32 0.044715, %v8832_v19  ;;  %v8834_v37 = vld [vmem:[#allocation22_spill] sm:$0xff] }
 0x45a   :  { %v3665_v24 = vmul.f32 %v3537_v42, %v2407_v61  ;;  %4531 = vmatpush.bf16.msrb.mxu0 %v5996_v48  ;;  %v2661_v42 = vmul.f32 0.044715, %v8831_v9  ;;  %v3541_v61 = vmul.f32 %v3413_v7, %v2517_v18  ;;  %v3544_v12 = vmul.f32 %v3416_v6, %v2520_v53  ;;  %v8833_v48 = vld [vmem:[#allocation21_spill] sm:$0xff] }
 0x45b   :  { %v8029_v8 = vpack.c.bf16 %v3668_v34, %v3664_v11  ;;  %4620 = vmatpush.bf16.msrb.mxu1 %v6060_v35  ;;  %v2916_v11 = vmul.f32 %v2788_v2, %v8830_v44  ;;  %v6632_v34 = vpop.eup %6631  ;;  %v3041_v7 = vadd.f32 %v2913_v40, %v8829_v25  ;;  %v3417_v35 = vadd.f32 1.0, %v6630_v39 }
 0x45c   :  { %v2789_v63 = vmul.f32 %v2661_v42, %v8831_v9  ;;  %v2792_v3 = vmul.f32 %v2664_v23, %v8832_v19  ;;  %6635 = vtanh.f32 %v3168_v5  ;;  %v2521_v6 = vmul.f32 0.5, %v8824_v62 }
 0x45d   :  { %v2319_v27 = vpop.f32.mrf.mxu2  ;;  %v2144_v14 = vpop.f32.mrf.mxu0  ;;  %v3044_v2 = vadd.f32 %v2916_v11, %v8830_v44  ;;  %v3420_v42 = vadd.f32 1.0, %v6632_v34  ;;  %v2524_v23 = vmul.f32 0.5, %v8825_v20 }
 0x45e   :  { %v2233_v41 = vpop.f32.mrf.mxu1  ;;  %v3545_v53 = vmul.f32 %v3417_v35, %v2521_v6  ;;  %v2920_v62 = vmul.f32 %v2792_v3, %v8832_v19 }
 0x45f   :  { %v2408_v51 = vpop.f32.mrf.mxu3  ;;  %v2234_v29 = vadd.f32 %v2233_v41, %v2144_v14  ;;  %v8836_v41 = vld [vmem:[#allocation118_spill] sm:$0xff]  ;;  %v3548_v34 = vmul.f32 %v3420_v42, %v2524_v23  ;;  %v8837_v42 = vld [vmem:[#allocation119_spill] sm:$0xff] }
 0x460   :  { %v2409_v52 = vadd.f32 %v2408_v51, %v2319_v27  ;;  %4187 = vmatmul.bf16.gmra.mxu0 %v8833_v48  ;;  %v8835_v27 = vld [vmem:[#allocation117_spill] sm:$0xff]  ;;  %v3169_v51 = vmul.f32 0.7978846, %v3041_v7  ;;  %v2668_v5 = vmul.f32 0.044715, %v8836_v41 }
 0x461   :  { %v3672_v26 = vmul.f32 %v3544_v12, %v2234_v29  ;;  %4276 = vmatmul.bf16.gmra.mxu1 %v8834_v37  ;;  %v2665_v49 = vmul.f32 0.044715, %v8835_v27  ;;  %v3172_v29 = vmul.f32 0.7978846, %v3044_v2  ;;  %v2525_v2 = vmul.f32 0.5, %v8826_v43 }
 0x462   :  { %v3669_v54 = vmul.f32 %v3541_v61, %v2409_v52  ;;  %4365 = vmatmul.bf16.gmra.mxu2 %v7833_v32  ;;  %v2917_v61 = vmul.f32 %v2789_v63, %v8831_v9  ;;  %v6634_v52 = vpop.eup %6633  ;;  %6637 = vtanh.f32 %v3169_v51  ;;  %v2796_v20 = vmul.f32 %v2668_v5, %v8836_v41 }
 0x463   :  { %v2793_v7 = vmul.f32 %v2665_v49, %v8835_v27  ;;  %v3421_v6 = vadd.f32 1.0, %v6634_v52  ;;  %6639 = vtanh.f32 %v3172_v29  ;;  %v2528_v52 = vmul.f32 0.5, %v8827_v50 }
 0x464   :  { %4454 = vmatmul.bf16.gmra.mxu3 %v7848_v4  ;;  %v8044_v18 = vpack.c.bf16 %v3669_v54, %v3665_v24  ;;  %v6636_v54 = vpop.eup %6635  ;;  %v3045_v63 = vadd.f32 %v2917_v61, %v8831_v9 }
 0x465   :  { %v2322_v40 = vpop.f32.mrf.mxu2  ;;  %v2146_v39 = vpop.f32.mrf.mxu0  ;;  %v2921_v51 = vmul.f32 %v2793_v7, %v8835_v27  ;;  %v3549_v61 = vmul.f32 %v3421_v6, %v2525_v2  ;;  %v8839_v7 = vld [vmem:[#allocation23_spill] sm:$0xff]  ;;  %v8840_v2 = vld [vmem:[#allocation24_spill] sm:$0xff] }
 0x466   :  { %v2235_v24 = vpop.f32.mrf.mxu1  ;;  %v3173_v49 = vmul.f32 0.7978846, %v3045_v63 }
 0x467   :  { %v2411_v14 = vpop.f32.mrf.mxu3  ;;  %v2236_v12 = vadd.f32 %v2235_v24, %v2146_v39  ;;  %v2669_v39 = vmul.f32 0.044715, %v8837_v42  ;;  %v8838_v24 = vld [vmem:[#allocation120_spill] sm:$0xff]  ;;  %v3049_v6 = vadd.f32 %v2921_v51, %v8835_v27 }
 0x468   :  { %v2412_v11 = vadd.f32 %v2411_v14, %v2322_v40  ;;  %v3048_v40 = vadd.f32 %v2920_v62, %v8832_v19  ;;  %v3424_v14 = vadd.f32 1.0, %v6636_v54  ;;  %v6638_v5 = vpop.eup %6637  ;;  %v2672_v29 = vmul.f32 0.044715, %v8838_v24 }
 0x469   :  { %v3676_v35 = vmul.f32 %v3548_v34, %v2236_v12  ;;  %v2797_v63 = vmul.f32 %v2669_v39, %v8837_v42  ;;  %6641 = vtanh.f32 %v3173_v49  ;;  %v6113_v39 = vld [vmem:[#allocation8 + $0x158] sm:$0xf0]  ;;  %v2529_v49 = vmul.f32 0.5, %v8829_v25 }
 0x46a   :  { %v3673_v4 = vmul.f32 %v3545_v53, %v2412_v11  ;;  %v3176_v43 = vmul.f32 0.7978846, %v3048_v40  ;;  %v3552_v54 = vmul.f32 %v3424_v14, %v2528_v52  ;;  %v2800_v40 = vmul.f32 %v2672_v29, %v8838_v24  ;;  %v6399_v14 = vld [vmem:[#allocation8 + $0x154] sm:$0xf]  ;;  %v6177_v52 = vld [vmem:[#allocation8 + $0x1d8] sm:$0xf0] }
 0x46b   :  { %v8057_v3 = vpack.c.bf16 %v3676_v35, %v3672_v26  ;;  %v2924_v26 = vmul.f32 %v2796_v20, %v8836_v41  ;;  %v6640_v35 = vpop.eup %6639  ;;  %v2925_v29 = vmul.f32 %v2797_v63, %v8837_v42 }
 0x46c   :  { %6643 = vtanh.f32 %v3176_v43  ;;  %v3428_v51 = vadd.f32 1.0, %v6640_v35 }
 0x46d   :  { %v2324_v23 = vpop.f32.mrf.mxu2  ;;  %v2149_v11 = vpop.f32.mrf.mxu0  ;;  %v3052_v20 = vadd.f32 %v2924_v26, %v8836_v41 }
 0x46e   :  { %v2238_v12 = vpop.f32.mrf.mxu1 }
 0x46f   :  { %v2413_v53 = vpop.f32.mrf.mxu3  ;;  %v2239_v34 = vadd.f32 %v2238_v12, %v2149_v11  ;;  %v6116_v11 = vor.u32 %v6399_v14, %v6113_v39  ;;  %v3180_v14 = vmul.f32 0.7978846, %v3052_v20  ;;  %v2928_v39 = vmul.f32 %v2800_v40, %v8838_v24 }
 0x470   :  { %v2414_v62 = vadd.f32 %v2413_v53, %v2324_v23  ;;  %4192 = vmatmul.bf16.gmra.mxu0 %v8839_v7  ;;  %v3425_v23 = vadd.f32 1.0, %v6638_v5  ;;  %v6415_v53 = vld [vmem:[#allocation8 + $0x1d4] sm:$0xf] }
 0x471   :  { %v3680_v50 = vmul.f32 %v3552_v54, %v2239_v34  ;;  %4281 = vmatmul.bf16.gmra.mxu1 %v8840_v2  ;;  %v3177_v34 = vmul.f32 0.7978846, %v3049_v6  ;;  %v6180_v54 = vor.u32 %v6415_v53, %v6177_v52  ;;  %4710 = vmatpush.bf16.msrb.mxu2 %v6116_v11  ;;  %v6383_v11 = vld [vmem:[#allocation8 + $0xd4] sm:$0xf]  ;;  %v3056_v40 = vadd.f32 %v2928_v39, %v8838_v24  ;;  %v8844_v39 = vld [vmem:[#allocation124_spill] sm:$0xff] }
 0x472   :  { %v3677_v32 = vmul.f32 %v3549_v61, %v2414_v62  ;;  %4370 = vmatmul.bf16.gmra.mxu2 %v7861_v30  ;;  %v8841_v62 = vld [vmem:[#allocation121_spill] sm:$0xff]  ;;  %v2532_v30 = vmul.f32 0.5, %v8830_v44  ;;  %v6367_v44 = vld [vmem:[#allocation8 + $0x54] sm:$0xf] }
 0x473   :  { %v2673_v12 = vmul.f32 0.044715, %v8841_v62  ;;  %4799 = vmatpush.bf16.msrb.mxu3 %v6180_v54  ;;  %6645 = vtanh.f32 %v3177_v34  ;;  %v8843_v34 = vld [vmem:[#allocation123_spill] sm:$0xff] }
 0x474   :  { %4459 = vmatmul.bf16.gmra.mxu3 %v7876_v33  ;;  %v8072_v61 = vpack.c.bf16 %v3677_v32, %v3673_v4  ;;  %v3553_v33 = vmul.f32 %v3425_v23, %v2529_v49  ;;  %v6642_v32 = vpop.eup %6641  ;;  %v8842_v4 = vld [vmem:[#allocation122_spill] sm:$0xff]  ;;  %v3556_v6 = vmul.f32 %v3428_v51, %v2532_v30  ;;  %v3053_v23 = vadd.f32 %v2925_v29, %v8837_v42  ;;  %v5985_v49 = vld [vmem:[#allocation8 + $0x58] sm:$0xf0] }
 0x475   :  { %v2327_v5 = vpop.f32.mrf.mxu2  ;;  %v2151_v26 = vpop.f32.mrf.mxu0  ;;  %v2676_v2 = vmul.f32 0.044715, %v8842_v4  ;;  %v2801_v63 = vmul.f32 %v2673_v12, %v8841_v62  ;;  %v3429_v48 = vadd.f32 1.0, %v6642_v32  ;;  %6647 = vtanh.f32 %v3180_v14 }
 0x476   :  { %v2240_v35 = vpop.f32.mrf.mxu1  ;;  %v6644_v37 = vpop.eup %6643  ;;  %v2533_v51 = vmul.f32 0.5, %v8831_v9  ;;  %v2677_v29 = vmul.f32 0.044715, %v8843_v34 }
 0x477   :  { %v2416_v43 = vpop.f32.mrf.mxu3  ;;  %v2241_v7 = vadd.f32 %v2240_v35, %v2151_v26  ;;  %v2804_v20 = vmul.f32 %v2676_v2, %v8842_v4  ;;  %v3432_v12 = vadd.f32 1.0, %v6644_v37  ;;  %v3181_v26 = vmul.f32 0.7978846, %v3053_v23 }
 0x478   :  { %v2417_v25 = vadd.f32 %v2416_v43, %v2327_v5  ;;  %v5988_v5 = vor.u32 %v6367_v44, %v5985_v49  ;;  %v6049_v43 = vld [vmem:[#allocation8 + $0xd8] sm:$0xf0]  ;;  %v2536_v35 = vmul.f32 0.5, %v8832_v19  ;;  %v3184_v44 = vmul.f32 0.7978846, %v3056_v40 }
 0x479   :  { %v3684_v52 = vmul.f32 %v3556_v6, %v2241_v7  ;;  %v6052_v30 = vor.u32 %v6383_v11, %v6049_v43  ;;  %v2929_v7 = vmul.f32 %v2801_v63, %v8841_v62  ;;  %v6646_v14 = vpop.eup %6645  ;;  %v2680_v6 = vmul.f32 0.044715, %v8844_v39  ;;  %v8846_v43 = vld [vmem:[#allocation26_spill] sm:$0xff] }
 0x47a   :  { %v3681_v53 = vmul.f32 %v3553_v33, %v2417_v25  ;;  %4532 = vmatpush.bf16.msrb.mxu0 %v5988_v5  ;;  %v3557_v25 = vmul.f32 %v3429_v48, %v2533_v51  ;;  %v3560_v11 = vmul.f32 %v3432_v12, %v2536_v35  ;;  %v2805_v23 = vmul.f32 %v2677_v29, %v8843_v34  ;;  %v8845_v5 = vld [vmem:[#allocation25_spill] sm:$0xff] }
 0x47b   :  { %v8085_v33 = vpack.c.bf16 %v3684_v52, %v3680_v50  ;;  %4621 = vmatpush.bf16.msrb.mxu1 %v6052_v30  ;;  %v2932_v50 = vmul.f32 %v2804_v20, %v8842_v4  ;;  %v6648_v52 = vpop.eup %6647  ;;  %6649 = vtanh.f32 %v3181_v26  ;;  %v3057_v48 = vadd.f32 %v2929_v7, %v8841_v62 }
 0x47c   :  { %v3433_v30 = vadd.f32 1.0, %v6646_v14  ;;  %v2808_v40 = vmul.f32 %v2680_v6, %v8844_v39  ;;  %6651 = vtanh.f32 %v3184_v44  ;;  %v2537_v12 = vmul.f32 0.5, %v8835_v27 }
 0x47d   :  { %v2329_v54 = vpop.f32.mrf.mxu2  ;;  %v2154_v2 = vpop.f32.mrf.mxu0  ;;  %v3060_v20 = vadd.f32 %v2932_v50, %v8842_v4  ;;  %v3436_v29 = vadd.f32 1.0, %v6648_v52  ;;  %v2540_v6 = vmul.f32 0.5, %v8836_v41 }
 0x47e   :  { %v2243_v37 = vpop.f32.mrf.mxu1  ;;  %v3561_v35 = vmul.f32 %v3433_v30, %v2537_v12  ;;  %v2936_v27 = vmul.f32 %v2808_v40, %v8844_v39 }
 0x47f   :  { %v2418_v32 = vpop.f32.mrf.mxu3  ;;  %v2244_v49 = vadd.f32 %v2243_v37, %v2154_v2  ;;  %v8848_v37 = vld [vmem:[#allocation126_spill] sm:$0xff]  ;;  %v3564_v52 = vmul.f32 %v3436_v29, %v2540_v6 }
 0x480   :  { %v2419_v9 = vadd.f32 %v2418_v32, %v2329_v54  ;;  %4197 = vmatmul.bf16.gmra.mxu0 %v8845_v5  ;;  %v8847_v54 = vld [vmem:[#allocation125_spill] sm:$0xff]  ;;  %v3185_v32 = vmul.f32 0.7978846, %v3057_v48  ;;  %v2684_v44 = vmul.f32 0.044715, %v8848_v37 }
 0x481   :  { %v3688_v19 = vmul.f32 %v3560_v11, %v2244_v49  ;;  %4286 = vmatmul.bf16.gmra.mxu1 %v8846_v43  ;;  %v2681_v26 = vmul.f32 0.044715, %v8847_v54  ;;  %v3188_v49 = vmul.f32 0.7978846, %v3060_v20  ;;  %v2541_v20 = vmul.f32 0.5, %v8837_v42 }
 0x482   :  { %v3685_v63 = vmul.f32 %v3557_v25, %v2419_v9  ;;  %4375 = vmatmul.bf16.gmra.mxu2 %v7889_v36  ;;  %v2933_v25 = vmul.f32 %v2805_v23, %v8843_v34  ;;  %v6650_v9 = vpop.eup %6649  ;;  %6653 = vtanh.f32 %v3185_v32  ;;  %v2812_v41 = vmul.f32 %v2684_v44, %v8848_v37  ;;  %v8852_v36 = vld [vmem:[#allocation28_spill] sm:$0xff] }
 0x483   :  { %v2809_v48 = vmul.f32 %v2681_v26, %v8847_v54  ;;  %v3437_v12 = vadd.f32 1.0, %v6650_v9  ;;  %6655 = vtanh.f32 %v3188_v49  ;;  %v2544_v9 = vmul.f32 0.5, %v8838_v24 }
 0x484   :  { %4464 = vmatmul.bf16.gmra.mxu3 %v7904_v15  ;;  %v8100_v51 = vpack.c.bf16 %v3685_v63, %v3681_v53  ;;  %v6652_v63 = vpop.eup %6651  ;;  %v3061_v23 = vadd.f32 %v2933_v25, %v8843_v34 }
 0x485   :  { %v2332_v7 = vpop.f32.mrf.mxu2  ;;  %v2156_v14 = vpop.f32.mrf.mxu0  ;;  %v2937_v26 = vmul.f32 %v2809_v48, %v8847_v54  ;;  %v3565_v25 = vmul.f32 %v3437_v12, %v2541_v20  ;;  %v8851_v48 = vld [vmem:[#allocation27_spill] sm:$0xff] }
 0x486   :  { %v2245_v53 = vpop.f32.mrf.mxu1 }
 0x487   :  { %v2421_v2 = vpop.f32.mrf.mxu3  ;;  %v2246_v11 = vadd.f32 %v2245_v53, %v2156_v14  ;;  %v3189_v14 = vmul.f32 0.7978846, %v3061_v23  ;;  %v8850_v53 = vld [vmem:[#allocation128_spill] sm:$0xff]  ;;  %v3065_v12 = vadd.f32 %v2937_v26, %v8847_v54  ;;  %v8853_v26 = vld [vmem:[#allocation129_spill] sm:$0xff] }
 0x488   :  { %v2422_v50 = vadd.f32 %v2421_v2, %v2332_v7  ;;  %v3064_v7 = vadd.f32 %v2936_v27, %v8844_v39  ;;  %v3440_v2 = vadd.f32 1.0, %v6652_v63  ;;  %v6654_v44 = vpop.eup %6653  ;;  %v2688_v49 = vmul.f32 0.044715, %v8850_v53 }
 0x489   :  { %v3692_v30 = vmul.f32 %v3564_v52, %v2246_v11  ;;  %v6656_v23 = vpop.eup %6655  ;;  %6657 = vtanh.f32 %v3189_v14  ;;  %v6413_v14 = vld [vmem:[#allocation8 + $0x1c4] sm:$0xf] }
 0x48a   :  { %v3689_v15 = vmul.f32 %v3561_v35, %v2422_v50  ;;  %v8849_v35 = vld [vmem:[#allocation127_spill] sm:$0xff]  ;;  %v3192_v42 = vmul.f32 0.7978846, %v3064_v7  ;;  %v3568_v63 = vmul.f32 %v3440_v2, %v2544_v9  ;;  %v2816_v7 = vmul.f32 %v2688_v49, %v8850_v53  ;;  %v6397_v2 = vld [vmem:[#allocation8 + $0x144] sm:$0xf] }
 0x48b   :  { %v8113_v40 = vpack.c.bf16 %v3692_v30, %v3688_v19  ;;  %v2685_v32 = vmul.f32 0.044715, %v8849_v35  ;;  %v2940_v19 = vmul.f32 %v2812_v41, %v8848_v37  ;;  %v3444_v9 = vadd.f32 1.0, %v6656_v23 }
 0x48c   :  { %6659 = vtanh.f32 %v3192_v42  ;;  %v2944_v23 = vmul.f32 %v2816_v7, %v8850_v53 }
 0x48d   :  { %v2334_v29 = vpop.f32.mrf.mxu2  ;;  %v2159_v50 = vpop.f32.mrf.mxu0  ;;  %v2813_v20 = vmul.f32 %v2685_v32, %v8849_v35  ;;  %v3068_v41 = vadd.f32 %v2940_v19, %v8848_v37  ;;  %v2689_v32 = vmul.f32 0.044715, %v8853_v26  ;;  %v2548_v19 = vmul.f32 0.5, %v8842_v4  ;;  %v6365_v4 = vld [vmem:[#allocation8 + $0x44] sm:$0xf] }
 0x48e   :  { %v2248_v11 = vpop.f32.mrf.mxu1  ;;  %v3072_v7 = vadd.f32 %v2944_v23, %v8850_v53 }
 0x48f   :  { %v2423_v6 = vpop.f32.mrf.mxu3  ;;  %v2249_v52 = vadd.f32 %v2248_v11, %v2159_v50  ;;  %v2545_v50 = vmul.f32 0.5, %v8841_v62  ;;  %v6169_v11 = vld [vmem:[#allocation8 + $0x1c8] sm:$0xf0]  ;;  %v3196_v62 = vmul.f32 0.7978846, %v3068_v41 }
 0x490   :  { %v2424_v27 = vadd.f32 %v2423_v6, %v2334_v29  ;;  %4202 = vmatmul.bf16.gmra.mxu0 %v8851_v48  ;;  %v3441_v29 = vadd.f32 1.0, %v6654_v44  ;;  %v6105_v6 = vld [vmem:[#allocation8 + $0x148] sm:$0xf0]  ;;  %v6172_v49 = vor.u32 %v6413_v14, %v6169_v11 }
 0x491   :  { %v3696_v24 = vmul.f32 %v3568_v63, %v2249_v52  ;;  %4291 = vmatmul.bf16.gmra.mxu1 %v8852_v36  ;;  %v3193_v52 = vmul.f32 0.7978846, %v3065_v12  ;;  %v2817_v12 = vmul.f32 %v2689_v32, %v8853_v26 }
 0x492   :  { %v3693_v30 = vmul.f32 %v3565_v25, %v2424_v27  ;;  %4380 = vmatmul.bf16.gmra.mxu2 %v7917_v17  ;;  %v6108_v27 = vor.u32 %v6397_v2, %v6105_v6  ;;  %v2941_v17 = vmul.f32 %v2813_v20, %v8849_v35  ;;  %4800 = vmatpush.bf16.msrb.mxu3 %v6172_v49  ;;  %v6381_v20 = vld [vmem:[#allocation8 + $0xc4] sm:$0xf]  ;;  %v8855_v49 = vld [vmem:[#allocation131_spill] sm:$0xff] }
 0x493   :  { %v3572_v6 = vmul.f32 %v3444_v9, %v2548_v19  ;;  %6661 = vtanh.f32 %v3193_v52 }
 0x494   :  { %4469 = vmatmul.bf16.gmra.mxu3 %v7932_v46  ;;  %v8128_v25 = vpack.c.bf16 %v3693_v30, %v3689_v15  ;;  %v3569_v46 = vmul.f32 %v3441_v29, %v2545_v50  ;;  %4711 = vmatpush.bf16.msrb.mxu2 %v6108_v27  ;;  %v6658_v15 = vpop.eup %6657  ;;  %v8854_v30 = vld [vmem:[#allocation130_spill] sm:$0xff]  ;;  %v3069_v5 = vadd.f32 %v2941_v17, %v8849_v35  ;;  %6663 = vtanh.f32 %v3196_v62 }
 0x495   :  { %v2337_v44 = vpop.f32.mrf.mxu2  ;;  %v2161_v42 = vpop.f32.mrf.mxu0  ;;  %v2692_v36 = vmul.f32 0.044715, %v8854_v30  ;;  %v5977_v50 = vld [vmem:[#allocation8 + $0x48] sm:$0xf0]  ;;  %v3445_v11 = vadd.f32 1.0, %v6658_v15 }
 0x496   :  { %v2250_v43 = vpop.f32.mrf.mxu1  ;;  %v6660_v29 = vpop.eup %6659  ;;  %v2693_v17 = vmul.f32 0.044715, %v8855_v49  ;;  %v3197_v62 = vmul.f32 0.7978846, %v3069_v5  ;;  %v8858_v5 = vld [vmem:[#allocation30_spill] sm:$0xff] }
 0x497   :  { %v2426_v63 = vpop.f32.mrf.mxu3  ;;  %v2251_v2 = vadd.f32 %v2250_v43, %v2161_v42  ;;  %v2820_v41 = vmul.f32 %v2692_v36, %v8854_v30  ;;  %v2549_v43 = vmul.f32 0.5, %v8843_v34  ;;  %v3448_v9 = vadd.f32 1.0, %v6660_v29 }
 0x498   :  { %v2427_v48 = vadd.f32 %v2426_v63, %v2337_v44  ;;  %v5980_v44 = vor.u32 %v6365_v4, %v5977_v50  ;;  %v6041_v63 = vld [vmem:[#allocation8 + $0xc8] sm:$0xf0]  ;;  %v2552_v36 = vmul.f32 0.5, %v8844_v39  ;;  %v3200_v4 = vmul.f32 0.7978846, %v3072_v7 }
 0x499   :  { %v3700_v27 = vmul.f32 %v3572_v6, %v2251_v2  ;;  %v6044_v32 = vor.u32 %v6381_v20, %v6041_v63  ;;  %v3573_v19 = vmul.f32 %v3445_v11, %v2549_v43  ;;  %v6662_v23 = vpop.eup %6661  ;;  %v8856_v2 = vld [vmem:[#allocation132_spill] sm:$0xff]  ;;  %v8857_v63 = vld [vmem:[#allocation29_spill] sm:$0xff]  ;;  %v2821_v11 = vmul.f32 %v2693_v17, %v8855_v49 }
 0x49a   :  { %v3697_v14 = vmul.f32 %v3569_v46, %v2427_v48  ;;  %v2945_v46 = vmul.f32 %v2817_v12, %v8853_v26  ;;  %4533 = vmatpush.bf16.msrb.mxu0 %v5980_v44  ;;  %v2696_v6 = vmul.f32 0.044715, %v8856_v2  ;;  %v2948_v12 = vmul.f32 %v2820_v41, %v8854_v30 }
 0x49b   :  { %v8142_v48 = vpack.c.bf16 %v3700_v27, %v3696_v24  ;;  %4622 = vmatpush.bf16.msrb.mxu1 %v6044_v32  ;;  %v3576_v50 = vmul.f32 %v3448_v9, %v2552_v36  ;;  %v6664_v27 = vpop.eup %6663  ;;  %v3449_v32 = vadd.f32 1.0, %v6662_v23  ;;  %6665 = vtanh.f32 %v3197_v62 }
 0x49c   :  { %v3073_v20 = vadd.f32 %v2945_v46, %v8853_v26  ;;  %v2824_v7 = vmul.f32 %v2696_v6, %v8856_v2  ;;  %6667 = vtanh.f32 %v3200_v4  ;;  %v3076_v41 = vadd.f32 %v2948_v12, %v8854_v30 }
 0x49d   :  { %v2339_v52 = vpop.f32.mrf.mxu2  ;;  %v2164_v15 = vpop.f32.mrf.mxu0  ;;  %v2553_v9 = vmul.f32 0.5, %v8847_v54  ;;  %v3452_v46 = vadd.f32 1.0, %v6664_v27  ;;  %v2556_v62 = vmul.f32 0.5, %v8848_v37  ;;  %v2949_v6 = vmul.f32 %v2821_v11, %v8855_v49 }
 0x49e   :  { %v2253_v29 = vpop.f32.mrf.mxu1 }
 0x49f   :  { %v2428_v42 = vpop.f32.mrf.mxu3  ;;  %v2254_v24 = vadd.f32 %v2253_v29, %v2164_v15  ;;  %v3577_v36 = vmul.f32 %v3449_v32, %v2553_v9  ;;  %v3077_v37 = vadd.f32 %v2949_v6, %v8855_v49 }
 0x4a0   :  { %v2429_v34 = vadd.f32 %v2428_v42, %v2339_v52  ;;  %4207 = vmatmul.bf16.gmra.mxu0 %v8857_v63  ;;  %v3201_v52 = vmul.f32 0.7978846, %v3073_v20  ;;  %v8859_v42 = vld [vmem:[#allocation133_spill] sm:$0xff]  ;;  %v3580_v20 = vmul.f32 %v3452_v46, %v2556_v62  ;;  %v2557_v46 = vmul.f32 0.5, %v8849_v35 }
 0x4a1   :  { %v3704_v39 = vmul.f32 %v3576_v50, %v2254_v24  ;;  %4296 = vmatmul.bf16.gmra.mxu1 %v8858_v5  ;;  %v2952_v24 = vmul.f32 %v2824_v7, %v8856_v2  ;;  %v6666_v54 = vpop.eup %6665  ;;  %v3205_v6 = vmul.f32 0.7978846, %v3077_v37  ;;  %v6097_v37 = vld [vmem:[#allocation8 + $0x138] sm:$0xf0] }
 0x4a2   :  { %v3701_v44 = vmul.f32 %v3573_v19, %v2429_v34  ;;  %4385 = vmatmul.bf16.gmra.mxu2 %v7945_v56  ;;  %v2697_v19 = vmul.f32 0.044715, %v8859_v42  ;;  %v8860_v34 = vld [vmem:[#allocation134_spill] sm:$0xff]  ;;  %6669 = vtanh.f32 %v3201_v52  ;;  %v6668_v27 = vpop.eup %6667 }
 0x4a3   :  { %v2700_v29 = vmul.f32 0.044715, %v8860_v34 }
 0x4a4   :  { %4474 = vmatmul.bf16.gmra.mxu3 %v7960_v47  ;;  %v8156_v43 = vpack.c.bf16 %v3701_v44, %v3697_v14  ;;  %v3204_v14 = vmul.f32 0.7978846, %v3076_v41  ;;  %v2825_v32 = vmul.f32 %v2697_v19, %v8859_v42  ;;  %v3453_v47 = vadd.f32 1.0, %v6666_v54 }
 0x4a5   :  { %v2342_v17 = vpop.f32.mrf.mxu2  ;;  %v2166_v23 = vpop.f32.mrf.mxu0  ;;  %v2828_v11 = vmul.f32 %v2700_v29, %v8860_v34  ;;  %v3456_v41 = vadd.f32 1.0, %v6668_v27 }
 0x4a6   :  { %v2255_v12 = vpop.f32.mrf.mxu1  ;;  %6671 = vtanh.f32 %v3204_v14  ;;  %v2953_v29 = vmul.f32 %v2825_v32, %v8859_v42  ;;  %v3581_v14 = vmul.f32 %v3453_v47, %v2557_v46  ;;  %v6395_v32 = vld [vmem:[#allocation8 + $0x134] sm:$0xf]  ;;  %v6161_v46 = vld [vmem:[#allocation8 + $0x1b8] sm:$0xf0] }
 0x4a7   :  { %v2431_v15 = vpop.f32.mrf.mxu3  ;;  %v2256_v50 = vadd.f32 %v2255_v12, %v2166_v23  ;;  %v8862_v23 = vld [vmem:[#allocation135_spill] sm:$0xff]  ;;  %6673 = vtanh.f32 %v3205_v6  ;;  %v2564_v6 = vmul.f32 0.5, %v8854_v30 }
 0x4a8   :  { %v2432_v4 = vadd.f32 %v2431_v15, %v2342_v17  ;;  %v3080_v17 = vadd.f32 %v2952_v24, %v8856_v2  ;;  %v6670_v52 = vpop.eup %6669  ;;  %v3081_v47 = vadd.f32 %v2953_v29, %v8859_v42 }
 0x4a9   :  { %v3708_v9 = vmul.f32 %v3580_v20, %v2256_v50 }
 0x4aa   :  { %v3705_v44 = vmul.f32 %v3577_v36, %v2432_v4  ;;  %v2701_v36 = vmul.f32 0.044715, %v8862_v23  ;;  %v2560_v4 = vmul.f32 0.5, %v8850_v53  ;;  %v3208_v24 = vmul.f32 0.7978846, %v3080_v17 }
 0x4ab   :  { %v8168_v15 = vpack.c.bf16 %v3708_v9, %v3704_v39  ;;  %v2956_v39 = vmul.f32 %v2828_v11, %v8860_v34  ;;  %v3457_v9 = vadd.f32 1.0, %v6670_v52  ;;  %v6411_v11 = vld [vmem:[#allocation8 + $0x1b4] sm:$0xf]  ;;  %v3209_v29 = vmul.f32 0.7978846, %v3081_v47 }
 0x4ac   :  { %v3584_v20 = vmul.f32 %v3456_v41, %v2560_v4  ;;  %v6672_v27 = vpop.eup %6671  ;;  %v2829_v56 = vmul.f32 %v2701_v36, %v8862_v23  ;;  %6675 = vtanh.f32 %v3208_v24  ;;  %v2561_v36 = vmul.f32 0.5, %v8853_v26  ;;  %v6379_v26 = vld [vmem:[#allocation8 + $0xb4] sm:$0xf] }
 0x4ad   :  { %8861 = vst [vmem:[#allocation52_spill] sm:$0xff] %v8168_v15  ;;  %v2344_v7 = vpop.f32.mrf.mxu2  ;;  %v2169_v19 = vpop.f32.mrf.mxu0  ;;  %v3084_v53 = vadd.f32 %v2956_v39, %v8860_v34  ;;  %v3460_v41 = vadd.f32 1.0, %v6672_v27  ;;  %v6363_v27 = vld [vmem:[#allocation8 + $0x34] sm:$0xf]  ;;  %6677 = vtanh.f32 %v3209_v29 }
 0x4ae   :  { %v2258_v54 = vpop.f32.mrf.mxu1  ;;  %v6674_v39 = vpop.eup %6673 }
 0x4af   :  { %v2433_v62 = vpop.f32.mrf.mxu3  ;;  %v2259_v50 = vadd.f32 %v2258_v54, %v2169_v19  ;;  %v3585_v54 = vmul.f32 %v3457_v9, %v2561_v36 }
 0x4b0   :  { %v2434_v12 = vadd.f32 %v2433_v62, %v2344_v7  ;;  %4212 = vmatmul.bf16.gmra.mxu0 %v7525_v0  ;;  %v6100_v7 = vor.u32 %v6395_v32, %v6097_v37  ;;  %v6164_v62 = vor.u32 %v6411_v11, %v6161_v46  ;;  %v6033_v46 = vld [vmem:[#allocation8 + $0xb8] sm:$0xf0] }
 0x4b1   :  { %v3712_v5 = vmul.f32 %v3584_v20, %v2259_v50  ;;  %4301 = vmatmul.bf16.gmra.mxu1 %v7540_v10  ;;  %v3588_v20 = vmul.f32 %v3460_v41, %v2564_v6  ;;  %v6036_v47 = vor.u32 %v6379_v26, %v6033_v46  ;;  %v2569_v26 = vmul.f32 0.5, %v8859_v42 }
 0x4b2   :  { %v3709_v35 = vmul.f32 %v3581_v14, %v2434_v12  ;;  %4390 = vmatmul.bf16.gmra.mxu2 %v7973_v57  ;;  %v2957_v12 = vmul.f32 %v2829_v56, %v8862_v23  ;;  %4801 = vmatpush.bf16.msrb.mxu3 %v6164_v62  ;;  %v6676_v32 = vpop.eup %6675  ;;  %v2572_v46 = vmul.f32 0.5, %v8860_v34 }
 0x4b3   :  { %4712 = vmatpush.bf16.msrb.mxu2 %v6100_v7  ;;  %v3461_v7 = vadd.f32 1.0, %v6674_v39  ;;  %v3464_v9 = vadd.f32 1.0, %v6676_v32  ;;  %4623 = vmatpush.bf16.msrb.mxu1 %v6036_v47 }
 0x4b4   :  { %4479 = vmatmul.bf16.gmra.mxu3 %v7988_v38  ;;  %v8182_v17 = vpack.c.bf16 %v3709_v35, %v3705_v44  ;;  %v3212_v44 = vmul.f32 0.7978846, %v3084_v53  ;;  %v5969_v35 = vld [vmem:[#allocation8 + $0x38] sm:$0xf0]  ;;  %v3085_v56 = vadd.f32 %v2957_v12, %v8862_v23  ;;  %v6678_v12 = vpop.eup %6677 }
 0x4b5   :  { %v2347_v52 = vpop.f32.mrf.mxu2  ;;  %v2171_v4 = vpop.f32.mrf.mxu0  ;;  %v5972_v11 = vor.u32 %v6363_v27, %v5969_v35 }
 0x4b6   :  { %v2260_v24 = vpop.f32.mrf.mxu1  ;;  %6679 = vtanh.f32 %v3212_v44 }
 0x4b7   :  { %v2436_v19 = vpop.f32.mrf.mxu3  ;;  %v2261_v50 = vadd.f32 %v2260_v24, %v2171_v4  ;;  %4534 = vmatpush.bf16.msrb.mxu0 %v5972_v11  ;;  %v3213_v4 = vmul.f32 0.7978846, %v3085_v56 }
 0x4b8   :  { %v2437_v14 = vadd.f32 %v2436_v19, %v2347_v52  ;;  %v2565_v52 = vmul.f32 0.5, %v8855_v49  ;;  %v2568_v19 = vmul.f32 0.5, %v8856_v2  ;;  %v3465_v49 = vadd.f32 1.0, %v6678_v12 }
 0x4b9   :  { %v3716_v30 = vmul.f32 %v3588_v20, %v2261_v50  ;;  %v8864_v50 = vld [vmem:[#allocation31_spill] sm:$0xff]  ;;  %v8865_v20 = vld [vmem:[#allocation32_spill] sm:$0xff]  ;;  %6681 = vtanh.f32 %v3213_v4  ;;  %v2573_v4 = vmul.f32 0.5, %v8862_v23 }
 0x4ba   :  { %v3713_v37 = vmul.f32 %v3585_v54, %v2437_v14  ;;  %v3589_v29 = vmul.f32 %v3461_v7, %v2565_v52  ;;  %v3592_v24 = vmul.f32 %v3464_v9, %v2568_v19  ;;  %v3593_v56 = vmul.f32 %v3465_v49, %v2569_v26  ;;  %v6153_v49 = vld [vmem:[#allocation8 + $0x1a8] sm:$0xf0] }
 0x4bb   :  { %v8188_v53 = vpack.c.bf16 %v3716_v30, %v3712_v5 }
 0x4bc   :  { %v6680_v44 = vpop.eup %6679 }
 0x4bd   :  { %8863 = vst [vmem:[#allocation53_spill] sm:$0xff] %v8188_v53  ;;  %v2349_v41 = vpop.f32.mrf.mxu2  ;;  %v2174_v62 = vpop.f32.mrf.mxu0  ;;  %v3468_v27 = vadd.f32 1.0, %v6680_v44  ;;  %v6089_v44 = vld [vmem:[#allocation8 + $0x128] sm:$0xf0] }
 0x4be   :  { %v2263_v14 = vpop.f32.mrf.mxu1 }
 0x4bf   :  { %v2438_v36 = vpop.f32.mrf.mxu3  ;;  %v2264_v54 = vadd.f32 %v2263_v14, %v2174_v62  ;;  %v6682_v7 = vpop.eup %6681 }
 0x4c0   :  { %v2439_v6 = vadd.f32 %v2438_v36, %v2349_v41  ;;  %4217 = vmatmul.bf16.gmra.mxu0 %v8864_v50  ;;  %v3596_v41 = vmul.f32 %v3468_v27, %v2572_v46  ;;  %v3469_v62 = vadd.f32 1.0, %v6682_v7  ;;  %v5961_v7 = vld [vmem:[#allocation8 + $0x28] sm:$0xf0] }
 0x4c1   :  { %v3720_v5 = vmul.f32 %v3592_v24, %v2264_v54  ;;  %4306 = vmatmul.bf16.gmra.mxu1 %v8865_v20  ;;  %v6393_v24 = vld [vmem:[#allocation8 + $0x124] sm:$0xf] }
 0x4c2   :  { %v3717_v39 = vmul.f32 %v3589_v29, %v2439_v6  ;;  %4395 = vmatmul.bf16.gmra.mxu2 %v8001_v58  ;;  %v3597_v14 = vmul.f32 %v3469_v62, %v2573_v4  ;;  %v6092_v23 = vor.u32 %v6393_v24, %v6089_v44 }
 0x4c4   :  { %4484 = vmatmul.bf16.gmra.mxu3 %v8016_v13  ;;  %v8196_v2 = vpack.c.bf16 %v3717_v39, %v3713_v37  ;;  %v6409_v39 = vld [vmem:[#allocation8 + $0x1a4] sm:$0xf]  ;;  %4713 = vmatpush.bf16.msrb.mxu2 %v6092_v23 }
 0x4c5   :  { %v2352_v35 = vpop.f32.mrf.mxu2  ;;  %v2176_v11 = vpop.f32.mrf.mxu0 }
 0x4c6   :  { %v2265_v47 = vpop.f32.mrf.mxu1 }
 0x4c7   :  { %v2441_v32 = vpop.f32.mrf.mxu3  ;;  %v2266_v9 = vadd.f32 %v2265_v47, %v2176_v11  ;;  %v6361_v47 = vld [vmem:[#allocation8 + $0x24] sm:$0xf] }
 0x4c8   :  { %v2442_v30 = vadd.f32 %v2441_v32, %v2352_v35  ;;  %v6156_v35 = vor.u32 %v6409_v39, %v6153_v49 }
 0x4c9   :  { %v3724_v36 = vmul.f32 %v3596_v41, %v2266_v9  ;;  %v6377_v9 = vld [vmem:[#allocation8 + $0xa4] sm:$0xf]  ;;  %v5964_v41 = vor.u32 %v6361_v47, %v5961_v7  ;;  %v6081_v47 = vld [vmem:[#allocation8 + $0x118] sm:$0xf0]  ;;  %v6407_v7 = vld [vmem:[#allocation8 + $0x194] sm:$0xf] }
 0x4ca   :  { %v3721_v52 = vmul.f32 %v3593_v56, %v2442_v30  ;;  %4802 = vmatpush.bf16.msrb.mxu3 %v6156_v35 }
 0x4cb   :  { %v8200_v19 = vpack.c.bf16 %v3724_v36, %v3720_v5  ;;  %v6025_v36 = vld [vmem:[#allocation8 + $0xa8] sm:$0xf0]  ;;  %4535 = vmatpush.bf16.msrb.mxu0 %v5964_v41  ;;  %v6145_v41 = vld [vmem:[#allocation8 + $0x198] sm:$0xf0] }
 0x4cd   :  { %8866 = vst [vmem:[#allocation54_spill] sm:$0xff] %v8200_v19  ;;  %v2354_v37 = vpop.f32.mrf.mxu2  ;;  %v4183_v42 = vpop.f32.mrf.mxu0 }
 0x4ce   :  { %v4272_v12 = vpop.f32.mrf.mxu1 }
 0x4cf   :  { %v2443_v6 = vpop.f32.mrf.mxu3  ;;  %v4273_v34 = vadd.f32 %v4272_v12, %v4183_v42 }
 0x4d0   :  { %v2444_v29 = vadd.f32 %v2443_v6, %v2354_v37  ;;  %4222 = vmatmul.bf16.gmra.mxu0 %v7581_v55 }
 0x4d1   :  { %4311 = vmatmul.bf16.gmra.mxu1 %v7596_v59 }
 0x4d2   :  { %v3725_v54 = vmul.f32 %v3597_v14, %v2444_v29  ;;  %4400 = vmatmul.bf16.gmra.mxu2 %v8029_v8 }
 0x4d4   :  { %4489 = vmatmul.bf16.gmra.mxu3 %v8044_v18  ;;  %v8207_v5 = vpack.c.bf16 %v3725_v54, %v3721_v52  ;;  %v6028_v52 = vor.u32 %v6377_v9, %v6025_v36 }
 0x4d5   :  { %v4361_v27 = vpop.f32.mrf.mxu2  ;;  %v4185_v11 = vpop.f32.mrf.mxu0 }
 0x4d6   :  { %8867 = vst [vmem:[#allocation55_spill] sm:$0xff] %v8207_v5  ;;  %v4362_v26 = vadd.f32 %v4361_v27, %v4273_v34  ;;  %v4274_v46 = vpop.f32.mrf.mxu1  ;;  %4624 = vmatpush.bf16.msrb.mxu1 %v6028_v52  ;;  %v6148_v52 = vor.u32 %v6407_v7, %v6145_v41 }
 0x4d7   :  { %v4450_v32 = vpop.f32.mrf.mxu3  ;;  %v4275_v56 = vadd.f32 %v4274_v46, %v4185_v11 }
 0x4d8   :  { %v8209_v30 = vadd.f32 %v4450_v32, %v4362_v26  ;;  %4803 = vmatpush.bf16.msrb.mxu3 %v6148_v52 }
 0x4dd   :  { %v4363_v62 = vpop.f32.mrf.mxu2  ;;  %v4188_v6 = vpop.f32.mrf.mxu0 }
 0x4de   :  { %v4364_v37 = vadd.f32 %v4363_v62, %v4275_v56  ;;  %v4277_v42 = vpop.f32.mrf.mxu1  ;;  %v6391_v56 = vld [vmem:[#allocation8 + $0x114] sm:$0xf] }
 0x4df   :  { %v4452_v4 = vpop.f32.mrf.mxu3  ;;  %v4278_v14 = vadd.f32 %v4277_v42, %v4188_v6  ;;  %v6084_v9 = vor.u32 %v6391_v56, %v6081_v47 }
 0x4e0   :  { %v8211_v29 = vadd.f32 %v4452_v4, %v4364_v37  ;;  %4227 = vmatmul.bf16.gmra.mxu0 %v7609_v1 }
 0x4e1   :  { %4316 = vmatmul.bf16.gmra.mxu1 %v7624_v22  ;;  %4714 = vmatpush.bf16.msrb.mxu2 %v6084_v9 }
 0x4e2   :  { %4405 = vmatmul.bf16.gmra.mxu2 %v8057_v3 }
 0x4e4   :  { %4494 = vmatmul.bf16.gmra.mxu3 %v8072_v61 }
 0x4e5   :  { %v4366_v12 = vpop.f32.mrf.mxu2  ;;  %v4190_v24 = vpop.f32.mrf.mxu0 }
 0x4e6   :  { %v4367_v34 = vadd.f32 %v4366_v12, %v4278_v14  ;;  %v4279_v44 = vpop.f32.mrf.mxu1  ;;  %v6359_v12 = vld [vmem:[#allocation8 + $0x14] sm:$0xf] }
 0x4e7   :  { %v4455_v54 = vpop.f32.mrf.mxu3  ;;  %v4280_v23 = vadd.f32 %v4279_v44, %v4190_v24  ;;  %v6017_v44 = vld [vmem:[#allocation8 + $0x98] sm:$0xf0] }
 0x4e8   :  { %v8217_v39 = vadd.f32 %v4455_v54, %v4367_v34  ;;  %v5953_v34 = vld [vmem:[#allocation8 + $0x18] sm:$0xf0]  ;;  %v6375_v54 = vld [vmem:[#allocation8 + $0x94] sm:$0xf] }
 0x4e9   :  { %v5956_v24 = vor.u32 %v6359_v12, %v5953_v34 }
 0x4eb   :  { %4536 = vmatpush.bf16.msrb.mxu0 %v5956_v24  ;;  %v8868_v24 = vld [vmem:[#allocation33_spill] sm:$0xff] }
 0x4ed   :  { %v4368_v49 = vpop.f32.mrf.mxu2  ;;  %v4193_v26 = vpop.f32.mrf.mxu0 }
 0x4ee   :  { %v4369_v27 = vadd.f32 %v4368_v49, %v4280_v23  ;;  %v4282_v32 = vpop.f32.mrf.mxu1  ;;  %v6020_v23 = vor.u32 %v6375_v54, %v6017_v44  ;;  %v6389_v44 = vld [vmem:[#allocation8 + $0x104] sm:$0xf] }
 0x4ef   :  { %v4457_v35 = vpop.f32.mrf.mxu3  ;;  %v4283_v46 = vadd.f32 %v4282_v32, %v4193_v26 }
 0x4f0   :  { %v8219_v11 = vadd.f32 %v4457_v35, %v4369_v27  ;;  %4232 = vmatmul.bf16.gmra.mxu0 %v7637_v60  ;;  %4625 = vmatpush.bf16.msrb.mxu1 %v6020_v23  ;;  %v6073_v23 = vld [vmem:[#allocation8 + $0x108] sm:$0xf0] }
 0x4f1   :  { %4321 = vmatmul.bf16.gmra.mxu1 %v7652_v28 }
 0x4f2   :  { %4410 = vmatmul.bf16.gmra.mxu2 %v8085_v33 }
 0x4f4   :  { %4499 = vmatmul.bf16.gmra.mxu3 %v8100_v51 }
 0x4f5   :  { %v4371_v36 = vpop.f32.mrf.mxu2  ;;  %v4195_v4 = vpop.f32.mrf.mxu0 }
 0x4f6   :  { %v4372_v62 = vadd.f32 %v4371_v36, %v4283_v46  ;;  %v4284_v6 = vpop.f32.mrf.mxu1 }
 0x4f7   :  { %v4460_v37 = vpop.f32.mrf.mxu3  ;;  %v4285_v14 = vadd.f32 %v4284_v6, %v4195_v4 }
 0x4f8   :  { %v8225_v42 = vadd.f32 %v4460_v37, %v4372_v62 }
 0x4fd   :  { %v4373_v49 = vpop.f32.mrf.mxu2  ;;  %v4198_v26 = vpop.f32.mrf.mxu0 }
 0x4fe   :  { %v4374_v27 = vadd.f32 %v4373_v49, %v4285_v14  ;;  %v4287_v32 = vpop.f32.mrf.mxu1  ;;  %v6405_v49 = vld [vmem:[#allocation8 + $0x184] sm:$0xf] }
 0x4ff   :  { %v4462_v35 = vpop.f32.mrf.mxu3  ;;  %v4288_v56 = vadd.f32 %v4287_v32, %v4198_v26 }
 0x500   :  { %v8227_v46 = vadd.f32 %v4462_v35, %v4374_v27  ;;  %4237 = vmatmul.bf16.gmra.mxu0 %v7665_v31  ;;  %v6076_v27 = vor.u32 %v6389_v44, %v6073_v23  ;;  %v6137_v35 = vld [vmem:[#allocation8 + $0x188] sm:$0xf0] }
 0x501   :  { %4326 = vmatmul.bf16.gmra.mxu1 %v7680_v16  ;;  %v6140_v32 = vor.u32 %v6405_v49, %v6137_v35 }
 0x502   :  { %4415 = vmatmul.bf16.gmra.mxu2 %v8113_v40 }
 0x503   :  { %4715 = vmatpush.bf16.msrb.mxu2 %v6076_v27  ;;  %4804 = vmatpush.bf16.msrb.mxu3 %v6140_v32  ;;  %v8869_v32 = vld [vmem:[#allocation34_spill] sm:$0xff] }
 0x504   :  { %4504 = vmatmul.bf16.gmra.mxu3 %v8128_v25 }
 0x505   :  { %v4376_v47 = vpop.f32.mrf.mxu2  ;;  %v4200_v41 = vpop.f32.mrf.mxu0 }
 0x506   :  { %v4377_v7 = vadd.f32 %v4376_v47, %v4288_v56  ;;  %v4289_v36 = vpop.f32.mrf.mxu1 }
 0x507   :  { %v4465_v9 = vpop.f32.mrf.mxu3  ;;  %v4290_v62 = vadd.f32 %v4289_v36, %v4200_v41 }
 0x508   :  { %v8233_v52 = vadd.f32 %v4465_v9, %v4377_v7 }
 0x50d   :  { %v4378_v37 = vpop.f32.mrf.mxu2  ;;  %v4203_v14 = vpop.f32.mrf.mxu0 }
 0x50e   :  { %v4379_v4 = vadd.f32 %v4378_v37, %v4290_v62  ;;  %v4292_v12 = vpop.f32.mrf.mxu1  ;;  %v6357_v62 = vld [vmem:[#allocation8 + $0x4] sm:$0xf]  ;;  %v5945_v37 = vld [vmem:[#allocation8 + $0x8] sm:$0xf0] }
 0x50f   :  { %v4467_v6 = vpop.f32.mrf.mxu3  ;;  %v4293_v54 = vadd.f32 %v4292_v12, %v4203_v14  ;;  %v6009_v14 = vld [vmem:[#allocation8 + $0x88] sm:$0xf0] }
 0x510   :  { %v8235_v34 = vadd.f32 %v4467_v6, %v4379_v4  ;;  %4242 = vmatmul.bf16.gmra.mxu0 %v7693_v45  ;;  %v6373_v4 = vld [vmem:[#allocation8 + $0x84] sm:$0xf]  ;;  %v5948_v6 = vor.u32 %v6357_v62, %v5945_v37 }
 0x511   :  { %4331 = vmatmul.bf16.gmra.mxu1 %v8868_v24  ;;  %v6012_v12 = vor.u32 %v6373_v4, %v6009_v14 }
 0x512   :  { %4420 = vmatmul.bf16.gmra.mxu2 %v8142_v48  ;;  %4537 = vmatpush.bf16.msrb.mxu0 %v5948_v6 }
 0x513   :  { %4626 = vmatpush.bf16.msrb.mxu1 %v6012_v12 }
 0x514   :  { %4509 = vmatmul.bf16.gmra.mxu3 %v8156_v43 }
 0x515   :  { %v4381_v26 = vpop.f32.mrf.mxu2  ;;  %v4205_v7 = vpop.f32.mrf.mxu0 }
 0x516   :  { %v4382_v56 = vadd.f32 %v4381_v26, %v4293_v54  ;;  %v4294_v9 = vpop.f32.mrf.mxu1 }
 0x517   :  { %v4470_v47 = vpop.f32.mrf.mxu3  ;;  %v4295_v36 = vadd.f32 %v4294_v9, %v4205_v7 }
 0x518   :  { %v8241_v41 = vadd.f32 %v4470_v47, %v4382_v56  ;;  %v8870_v56 = vld [vmem:[#allocation35_spill] sm:$0xff] }
 0x51d   :  { %v4383_v44 = vpop.f32.mrf.mxu2  ;;  %v4208_v54 = vpop.f32.mrf.mxu0 }
 0x51e   :  { %v4384_v23 = vadd.f32 %v4383_v44, %v4295_v36  ;;  %v4297_v35 = vpop.f32.mrf.mxu1 }
 0x51f   :  { %v4472_v49 = vpop.f32.mrf.mxu3  ;;  %v4298_v27 = vadd.f32 %v4297_v35, %v4208_v54  ;;  %v8872_v35 = vld [vmem:[#allocation36_spill] sm:$0xff] }
 0x520   :  { %v8243_v26 = vadd.f32 %v4472_v49, %v4384_v23  ;;  %4247 = vmatmul.bf16.gmra.mxu0 %v8869_v32 }
 0x521   :  { %4336 = vmatmul.bf16.gmra.mxu1 %v8870_v56 }
 0x522   :  { %4425 = vmatmul.bf16.gmra.mxu2 %v8168_v15  ;;  %v8873_v15 = vld [vmem:[#allocation37_spill] sm:$0xff] }
 0x524   :  { %4514 = vmatmul.bf16.gmra.mxu3 %v8182_v17 }
 0x525   :  { %v4386_v47 = vpop.f32.mrf.mxu2  ;;  %v4210_v62 = vpop.f32.mrf.mxu0 }
 0x526   :  { %v4387_v7 = vadd.f32 %v4386_v47, %v4298_v27  ;;  %v4299_v37 = vpop.f32.mrf.mxu1 }
 0x527   :  { %v4475_v9 = vpop.f32.mrf.mxu3  ;;  %v4300_v4 = vadd.f32 %v4299_v37, %v4210_v62 }
 0x528   :  { %v8249_v36 = vadd.f32 %v4475_v9, %v4387_v7 }
 0x52d   :  { %v4388_v6 = vpop.f32.mrf.mxu2  ;;  %v4213_v44 = vpop.f32.mrf.mxu0 }
 0x52e   :  { %v4389_v14 = vadd.f32 %v4388_v6, %v4300_v4  ;;  %v4302_v23 = vpop.f32.mrf.mxu1 }
 0x52f   :  { %v4477_v12 = vpop.f32.mrf.mxu3  ;;  %v4303_v54 = vadd.f32 %v4302_v23, %v4213_v44 }
 0x530   :  { %v8251_v49 = vadd.f32 %v4477_v12, %v4389_v14  ;;  %4252 = vmatmul.bf16.gmra.mxu0 %v8872_v35  ;;  %v8875_v35 = vld [vmem:[#allocation38_spill] sm:$0xff] }
 0x531   :  { %4341 = vmatmul.bf16.gmra.mxu1 %v8873_v15 }
 0x532   :  { %8871 = vst [vmem:[#allocation56_spill] sm:$0xff] %v8251_v49  ;;  %4430 = vmatmul.bf16.gmra.mxu2 %v8188_v53  ;;  %v8876_v53 = vld [vmem:[#allocation39_spill] sm:$0xff] }
 0x534   :  { %4519 = vmatmul.bf16.gmra.mxu3 %v8196_v2 }
 0x535   :  { %v4391_v27 = vpop.f32.mrf.mxu2  ;;  %v4215_v9 = vpop.f32.mrf.mxu0 }
 0x536   :  { %v4392_v47 = vadd.f32 %v4391_v27, %v4303_v54  ;;  %v4304_v62 = vpop.f32.mrf.mxu1 }
 0x537   :  { %v4480_v7 = vpop.f32.mrf.mxu3  ;;  %v4305_v4 = vadd.f32 %v4304_v62, %v4215_v9 }
 0x538   :  { %v8257_v37 = vadd.f32 %v4480_v7, %v4392_v47 }
 0x53d   :  { %v4393_v6 = vpop.f32.mrf.mxu2  ;;  %v4218_v44 = vpop.f32.mrf.mxu0 }
 0x53e   :  { %v4394_v14 = vadd.f32 %v4393_v6, %v4305_v4  ;;  %v4307_v23 = vpop.f32.mrf.mxu1 }
 0x53f   :  { %v4482_v12 = vpop.f32.mrf.mxu3  ;;  %v4308_v15 = vadd.f32 %v4307_v23, %v4218_v44 }
 0x540   :  { %v8259_v49 = vadd.f32 %v4482_v12, %v4394_v14  ;;  %4257 = vmatmul.bf16.gmra.mxu0 %v8875_v35 }
 0x541   :  { %4346 = vmatmul.bf16.gmra.mxu1 %v8876_v53 }
 0x542   :  { %8874 = vst [vmem:[#allocation57_spill] sm:$0xff] %v8259_v49  ;;  %4435 = vmatmul.bf16.gmra.mxu2 %v8200_v19  ;;  %v8879_v19 = vld [vmem:[#allocation20_spill] sm:$0xff] }
 0x544   :  { %4524 = vmatmul.bf16.gmra.mxu3 %v8207_v5  ;;  %v8880_v5 = vld [vmem:[#allocation40_spill] sm:$0xff] }
 0x545   :  { %v4396_v54 = vpop.f32.mrf.mxu2  ;;  %v4220_v7 = vpop.f32.mrf.mxu0 }
 0x546   :  { %v4397_v27 = vadd.f32 %v4396_v54, %v4308_v15  ;;  %v4309_v9 = vpop.f32.mrf.mxu1  ;;  %v8881_v15 = vld [vmem:[#allocation41_spill] sm:$0xff] }
 0x547   :  { %v4485_v47 = vpop.f32.mrf.mxu3  ;;  %v4310_v4 = vadd.f32 %v4309_v9, %v4220_v7 }
 0x548   :  { %v8265_v62 = vadd.f32 %v4485_v47, %v4397_v27 }
 0x54a   :  { %8877 = vst [vmem:[#allocation58_spill] sm:$0xff] %v8265_v62 }
 0x54d   :  { %v4398_v6 = vpop.f32.mrf.mxu2  ;;  %v4223_v44 = vpop.f32.mrf.mxu0 }
 0x54e   :  { %v4399_v14 = vadd.f32 %v4398_v6, %v4310_v4  ;;  %v4312_v23 = vpop.f32.mrf.mxu1 }
 0x54f   :  { %v4487_v12 = vpop.f32.mrf.mxu3  ;;  %v4313_v53 = vadd.f32 %v4312_v23, %v4223_v44 }
 0x550   :  { %v8267_v49 = vadd.f32 %v4487_v12, %v4399_v14  ;;  %4538 = vmatmul.bf16.vlgmr.msrb.gmra.mxu0 %v7356_v21 }
 0x551   :  { %4627 = vmatmul.bf16.vlgmr.msrb.gmra.mxu1 %v8879_v19 }
 0x552   :  { %8878 = vst [vmem:[#allocation59_spill] sm:$0xff] %v8267_v49  ;;  %4716 = vmatmul.bf16.vlgmr.msrb.gmra.mxu2 %v8880_v5  ;;  %v8884_v49 = vld [vmem:[#allocation21_spill] sm:$0xff]  ;;  %v8885_v5 = vld [vmem:[#allocation22_spill] sm:$0xff] }
 0x554   :  { %4805 = vmatmul.bf16.vlgmr.msrb.gmra.mxu3 %v8881_v15  ;;  %v8886_v15 = vld [vmem:[#allocation42_spill] sm:$0xff] }
 0x555   :  { %v4401_v54 = vpop.f32.mrf.mxu2  ;;  %v4225_v7 = vpop.f32.mrf.mxu0 }
 0x556   :  { %v4402_v27 = vadd.f32 %v4401_v54, %v4313_v53  ;;  %v4314_v9 = vpop.f32.mrf.mxu1  ;;  %v8887_v53 = vld [vmem:[#allocation43_spill] sm:$0xff] }
 0x557   :  { %v4490_v47 = vpop.f32.mrf.mxu3  ;;  %v4315_v6 = vadd.f32 %v4314_v9, %v4225_v7 }
 0x558   :  { %v8273_v4 = vadd.f32 %v4490_v47, %v4402_v27 }
 0x55a   :  { %8882 = vst [vmem:[#allocation60_spill] sm:$0xff] %v8273_v4 }
 0x55d   :  { %v4403_v62 = vpop.f32.mrf.mxu2  ;;  %v4228_v44 = vpop.f32.mrf.mxu0 }
 0x55e   :  { %v4404_v14 = vadd.f32 %v4403_v62, %v4315_v6  ;;  %v4317_v23 = vpop.f32.mrf.mxu1 }
 0x55f   :  { %v4492_v12 = vpop.f32.mrf.mxu3  ;;  %v4318_v19 = vadd.f32 %v4317_v23, %v4228_v44 }
 0x560   :  { %v8275_v21 = vadd.f32 %v4492_v12, %v4404_v14  ;;  %4543 = vmatmul.bf16.gmra.mxu0 %v8884_v49 }
 0x561   :  { %4632 = vmatmul.bf16.gmra.mxu1 %v8885_v5 }
 0x562   :  { %8883 = vst [vmem:[#allocation61_spill] sm:$0xff] %v8275_v21  ;;  %4721 = vmatmul.bf16.gmra.mxu2 %v8886_v15  ;;  %v8890_v21 = vld [vmem:[#allocation23_spill] sm:$0xff]  ;;  %v8891_v15 = vld [vmem:[#allocation24_spill] sm:$0xff] }
 0x564   :  { %4810 = vmatmul.bf16.gmra.mxu3 %v8887_v53  ;;  %v8892_v53 = vld [vmem:[#allocation44_spill] sm:$0xff] }
 0x565   :  { %v4406_v54 = vpop.f32.mrf.mxu2  ;;  %v4230_v7 = vpop.f32.mrf.mxu0 }
 0x566   :  { %v4407_v27 = vadd.f32 %v4406_v54, %v4318_v19  ;;  %v4319_v9 = vpop.f32.mrf.mxu1  ;;  %v8893_v19 = vld [vmem:[#allocation45_spill] sm:$0xff] }
 0x567   :  { %v4495_v47 = vpop.f32.mrf.mxu3  ;;  %v4320_v6 = vadd.f32 %v4319_v9, %v4230_v7 }
 0x568   :  { %v8281_v62 = vadd.f32 %v4495_v47, %v4407_v27 }
 0x56a   :  { %8888 = vst [vmem:[#allocation62_spill] sm:$0xff] %v8281_v62 }
 0x56d   :  { %v4408_v4 = vpop.f32.mrf.mxu2  ;;  %v4233_v44 = vpop.f32.mrf.mxu0 }
 0x56e   :  { %v4409_v14 = vadd.f32 %v4408_v4, %v4320_v6  ;;  %v4322_v23 = vpop.f32.mrf.mxu1 }
 0x56f   :  { %v4497_v12 = vpop.f32.mrf.mxu3  ;;  %v4323_v5 = vadd.f32 %v4322_v23, %v4233_v44 }
 0x570   :  { %v8283_v49 = vadd.f32 %v4497_v12, %v4409_v14  ;;  %4548 = vmatmul.bf16.gmra.mxu0 %v8890_v21 }
 0x571   :  { %4637 = vmatmul.bf16.gmra.mxu1 %v8891_v15 }
 0x572   :  { %8889 = vst [vmem:[#allocation63_spill] sm:$0xff] %v8283_v49  ;;  %4726 = vmatmul.bf16.gmra.mxu2 %v8892_v53  ;;  %v8896_v49 = vld [vmem:[#allocation25_spill] sm:$0xff]  ;;  %v8897_v53 = vld [vmem:[#allocation26_spill] sm:$0xff] }
 0x574   :  { %4815 = vmatmul.bf16.gmra.mxu3 %v8893_v19  ;;  %v8898_v19 = vld [vmem:[#allocation46_spill] sm:$0xff] }
 0x575   :  { %v4411_v54 = vpop.f32.mrf.mxu2  ;;  %v4235_v7 = vpop.f32.mrf.mxu0 }
 0x576   :  { %v4412_v27 = vadd.f32 %v4411_v54, %v4323_v5  ;;  %v4324_v9 = vpop.f32.mrf.mxu1  ;;  %v8899_v5 = vld [vmem:[#allocation47_spill] sm:$0xff] }
 0x577   :  { %v4500_v47 = vpop.f32.mrf.mxu3  ;;  %v4325_v6 = vadd.f32 %v4324_v9, %v4235_v7 }
 0x578   :  { %v8289_v4 = vadd.f32 %v4500_v47, %v4412_v27 }
 0x57a   :  { %8894 = vst [vmem:[#allocation64_spill] sm:$0xff] %v8289_v4 }
 0x57d   :  { %v4413_v62 = vpop.f32.mrf.mxu2  ;;  %v4238_v44 = vpop.f32.mrf.mxu0 }
 0x57e   :  { %v4414_v14 = vadd.f32 %v4413_v62, %v4325_v6  ;;  %v4327_v23 = vpop.f32.mrf.mxu1 }
 0x57f   :  { %v4502_v12 = vpop.f32.mrf.mxu3  ;;  %v4328_v15 = vadd.f32 %v4327_v23, %v4238_v44 }
 0x580   :  { %v8291_v21 = vadd.f32 %v4502_v12, %v4414_v14  ;;  %4553 = vmatmul.bf16.gmra.mxu0 %v8896_v49 }
 0x581   :  { %4642 = vmatmul.bf16.gmra.mxu1 %v8897_v53 }
 0x582   :  { %8895 = vst [vmem:[#allocation65_spill] sm:$0xff] %v8291_v21  ;;  %4731 = vmatmul.bf16.gmra.mxu2 %v8898_v19  ;;  %v8901_v21 = vld [vmem:[#allocation27_spill] sm:$0xff]  ;;  %v8902_v19 = vld [vmem:[#allocation28_spill] sm:$0xff] }
 0x584   :  { %4820 = vmatmul.bf16.gmra.mxu3 %v8899_v5  ;;  %v8903_v5 = vld [vmem:[#allocation48_spill] sm:$0xff] }
 0x585   :  { %v4416_v54 = vpop.f32.mrf.mxu2  ;;  %v4240_v7 = vpop.f32.mrf.mxu0 }
 0x586   :  { %v4417_v27 = vadd.f32 %v4416_v54, %v4328_v15  ;;  %v4329_v9 = vpop.f32.mrf.mxu1  ;;  %v8904_v15 = vld [vmem:[#allocation49_spill] sm:$0xff] }
 0x587   :  { %v4505_v47 = vpop.f32.mrf.mxu3  ;;  %v4330_v6 = vadd.f32 %v4329_v9, %v4240_v7 }
 0x588   :  { %v8297_v62 = vadd.f32 %v4505_v47, %v4417_v27 }
 0x58a   :  { %8900 = vst [vmem:[#allocation66_spill] sm:$0xff] %v8297_v62 }
 0x58d   :  { %v4418_v4 = vpop.f32.mrf.mxu2  ;;  %v4243_v44 = vpop.f32.mrf.mxu0 }
 0x58e   :  { %v4419_v14 = vadd.f32 %v4418_v4, %v4330_v6  ;;  %v4332_v23 = vpop.f32.mrf.mxu1 }
 0x58f   :  { %v4507_v12 = vpop.f32.mrf.mxu3  ;;  %v4333_v53 = vadd.f32 %v4332_v23, %v4243_v44 }
 0x590   :  { %v8299_v49 = vadd.f32 %v4507_v12, %v4419_v14  ;;  %4558 = vmatmul.bf16.gmra.mxu0 %v8901_v21 }
 0x591   :  { %4647 = vmatmul.bf16.gmra.mxu1 %v8902_v19 }
 0x592   :  { %4736 = vmatmul.bf16.gmra.mxu2 %v8903_v5  ;;  %v8906_v5 = vld [vmem:[#allocation30_spill] sm:$0xff] }
 0x594   :  { %4825 = vmatmul.bf16.gmra.mxu3 %v8904_v15  ;;  %v8907_v15 = vld [vmem:[#allocation50_spill] sm:$0xff] }
 0x595   :  { %v4421_v54 = vpop.f32.mrf.mxu2  ;;  %v4245_v7 = vpop.f32.mrf.mxu0 }
 0x596   :  { %v4422_v27 = vadd.f32 %v4421_v54, %v4333_v53  ;;  %v4334_v9 = vpop.f32.mrf.mxu1  ;;  %v8908_v53 = vld [vmem:[#allocation51_spill] sm:$0xff] }
 0x597   :  { %v4510_v47 = vpop.f32.mrf.mxu3  ;;  %v4335_v6 = vadd.f32 %v4334_v9, %v4245_v7 }
 0x598   :  { %v8305_v4 = vadd.f32 %v4510_v47, %v4422_v27 }
 0x59a   :  { %8905 = vst [vmem:[#allocation67_spill] sm:$0xff] %v8305_v4 }
 0x59d   :  { %v4423_v62 = vpop.f32.mrf.mxu2  ;;  %v4248_v44 = vpop.f32.mrf.mxu0 }
 0x59e   :  { %v4424_v14 = vadd.f32 %v4423_v62, %v4335_v6  ;;  %v4337_v23 = vpop.f32.mrf.mxu1 }
 0x59f   :  { %v4512_v12 = vpop.f32.mrf.mxu3  ;;  %v4338_v19 = vadd.f32 %v4337_v23, %v4248_v44 }
 0x5a0   :  { %v8307_v21 = vadd.f32 %v4512_v12, %v4424_v14  ;;  %4563 = vmatmul.bf16.gmra.mxu0 %v8857_v63 }
 0x5a1   :  { %4652 = vmatmul.bf16.gmra.mxu1 %v8906_v5 }
 0x5a2   :  { %4741 = vmatmul.bf16.gmra.mxu2 %v8907_v15 }
 0x5a4   :  { %4830 = vmatmul.bf16.gmra.mxu3 %v8908_v53 }
 0x5a5   :  { %v4426_v54 = vpop.f32.mrf.mxu2  ;;  %v4250_v7 = vpop.f32.mrf.mxu0 }
 0x5a6   :  { %v4427_v27 = vadd.f32 %v4426_v54, %v4338_v19  ;;  %v4339_v9 = vpop.f32.mrf.mxu1 }
 0x5a7   :  { %v4515_v47 = vpop.f32.mrf.mxu3  ;;  %v4340_v6 = vadd.f32 %v4339_v9, %v4250_v7 }
 0x5a8   :  { %v8313_v62 = vadd.f32 %v4515_v47, %v4427_v27 }
 0x5ad   :  { %v4428_v4 = vpop.f32.mrf.mxu2  ;;  %v4253_v44 = vpop.f32.mrf.mxu0 }
 0x5ae   :  { %v4429_v14 = vadd.f32 %v4428_v4, %v4340_v6  ;;  %v4342_v23 = vpop.f32.mrf.mxu1 }
 0x5af   :  { %v4517_v12 = vpop.f32.mrf.mxu3  ;;  %v4343_v5 = vadd.f32 %v4342_v23, %v4253_v44 }
 0x5b0   :  { %v8315_v63 = vadd.f32 %v4517_v12, %v4429_v14  ;;  %4568 = vmatmul.bf16.gmra.mxu0 %v7525_v0 }
 0x5b1   :  { %4657 = vmatmul.bf16.gmra.mxu1 %v7540_v10 }
 0x5b2   :  { %4746 = vmatmul.bf16.gmra.mxu2 %v7973_v57 }
 0x5b4   :  { %4835 = vmatmul.bf16.gmra.mxu3 %v7988_v38 }
 0x5b5   :  { %v4431_v19 = vpop.f32.mrf.mxu2  ;;  %v4255_v54 = vpop.f32.mrf.mxu0 }
 0x5b6   :  { %v4432_v15 = vadd.f32 %v4431_v19, %v4343_v5  ;;  %v4344_v27 = vpop.f32.mrf.mxu1 }
 0x5b7   :  { %v4520_v53 = vpop.f32.mrf.mxu3  ;;  %v4345_v47 = vadd.f32 %v4344_v27, %v4255_v54 }
 0x5b8   :  { %v8321_v4 = vadd.f32 %v4520_v53, %v4432_v15 }
 0x5bd   :  { %v4433_v7 = vpop.f32.mrf.mxu2  ;;  %v4258_v14 = vpop.f32.mrf.mxu0 }
 0x5be   :  { %v4434_v9 = vadd.f32 %v4433_v7, %v4345_v47  ;;  %v4347_v12 = vpop.f32.mrf.mxu1 }
 0x5bf   :  { %v4522_v6 = vpop.f32.mrf.mxu3  ;;  %v4348_v10 = vadd.f32 %v4347_v12, %v4258_v14 }
 0x5c0   :  { %v8323_v0 = vadd.f32 %v4522_v6, %v4434_v9  ;;  %4573 = vmatmul.bf16.gmra.mxu0 %v8864_v50 }
 0x5c1   :  { %4662 = vmatmul.bf16.gmra.mxu1 %v8865_v20 }
 0x5c2   :  { %4751 = vmatmul.bf16.gmra.mxu2 %v8001_v58 }
 0x5c4   :  { %4840 = vmatmul.bf16.gmra.mxu3 %v8016_v13 }
 0x5c5   :  { %v4436_v57 = vpop.f32.mrf.mxu2  ;;  %v4260_v23 = vpop.f32.mrf.mxu0 }
 0x5c6   :  { %v4437_v38 = vadd.f32 %v4436_v57, %v4348_v10  ;;  %v4349_v5 = vpop.f32.mrf.mxu1 }
 0x5c7   :  { %v4525_v44 = vpop.f32.mrf.mxu3  ;;  %v4350_v15 = vadd.f32 %v4349_v5, %v4260_v23 }
 0x5c8   :  { %v8329_v19 = vadd.f32 %v4525_v44, %v4437_v38 }
 0x5cd   :  { %v4438_v53 = vpop.f32.mrf.mxu2  ;;  %v4539_v47 = vpop.f32.mrf.mxu0 }
 0x5ce   :  { %v4439_v54 = vadd.f32 %v4438_v53, %v4350_v15  ;;  %v4628_v7 = vpop.f32.mrf.mxu1 }
 0x5cf   :  { %v4527_v27 = vpop.f32.mrf.mxu3  ;;  %v4629_v58 = vadd.f32 %v4628_v7, %v4539_v47 }
 0x5d0   :  { %v8331_v50 = vadd.f32 %v4527_v27, %v4439_v54  ;;  %4578 = vmatmul.bf16.gmra.mxu0 %v7581_v55 }
 0x5d1   :  { %4667 = vmatmul.bf16.gmra.mxu1 %v7596_v59 }
 0x5d2   :  { %4756 = vmatmul.bf16.gmra.mxu2 %v8029_v8 }
 0x5d4   :  { %4845 = vmatmul.bf16.gmra.mxu3 %v8044_v18 }
 0x5d5   :  { %v4717_v13 = vpop.f32.mrf.mxu2  ;;  %v4541_v6 = vpop.f32.mrf.mxu0 }
 0x5d6   :  { %v4718_v20 = vadd.f32 %v4717_v13, %v4629_v58  ;;  %v4630_v14 = vpop.f32.mrf.mxu1 }
 0x5d7   :  { %v4806_v9 = vpop.f32.mrf.mxu3  ;;  %v4631_v57 = vadd.f32 %v4630_v14, %v4541_v6 }
 0x5d8   :  { %v4807_v12 = vadd.f32 %v4806_v9, %v4718_v20 }
 0x5da   :  { %v5217_v10 = vpack.c.bf16 %v4807_v12, %v8209_v30 }
 0x5dc   :  { %5249 = vst [vmem:[#allocation9] sm:$0xff] %v5217_v10 }
 0x5dd   :  { %v4719_v38 = vpop.f32.mrf.mxu2  ;;  %v4544_v23 = vpop.f32.mrf.mxu0 }
 0x5de   :  { %v4720_v44 = vadd.f32 %v4719_v38, %v4631_v57  ;;  %v4633_v59 = vpop.f32.mrf.mxu1 }
 0x5df   :  { %v4808_v55 = vpop.f32.mrf.mxu3  ;;  %v4634_v18 = vadd.f32 %v4633_v59, %v4544_v23 }
 0x5e0   :  { %v4809_v5 = vadd.f32 %v4808_v55, %v4720_v44  ;;  %4583 = vmatmul.bf16.gmra.mxu0 %v7609_v1 }
 0x5e1   :  { %4672 = vmatmul.bf16.gmra.mxu1 %v7624_v22 }
 0x5e2   :  { %v5218_v8 = vpack.c.bf16 %v4809_v5, %v8211_v29  ;;  %4761 = vmatmul.bf16.gmra.mxu2 %v8057_v3 }
 0x5e4   :  { %4850 = vmatmul.bf16.gmra.mxu3 %v8072_v61  ;;  %5250 = vst [vmem:[#allocation9 + $0x8] sm:$0xff] %v5218_v8 }
 0x5e5   :  { %v4722_v30 = vpop.f32.mrf.mxu2  ;;  %v4546_v54 = vpop.f32.mrf.mxu0 }
 0x5e6   :  { %v4723_v15 = vadd.f32 %v4722_v30, %v4634_v18  ;;  %v4635_v27 = vpop.f32.mrf.mxu1 }
 0x5e7   :  { %v4811_v53 = vpop.f32.mrf.mxu3  ;;  %v4636_v1 = vadd.f32 %v4635_v27, %v4546_v54 }
 0x5e8   :  { %v4812_v47 = vadd.f32 %v4811_v53, %v4723_v15 }
 0x5ea   :  { %v5219_v7 = vpack.c.bf16 %v4812_v47, %v8217_v39 }
 0x5ec   :  { %5251 = vst [vmem:[#allocation9 + $0x10] sm:$0xff] %v5219_v7 }
 0x5ed   :  { %v4724_v58 = vpop.f32.mrf.mxu2  ;;  %v4549_v22 = vpop.f32.mrf.mxu0 }
 0x5ee   :  { %v4725_v29 = vadd.f32 %v4724_v58, %v4636_v1  ;;  %v4638_v20 = vpop.f32.mrf.mxu1 }
 0x5ef   :  { %v4813_v13 = vpop.f32.mrf.mxu3  ;;  %v4639_v39 = vadd.f32 %v4638_v20, %v4549_v22 }
 0x5f0   :  { %v4814_v3 = vadd.f32 %v4813_v13, %v4725_v29  ;;  %4588 = vmatmul.bf16.gmra.mxu0 %v7637_v60 }
 0x5f1   :  { %4677 = vmatmul.bf16.gmra.mxu1 %v7652_v28 }
 0x5f2   :  { %v5220_v61 = vpack.c.bf16 %v4814_v3, %v8219_v11  ;;  %4766 = vmatmul.bf16.gmra.mxu2 %v8085_v33 }
 0x5f4   :  { %4855 = vmatmul.bf16.gmra.mxu3 %v8100_v51  ;;  %5252 = vst [vmem:[#allocation9 + $0x18] sm:$0xff] %v5220_v61 }
 0x5f5   :  { %v4727_v9 = vpop.f32.mrf.mxu2  ;;  %v4551_v12 = vpop.f32.mrf.mxu0 }
 0x5f6   :  { %v4728_v6 = vadd.f32 %v4727_v9, %v4639_v39  ;;  %v4640_v10 = vpop.f32.mrf.mxu1  ;;  %v8909_v9 = vld [vmem:[#allocation52_spill] sm:$0xff] }
 0x5f7   :  { %v4816_v14 = vpop.f32.mrf.mxu3  ;;  %v4641_v60 = vadd.f32 %v4640_v10, %v4551_v12 }
 0x5f8   :  { %v4817_v57 = vadd.f32 %v4816_v14, %v4728_v6 }
 0x5fa   :  { %v5221_v38 = vpack.c.bf16 %v4817_v57, %v8225_v42 }
 0x5fc   :  { %5253 = vst [vmem:[#allocation9 + $0x20] sm:$0xff] %v5221_v38 }
 0x5fd   :  { %v4729_v44 = vpop.f32.mrf.mxu2  ;;  %v4554_v28 = vpop.f32.mrf.mxu0 }
 0x5fe   :  { %v4730_v11 = vadd.f32 %v4729_v44, %v4641_v60  ;;  %v4643_v23 = vpop.f32.mrf.mxu1 }
 0x5ff   :  { %v4818_v55 = vpop.f32.mrf.mxu3  ;;  %v4644_v42 = vadd.f32 %v4643_v23, %v4554_v28  ;;  %v8910_v23 = vld [vmem:[#allocation36_spill] sm:$0xff] }
 0x600   :  { %v4819_v33 = vadd.f32 %v4818_v55, %v4730_v11  ;;  %4593 = vmatmul.bf16.gmra.mxu0 %v7665_v31 }
 0x601   :  { %4682 = vmatmul.bf16.gmra.mxu1 %v7680_v16 }
 0x602   :  { %v5222_v51 = vpack.c.bf16 %v4819_v33, %v8227_v46  ;;  %4771 = vmatmul.bf16.gmra.mxu2 %v8113_v40 }
 0x604   :  { %4860 = vmatmul.bf16.gmra.mxu3 %v8128_v25  ;;  %5254 = vst [vmem:[#allocation9 + $0x28] sm:$0xff] %v5222_v51  ;;  %v8912_v51 = vld [vmem:[#allocation37_spill] sm:$0xff] }
 0x605   :  { %v4732_v59 = vpop.f32.mrf.mxu2  ;;  %v4556_v18 = vpop.f32.mrf.mxu0 }
 0x606   :  { %v4733_v5 = vadd.f32 %v4732_v59, %v4644_v42  ;;  %v4645_v30 = vpop.f32.mrf.mxu1  ;;  %v8913_v42 = vld [vmem:[#allocation53_spill] sm:$0xff] }
 0x607   :  { %v4821_v8 = vpop.f32.mrf.mxu3  ;;  %v4646_v31 = vadd.f32 %v4645_v30, %v4556_v18 }
 0x608   :  { %v4822_v15 = vadd.f32 %v4821_v8, %v4733_v5 }
 0x60a   :  { %v5223_v53 = vpack.c.bf16 %v4822_v15, %v8233_v52 }
 0x60c   :  { %5255 = vst [vmem:[#allocation9 + $0x30] sm:$0xff] %v5223_v53 }
 0x60d   :  { %v4734_v54 = vpop.f32.mrf.mxu2  ;;  %v4559_v16 = vpop.f32.mrf.mxu0 }
 0x60e   :  { %v4735_v46 = vadd.f32 %v4734_v54, %v4646_v31  ;;  %v4648_v47 = vpop.f32.mrf.mxu1 }
 0x60f   :  { %v4823_v27 = vpop.f32.mrf.mxu3  ;;  %v4649_v52 = vadd.f32 %v4648_v47, %v4559_v16 }
 0x610   :  { %v4824_v40 = vadd.f32 %v4823_v27, %v4735_v46  ;;  %4598 = vmatmul.bf16.gmra.mxu0 %v7693_v45 }
 0x611   :  { %4687 = vmatmul.bf16.gmra.mxu1 %v8868_v24 }
 0x612   :  { %v5224_v25 = vpack.c.bf16 %v4824_v40, %v8235_v34  ;;  %4776 = vmatmul.bf16.gmra.mxu2 %v8142_v48 }
 0x614   :  { %4865 = vmatmul.bf16.gmra.mxu3 %v8156_v43  ;;  %5256 = vst [vmem:[#allocation9 + $0x38] sm:$0xff] %v5224_v25 }
 0x615   :  { %v4737_v7 = vpop.f32.mrf.mxu2  ;;  %v4561_v29 = vpop.f32.mrf.mxu0 }
 0x616   :  { %v4738_v1 = vadd.f32 %v4737_v7, %v4649_v52  ;;  %v4650_v13 = vpop.f32.mrf.mxu1  ;;  %v8915_v52 = vld [vmem:[#allocation39_spill] sm:$0xff]  ;;  %v8916_v7 = vld [vmem:[#allocation54_spill] sm:$0xff] }
 0x617   :  { %v4826_v58 = vpop.f32.mrf.mxu3  ;;  %v4651_v45 = vadd.f32 %v4650_v13, %v4561_v29 }
 0x618   :  { %v4827_v22 = vadd.f32 %v4826_v58, %v4738_v1  ;;  %v8917_v1 = vld [vmem:[#allocation55_spill] sm:$0xff] }
 0x61a   :  { %v5225_v20 = vpack.c.bf16 %v4827_v22, %v8241_v41 }
 0x61c   :  { %5257 = vst [vmem:[#allocation9 + $0x40] sm:$0xff] %v5225_v20 }
 0x61d   :  { %v4739_v3 = vpop.f32.mrf.mxu2  ;;  %v4564_v24 = vpop.f32.mrf.mxu0 }
 0x61e   :  { %v4740_v34 = vadd.f32 %v4739_v3, %v4651_v45  ;;  %v4653_v39 = vpop.f32.mrf.mxu1  ;;  %v8918_v3 = vld [vmem:[#allocation58_spill] sm:$0xff] }
 0x61f   :  { %v4828_v61 = vpop.f32.mrf.mxu3  ;;  %v4654_v41 = vadd.f32 %v4653_v39, %v4564_v24 }
 0x620   :  { %v4829_v48 = vadd.f32 %v4828_v61, %v4740_v34  ;;  %4603 = vmatmul.bf16.gmra.mxu0 %v8869_v32 }
 0x621   :  { %4692 = vmatmul.bf16.gmra.mxu1 %v8870_v56 }
 0x622   :  { %v5226_v43 = vpack.c.bf16 %v4829_v48, %v8243_v26  ;;  %4781 = vmatmul.bf16.gmra.mxu2 %v8909_v9 }
 0x624   :  { %4870 = vmatmul.bf16.gmra.mxu3 %v8182_v17  ;;  %5258 = vst [vmem:[#allocation9 + $0x48] sm:$0xff] %v5226_v43  ;;  %v8911_v17 = vld [vmem:[#allocation56_spill] sm:$0xff] }
 0x625   :  { %v4742_v6 = vpop.f32.mrf.mxu2  ;;  %v4566_v10 = vpop.f32.mrf.mxu0 }
 0x626   :  { %v4743_v14 = vadd.f32 %v4742_v6, %v4654_v41  ;;  %v4655_v57 = vpop.f32.mrf.mxu1  ;;  %v8919_v41 = vld [vmem:[#allocation59_spill] sm:$0xff] }
 0x627   :  { %v4831_v12 = vpop.f32.mrf.mxu3  ;;  %v4656_v32 = vadd.f32 %v4655_v57, %v4566_v10 }
 0x628   :  { %v4832_v38 = vadd.f32 %v4831_v12, %v4743_v14 }
 0x62a   :  { %v5227_v60 = vpack.c.bf16 %v4832_v38, %v8249_v36 }
 0x62c   :  { %5259 = vst [vmem:[#allocation9 + $0x50] sm:$0xff] %v5227_v60 }
 0x62d   :  { %v4744_v44 = vpop.f32.mrf.mxu2  ;;  %v4569_v56 = vpop.f32.mrf.mxu0 }
 0x62e   :  { %v4745_v26 = vadd.f32 %v4744_v44, %v4656_v32  ;;  %v4658_v55 = vpop.f32.mrf.mxu1  ;;  %v8920_v44 = vld [vmem:[#allocation60_spill] sm:$0xff] }
 0x62f   :  { %v4833_v11 = vpop.f32.mrf.mxu3  ;;  %v4659_v36 = vadd.f32 %v4658_v55, %v4569_v56 }
 0x630   :  { %v4834_v28 = vadd.f32 %v4833_v11, %v4745_v26  ;;  %4608 = vmatmul.bf16.gmra.mxu0 %v8910_v23 }
 0x631   :  { %4697 = vmatmul.bf16.gmra.mxu1 %v8912_v51  ;;  %v8921_v51 = vld [vmem:[#allocation61_spill] sm:$0xff] }
 0x632   :  { %v5228_v33 = vpack.c.bf16 %v4834_v28, %v8911_v17  ;;  %4786 = vmatmul.bf16.gmra.mxu2 %v8913_v42 }
 0x634   :  { %4875 = vmatmul.bf16.gmra.mxu3 %v8196_v2  ;;  %5260 = vst [vmem:[#allocation9 + $0x58] sm:$0xff] %v5228_v33  ;;  %v8914_v2 = vld [vmem:[#allocation57_spill] sm:$0xff] }
 0x635   :  { %v4747_v59 = vpop.f32.mrf.mxu2  ;;  %v4571_v18 = vpop.f32.mrf.mxu0 }
 0x636   :  { %v4748_v5 = vadd.f32 %v4747_v59, %v4659_v36  ;;  %v4660_v30 = vpop.f32.mrf.mxu1 }
 0x637   :  { %v4836_v8 = vpop.f32.mrf.mxu3  ;;  %v4661_v31 = vadd.f32 %v4660_v30, %v4571_v18 }
 0x638   :  { %v4837_v15 = vadd.f32 %v4836_v8, %v4748_v5 }
 0x63a   :  { %v5229_v53 = vpack.c.bf16 %v4837_v15, %v8257_v37 }
 0x63c   :  { %5261 = vst [vmem:[#allocation9 + $0x60] sm:$0xff] %v5229_v53  ;;  %v8922_v53 = vld [vmem:[#allocation62_spill] sm:$0xff] }
 0x63d   :  { %v4749_v54 = vpop.f32.mrf.mxu2  ;;  %v4574_v16 = vpop.f32.mrf.mxu0 }
 0x63e   :  { %v4750_v46 = vadd.f32 %v4749_v54, %v4661_v31  ;;  %v4663_v47 = vpop.f32.mrf.mxu1 }
 0x63f   :  { %v4838_v27 = vpop.f32.mrf.mxu3  ;;  %v4664_v37 = vadd.f32 %v4663_v47, %v4574_v16 }
 0x640   :  { %v4839_v40 = vadd.f32 %v4838_v27, %v4750_v46  ;;  %4613 = vmatmul.bf16.gmra.mxu0 %v8875_v35 }
 0x641   :  { %4702 = vmatmul.bf16.gmra.mxu1 %v8915_v52 }
 0x642   :  { %v5230_v25 = vpack.c.bf16 %v4839_v40, %v8914_v2  ;;  %4791 = vmatmul.bf16.gmra.mxu2 %v8916_v7 }
 0x644   :  { %4880 = vmatmul.bf16.gmra.mxu3 %v8917_v1  ;;  %5262 = vst [vmem:[#allocation9 + $0x68] sm:$0xff] %v5230_v25  ;;  %v8923_v25 = vld [vmem:[#allocation63_spill] sm:$0xff] }
 0x645   :  { %v4752_v58 = vpop.f32.mrf.mxu2  ;;  %v4576_v22 = vpop.f32.mrf.mxu0 }
 0x646   :  { %v4753_v29 = vadd.f32 %v4752_v58, %v4664_v37  ;;  %v4665_v20 = vpop.f32.mrf.mxu1 }
 0x647   :  { %v4841_v13 = vpop.f32.mrf.mxu3  ;;  %v4666_v35 = vadd.f32 %v4665_v20, %v4576_v22  ;;  %v8924_v20 = vld [vmem:[#allocation64_spill] sm:$0xff] }
 0x648   :  { %v4842_v45 = vadd.f32 %v4841_v13, %v4753_v29 }
 0x64a   :  { %v5231_v34 = vpack.c.bf16 %v4842_v45, %v8918_v3 }
 0x64c   :  { %5263 = vst [vmem:[#allocation9 + $0x70] sm:$0xff] %v5231_v34 }
 0x64d   :  { %v4754_v61 = vpop.f32.mrf.mxu2  ;;  %v4579_v48 = vpop.f32.mrf.mxu0 }
 0x64e   :  { %v4755_v24 = vadd.f32 %v4754_v61, %v4666_v35  ;;  %v4668_v43 = vpop.f32.mrf.mxu1 }
 0x64f   :  { %v4843_v39 = vpop.f32.mrf.mxu3  ;;  %v4669_v14 = vadd.f32 %v4668_v43, %v4579_v48  ;;  %v8925_v43 = vld [vmem:[#allocation65_spill] sm:$0xff] }
 0x650   :  { %v4844_v9 = vadd.f32 %v4843_v39, %v4755_v24 }
 0x652   :  { %v5232_v6 = vpack.c.bf16 %v4844_v9, %v8919_v41 }
 0x654   :  { %5264 = vst [vmem:[#allocation9 + $0x78] sm:$0xff] %v5232_v6 }
 0x655   :  { %v4757_v12 = vpop.f32.mrf.mxu2  ;;  %v4581_v38 = vpop.f32.mrf.mxu0 }
 0x656   :  { %v4758_v10 = vadd.f32 %v4757_v12, %v4669_v14  ;;  %v4670_v60 = vpop.f32.mrf.mxu1 }
 0x657   :  { %v4846_v57 = vpop.f32.mrf.mxu3  ;;  %v4671_v11 = vadd.f32 %v4670_v60, %v4581_v38  ;;  %v8926_v60 = vld [vmem:[#allocation66_spill] sm:$0xff] }
 0x658   :  { %v4847_v32 = vadd.f32 %v4846_v57, %v4758_v10 }
 0x65a   :  { %v5233_v26 = vpack.c.bf16 %v4847_v32, %v8920_v44 }
 0x65c   :  { %5265 = vst [vmem:[#allocation9 + $0x80] sm:$0xff] %v5233_v26 }
 0x65d   :  { %v4759_v56 = vpop.f32.mrf.mxu2  ;;  %v4584_v23 = vpop.f32.mrf.mxu0 }
 0x65e   :  { %v4760_v55 = vadd.f32 %v4759_v56, %v4671_v11  ;;  %v4673_v17 = vpop.f32.mrf.mxu1 }
 0x65f   :  { %v4848_v28 = vpop.f32.mrf.mxu3  ;;  %v4674_v36 = vadd.f32 %v4673_v17, %v4584_v23 }
 0x660   :  { %v4849_v33 = vadd.f32 %v4848_v28, %v4760_v55 }
 0x662   :  { %v5234_v42 = vpack.c.bf16 %v4849_v33, %v8921_v51 }
 0x664   :  { %5266 = vst [vmem:[#allocation9 + $0x88] sm:$0xff] %v5234_v42 }
 0x665   :  { %v4762_v59 = vpop.f32.mrf.mxu2  ;;  %v4586_v18 = vpop.f32.mrf.mxu0 }
 0x666   :  { %v4763_v5 = vadd.f32 %v4762_v59, %v4674_v36  ;;  %v4675_v30 = vpop.f32.mrf.mxu1 }
 0x667   :  { %v4851_v8 = vpop.f32.mrf.mxu3  ;;  %v4676_v54 = vadd.f32 %v4675_v30, %v4586_v18  ;;  %v8927_v18 = vld [vmem:[#allocation67_spill] sm:$0xff] }
 0x668   :  { %v4852_v15 = vadd.f32 %v4851_v8, %v4763_v5 }
 0x66a   :  { %v5235_v31 = vpack.c.bf16 %v4852_v15, %v8922_v53 }
 0x66c   :  { %5267 = vst [vmem:[#allocation9 + $0x90] sm:$0xff] %v5235_v31 }
 0x66d   :  { %v4764_v46 = vpop.f32.mrf.mxu2  ;;  %v4589_v47 = vpop.f32.mrf.mxu0 }
 0x66e   :  { %v4765_v27 = vadd.f32 %v4764_v46, %v4676_v54  ;;  %v4678_v40 = vpop.f32.mrf.mxu1 }
 0x66f   :  { %v4853_v16 = vpop.f32.mrf.mxu3  ;;  %v4679_v7 = vadd.f32 %v4678_v40, %v4589_v47 }
 0x670   :  { %v4854_v2 = vadd.f32 %v4853_v16, %v4765_v27 }
 0x672   :  { %v5236_v52 = vpack.c.bf16 %v4854_v2, %v8923_v25 }
 0x674   :  { %5268 = vst [vmem:[#allocation9 + $0x98] sm:$0xff] %v5236_v52 }
 0x675   :  { %v4767_v1 = vpop.f32.mrf.mxu2  ;;  %v4591_v29 = vpop.f32.mrf.mxu0 }
 0x676   :  { %v4768_v37 = vadd.f32 %v4767_v1, %v4679_v7  ;;  %v4680_v13 = vpop.f32.mrf.mxu1 }
 0x677   :  { %v4856_v58 = vpop.f32.mrf.mxu3  ;;  %v4681_v3 = vadd.f32 %v4680_v13, %v4591_v29 }
 0x678   :  { %v4857_v22 = vadd.f32 %v4856_v58, %v4768_v37 }
 0x67a   :  { %v5237_v45 = vpack.c.bf16 %v4857_v22, %v8924_v20 }
 0x67c   :  { %5269 = vst [vmem:[#allocation9 + $0xa0] sm:$0xff] %v5237_v45 }
 0x67d   :  { %v4769_v34 = vpop.f32.mrf.mxu2  ;;  %v4594_v24 = vpop.f32.mrf.mxu0 }
 0x67e   :  { %v4770_v35 = vadd.f32 %v4769_v34, %v4681_v3  ;;  %v4683_v39 = vpop.f32.mrf.mxu1 }
 0x67f   :  { %v4858_v61 = vpop.f32.mrf.mxu3  ;;  %v4684_v41 = vadd.f32 %v4683_v39, %v4594_v24 }
 0x680   :  { %v4859_v48 = vadd.f32 %v4858_v61, %v4770_v35 }
 0x682   :  { %v5238_v9 = vpack.c.bf16 %v4859_v48, %v8925_v43 }
 0x684   :  { %5270 = vst [vmem:[#allocation9 + $0xa8] sm:$0xff] %v5238_v9 }
 0x685   :  { %v4772_v6 = vpop.f32.mrf.mxu2  ;;  %v4596_v10 = vpop.f32.mrf.mxu0 }
 0x686   :  { %v4773_v14 = vadd.f32 %v4772_v6, %v4684_v41  ;;  %v4685_v57 = vpop.f32.mrf.mxu1 }
 0x687   :  { %v4861_v12 = vpop.f32.mrf.mxu3  ;;  %v4686_v44 = vadd.f32 %v4685_v57, %v4596_v10 }
 0x688   :  { %v4862_v38 = vadd.f32 %v4861_v12, %v4773_v14 }
 0x68a   :  { %v5239_v32 = vpack.c.bf16 %v4862_v38, %v8926_v60 }
 0x68c   :  { %5271 = vst [vmem:[#allocation9 + $0xb0] sm:$0xff] %v5239_v32 }
 0x68d   :  { %v4774_v26 = vpop.f32.mrf.mxu2  ;;  %v4599_v55 = vpop.f32.mrf.mxu0 }
 0x68e   :  { %v4775_v11 = vadd.f32 %v4774_v26, %v4686_v44  ;;  %v4688_v28 = vpop.f32.mrf.mxu1 }
 0x68f   :  { %v4863_v56 = vpop.f32.mrf.mxu3  ;;  %v4689_v33 = vadd.f32 %v4688_v28, %v4599_v55 }
 0x690   :  { %v4864_v23 = vadd.f32 %v4863_v56, %v4775_v11 }
 0x692   :  { %v5240_v17 = vpack.c.bf16 %v4864_v23, %v8299_v49 }
 0x694   :  { %5272 = vst [vmem:[#allocation9 + $0xb8] sm:$0xff] %v5240_v17 }
 0x695   :  { %v4777_v51 = vpop.f32.mrf.mxu2  ;;  %v4601_v59 = vpop.f32.mrf.mxu0 }
 0x696   :  { %v4778_v42 = vadd.f32 %v4777_v51, %v4689_v33  ;;  %v4690_v5 = vpop.f32.mrf.mxu1 }
 0x697   :  { %v4866_v36 = vpop.f32.mrf.mxu3  ;;  %v4691_v15 = vadd.f32 %v4690_v5, %v4601_v59 }
 0x698   :  { %v4867_v8 = vadd.f32 %v4866_v36, %v4778_v42 }
 0x69a   :  { %v5241_v30 = vpack.c.bf16 %v4867_v8, %v8927_v18 }
 0x69c   :  { %5273 = vst [vmem:[#allocation9 + $0xc0] sm:$0xff] %v5241_v30 }
 0x69d   :  { %v4779_v53 = vpop.f32.mrf.mxu2  ;;  %v4604_v46 = vpop.f32.mrf.mxu0 }
 0x69e   :  { %v4780_v31 = vadd.f32 %v4779_v53, %v4691_v15  ;;  %v4693_v27 = vpop.f32.mrf.mxu1 }
 0x69f   :  { %v4868_v54 = vpop.f32.mrf.mxu3  ;;  %v4694_v47 = vadd.f32 %v4693_v27, %v4604_v46 }
 0x6a0   :  { %v4869_v16 = vadd.f32 %v4868_v54, %v4780_v31 }
 0x6a2   :  { %v5242_v49 = vpack.c.bf16 %v4869_v16, %v8307_v21 }
 0x6a4   :  { %5274 = vst [vmem:[#allocation9 + $0xc8] sm:$0xff] %v5242_v49 }
 0x6a5   :  { %v4782_v40 = vpop.f32.mrf.mxu2  ;;  %v4606_v52 = vpop.f32.mrf.mxu0 }
 0x6a6   :  { %v4783_v2 = vadd.f32 %v4782_v40, %v4694_v47  ;;  %v4695_v7 = vpop.f32.mrf.mxu1 }
 0x6a7   :  { %v4871_v25 = vpop.f32.mrf.mxu3  ;;  %v4696_v58 = vadd.f32 %v4695_v7, %v4606_v52 }
 0x6a8   :  { %v4872_v1 = vadd.f32 %v4871_v25, %v4783_v2 }
 0x6aa   :  { %v5243_v37 = vpack.c.bf16 %v4872_v1, %v8313_v62 }
 0x6ac   :  { %5275 = vst [vmem:[#allocation9 + $0xd0] sm:$0xff] %v5243_v37 }
 0x6ad   :  { %v4784_v29 = vpop.f32.mrf.mxu2  ;;  %v4609_v20 = vpop.f32.mrf.mxu0 }
 0x6ae   :  { %v4785_v13 = vadd.f32 %v4784_v29, %v4696_v58  ;;  %v4698_v45 = vpop.f32.mrf.mxu1 }
 0x6af   :  { %v4873_v22 = vpop.f32.mrf.mxu3  ;;  %v4699_v34 = vadd.f32 %v4698_v45, %v4609_v20 }
 0x6b0   :  { %v4874_v3 = vadd.f32 %v4873_v22, %v4785_v13 }
 0x6b2   :  { %v5244_v21 = vpack.c.bf16 %v4874_v3, %v8315_v63 }
 0x6b4   :  { %5276 = vst [vmem:[#allocation9 + $0xd8] sm:$0xff] %v5244_v21 }
 0x6b5   :  { %v4787_v35 = vpop.f32.mrf.mxu2  ;;  %v4611_v39 = vpop.f32.mrf.mxu0 }
 0x6b6   :  { %v4788_v61 = vadd.f32 %v4787_v35, %v4699_v34  ;;  %v4700_v48 = vpop.f32.mrf.mxu1 }
 0x6b7   :  { %v4876_v24 = vpop.f32.mrf.mxu3  ;;  %v4701_v9 = vadd.f32 %v4700_v48, %v4611_v39 }
 0x6b8   :  { %v4877_v43 = vadd.f32 %v4876_v24, %v4788_v61 }
 0x6ba   :  { %v5245_v62 = vpack.c.bf16 %v4877_v43, %v8321_v4 }
 0x6bc   :  { %5277 = vst [vmem:[#allocation9 + $0xe0] sm:$0xff] %v5245_v62 }
 0x6bd   :  { %v4789_v41 = vpop.f32.mrf.mxu2  ;;  %v4614_v12 = vpop.f32.mrf.mxu0 }
 0x6be   :  { %v4790_v6 = vadd.f32 %v4789_v41, %v4701_v9  ;;  %v4703_v10 = vpop.f32.mrf.mxu1 }
 0x6bf   :  { %v4878_v14 = vpop.f32.mrf.mxu3  ;;  %v4704_v38 = vadd.f32 %v4703_v10, %v4614_v12 }
 0x6c0   :  { %v4879_v57 = vadd.f32 %v4878_v14, %v4790_v6 }
 0x6c2   :  { %v5246_v63 = vpack.c.bf16 %v4879_v57, %v8323_v0 }
 0x6c4   :  { %5278 = vst [vmem:[#allocation9 + $0xe8] sm:$0xff] %v5246_v63 }
 0x6c5   :  { %v4792_v60 = vpop.f32.mrf.mxu2  ;;  %v4616_v11 = vpop.f32.mrf.mxu0 }
 0x6c6   :  { %v4793_v32 = vadd.f32 %v4792_v60, %v4704_v38  ;;  %v4705_v56 = vpop.f32.mrf.mxu1 }
 0x6c7   :  { %v4881_v44 = vpop.f32.mrf.mxu3  ;;  %v4706_v55 = vadd.f32 %v4705_v56, %v4616_v11 }
 0x6c8   :  { %v4882_v26 = vadd.f32 %v4881_v44, %v4793_v32 }
 0x6ca   :  { %v5247_v4 = vpack.c.bf16 %v4882_v26, %v8329_v19 }
 0x6cc   :  { %5279 = vst [vmem:[#allocation9 + $0xf0] sm:$0xff] %v5247_v4 }
 0x6cd   :  { %v4794_v28 = vpop.f32.mrf.mxu2 }
 0x6ce   :  { %v4795_v23 = vadd.f32 %v4794_v28, %v4706_v55 }
 0x6cf   :  { %v4883_v17 = vpop.f32.mrf.mxu3 }
 0x6d0   :  { %v4884_v0 = vadd.f32 %v4883_v17, %v4795_v23 }
 0x6d2   :  { %v5248_v33 = vpack.c.bf16 %v4884_v0, %v8331_v50 }
 0x6d4   :  { %5280 = vst [vmem:[#allocation9 + $0xf8] sm:$0xff] %v5248_v33 }
 0x6d5   :  { %5293 = dma.vmem_to_hbm [thread:$0]  %s5286_s27, 4096, %s5288_s30, [#allocation5], %s6786_s20, %s6786_s20, %s6787_s21  }
 0x6d6   :  { %6783 = dma.done.wait [#allocation5], 4096  }
 0x6d7   :  { %6784 = vsyncadd [#allocation5], 4294963200 }
 0x6d8   :  { %5298 = vsyncpa [#allocation4], 1 }
 0x6d9   :  { %5299 = vsyncpa [#allocation7], 1 }
 0x6da   :  { %5300 = vsyncpa [#allocation5], 1 }

</bundles_post_ra>
